<compile_context>
chip_gen: v7x
topology: tpu7x:2x2x1
jax: 0.10.0
libtpu: 0.0.40
codegen_flags: <defaults>
</compile_context>

<pallas_src>
import jax
import jax.numpy as jnp
from jax import lax
from jax.experimental import pallas as pl
from jax.experimental.pallas import tpu as pltpu

LANE = 128      # vreg lane width
SUBLANE = 8     # vreg sublane count


def _round_up(x, m):
    return ((x + m - 1) // m) * m


def _vmem_capacity_bytes():
    try:
        return int(pltpu.get_tpu_info().vmem_capacity_bytes)
    except Exception:
        return 64 * 1024 * 1024      # conservative (v7x per-core VMEM)


def _pick_time_chunk(T, b_tile, Ep, Hp, L, budget_bytes, cap=256):
    """Largest time chunk whose per-step VMEM footprint fits the budget."""
    per_t = b_tile * (2 * 2 * Ep                      # x block, 2 bufs, bf16
                      + 4 * 4 * Hp                    # gx_buf scratch, f32
                      + (2 * Hp if L > 1 else 0))     # y_buf scratch, bf16
    tc = int(max(1, min(T, cap, budget_bytes // max(per_t, 1))))
    # prefer an exact divisor of T (no masked tail) when one is close enough
    for d in range(tc, 0, -1):
        if T % d == 0 and 2 * d > tc:
            return d
    return tc   # ragged: trailing steps masked inside the kernel


# ------------------------------------------------------------------
# Fused kernel: L-layer LSTM (time-chunked) + final-timestep fc + softmax
# ------------------------------------------------------------------
def _make_fused_kernel(no_layers, hp, time_chunk, t_total, unroll, ragged):
    """Build the kernel body for static layer count / padded hidden / chunk."""
    n_in = 3 + 3 * no_layers + 2
    has_y = no_layers > 1

    def kernel(*refs):
        # ---- unpack: inputs | outputs | scratch --------------------------
        x_ref, h0_ref, c0_ref = refs[0], refs[1], refs[2]
        layer_refs = refs[3:3 + 3 * no_layers]          # (wih, whh, bias) / layer
        fcw_ref, fcb_ref = refs[n_in - 2], refs[n_in - 1]
        out_ref, hN_ref, cN_ref = refs[n_in], refs[n_in + 1], refs[n_in + 2]
        scr = refs[n_in + 3:]
        h_st, c_st = scr[0], scr[1]
        y_buf = scr[2] if has_y else None
        gx_buf = scr[3] if has_y else scr[2]

        t_idx = pl.program_id(1)
        n_t = pl.num_programs(1)
        tc = x_ref.shape[0]          # time-chunk length
        bt = x_ref.shape[1]          # batch tile

        # first time-chunk of this batch block: load initial state into scratch
        @pl.when(t_idx == 0)
        def _():
            h_st[...] = h0_ref[...]
            c_st[...] = c0_ref[...]

        for l in range(no_layers):
            wih_ref = layer_refs[3 * l + 0]     # (Dp, 4*Hp)  bf16  W_ih^T
            whh_ref = layer_refs[3 * l + 1]     # (Hp, 4*Hp)  bf16  W_hh^T
            b_ref = layer_refs[3 * l + 2]       # (1, 4*Hp)   f32   b_ih + b_hh

            # ---- input projection hoisted out of the recurrence ----------
            if l == 0:
                x_all = x_ref[...].reshape(tc * bt, x_ref.shape[2])   # bf16
            else:
                x_all = y_buf[...].reshape(tc * bt, hp)               # bf16
            gx = jnp.dot(x_all, wih_ref[...],
                         preferred_element_type=jnp.float32) + b_ref[...]
            gx_buf[...] = gx.reshape(tc, bt, 4 * hp)

            write_y = has_y and (l < no_layers - 1)   # top layer's y unused

            def step(t, carry, whh_ref=whh_ref, write_y=write_y):
                h, c = carry
                gates = gx_buf[t] + jnp.dot(h.astype(jnp.bfloat16),
                                            whh_ref[...],
                                            preferred_element_type=jnp.float32)
                # gate blocks are lane-aligned (each Hp = multiple of 128)
                i_g = jax.nn.sigmoid(gates[:, 0 * hp:1 * hp])
                f_g = jax.nn.sigmoid(gates[:, 1 * hp:2 * hp])
                g_g = jnp.tanh(gates[:, 2 * hp:3 * hp])
                o_g = jax.nn.sigmoid(gates[:, 3 * hp:4 * hp])
                c_new = f_g * c + i_g * g_g
                h_new = o_g * jnp.tanh(c_new)
                if ragged:
                    # mask trailing (padded) timesteps of the last chunk
                    valid = (t_idx * time_chunk + t) < t_total
                    h_new = jnp.where(valid, h_new, h)
                    c_new = jnp.where(valid, c_new, c)
                if write_y:
                    y_buf[t] = h_new.astype(jnp.bfloat16)   # lane-dense store
                return (h_new, c_new)

            h_fin, c_fin = lax.fori_loop(0, tc, step, (h_st[l], c_st[l]),
                                         unroll=unroll)
            h_st[l] = h_fin
            c_st[l] = c_fin

        # last time-chunk: emit final states and fc+softmax of top-layer h
        @pl.when(t_idx == n_t - 1)
        def _():
            hN_ref[...] = h_st[...]
            cN_ref[...] = c_st[...]
            h_top = h_st[no_layers - 1]                                # (bt, Hp)
            logits = jnp.dot(h_top.astype(jnp.bfloat16), fcw_ref[...],
                             preferred_element_type=jnp.float32) + fcb_ref[...]
            m = jnp.max(logits, axis=1, keepdims=True)
            e = jnp.exp(logits - m)     # padded class cols: f32 bias -1e30 -> 0
            inv = pl.reciprocal(jnp.sum(e, axis=1, keepdims=True), approx=True)
            out_ref[...] = (e * inv).astype(out_ref.dtype)

    return kernel


# ------------------------------------------------------------------
# One-time parameter preparation (transpose / pad / pre-add biases / bf16)
# ------------------------------------------------------------------
def prepare_params(raw):
    emb = raw["embedding"]                     # (V, E)
    fc_w = raw["fc_w"]                         # (C, H)
    fc_b = raw["fc_b"]                         # (C,)
    V, E = emb.shape
    C, H = fc_w.shape
    Hp = _round_up(H, LANE)
    Ep = _round_up(E, LANE)
    Cp = _round_up(C, LANE)

    # bf16 embedding table: halves HBM traffic of the gathered (T,B,Ep) x path
    emb_p = jnp.zeros((V, Ep), jnp.float32).at[:, :E].set(emb)
    emb_p = emb_p.astype(jnp.bfloat16)

    layers = []
    for l, (w_ih, w_hh, b_ih, b_hh) in enumerate(raw["lstm"]):
        D = w_ih.shape[1]
        Dp = Ep if l == 0 else Hp
        wih_p = jnp.zeros((Dp, 4 * Hp), jnp.float32)
        whh_p = jnp.zeros((Hp, 4 * Hp), jnp.float32)
        b_p = jnp.zeros((1, 4 * Hp), jnp.float32)
        bias = b_ih + b_hh
        for g in range(4):                     # PyTorch gate order: i, f, g, o
            wih_p = wih_p.at[:D, g * Hp:g * Hp + H].set(w_ih[g * H:(g + 1) * H, :].T)
            whh_p = whh_p.at[:H, g * Hp:g * Hp + H].set(w_hh[g * H:(g + 1) * H, :].T)
            b_p = b_p.at[0, g * Hp:g * Hp + H].set(bias[g * H:(g + 1) * H])
        layers.append((wih_p.astype(jnp.bfloat16),
                       whh_p.astype(jnp.bfloat16),
                       b_p))                               # bias stays f32

    fc_w_p = jnp.zeros((Hp, Cp), jnp.float32).at[:H, :C].set(fc_w.T)
    fc_w_p = fc_w_p.astype(jnp.bfloat16)
    # padded class columns get a huge negative *f32* bias -> exp underflows to
    # 0, so softmax over the padded width equals softmax over the real C.
    fc_b_p = jnp.full((1, Cp), -1e30, jnp.float32).at[0, :C].set(fc_b)

    return {
        "embedding": emb_p,
        "lstm": layers,
        "fc_w": fc_w_p,
        "fc_b": fc_b_p,
        "dims": dict(E=E, H=H, C=C, Ep=Ep, Hp=Hp, Cp=Cp, L=len(layers)),
    }


# ------------------------------------------------------------------
# Full forward (matches SentimentRNN.forward, eval mode dropout = identity)
# ------------------------------------------------------------------
def sentiment_rnn_forward(params, x_ids, hidden, *, time_chunk=None):
    """
    x_ids : (B, T) int32 token ids
    hidden: (h0, c0), each (L, B, H)
    returns (sig_out (B, 3), (hN, cN))
    """
    d = params["dims"]
    E, H, C = d["E"], d["H"], d["C"]
    Ep, Hp, Cp, L = d["Ep"], d["Hp"], d["Cp"], d["L"]

    h0_all, c0_all = hidden
    B, T = x_ids.shape

    # ---- batch tiling ------------------------------------------------------
    Bp = _round_up(B, SUBLANE)
    if Bp < 32:
        b_tile = Bp                       # tiny batch: one block, latency-bound
    else:
        # >=2 batch blocks so the "parallel" axis feeds both v7x TensorCores;
        # tiles up to 256 rows to feed the 256-wide MXU on v6e/v7x.
        b_tile = min(256, _round_up(pl.cdiv(Bp, 2), SUBLANE))
        Bp = _round_up(Bp, b_tile)
    n_b = Bp // b_tile

    # ---- VMEM budget / time chunk ------------------------------------------
    vmem_cap = _vmem_capacity_bytes()
    vmem_limit = int(min(0.8 * vmem_cap, 100 * 1024 * 1024))
    fixed = 0
    for (wih_p, whh_p, b_p) in params["lstm"]:
        fixed += wih_p.size * wih_p.dtype.itemsize
        fixed += whh_p.size * whh_p.dtype.itemsize
        fixed += b_p.size * 4
    fixed += params["fc_w"].size * 2 + params["fc_b"].size * 4
    fixed += 8 * L * b_tile * Hp * 4          # h0/c0/hN/cN blocks + state scratch
    fixed += 2 * b_tile * Cp * 4              # probs block
    budget = max(vmem_limit - fixed - (4 << 20), 2 << 20)

    if time_chunk is None:
        time_chunk = _pick_time_chunk(T, b_tile, Ep, Hp, L, budget)
    n_t = pl.cdiv(T, time_chunk)
    T_pad = n_t * time_chunk
    ragged = T_pad != T
    unroll = max(1, min(8, time_chunk))

    # ---- embedding gather directly in time-major layout (bf16) -------------
    x_ids_p = x_ids if not ragged else jnp.pad(x_ids, ((0, 0), (0, T_pad - T)))
    embeds = jnp.take(params["embedding"], x_ids_p.T, axis=0)     # (T_pad,B,Ep)
    x_p = jnp.pad(embeds, ((0, 0), (0, Bp - B), (0, 0)))          # bf16
    h0_p = jnp.pad(h0_all, ((0, 0), (0, Bp - B), (0, Hp - H)))    # (L,Bp,Hp) f32
    c0_p = jnp.pad(c0_all, ((0, 0), (0, Bp - B), (0, Hp - H)))

    layer_flat = []
    for (wih_p, whh_p, b_p) in params["lstm"]:
        layer_flat.extend([wih_p, whh_p, b_p])

    out_specs = (
        pl.BlockSpec((b_tile, Cp), lambda b, t: (b, 0)),                 # probs
        pl.BlockSpec((L, b_tile, Hp), lambda b, t: (0, b, 0)),           # hN
        pl.BlockSpec((L, b_tile, Hp), lambda b, t: (0, b, 0)),           # cN
    )
    out_shapes = (
        jax.ShapeDtypeStruct((Bp, Cp), jnp.float32),
        jax.ShapeDtypeStruct((L, Bp, Hp), jnp.float32),
        jax.ShapeDtypeStruct((L, Bp, Hp), jnp.float32),
    )
    scratch = [
        pltpu.VMEM((L, b_tile, Hp), jnp.float32),               # carried h state
        pltpu.VMEM((L, b_tile, Hp), jnp.float32),               # carried c state
    ]
    if L > 1:
        scratch.append(pltpu.VMEM((time_chunk, b_tile, Hp), jnp.bfloat16))
    scratch.append(pltpu.VMEM((time_chunk, b_tile, 4 * Hp), jnp.float32))

    kernel = _make_fused_kernel(L, Hp, time_chunk, T, unroll, ragged)

    def _run(single_buffer_weights):
        def const_spec(shape):
            idx = lambda b, t: (0,) * len(shape)
            if single_buffer_weights:
                # weights never change across the grid -> no double buffer
                return pl.BlockSpec(shape, idx, pipeline_mode=pl.Buffered(1))
            return pl.BlockSpec(shape, idx)

        in_specs = [
            pl.BlockSpec((time_chunk, b_tile, Ep), lambda b, t: (t, b, 0)),  # x
            pl.BlockSpec((L, b_tile, Hp), lambda b, t: (0, b, 0)),           # h0
            pl.BlockSpec((L, b_tile, Hp), lambda b, t: (0, b, 0)),           # c0
        ]
        for (wih_p, whh_p, b_p) in params["lstm"]:
            in_specs.append(const_spec(wih_p.shape))
            in_specs.append(const_spec(whh_p.shape))
            in_specs.append(const_spec(b_p.shape))
        in_specs.append(const_spec(params["fc_w"].shape))
        in_specs.append(const_spec(params["fc_b"].shape))

        outs = pl.pallas_call(
            kernel,
            out_shape=out_shapes,
            grid_spec=pltpu.PrefetchScalarGridSpec(
                num_scalar_prefetch=0,
                grid=(n_b, n_t),
                in_specs=in_specs,
                out_specs=out_specs,
                scratch_shapes=scratch,
            ),
            input_output_aliases={1: 1, 2: 2},     # h0 -> hN, c0 -> cN
            compiler_params=pltpu.CompilerParams(
                dimension_semantics=("parallel", "arbitrary"),
                vmem_limit_bytes=vmem_limit,
            ),
        )(x_p, h0_p, c0_p, *layer_flat, params["fc_w"], params["fc_b"])
        jax.block_until_ready(outs)
        return outs

    try:
        probs_p, hN_p, cN_p = _run(single_buffer_weights=True)
    except Exception:
        # pl.Buffered(1) (single-buffered resident weights) unsupported on this
        # jax/libtpu version -> fall back to default double buffering.
        probs_p, hN_p, cN_p = _run(single_buffer_weights=False)

    hN = hN_p[:, :B, :H]
    cN = cN_p[:, :B, :H]
    probs = probs_p[:B, :C]          # softmax of the final timestep's fc output

    # Original module: softmax over all (B*T, C) rows, view(B, T*C), last 3
    # cols.  For output_dim >= 3 that is exactly the last 3 classes of the
    # FINAL timestep, so fc+softmax over the other T-1 timesteps is skipped.
    assert C >= 3, "view(B,-1)[:, -3:] trick assumes output_dim >= 3"
    sig_out = probs[:, -3:]
    return sig_out, (hN, cN)


# ------------------------------------------------------------------
# Deterministic parameter init (synthetic stand-in for the word2vec checkpoint)
# ------------------------------------------------------------------
def init_params(key, no_layers, vocab_size, output_dim, hidden_dim, embedding_dim):
    keys = jax.random.split(key, 3 + 4 * no_layers)
    params = {}
    params["embedding"] = 0.1 * jax.random.normal(
        keys[0], (vocab_size, embedding_dim), dtype=jnp.float32)
    params["embedding"] = params["embedding"].at[0].set(0.0)   # padding_idx row

    lstm = []
    k_idx = 1
    for l in range(no_layers):
        in_dim = embedding_dim if l == 0 else hidden_dim
        scale = 1.0 / jnp.sqrt(hidden_dim)
        w_ih = scale * jax.random.normal(keys[k_idx], (4 * hidden_dim, in_dim), jnp.float32)
        w_hh = scale * jax.random.normal(keys[k_idx + 1], (4 * hidden_dim, hidden_dim), jnp.float32)
        b_ih = scale * jax.random.normal(keys[k_idx + 2], (4 * hidden_dim,), jnp.float32)
        b_hh = scale * jax.random.normal(keys[k_idx + 3], (4 * hidden_dim,), jnp.float32)
        lstm.append((w_ih, w_hh, b_ih, b_hh))
        k_idx += 4
    params["lstm"] = lstm

    params["fc_w"] = 0.1 * jax.random.normal(keys[k_idx], (output_dim, hidden_dim), jnp.float32)
    params["fc_b"] = 0.1 * jax.random.normal(keys[k_idx + 1], (output_dim,), jnp.float32)
    return params


# ------------------------------------------------------------------
# Pure-JAX reference (mirrors the PyTorch forward, f32) for a sanity check
# ------------------------------------------------------------------
def _reference_forward(raw, x_ids, hidden):
    h0_all, c0_all = hidden
    B, T = x_ids.shape
    H = raw["fc_w"].shape[1]
    embeds = jnp.take(raw["embedding"], x_ids, axis=0)          # (B, T, E)
    layer_in = jnp.transpose(embeds, (1, 0, 2))                 # (T, B, E)
    hs, cs = [], []
    for l, (w_ih, w_hh, b_ih, b_hh) in enumerate(raw["lstm"]):
        h, c = h0_all[l], c0_all[l]
        ys = []
        for t in range(T):
            g = layer_in[t] @ w_ih.T + h @ w_hh.T + b_ih + b_hh
            i = jax.nn.sigmoid(g[:, 0 * H:1 * H])
            f = jax.nn.sigmoid(g[:, 1 * H:2 * H])
            gg = jnp.tanh(g[:, 2 * H:3 * H])
            o = jax.nn.sigmoid(g[:, 3 * H:4 * H])
            c = f * c + i * gg
            h = o * jnp.tanh(c)
            ys.append(h)
        layer_in = jnp.stack(ys, axis=0)
        hs.append(h)
        cs.append(c)
    hN, cN = jnp.stack(hs), jnp.stack(cs)
    lstm_out = jnp.transpose(layer_in, (1, 0, 2)).reshape(-1, H)
    logits = lstm_out @ raw["fc_w"].T + raw["fc_b"]
    sig = jax.nn.softmax(logits, axis=1).reshape(B, -1)[:, -3:]
    return sig, (hN, cN)


if __name__ == "__main__":
    no_layers = 2
    vocab_size = 50
    output_dim = 3
    hidden_dim = 32
    embedding_dim = 32
    batch = 2
    seq_len = 8

    key = jax.random.PRNGKey(0)
    k_params, k_ids = jax.random.split(key)

    raw = init_params(k_params, no_layers, vocab_size, output_dim,
                      hidden_dim, embedding_dim)
    params = prepare_params(raw)       # one-time layout / padding / bf16 work

    x_ids = jax.random.randint(k_ids, (batch, seq_len), 0, vocab_size, dtype=jnp.int32)
    h0 = jnp.zeros((no_layers, batch, hidden_dim), jnp.float32)
    c0 = jnp.zeros((no_layers, batch, hidden_dim), jnp.float32)

    sig_out, (hN, cN) = sentiment_rnn_forward(params, x_ids, (h0, c0))
    jax.block_until_ready((sig_out, hN, cN))

    assert sig_out.shape == (batch, 3)
    assert hN.shape == (no_layers, batch, hidden_dim)
    assert cN.shape == (no_layers, batch, hidden_dim)
    assert bool(jnp.all(jnp.isfinite(sig_out)))

    # numerical sanity check vs the f32 pure-JAX reference (loose tolerance to
    # absorb the bf16 matmul operands + TPU op-ordering differences)
    ref_sig, (ref_hN, ref_cN) = _reference_forward(raw, x_ids, (h0, c0))
    assert bool(jnp.allclose(sig_out, ref_sig, atol=5e-2, rtol=5e-2)), "sig_out mismatch"
    assert bool(jnp.allclose(hN, ref_hN, atol=5e-2, rtol=5e-2)), "hN mismatch"
    assert bool(jnp.allclose(cN, ref_cN, atol=5e-2, rtol=5e-2)), "cN mismatch"

    print("KERNEL_OK")
</pallas_src>

<mosaic_0001>
module attributes {stable_mosaic.version = 11 : i64} {
  func.func @kernel(%arg0: i32, %arg1: i32, %arg2: memref<8x8x128xbf16, #tpu.memory_space<vmem>>, %arg3: memref<2x8x128xf32, #tpu.memory_space<vmem>>, %arg4: memref<2x8x128xf32, #tpu.memory_space<vmem>>, %arg5: memref<128x512xbf16, #tpu.memory_space<vmem>>, %arg6: memref<128x512xbf16, #tpu.memory_space<vmem>>, %arg7: memref<1x512xf32, #tpu.memory_space<vmem>>, %arg8: memref<128x512xbf16, #tpu.memory_space<vmem>>, %arg9: memref<128x512xbf16, #tpu.memory_space<vmem>>, %arg10: memref<1x512xf32, #tpu.memory_space<vmem>>, %arg11: memref<128x128xbf16, #tpu.memory_space<vmem>>, %arg12: memref<1x128xf32, #tpu.memory_space<vmem>>, %arg13: memref<8x128xf32, #tpu.memory_space<vmem>>, %arg14: memref<2x8x128xf32, #tpu.memory_space<vmem>>, %arg15: memref<2x8x128xf32, #tpu.memory_space<vmem>>, %arg16: memref<2x8x128xf32, #tpu.memory_space<vmem>>, %arg17: memref<2x8x128xf32, #tpu.memory_space<vmem>>, %arg18: memref<8x8x128xbf16, #tpu.memory_space<vmem>>, %arg19: memref<8x8x512xf32, #tpu.memory_space<vmem>>) attributes {dimension_semantics = [#tpu.dimension_semantics<parallel>, #tpu.dimension_semantics<arbitrary>], iteration_bounds = array<i64: 1, 1>, scalar_prefetch = 0 : i64, scratch_operands = 4 : i64, tpu.core_type = #tpu.core_type<tc>, window_params = [{transform_indices = @transform_0, window_bounds = array<i64: 8, 8, 128>}, {transform_indices = @transform_1, window_bounds = array<i64: 2, 8, 128>}, {transform_indices = @transform_2, window_bounds = array<i64: 2, 8, 128>}, {pipeline_mode = #tpu.pipeline_mode<synchronous>, transform_indices = @transform_3, window_bounds = array<i64: 128, 512>}, {pipeline_mode = #tpu.pipeline_mode<synchronous>, transform_indices = @transform_4, window_bounds = array<i64: 128, 512>}, {pipeline_mode = #tpu.pipeline_mode<synchronous>, transform_indices = @transform_5, window_bounds = array<i64: 1, 512>}, {pipeline_mode = #tpu.pipeline_mode<synchronous>, transform_indices = @transform_6, window_bounds = array<i64: 128, 512>}, {pipeline_mode = #tpu.pipeline_mode<synchronous>, transform_indices = @transform_7, window_bounds = array<i64: 128, 512>}, {pipeline_mode = #tpu.pipeline_mode<synchronous>, transform_indices = @transform_8, window_bounds = array<i64: 1, 512>}, {pipeline_mode = #tpu.pipeline_mode<synchronous>, transform_indices = @transform_9, window_bounds = array<i64: 128, 128>}, {pipeline_mode = #tpu.pipeline_mode<synchronous>, transform_indices = @transform_10, window_bounds = array<i64: 1, 128>}, {transform_indices = @transform_11, window_bounds = array<i64: 8, 128>}, {transform_indices = @transform_12, window_bounds = array<i64: 2, 8, 128>}, {transform_indices = @transform_13, window_bounds = array<i64: 2, 8, 128>}]} {
    %c0_i32 = arith.constant 0 : i32
    %0 = arith.cmpi eq, %arg1, %c0_i32 : i32
    %1 = arith.extui %0 : i1 to i32
    %c0_i32_0 = arith.constant 0 : i32
    %2 = arith.cmpi ne, %1, %c0_i32_0 : i32
    scf.if %2 {
      %c0_200 = arith.constant 0 : index
      %c0_201 = arith.constant 0 : index
      %c0_202 = arith.constant 0 : index
      %596 = vector.load %arg3[%c0_200, %c0_201, %c0_202] : memref<2x8x128xf32, #tpu.memory_space<vmem>>, vector<2x8x128xf32>
      %c0_203 = arith.constant 0 : index
      %c0_204 = arith.constant 0 : index
      %c0_205 = arith.constant 0 : index
      %597 = vector.load %arg16[%c0_203, %c0_204, %c0_205] : memref<2x8x128xf32, #tpu.memory_space<vmem>>, vector<2x8x128xf32>
      tpu.vector_store %arg16[%c0_203, %c0_204, %c0_205], %596 {strides = array<i32>} : memref<2x8x128xf32, #tpu.memory_space<vmem>>, vector<2x8x128xf32>,
      %c0_206 = arith.constant 0 : index
      %c0_207 = arith.constant 0 : index
      %c0_208 = arith.constant 0 : index
      %598 = vector.load %arg4[%c0_206, %c0_207, %c0_208] : memref<2x8x128xf32, #tpu.memory_space<vmem>>, vector<2x8x128xf32>
      %c0_209 = arith.constant 0 : index
      %c0_210 = arith.constant 0 : index
      %c0_211 = arith.constant 0 : index
      %599 = vector.load %arg17[%c0_209, %c0_210, %c0_211] : memref<2x8x128xf32, #tpu.memory_space<vmem>>, vector<2x8x128xf32>
      tpu.vector_store %arg17[%c0_209, %c0_210, %c0_211], %598 {strides = array<i32>} : memref<2x8x128xf32, #tpu.memory_space<vmem>>, vector<2x8x128xf32>,
    } else {
    }
    %c0 = arith.constant 0 : index
    %c0_1 = arith.constant 0 : index
    %c0_2 = arith.constant 0 : index
    %3 = vector.load %arg2[%c0, %c0_1, %c0_2] : memref<8x8x128xbf16, #tpu.memory_space<vmem>>, vector<8x8x128xbf16>
    %4 = vector.shape_cast %3 : vector<8x8x128xbf16> to vector<64x128xbf16>
    %c0_3 = arith.constant 0 : index
    %c0_4 = arith.constant 0 : index
    %5 = vector.load %arg5[%c0_3, %c0_4] : memref<128x512xbf16, #tpu.memory_space<vmem>>, vector<128x512xbf16>
    %cst = arith.constant dense<0.000000e+00> : vector<64x512xf32>
    %6 = tpu.matmul %4, %5, %cst {dimension_numbers = #tpu.dot_dimension_numbers<[1], [0], [0], [1], [0, 0, 1, 1], [], []>} : vector<64x128xbf16>, vector<128x512xbf16>, vector<64x512xf32> -> vector<64x512xf32>
    %c0_5 = arith.constant 0 : index
    %c0_6 = arith.constant 0 : index
    %7 = vector.load %arg7[%c0_5, %c0_6] : memref<1x512xf32, #tpu.memory_space<vmem>>, vector<1x512xf32>
    %8 = vector.broadcast %7 : vector<1x512xf32> to vector<64x512xf32>
    %9 = arith.addf %6, %8 : vector<64x512xf32>
    %10 = vector.shape_cast %9 : vector<64x512xf32> to vector<8x8x512xf32>
    %c0_7 = arith.constant 0 : index
    %c0_8 = arith.constant 0 : index
    %c0_9 = arith.constant 0 : index
    %11 = vector.load %arg19[%c0_7, %c0_8, %c0_9] : memref<8x8x512xf32, #tpu.memory_space<vmem>>, vector<8x8x512xf32>
    tpu.vector_store %arg19[%c0_7, %c0_8, %c0_9], %10 {strides = array<i32>} : memref<8x8x512xf32, #tpu.memory_space<vmem>>, vector<8x8x512xf32>,
    %c0_10 = arith.constant 0 : index
    %c0_11 = arith.constant 0 : index
    %c0_12 = arith.constant 0 : index
    %12 = vector.load %arg16[%c0_10, %c0_11, %c0_12] : memref<2x8x128xf32, #tpu.memory_space<vmem>>, vector<1x8x128xf32>
    %13 = vector.shape_cast %12 : vector<1x8x128xf32> to vector<8x128xf32>
    %c0_13 = arith.constant 0 : index
    %c0_14 = arith.constant 0 : index
    %c0_15 = arith.constant 0 : index
    %14 = vector.load %arg17[%c0_13, %c0_14, %c0_15] : memref<2x8x128xf32, #tpu.memory_space<vmem>>, vector<1x8x128xf32>
    %15 = vector.shape_cast %14 : vector<1x8x128xf32> to vector<8x128xf32>
    %c0_i32_16 = arith.constant 0 : i32
    %16 = arith.index_cast %c0_i32_16 : i32 to index
    %c0_17 = arith.constant 0 : index
    %c0_18 = arith.constant 0 : index
    %17 = vector.load %arg19[%16, %c0_17, %c0_18] : memref<8x8x512xf32, #tpu.memory_space<vmem>>, vector<1x8x512xf32>
    %18 = vector.shape_cast %17 : vector<1x8x512xf32> to vector<8x512xf32>
    %19 = arith.truncf %13 : vector<8x128xf32> to vector<8x128xbf16>
    %c0_19 = arith.constant 0 : index
    %c0_20 = arith.constant 0 : index
    %20 = vector.load %arg6[%c0_19, %c0_20] : memref<128x512xbf16, #tpu.memory_space<vmem>>, vector<128x512xbf16>
    %cst_21 = arith.constant dense<0.000000e+00> : vector<8x512xf32>
    %21 = tpu.matmul %19, %20, %cst_21 {dimension_numbers = #tpu.dot_dimension_numbers<[1], [0], [0], [1], [0, 0, 1, 1], [], []>} : vector<8x128xbf16>, vector<128x512xbf16>, vector<8x512xf32> -> vector<8x512xf32>
    %22 = arith.addf %18, %21 : vector<8x512xf32>
    %23 = vector.extract_strided_slice %22 {offsets = [0, 0], sizes = [8, 128], strides = [1, 1]} : vector<8x512xf32> to vector<8x128xf32>
    %24 = arith.negf %23 : vector<8x128xf32>
    %25 = math.exp %24 : vector<8x128xf32>
    %cst_22 = arith.constant 1.000000e+00 : f32
    %26 = vector.broadcast %cst_22 : f32 to vector<8x128xf32>
    %27 = arith.addf %26, %25 : vector<8x128xf32>
    %28 = arith.divf %26, %27 : vector<8x128xf32>
    %29 = vector.extract_strided_slice %22 {offsets = [0, 128], sizes = [8, 128], strides = [1, 1]} : vector<8x512xf32> to vector<8x128xf32>
    %30 = arith.negf %29 : vector<8x128xf32>
    %31 = math.exp %30 : vector<8x128xf32>
    %cst_23 = arith.constant 1.000000e+00 : f32
    %32 = vector.broadcast %cst_23 : f32 to vector<8x128xf32>
    %33 = arith.addf %32, %31 : vector<8x128xf32>
    %34 = arith.divf %32, %33 : vector<8x128xf32>
    %35 = vector.extract_strided_slice %22 {offsets = [0, 256], sizes = [8, 128], strides = [1, 1]} : vector<8x512xf32> to vector<8x128xf32>
    %36 = math.tanh %35 : vector<8x128xf32>
    %37 = vector.extract_strided_slice %22 {offsets = [0, 384], sizes = [8, 128], strides = [1, 1]} : vector<8x512xf32> to vector<8x128xf32>
    %38 = arith.negf %37 : vector<8x128xf32>
    %39 = math.exp %38 : vector<8x128xf32>
    %cst_24 = arith.constant 1.000000e+00 : f32
    %40 = vector.broadcast %cst_24 : f32 to vector<8x128xf32>
    %41 = arith.addf %40, %39 : vector<8x128xf32>
    %42 = arith.divf %40, %41 : vector<8x128xf32>
    %43 = arith.mulf %34, %15 : vector<8x128xf32>
    %44 = arith.mulf %28, %36 : vector<8x128xf32>
    %45 = arith.addf %43, %44 : vector<8x128xf32>
    %46 = math.tanh %45 : vector<8x128xf32>
    %47 = arith.mulf %42, %46 : vector<8x128xf32>
    %48 = arith.truncf %47 : vector<8x128xf32> to vector<8x128xbf16>
    %49 = arith.index_cast %c0_i32_16 : i32 to index
    %c0_25 = arith.constant 0 : index
    %c0_26 = arith.constant 0 : index
    %50 = vector.load %arg18[%49, %c0_25, %c0_26] : memref<8x8x128xbf16, #tpu.memory_space<vmem>>, vector<1x8x128xbf16>
    %51 = vector.shape_cast %50 : vector<1x8x128xbf16> to vector<8x128xbf16>
    %52 = vector.shape_cast %48 : vector<8x128xbf16> to vector<1x8x128xbf16>
    tpu.vector_store %arg18[%49, %c0_25, %c0_26], %52 {strides = array<i32>} : memref<8x8x128xbf16, #tpu.memory_space<vmem>>, vector<1x8x128xbf16>,
    %c1_i32 = arith.constant 1 : i32
    %53 = arith.index_cast %c1_i32 : i32 to index
    %c0_27 = arith.constant 0 : index
    %c0_28 = arith.constant 0 : index
    %54 = vector.load %arg19[%53, %c0_27, %c0_28] : memref<8x8x512xf32, #tpu.memory_space<vmem>>, vector<1x8x512xf32>
    %55 = vector.shape_cast %54 : vector<1x8x512xf32> to vector<8x512xf32>
    %56 = arith.truncf %47 : vector<8x128xf32> to vector<8x128xbf16>
    %c0_29 = arith.constant 0 : index
    %c0_30 = arith.constant 0 : index
    %57 = vector.load %arg6[%c0_29, %c0_30] : memref<128x512xbf16, #tpu.memory_space<vmem>>, vector<128x512xbf16>
    %cst_31 = arith.constant dense<0.000000e+00> : vector<8x512xf32>
    %58 = tpu.matmul %56, %57, %cst_31 {dimension_numbers = #tpu.dot_dimension_numbers<[1], [0], [0], [1], [0, 0, 1, 1], [], []>} : vector<8x128xbf16>, vector<128x512xbf16>, vector<8x512xf32> -> vector<8x512xf32>
    %59 = arith.addf %55, %58 : vector<8x512xf32>
    %60 = vector.extract_strided_slice %59 {offsets = [0, 0], sizes = [8, 128], strides = [1, 1]} : vector<8x512xf32> to vector<8x128xf32>
    %61 = arith.negf %60 : vector<8x128xf32>
    %62 = math.exp %61 : vector<8x128xf32>
    %cst_32 = arith.constant 1.000000e+00 : f32
    %63 = vector.broadcast %cst_32 : f32 to vector<8x128xf32>
    %64 = arith.addf %63, %62 : vector<8x128xf32>
    %65 = arith.divf %63, %64 : vector<8x128xf32>
    %66 = vector.extract_strided_slice %59 {offsets = [0, 128], sizes = [8, 128], strides = [1, 1]} : vector<8x512xf32> to vector<8x128xf32>
    %67 = arith.negf %66 : vector<8x128xf32>
    %68 = math.exp %67 : vector<8x128xf32>
    %cst_33 = arith.constant 1.000000e+00 : f32
    %69 = vector.broadcast %cst_33 : f32 to vector<8x128xf32>
    %70 = arith.addf %69, %68 : vector<8x128xf32>
    %71 = arith.divf %69, %70 : vector<8x128xf32>
    %72 = vector.extract_strided_slice %59 {offsets = [0, 256], sizes = [8, 128], strides = [1, 1]} : vector<8x512xf32> to vector<8x128xf32>
    %73 = math.tanh %72 : vector<8x128xf32>
    %74 = vector.extract_strided_slice %59 {offsets = [0, 384], sizes = [8, 128], strides = [1, 1]} : vector<8x512xf32> to vector<8x128xf32>
    %75 = arith.negf %74 : vector<8x128xf32>
    %76 = math.exp %75 : vector<8x128xf32>
    %cst_34 = arith.constant 1.000000e+00 : f32
    %77 = vector.broadcast %cst_34 : f32 to vector<8x128xf32>
    %78 = arith.addf %77, %76 : vector<8x128xf32>
    %79 = arith.divf %77, %78 : vector<8x128xf32>
    %80 = arith.mulf %71, %45 : vector<8x128xf32>
    %81 = arith.mulf %65, %73 : vector<8x128xf32>
    %82 = arith.addf %80, %81 : vector<8x128xf32>
    %83 = math.tanh %82 : vector<8x128xf32>
    %84 = arith.mulf %79, %83 : vector<8x128xf32>
    %85 = arith.truncf %84 : vector<8x128xf32> to vector<8x128xbf16>
    %86 = arith.index_cast %c1_i32 : i32 to index
    %c0_35 = arith.constant 0 : index
    %c0_36 = arith.constant 0 : index
    %87 = vector.load %arg18[%86, %c0_35, %c0_36] : memref<8x8x128xbf16, #tpu.memory_space<vmem>>, vector<1x8x128xbf16>
    %88 = vector.shape_cast %87 : vector<1x8x128xbf16> to vector<8x128xbf16>
    %89 = vector.shape_cast %85 : vector<8x128xbf16> to vector<1x8x128xbf16>
    tpu.vector_store %arg18[%86, %c0_35, %c0_36], %89 {strides = array<i32>} : memref<8x8x128xbf16, #tpu.memory_space<vmem>>, vector<1x8x128xbf16>,
    %c2_i32 = arith.constant 2 : i32
    %90 = arith.index_cast %c2_i32 : i32 to index
    %c0_37 = arith.constant 0 : index
    %c0_38 = arith.constant 0 : index
    %91 = vector.load %arg19[%90, %c0_37, %c0_38] : memref<8x8x512xf32, #tpu.memory_space<vmem>>, vector<1x8x512xf32>
    %92 = vector.shape_cast %91 : vector<1x8x512xf32> to vector<8x512xf32>
    %93 = arith.truncf %84 : vector<8x128xf32> to vector<8x128xbf16>
    %c0_39 = arith.constant 0 : index
    %c0_40 = arith.constant 0 : index
    %94 = vector.load %arg6[%c0_39, %c0_40] : memref<128x512xbf16, #tpu.memory_space<vmem>>, vector<128x512xbf16>
    %cst_41 = arith.constant dense<0.000000e+00> : vector<8x512xf32>
    %95 = tpu.matmul %93, %94, %cst_41 {dimension_numbers = #tpu.dot_dimension_numbers<[1], [0], [0], [1], [0, 0, 1, 1], [], []>} : vector<8x128xbf16>, vector<128x512xbf16>, vector<8x512xf32> -> vector<8x512xf32>
    %96 = arith.addf %92, %95 : vector<8x512xf32>
    %97 = vector.extract_strided_slice %96 {offsets = [0, 0], sizes = [8, 128], strides = [1, 1]} : vector<8x512xf32> to vector<8x128xf32>
    %98 = arith.negf %97 : vector<8x128xf32>
    %99 = math.exp %98 : vector<8x128xf32>
    %cst_42 = arith.constant 1.000000e+00 : f32
    %100 = vector.broadcast %cst_42 : f32 to vector<8x128xf32>
    %101 = arith.addf %100, %99 : vector<8x128xf32>
    %102 = arith.divf %100, %101 : vector<8x128xf32>
    %103 = vector.extract_strided_slice %96 {offsets = [0, 128], sizes = [8, 128], strides = [1, 1]} : vector<8x512xf32> to vector<8x128xf32>
    %104 = arith.negf %103 : vector<8x128xf32>
    %105 = math.exp %104 : vector<8x128xf32>
    %cst_43 = arith.constant 1.000000e+00 : f32
    %106 = vector.broadcast %cst_43 : f32 to vector<8x128xf32>
    %107 = arith.addf %106, %105 : vector<8x128xf32>
    %108 = arith.divf %106, %107 : vector<8x128xf32>
    %109 = vector.extract_strided_slice %96 {offsets = [0, 256], sizes = [8, 128], strides = [1, 1]} : vector<8x512xf32> to vector<8x128xf32>
    %110 = math.tanh %109 : vector<8x128xf32>
    %111 = vector.extract_strided_slice %96 {offsets = [0, 384], sizes = [8, 128], strides = [1, 1]} : vector<8x512xf32> to vector<8x128xf32>
    %112 = arith.negf %111 : vector<8x128xf32>
    %113 = math.exp %112 : vector<8x128xf32>
    %cst_44 = arith.constant 1.000000e+00 : f32
    %114 = vector.broadcast %cst_44 : f32 to vector<8x128xf32>
    %115 = arith.addf %114, %113 : vector<8x128xf32>
    %116 = arith.divf %114, %115 : vector<8x128xf32>
    %117 = arith.mulf %108, %82 : vector<8x128xf32>
    %118 = arith.mulf %102, %110 : vector<8x128xf32>
    %119 = arith.addf %117, %118 : vector<8x128xf32>
    %120 = math.tanh %119 : vector<8x128xf32>
    %121 = arith.mulf %116, %120 : vector<8x128xf32>
    %122 = arith.truncf %121 : vector<8x128xf32> to vector<8x128xbf16>
    %123 = arith.index_cast %c2_i32 : i32 to index
    %c0_45 = arith.constant 0 : index
    %c0_46 = arith.constant 0 : index
    %124 = vector.load %arg18[%123, %c0_45, %c0_46] : memref<8x8x128xbf16, #tpu.memory_space<vmem>>, vector<1x8x128xbf16>
    %125 = vector.shape_cast %124 : vector<1x8x128xbf16> to vector<8x128xbf16>
    %126 = vector.shape_cast %122 : vector<8x128xbf16> to vector<1x8x128xbf16>
    tpu.vector_store %arg18[%123, %c0_45, %c0_46], %126 {strides = array<i32>} : memref<8x8x128xbf16, #tpu.memory_space<vmem>>, vector<1x8x128xbf16>,
    %c3_i32 = arith.constant 3 : i32
    %127 = arith.index_cast %c3_i32 : i32 to index
    %c0_47 = arith.constant 0 : index
    %c0_48 = arith.constant 0 : index
    %128 = vector.load %arg19[%127, %c0_47, %c0_48] : memref<8x8x512xf32, #tpu.memory_space<vmem>>, vector<1x8x512xf32>
    %129 = vector.shape_cast %128 : vector<1x8x512xf32> to vector<8x512xf32>
    %130 = arith.truncf %121 : vector<8x128xf32> to vector<8x128xbf16>
    %c0_49 = arith.constant 0 : index
    %c0_50 = arith.constant 0 : index
    %131 = vector.load %arg6[%c0_49, %c0_50] : memref<128x512xbf16, #tpu.memory_space<vmem>>, vector<128x512xbf16>
    %cst_51 = arith.constant dense<0.000000e+00> : vector<8x512xf32>
    %132 = tpu.matmul %130, %131, %cst_51 {dimension_numbers = #tpu.dot_dimension_numbers<[1], [0], [0], [1], [0, 0, 1, 1], [], []>} : vector<8x128xbf16>, vector<128x512xbf16>, vector<8x512xf32> -> vector<8x512xf32>
    %133 = arith.addf %129, %132 : vector<8x512xf32>
    %134 = vector.extract_strided_slice %133 {offsets = [0, 0], sizes = [8, 128], strides = [1, 1]} : vector<8x512xf32> to vector<8x128xf32>
    %135 = arith.negf %134 : vector<8x128xf32>
    %136 = math.exp %135 : vector<8x128xf32>
    %cst_52 = arith.constant 1.000000e+00 : f32
    %137 = vector.broadcast %cst_52 : f32 to vector<8x128xf32>
    %138 = arith.addf %137, %136 : vector<8x128xf32>
    %139 = arith.divf %137, %138 : vector<8x128xf32>
    %140 = vector.extract_strided_slice %133 {offsets = [0, 128], sizes = [8, 128], strides = [1, 1]} : vector<8x512xf32> to vector<8x128xf32>
    %141 = arith.negf %140 : vector<8x128xf32>
    %142 = math.exp %141 : vector<8x128xf32>
    %cst_53 = arith.constant 1.000000e+00 : f32
    %143 = vector.broadcast %cst_53 : f32 to vector<8x128xf32>
    %144 = arith.addf %143, %142 : vector<8x128xf32>
    %145 = arith.divf %143, %144 : vector<8x128xf32>
    %146 = vector.extract_strided_slice %133 {offsets = [0, 256], sizes = [8, 128], strides = [1, 1]} : vector<8x512xf32> to vector<8x128xf32>
    %147 = math.tanh %146 : vector<8x128xf32>
    %148 = vector.extract_strided_slice %133 {offsets = [0, 384], sizes = [8, 128], strides = [1, 1]} : vector<8x512xf32> to vector<8x128xf32>
    %149 = arith.negf %148 : vector<8x128xf32>
    %150 = math.exp %149 : vector<8x128xf32>
    %cst_54 = arith.constant 1.000000e+00 : f32
    %151 = vector.broadcast %cst_54 : f32 to vector<8x128xf32>
    %152 = arith.addf %151, %150 : vector<8x128xf32>
    %153 = arith.divf %151, %152 : vector<8x128xf32>
    %154 = arith.mulf %145, %119 : vector<8x128xf32>
    %155 = arith.mulf %139, %147 : vector<8x128xf32>
    %156 = arith.addf %154, %155 : vector<8x128xf32>
    %157 = math.tanh %156 : vector<8x128xf32>
    %158 = arith.mulf %153, %157 : vector<8x128xf32>
    %159 = arith.truncf %158 : vector<8x128xf32> to vector<8x128xbf16>
    %160 = arith.index_cast %c3_i32 : i32 to index
    %c0_55 = arith.constant 0 : index
    %c0_56 = arith.constant 0 : index
    %161 = vector.load %arg18[%160, %c0_55, %c0_56] : memref<8x8x128xbf16, #tpu.memory_space<vmem>>, vector<1x8x128xbf16>
    %162 = vector.shape_cast %161 : vector<1x8x128xbf16> to vector<8x128xbf16>
    %163 = vector.shape_cast %159 : vector<8x128xbf16> to vector<1x8x128xbf16>
    tpu.vector_store %arg18[%160, %c0_55, %c0_56], %163 {strides = array<i32>} : memref<8x8x128xbf16, #tpu.memory_space<vmem>>, vector<1x8x128xbf16>,
    %c4_i32 = arith.constant 4 : i32
    %164 = arith.index_cast %c4_i32 : i32 to index
    %c0_57 = arith.constant 0 : index
    %c0_58 = arith.constant 0 : index
    %165 = vector.load %arg19[%164, %c0_57, %c0_58] : memref<8x8x512xf32, #tpu.memory_space<vmem>>, vector<1x8x512xf32>
    %166 = vector.shape_cast %165 : vector<1x8x512xf32> to vector<8x512xf32>
    %167 = arith.truncf %158 : vector<8x128xf32> to vector<8x128xbf16>
    %c0_59 = arith.constant 0 : index
    %c0_60 = arith.constant 0 : index
    %168 = vector.load %arg6[%c0_59, %c0_60] : memref<128x512xbf16, #tpu.memory_space<vmem>>, vector<128x512xbf16>
    %cst_61 = arith.constant dense<0.000000e+00> : vector<8x512xf32>
    %169 = tpu.matmul %167, %168, %cst_61 {dimension_numbers = #tpu.dot_dimension_numbers<[1], [0], [0], [1], [0, 0, 1, 1], [], []>} : vector<8x128xbf16>, vector<128x512xbf16>, vector<8x512xf32> -> vector<8x512xf32>
    %170 = arith.addf %166, %169 : vector<8x512xf32>
    %171 = vector.extract_strided_slice %170 {offsets = [0, 0], sizes = [8, 128], strides = [1, 1]} : vector<8x512xf32> to vector<8x128xf32>
    %172 = arith.negf %171 : vector<8x128xf32>
    %173 = math.exp %172 : vector<8x128xf32>
    %cst_62 = arith.constant 1.000000e+00 : f32
    %174 = vector.broadcast %cst_62 : f32 to vector<8x128xf32>
    %175 = arith.addf %174, %173 : vector<8x128xf32>
    %176 = arith.divf %174, %175 : vector<8x128xf32>
    %177 = vector.extract_strided_slice %170 {offsets = [0, 128], sizes = [8, 128], strides = [1, 1]} : vector<8x512xf32> to vector<8x128xf32>
    %178 = arith.negf %177 : vector<8x128xf32>
    %179 = math.exp %178 : vector<8x128xf32>
    %cst_63 = arith.constant 1.000000e+00 : f32
    %180 = vector.broadcast %cst_63 : f32 to vector<8x128xf32>
    %181 = arith.addf %180, %179 : vector<8x128xf32>
    %182 = arith.divf %180, %181 : vector<8x128xf32>
    %183 = vector.extract_strided_slice %170 {offsets = [0, 256], sizes = [8, 128], strides = [1, 1]} : vector<8x512xf32> to vector<8x128xf32>
    %184 = math.tanh %183 : vector<8x128xf32>
    %185 = vector.extract_strided_slice %170 {offsets = [0, 384], sizes = [8, 128], strides = [1, 1]} : vector<8x512xf32> to vector<8x128xf32>
    %186 = arith.negf %185 : vector<8x128xf32>
    %187 = math.exp %186 : vector<8x128xf32>
    %cst_64 = arith.constant 1.000000e+00 : f32
    %188 = vector.broadcast %cst_64 : f32 to vector<8x128xf32>
    %189 = arith.addf %188, %187 : vector<8x128xf32>
    %190 = arith.divf %188, %189 : vector<8x128xf32>
    %191 = arith.mulf %182, %156 : vector<8x128xf32>
    %192 = arith.mulf %176, %184 : vector<8x128xf32>
    %193 = arith.addf %191, %192 : vector<8x128xf32>
    %194 = math.tanh %193 : vector<8x128xf32>
    %195 = arith.mulf %190, %194 : vector<8x128xf32>
    %196 = arith.truncf %195 : vector<8x128xf32> to vector<8x128xbf16>
    %197 = arith.index_cast %c4_i32 : i32 to index
    %c0_65 = arith.constant 0 : index
    %c0_66 = arith.constant 0 : index
    %198 = vector.load %arg18[%197, %c0_65, %c0_66] : memref<8x8x128xbf16, #tpu.memory_space<vmem>>, vector<1x8x128xbf16>
    %199 = vector.shape_cast %198 : vector<1x8x128xbf16> to vector<8x128xbf16>
    %200 = vector.shape_cast %196 : vector<8x128xbf16> to vector<1x8x128xbf16>
    tpu.vector_store %arg18[%197, %c0_65, %c0_66], %200 {strides = array<i32>} : memref<8x8x128xbf16, #tpu.memory_space<vmem>>, vector<1x8x128xbf16>,
    %c5_i32 = arith.constant 5 : i32
    %201 = arith.index_cast %c5_i32 : i32 to index
    %c0_67 = arith.constant 0 : index
    %c0_68 = arith.constant 0 : index
    %202 = vector.load %arg19[%201, %c0_67, %c0_68] : memref<8x8x512xf32, #tpu.memory_space<vmem>>, vector<1x8x512xf32>
    %203 = vector.shape_cast %202 : vector<1x8x512xf32> to vector<8x512xf32>
    %204 = arith.truncf %195 : vector<8x128xf32> to vector<8x128xbf16>
    %c0_69 = arith.constant 0 : index
    %c0_70 = arith.constant 0 : index
    %205 = vector.load %arg6[%c0_69, %c0_70] : memref<128x512xbf16, #tpu.memory_space<vmem>>, vector<128x512xbf16>
    %cst_71 = arith.constant dense<0.000000e+00> : vector<8x512xf32>
    %206 = tpu.matmul %204, %205, %cst_71 {dimension_numbers = #tpu.dot_dimension_numbers<[1], [0], [0], [1], [0, 0, 1, 1], [], []>} : vector<8x128xbf16>, vector<128x512xbf16>, vector<8x512xf32> -> vector<8x512xf32>
    %207 = arith.addf %203, %206 : vector<8x512xf32>
    %208 = vector.extract_strided_slice %207 {offsets = [0, 0], sizes = [8, 128], strides = [1, 1]} : vector<8x512xf32> to vector<8x128xf32>
    %209 = arith.negf %208 : vector<8x128xf32>
    %210 = math.exp %209 : vector<8x128xf32>
    %cst_72 = arith.constant 1.000000e+00 : f32
    %211 = vector.broadcast %cst_72 : f32 to vector<8x128xf32>
    %212 = arith.addf %211, %210 : vector<8x128xf32>
    %213 = arith.divf %211, %212 : vector<8x128xf32>
    %214 = vector.extract_strided_slice %207 {offsets = [0, 128], sizes = [8, 128], strides = [1, 1]} : vector<8x512xf32> to vector<8x128xf32>
    %215 = arith.negf %214 : vector<8x128xf32>
    %216 = math.exp %215 : vector<8x128xf32>
    %cst_73 = arith.constant 1.000000e+00 : f32
    %217 = vector.broadcast %cst_73 : f32 to vector<8x128xf32>
    %218 = arith.addf %217, %216 : vector<8x128xf32>
    %219 = arith.divf %217, %218 : vector<8x128xf32>
    %220 = vector.extract_strided_slice %207 {offsets = [0, 256], sizes = [8, 128], strides = [1, 1]} : vector<8x512xf32> to vector<8x128xf32>
    %221 = math.tanh %220 : vector<8x128xf32>
    %222 = vector.extract_strided_slice %207 {offsets = [0, 384], sizes = [8, 128], strides = [1, 1]} : vector<8x512xf32> to vector<8x128xf32>
    %223 = arith.negf %222 : vector<8x128xf32>
    %224 = math.exp %223 : vector<8x128xf32>
    %cst_74 = arith.constant 1.000000e+00 : f32
    %225 = vector.broadcast %cst_74 : f32 to vector<8x128xf32>
    %226 = arith.addf %225, %224 : vector<8x128xf32>
    %227 = arith.divf %225, %226 : vector<8x128xf32>
    %228 = arith.mulf %219, %193 : vector<8x128xf32>
    %229 = arith.mulf %213, %221 : vector<8x128xf32>
    %230 = arith.addf %228, %229 : vector<8x128xf32>
    %231 = math.tanh %230 : vector<8x128xf32>
    %232 = arith.mulf %227, %231 : vector<8x128xf32>
    %233 = arith.truncf %232 : vector<8x128xf32> to vector<8x128xbf16>
    %234 = arith.index_cast %c5_i32 : i32 to index
    %c0_75 = arith.constant 0 : index
    %c0_76 = arith.constant 0 : index
    %235 = vector.load %arg18[%234, %c0_75, %c0_76] : memref<8x8x128xbf16, #tpu.memory_space<vmem>>, vector<1x8x128xbf16>
    %236 = vector.shape_cast %235 : vector<1x8x128xbf16> to vector<8x128xbf16>
    %237 = vector.shape_cast %233 : vector<8x128xbf16> to vector<1x8x128xbf16>
    tpu.vector_store %arg18[%234, %c0_75, %c0_76], %237 {strides = array<i32>} : memref<8x8x128xbf16, #tpu.memory_space<vmem>>, vector<1x8x128xbf16>,
    %c6_i32 = arith.constant 6 : i32
    %238 = arith.index_cast %c6_i32 : i32 to index
    %c0_77 = arith.constant 0 : index
    %c0_78 = arith.constant 0 : index
    %239 = vector.load %arg19[%238, %c0_77, %c0_78] : memref<8x8x512xf32, #tpu.memory_space<vmem>>, vector<1x8x512xf32>
    %240 = vector.shape_cast %239 : vector<1x8x512xf32> to vector<8x512xf32>
    %241 = arith.truncf %232 : vector<8x128xf32> to vector<8x128xbf16>
    %c0_79 = arith.constant 0 : index
    %c0_80 = arith.constant 0 : index
    %242 = vector.load %arg6[%c0_79, %c0_80] : memref<128x512xbf16, #tpu.memory_space<vmem>>, vector<128x512xbf16>
    %cst_81 = arith.constant dense<0.000000e+00> : vector<8x512xf32>
    %243 = tpu.matmul %241, %242, %cst_81 {dimension_numbers = #tpu.dot_dimension_numbers<[1], [0], [0], [1], [0, 0, 1, 1], [], []>} : vector<8x128xbf16>, vector<128x512xbf16>, vector<8x512xf32> -> vector<8x512xf32>
    %244 = arith.addf %240, %243 : vector<8x512xf32>
    %245 = vector.extract_strided_slice %244 {offsets = [0, 0], sizes = [8, 128], strides = [1, 1]} : vector<8x512xf32> to vector<8x128xf32>
    %246 = arith.negf %245 : vector<8x128xf32>
    %247 = math.exp %246 : vector<8x128xf32>
    %cst_82 = arith.constant 1.000000e+00 : f32
    %248 = vector.broadcast %cst_82 : f32 to vector<8x128xf32>
    %249 = arith.addf %248, %247 : vector<8x128xf32>
    %250 = arith.divf %248, %249 : vector<8x128xf32>
    %251 = vector.extract_strided_slice %244 {offsets = [0, 128], sizes = [8, 128], strides = [1, 1]} : vector<8x512xf32> to vector<8x128xf32>
    %252 = arith.negf %251 : vector<8x128xf32>
    %253 = math.exp %252 : vector<8x128xf32>
    %cst_83 = arith.constant 1.000000e+00 : f32
    %254 = vector.broadcast %cst_83 : f32 to vector<8x128xf32>
    %255 = arith.addf %254, %253 : vector<8x128xf32>
    %256 = arith.divf %254, %255 : vector<8x128xf32>
    %257 = vector.extract_strided_slice %244 {offsets = [0, 256], sizes = [8, 128], strides = [1, 1]} : vector<8x512xf32> to vector<8x128xf32>
    %258 = math.tanh %257 : vector<8x128xf32>
    %259 = vector.extract_strided_slice %244 {offsets = [0, 384], sizes = [8, 128], strides = [1, 1]} : vector<8x512xf32> to vector<8x128xf32>
    %260 = arith.negf %259 : vector<8x128xf32>
    %261 = math.exp %260 : vector<8x128xf32>
    %cst_84 = arith.constant 1.000000e+00 : f32
    %262 = vector.broadcast %cst_84 : f32 to vector<8x128xf32>
    %263 = arith.addf %262, %261 : vector<8x128xf32>
    %264 = arith.divf %262, %263 : vector<8x128xf32>
    %265 = arith.mulf %256, %230 : vector<8x128xf32>
    %266 = arith.mulf %250, %258 : vector<8x128xf32>
    %267 = arith.addf %265, %266 : vector<8x128xf32>
    %268 = math.tanh %267 : vector<8x128xf32>
    %269 = arith.mulf %264, %268 : vector<8x128xf32>
    %270 = arith.truncf %269 : vector<8x128xf32> to vector<8x128xbf16>
    %271 = arith.index_cast %c6_i32 : i32 to index
    %c0_85 = arith.constant 0 : index
    %c0_86 = arith.constant 0 : index
    %272 = vector.load %arg18[%271, %c0_85, %c0_86] : memref<8x8x128xbf16, #tpu.memory_space<vmem>>, vector<1x8x128xbf16>
    %273 = vector.shape_cast %272 : vector<1x8x128xbf16> to vector<8x128xbf16>
    %274 = vector.shape_cast %270 : vector<8x128xbf16> to vector<1x8x128xbf16>
    tpu.vector_store %arg18[%271, %c0_85, %c0_86], %274 {strides = array<i32>} : memref<8x8x128xbf16, #tpu.memory_space<vmem>>, vector<1x8x128xbf16>,
    %c7_i32 = arith.constant 7 : i32
    %275 = arith.index_cast %c7_i32 : i32 to index
    %c0_87 = arith.constant 0 : index
    %c0_88 = arith.constant 0 : index
    %276 = vector.load %arg19[%275, %c0_87, %c0_88] : memref<8x8x512xf32, #tpu.memory_space<vmem>>, vector<1x8x512xf32>
    %277 = vector.shape_cast %276 : vector<1x8x512xf32> to vector<8x512xf32>
    %278 = arith.truncf %269 : vector<8x128xf32> to vector<8x128xbf16>
    %c0_89 = arith.constant 0 : index
    %c0_90 = arith.constant 0 : index
    %279 = vector.load %arg6[%c0_89, %c0_90] : memref<128x512xbf16, #tpu.memory_space<vmem>>, vector<128x512xbf16>
    %cst_91 = arith.constant dense<0.000000e+00> : vector<8x512xf32>
    %280 = tpu.matmul %278, %279, %cst_91 {dimension_numbers = #tpu.dot_dimension_numbers<[1], [0], [0], [1], [0, 0, 1, 1], [], []>} : vector<8x128xbf16>, vector<128x512xbf16>, vector<8x512xf32> -> vector<8x512xf32>
    %281 = arith.addf %277, %280 : vector<8x512xf32>
    %282 = vector.extract_strided_slice %281 {offsets = [0, 0], sizes = [8, 128], strides = [1, 1]} : vector<8x512xf32> to vector<8x128xf32>
    %283 = arith.negf %282 : vector<8x128xf32>
    %284 = math.exp %283 : vector<8x128xf32>
    %cst_92 = arith.constant 1.000000e+00 : f32
    %285 = vector.broadcast %cst_92 : f32 to vector<8x128xf32>
    %286 = arith.addf %285, %284 : vector<8x128xf32>
    %287 = arith.divf %285, %286 : vector<8x128xf32>
    %288 = vector.extract_strided_slice %281 {offsets = [0, 128], sizes = [8, 128], strides = [1, 1]} : vector<8x512xf32> to vector<8x128xf32>
    %289 = arith.negf %288 : vector<8x128xf32>
    %290 = math.exp %289 : vector<8x128xf32>
    %cst_93 = arith.constant 1.000000e+00 : f32
    %291 = vector.broadcast %cst_93 : f32 to vector<8x128xf32>
    %292 = arith.addf %291, %290 : vector<8x128xf32>
    %293 = arith.divf %291, %292 : vector<8x128xf32>
    %294 = vector.extract_strided_slice %281 {offsets = [0, 256], sizes = [8, 128], strides = [1, 1]} : vector<8x512xf32> to vector<8x128xf32>
    %295 = math.tanh %294 : vector<8x128xf32>
    %296 = vector.extract_strided_slice %281 {offsets = [0, 384], sizes = [8, 128], strides = [1, 1]} : vector<8x512xf32> to vector<8x128xf32>
    %297 = arith.negf %296 : vector<8x128xf32>
    %298 = math.exp %297 : vector<8x128xf32>
    %cst_94 = arith.constant 1.000000e+00 : f32
    %299 = vector.broadcast %cst_94 : f32 to vector<8x128xf32>
    %300 = arith.addf %299, %298 : vector<8x128xf32>
    %301 = arith.divf %299, %300 : vector<8x128xf32>
    %302 = arith.mulf %293, %267 : vector<8x128xf32>
    %303 = arith.mulf %287, %295 : vector<8x128xf32>
    %304 = arith.addf %302, %303 : vector<8x128xf32>
    %305 = math.tanh %304 : vector<8x128xf32>
    %306 = arith.mulf %301, %305 : vector<8x128xf32>
    %307 = arith.truncf %306 : vector<8x128xf32> to vector<8x128xbf16>
    %308 = arith.index_cast %c7_i32 : i32 to index
    %c0_95 = arith.constant 0 : index
    %c0_96 = arith.constant 0 : index
    %309 = vector.load %arg18[%308, %c0_95, %c0_96] : memref<8x8x128xbf16, #tpu.memory_space<vmem>>, vector<1x8x128xbf16>
    %310 = vector.shape_cast %309 : vector<1x8x128xbf16> to vector<8x128xbf16>
    %311 = vector.shape_cast %307 : vector<8x128xbf16> to vector<1x8x128xbf16>
    tpu.vector_store %arg18[%308, %c0_95, %c0_96], %311 {strides = array<i32>} : memref<8x8x128xbf16, #tpu.memory_space<vmem>>, vector<1x8x128xbf16>,
    %c8_i32 = arith.constant 8 : i32
    %c0_97 = arith.constant 0 : index
    %c0_98 = arith.constant 0 : index
    %c0_99 = arith.constant 0 : index
    %312 = vector.load %arg16[%c0_97, %c0_98, %c0_99] : memref<2x8x128xf32, #tpu.memory_space<vmem>>, vector<1x8x128xf32>
    %313 = vector.shape_cast %312 : vector<1x8x128xf32> to vector<8x128xf32>
    %314 = vector.shape_cast %306 : vector<8x128xf32> to vector<1x8x128xf32>
    tpu.vector_store %arg16[%c0_97, %c0_98, %c0_99], %314 {strides = array<i32>} : memref<2x8x128xf32, #tpu.memory_space<vmem>>, vector<1x8x128xf32>,
    %c0_100 = arith.constant 0 : index
    %c0_101 = arith.constant 0 : index
    %c0_102 = arith.constant 0 : index
    %315 = vector.load %arg17[%c0_100, %c0_101, %c0_102] : memref<2x8x128xf32, #tpu.memory_space<vmem>>, vector<1x8x128xf32>
    %316 = vector.shape_cast %315 : vector<1x8x128xf32> to vector<8x128xf32>
    %317 = vector.shape_cast %304 : vector<8x128xf32> to vector<1x8x128xf32>
    tpu.vector_store %arg17[%c0_100, %c0_101, %c0_102], %317 {strides = array<i32>} : memref<2x8x128xf32, #tpu.memory_space<vmem>>, vector<1x8x128xf32>,
    %c0_103 = arith.constant 0 : index
    %c0_104 = arith.constant 0 : index
    %c0_105 = arith.constant 0 : index
    %318 = vector.load %arg18[%c0_103, %c0_104, %c0_105] : memref<8x8x128xbf16, #tpu.memory_space<vmem>>, vector<8x8x128xbf16>
    %319 = vector.shape_cast %318 : vector<8x8x128xbf16> to vector<64x128xbf16>
    %c0_106 = arith.constant 0 : index
    %c0_107 = arith.constant 0 : index
    %320 = vector.load %arg8[%c0_106, %c0_107] : memref<128x512xbf16, #tpu.memory_space<vmem>>, vector<128x512xbf16>
    %cst_108 = arith.constant dense<0.000000e+00> : vector<64x512xf32>
    %321 = tpu.matmul %319, %320, %cst_108 {dimension_numbers = #tpu.dot_dimension_numbers<[1], [0], [0], [1], [0, 0, 1, 1], [], []>} : vector<64x128xbf16>, vector<128x512xbf16>, vector<64x512xf32> -> vector<64x512xf32>
    %c0_109 = arith.constant 0 : index
    %c0_110 = arith.constant 0 : index
    %322 = vector.load %arg10[%c0_109, %c0_110] : memref<1x512xf32, #tpu.memory_space<vmem>>, vector<1x512xf32>
    %323 = vector.broadcast %322 : vector<1x512xf32> to vector<64x512xf32>
    %324 = arith.addf %321, %323 : vector<64x512xf32>
    %325 = vector.shape_cast %324 : vector<64x512xf32> to vector<8x8x512xf32>
    %c0_111 = arith.constant 0 : index
    %c0_112 = arith.constant 0 : index
    %c0_113 = arith.constant 0 : index
    %326 = vector.load %arg19[%c0_111, %c0_112, %c0_113] : memref<8x8x512xf32, #tpu.memory_space<vmem>>, vector<8x8x512xf32>
    tpu.vector_store %arg19[%c0_111, %c0_112, %c0_113], %325 {strides = array<i32>} : memref<8x8x512xf32, #tpu.memory_space<vmem>>, vector<8x8x512xf32>,
    %c1 = arith.constant 1 : index
    %c0_114 = arith.constant 0 : index
    %c0_115 = arith.constant 0 : index
    %327 = vector.load %arg16[%c1, %c0_114, %c0_115] : memref<2x8x128xf32, #tpu.memory_space<vmem>>, vector<1x8x128xf32>
    %328 = vector.shape_cast %327 : vector<1x8x128xf32> to vector<8x128xf32>
    %c1_116 = arith.constant 1 : index
    %c0_117 = arith.constant 0 : index
    %c0_118 = arith.constant 0 : index
    %329 = vector.load %arg17[%c1_116, %c0_117, %c0_118] : memref<2x8x128xf32, #tpu.memory_space<vmem>>, vector<1x8x128xf32>
    %330 = vector.shape_cast %329 : vector<1x8x128xf32> to vector<8x128xf32>
    %c0_i32_119 = arith.constant 0 : i32
    %331 = arith.index_cast %c0_i32_119 : i32 to index
    %c0_120 = arith.constant 0 : index
    %c0_121 = arith.constant 0 : index
    %332 = vector.load %arg19[%331, %c0_120, %c0_121] : memref<8x8x512xf32, #tpu.memory_space<vmem>>, vector<1x8x512xf32>
    %333 = vector.shape_cast %332 : vector<1x8x512xf32> to vector<8x512xf32>
    %334 = arith.truncf %328 : vector<8x128xf32> to vector<8x128xbf16>
    %c0_122 = arith.constant 0 : index
    %c0_123 = arith.constant 0 : index
    %335 = vector.load %arg9[%c0_122, %c0_123] : memref<128x512xbf16, #tpu.memory_space<vmem>>, vector<128x512xbf16>
    %cst_124 = arith.constant dense<0.000000e+00> : vector<8x512xf32>
    %336 = tpu.matmul %334, %335, %cst_124 {dimension_numbers = #tpu.dot_dimension_numbers<[1], [0], [0], [1], [0, 0, 1, 1], [], []>} : vector<8x128xbf16>, vector<128x512xbf16>, vector<8x512xf32> -> vector<8x512xf32>
    %337 = arith.addf %333, %336 : vector<8x512xf32>
    %338 = vector.extract_strided_slice %337 {offsets = [0, 0], sizes = [8, 128], strides = [1, 1]} : vector<8x512xf32> to vector<8x128xf32>
    %339 = arith.negf %338 : vector<8x128xf32>
    %340 = math.exp %339 : vector<8x128xf32>
    %cst_125 = arith.constant 1.000000e+00 : f32
    %341 = vector.broadcast %cst_125 : f32 to vector<8x128xf32>
    %342 = arith.addf %341, %340 : vector<8x128xf32>
    %343 = arith.divf %341, %342 : vector<8x128xf32>
    %344 = vector.extract_strided_slice %337 {offsets = [0, 128], sizes = [8, 128], strides = [1, 1]} : vector<8x512xf32> to vector<8x128xf32>
    %345 = arith.negf %344 : vector<8x128xf32>
    %346 = math.exp %345 : vector<8x128xf32>
    %cst_126 = arith.constant 1.000000e+00 : f32
    %347 = vector.broadcast %cst_126 : f32 to vector<8x128xf32>
    %348 = arith.addf %347, %346 : vector<8x128xf32>
    %349 = arith.divf %347, %348 : vector<8x128xf32>
    %350 = vector.extract_strided_slice %337 {offsets = [0, 256], sizes = [8, 128], strides = [1, 1]} : vector<8x512xf32> to vector<8x128xf32>
    %351 = math.tanh %350 : vector<8x128xf32>
    %352 = vector.extract_strided_slice %337 {offsets = [0, 384], sizes = [8, 128], strides = [1, 1]} : vector<8x512xf32> to vector<8x128xf32>
    %353 = arith.negf %352 : vector<8x128xf32>
    %354 = math.exp %353 : vector<8x128xf32>
    %cst_127 = arith.constant 1.000000e+00 : f32
    %355 = vector.broadcast %cst_127 : f32 to vector<8x128xf32>
    %356 = arith.addf %355, %354 : vector<8x128xf32>
    %357 = arith.divf %355, %356 : vector<8x128xf32>
    %358 = arith.mulf %349, %330 : vector<8x128xf32>
    %359 = arith.mulf %343, %351 : vector<8x128xf32>
    %360 = arith.addf %358, %359 : vector<8x128xf32>
    %361 = math.tanh %360 : vector<8x128xf32>
    %362 = arith.mulf %357, %361 : vector<8x128xf32>
    %c1_i32_128 = arith.constant 1 : i32
    %363 = arith.index_cast %c1_i32_128 : i32 to index
    %c0_129 = arith.constant 0 : index
    %c0_130 = arith.constant 0 : index
    %364 = vector.load %arg19[%363, %c0_129, %c0_130] : memref<8x8x512xf32, #tpu.memory_space<vmem>>, vector<1x8x512xf32>
    %365 = vector.shape_cast %364 : vector<1x8x512xf32> to vector<8x512xf32>
    %366 = arith.truncf %362 : vector<8x128xf32> to vector<8x128xbf16>
    %c0_131 = arith.constant 0 : index
    %c0_132 = arith.constant 0 : index
    %367 = vector.load %arg9[%c0_131, %c0_132] : memref<128x512xbf16, #tpu.memory_space<vmem>>, vector<128x512xbf16>
    %cst_133 = arith.constant dense<0.000000e+00> : vector<8x512xf32>
    %368 = tpu.matmul %366, %367, %cst_133 {dimension_numbers = #tpu.dot_dimension_numbers<[1], [0], [0], [1], [0, 0, 1, 1], [], []>} : vector<8x128xbf16>, vector<128x512xbf16>, vector<8x512xf32> -> vector<8x512xf32>
    %369 = arith.addf %365, %368 : vector<8x512xf32>
    %370 = vector.extract_strided_slice %369 {offsets = [0, 0], sizes = [8, 128], strides = [1, 1]} : vector<8x512xf32> to vector<8x128xf32>
    %371 = arith.negf %370 : vector<8x128xf32>
    %372 = math.exp %371 : vector<8x128xf32>
    %cst_134 = arith.constant 1.000000e+00 : f32
    %373 = vector.broadcast %cst_134 : f32 to vector<8x128xf32>
    %374 = arith.addf %373, %372 : vector<8x128xf32>
    %375 = arith.divf %373, %374 : vector<8x128xf32>
    %376 = vector.extract_strided_slice %369 {offsets = [0, 128], sizes = [8, 128], strides = [1, 1]} : vector<8x512xf32> to vector<8x128xf32>
    %377 = arith.negf %376 : vector<8x128xf32>
    %378 = math.exp %377 : vector<8x128xf32>
    %cst_135 = arith.constant 1.000000e+00 : f32
    %379 = vector.broadcast %cst_135 : f32 to vector<8x128xf32>
    %380 = arith.addf %379, %378 : vector<8x128xf32>
    %381 = arith.divf %379, %380 : vector<8x128xf32>
    %382 = vector.extract_strided_slice %369 {offsets = [0, 256], sizes = [8, 128], strides = [1, 1]} : vector<8x512xf32> to vector<8x128xf32>
    %383 = math.tanh %382 : vector<8x128xf32>
    %384 = vector.extract_strided_slice %369 {offsets = [0, 384], sizes = [8, 128], strides = [1, 1]} : vector<8x512xf32> to vector<8x128xf32>
    %385 = arith.negf %384 : vector<8x128xf32>
    %386 = math.exp %385 : vector<8x128xf32>
    %cst_136 = arith.constant 1.000000e+00 : f32
    %387 = vector.broadcast %cst_136 : f32 to vector<8x128xf32>
    %388 = arith.addf %387, %386 : vector<8x128xf32>
    %389 = arith.divf %387, %388 : vector<8x128xf32>
    %390 = arith.mulf %381, %360 : vector<8x128xf32>
    %391 = arith.mulf %375, %383 : vector<8x128xf32>
    %392 = arith.addf %390, %391 : vector<8x128xf32>
    %393 = math.tanh %392 : vector<8x128xf32>
    %394 = arith.mulf %389, %393 : vector<8x128xf32>
    %c2_i32_137 = arith.constant 2 : i32
    %395 = arith.index_cast %c2_i32_137 : i32 to index
    %c0_138 = arith.constant 0 : index
    %c0_139 = arith.constant 0 : index
    %396 = vector.load %arg19[%395, %c0_138, %c0_139] : memref<8x8x512xf32, #tpu.memory_space<vmem>>, vector<1x8x512xf32>
    %397 = vector.shape_cast %396 : vector<1x8x512xf32> to vector<8x512xf32>
    %398 = arith.truncf %394 : vector<8x128xf32> to vector<8x128xbf16>
    %c0_140 = arith.constant 0 : index
    %c0_141 = arith.constant 0 : index
    %399 = vector.load %arg9[%c0_140, %c0_141] : memref<128x512xbf16, #tpu.memory_space<vmem>>, vector<128x512xbf16>
    %cst_142 = arith.constant dense<0.000000e+00> : vector<8x512xf32>
    %400 = tpu.matmul %398, %399, %cst_142 {dimension_numbers = #tpu.dot_dimension_numbers<[1], [0], [0], [1], [0, 0, 1, 1], [], []>} : vector<8x128xbf16>, vector<128x512xbf16>, vector<8x512xf32> -> vector<8x512xf32>
    %401 = arith.addf %397, %400 : vector<8x512xf32>
    %402 = vector.extract_strided_slice %401 {offsets = [0, 0], sizes = [8, 128], strides = [1, 1]} : vector<8x512xf32> to vector<8x128xf32>
    %403 = arith.negf %402 : vector<8x128xf32>
    %404 = math.exp %403 : vector<8x128xf32>
    %cst_143 = arith.constant 1.000000e+00 : f32
    %405 = vector.broadcast %cst_143 : f32 to vector<8x128xf32>
    %406 = arith.addf %405, %404 : vector<8x128xf32>
    %407 = arith.divf %405, %406 : vector<8x128xf32>
    %408 = vector.extract_strided_slice %401 {offsets = [0, 128], sizes = [8, 128], strides = [1, 1]} : vector<8x512xf32> to vector<8x128xf32>
    %409 = arith.negf %408 : vector<8x128xf32>
    %410 = math.exp %409 : vector<8x128xf32>
    %cst_144 = arith.constant 1.000000e+00 : f32
    %411 = vector.broadcast %cst_144 : f32 to vector<8x128xf32>
    %412 = arith.addf %411, %410 : vector<8x128xf32>
    %413 = arith.divf %411, %412 : vector<8x128xf32>
    %414 = vector.extract_strided_slice %401 {offsets = [0, 256], sizes = [8, 128], strides = [1, 1]} : vector<8x512xf32> to vector<8x128xf32>
    %415 = math.tanh %414 : vector<8x128xf32>
    %416 = vector.extract_strided_slice %401 {offsets = [0, 384], sizes = [8, 128], strides = [1, 1]} : vector<8x512xf32> to vector<8x128xf32>
    %417 = arith.negf %416 : vector<8x128xf32>
    %418 = math.exp %417 : vector<8x128xf32>
    %cst_145 = arith.constant 1.000000e+00 : f32
    %419 = vector.broadcast %cst_145 : f32 to vector<8x128xf32>
    %420 = arith.addf %419, %418 : vector<8x128xf32>
    %421 = arith.divf %419, %420 : vector<8x128xf32>
    %422 = arith.mulf %413, %392 : vector<8x128xf32>
    %423 = arith.mulf %407, %415 : vector<8x128xf32>
    %424 = arith.addf %422, %423 : vector<8x128xf32>
    %425 = math.tanh %424 : vector<8x128xf32>
    %426 = arith.mulf %421, %425 : vector<8x128xf32>
    %c3_i32_146 = arith.constant 3 : i32
    %427 = arith.index_cast %c3_i32_146 : i32 to index
    %c0_147 = arith.constant 0 : index
    %c0_148 = arith.constant 0 : index
    %428 = vector.load %arg19[%427, %c0_147, %c0_148] : memref<8x8x512xf32, #tpu.memory_space<vmem>>, vector<1x8x512xf32>
    %429 = vector.shape_cast %428 : vector<1x8x512xf32> to vector<8x512xf32>
    %430 = arith.truncf %426 : vector<8x128xf32> to vector<8x128xbf16>
    %c0_149 = arith.constant 0 : index
    %c0_150 = arith.constant 0 : index
    %431 = vector.load %arg9[%c0_149, %c0_150] : memref<128x512xbf16, #tpu.memory_space<vmem>>, vector<128x512xbf16>
    %cst_151 = arith.constant dense<0.000000e+00> : vector<8x512xf32>
    %432 = tpu.matmul %430, %431, %cst_151 {dimension_numbers = #tpu.dot_dimension_numbers<[1], [0], [0], [1], [0, 0, 1, 1], [], []>} : vector<8x128xbf16>, vector<128x512xbf16>, vector<8x512xf32> -> vector<8x512xf32>
    %433 = arith.addf %429, %432 : vector<8x512xf32>
    %434 = vector.extract_strided_slice %433 {offsets = [0, 0], sizes = [8, 128], strides = [1, 1]} : vector<8x512xf32> to vector<8x128xf32>
    %435 = arith.negf %434 : vector<8x128xf32>
    %436 = math.exp %435 : vector<8x128xf32>
    %cst_152 = arith.constant 1.000000e+00 : f32
    %437 = vector.broadcast %cst_152 : f32 to vector<8x128xf32>
    %438 = arith.addf %437, %436 : vector<8x128xf32>
    %439 = arith.divf %437, %438 : vector<8x128xf32>
    %440 = vector.extract_strided_slice %433 {offsets = [0, 128], sizes = [8, 128], strides = [1, 1]} : vector<8x512xf32> to vector<8x128xf32>
    %441 = arith.negf %440 : vector<8x128xf32>
    %442 = math.exp %441 : vector<8x128xf32>
    %cst_153 = arith.constant 1.000000e+00 : f32
    %443 = vector.broadcast %cst_153 : f32 to vector<8x128xf32>
    %444 = arith.addf %443, %442 : vector<8x128xf32>
    %445 = arith.divf %443, %444 : vector<8x128xf32>
    %446 = vector.extract_strided_slice %433 {offsets = [0, 256], sizes = [8, 128], strides = [1, 1]} : vector<8x512xf32> to vector<8x128xf32>
    %447 = math.tanh %446 : vector<8x128xf32>
    %448 = vector.extract_strided_slice %433 {offsets = [0, 384], sizes = [8, 128], strides = [1, 1]} : vector<8x512xf32> to vector<8x128xf32>
    %449 = arith.negf %448 : vector<8x128xf32>
    %450 = math.exp %449 : vector<8x128xf32>
    %cst_154 = arith.constant 1.000000e+00 : f32
    %451 = vector.broadcast %cst_154 : f32 to vector<8x128xf32>
    %452 = arith.addf %451, %450 : vector<8x128xf32>
    %453 = arith.divf %451, %452 : vector<8x128xf32>
    %454 = arith.mulf %445, %424 : vector<8x128xf32>
    %455 = arith.mulf %439, %447 : vector<8x128xf32>
    %456 = arith.addf %454, %455 : vector<8x128xf32>
    %457 = math.tanh %456 : vector<8x128xf32>
    %458 = arith.mulf %453, %457 : vector<8x128xf32>
    %c4_i32_155 = arith.constant 4 : i32
    %459 = arith.index_cast %c4_i32_155 : i32 to index
    %c0_156 = arith.constant 0 : index
    %c0_157 = arith.constant 0 : index
    %460 = vector.load %arg19[%459, %c0_156, %c0_157] : memref<8x8x512xf32, #tpu.memory_space<vmem>>, vector<1x8x512xf32>
    %461 = vector.shape_cast %460 : vector<1x8x512xf32> to vector<8x512xf32>
    %462 = arith.truncf %458 : vector<8x128xf32> to vector<8x128xbf16>
    %c0_158 = arith.constant 0 : index
    %c0_159 = arith.constant 0 : index
    %463 = vector.load %arg9[%c0_158, %c0_159] : memref<128x512xbf16, #tpu.memory_space<vmem>>, vector<128x512xbf16>
    %cst_160 = arith.constant dense<0.000000e+00> : vector<8x512xf32>
    %464 = tpu.matmul %462, %463, %cst_160 {dimension_numbers = #tpu.dot_dimension_numbers<[1], [0], [0], [1], [0, 0, 1, 1], [], []>} : vector<8x128xbf16>, vector<128x512xbf16>, vector<8x512xf32> -> vector<8x512xf32>
    %465 = arith.addf %461, %464 : vector<8x512xf32>
    %466 = vector.extract_strided_slice %465 {offsets = [0, 0], sizes = [8, 128], strides = [1, 1]} : vector<8x512xf32> to vector<8x128xf32>
    %467 = arith.negf %466 : vector<8x128xf32>
    %468 = math.exp %467 : vector<8x128xf32>
    %cst_161 = arith.constant 1.000000e+00 : f32
    %469 = vector.broadcast %cst_161 : f32 to vector<8x128xf32>
    %470 = arith.addf %469, %468 : vector<8x128xf32>
    %471 = arith.divf %469, %470 : vector<8x128xf32>
    %472 = vector.extract_strided_slice %465 {offsets = [0, 128], sizes = [8, 128], strides = [1, 1]} : vector<8x512xf32> to vector<8x128xf32>
    %473 = arith.negf %472 : vector<8x128xf32>
    %474 = math.exp %473 : vector<8x128xf32>
    %cst_162 = arith.constant 1.000000e+00 : f32
    %475 = vector.broadcast %cst_162 : f32 to vector<8x128xf32>
    %476 = arith.addf %475, %474 : vector<8x128xf32>
    %477 = arith.divf %475, %476 : vector<8x128xf32>
    %478 = vector.extract_strided_slice %465 {offsets = [0, 256], sizes = [8, 128], strides = [1, 1]} : vector<8x512xf32> to vector<8x128xf32>
    %479 = math.tanh %478 : vector<8x128xf32>
    %480 = vector.extract_strided_slice %465 {offsets = [0, 384], sizes = [8, 128], strides = [1, 1]} : vector<8x512xf32> to vector<8x128xf32>
    %481 = arith.negf %480 : vector<8x128xf32>
    %482 = math.exp %481 : vector<8x128xf32>
    %cst_163 = arith.constant 1.000000e+00 : f32
    %483 = vector.broadcast %cst_163 : f32 to vector<8x128xf32>
    %484 = arith.addf %483, %482 : vector<8x128xf32>
    %485 = arith.divf %483, %484 : vector<8x128xf32>
    %486 = arith.mulf %477, %456 : vector<8x128xf32>
    %487 = arith.mulf %471, %479 : vector<8x128xf32>
    %488 = arith.addf %486, %487 : vector<8x128xf32>
    %489 = math.tanh %488 : vector<8x128xf32>
    %490 = arith.mulf %485, %489 : vector<8x128xf32>
    %c5_i32_164 = arith.constant 5 : i32
    %491 = arith.index_cast %c5_i32_164 : i32 to index
    %c0_165 = arith.constant 0 : index
    %c0_166 = arith.constant 0 : index
    %492 = vector.load %arg19[%491, %c0_165, %c0_166] : memref<8x8x512xf32, #tpu.memory_space<vmem>>, vector<1x8x512xf32>
    %493 = vector.shape_cast %492 : vector<1x8x512xf32> to vector<8x512xf32>
    %494 = arith.truncf %490 : vector<8x128xf32> to vector<8x128xbf16>
    %c0_167 = arith.constant 0 : index
    %c0_168 = arith.constant 0 : index
    %495 = vector.load %arg9[%c0_167, %c0_168] : memref<128x512xbf16, #tpu.memory_space<vmem>>, vector<128x512xbf16>
    %cst_169 = arith.constant dense<0.000000e+00> : vector<8x512xf32>
    %496 = tpu.matmul %494, %495, %cst_169 {dimension_numbers = #tpu.dot_dimension_numbers<[1], [0], [0], [1], [0, 0, 1, 1], [], []>} : vector<8x128xbf16>, vector<128x512xbf16>, vector<8x512xf32> -> vector<8x512xf32>
    %497 = arith.addf %493, %496 : vector<8x512xf32>
    %498 = vector.extract_strided_slice %497 {offsets = [0, 0], sizes = [8, 128], strides = [1, 1]} : vector<8x512xf32> to vector<8x128xf32>
    %499 = arith.negf %498 : vector<8x128xf32>
    %500 = math.exp %499 : vector<8x128xf32>
    %cst_170 = arith.constant 1.000000e+00 : f32
    %501 = vector.broadcast %cst_170 : f32 to vector<8x128xf32>
    %502 = arith.addf %501, %500 : vector<8x128xf32>
    %503 = arith.divf %501, %502 : vector<8x128xf32>
    %504 = vector.extract_strided_slice %497 {offsets = [0, 128], sizes = [8, 128], strides = [1, 1]} : vector<8x512xf32> to vector<8x128xf32>
    %505 = arith.negf %504 : vector<8x128xf32>
    %506 = math.exp %505 : vector<8x128xf32>
    %cst_171 = arith.constant 1.000000e+00 : f32
    %507 = vector.broadcast %cst_171 : f32 to vector<8x128xf32>
    %508 = arith.addf %507, %506 : vector<8x128xf32>
    %509 = arith.divf %507, %508 : vector<8x128xf32>
    %510 = vector.extract_strided_slice %497 {offsets = [0, 256], sizes = [8, 128], strides = [1, 1]} : vector<8x512xf32> to vector<8x128xf32>
    %511 = math.tanh %510 : vector<8x128xf32>
    %512 = vector.extract_strided_slice %497 {offsets = [0, 384], sizes = [8, 128], strides = [1, 1]} : vector<8x512xf32> to vector<8x128xf32>
    %513 = arith.negf %512 : vector<8x128xf32>
    %514 = math.exp %513 : vector<8x128xf32>
    %cst_172 = arith.constant 1.000000e+00 : f32
    %515 = vector.broadcast %cst_172 : f32 to vector<8x128xf32>
    %516 = arith.addf %515, %514 : vector<8x128xf32>
    %517 = arith.divf %515, %516 : vector<8x128xf32>
    %518 = arith.mulf %509, %488 : vector<8x128xf32>
    %519 = arith.mulf %503, %511 : vector<8x128xf32>
    %520 = arith.addf %518, %519 : vector<8x128xf32>
    %521 = math.tanh %520 : vector<8x128xf32>
    %522 = arith.mulf %517, %521 : vector<8x128xf32>
    %c6_i32_173 = arith.constant 6 : i32
    %523 = arith.index_cast %c6_i32_173 : i32 to index
    %c0_174 = arith.constant 0 : index
    %c0_175 = arith.constant 0 : index
    %524 = vector.load %arg19[%523, %c0_174, %c0_175] : memref<8x8x512xf32, #tpu.memory_space<vmem>>, vector<1x8x512xf32>
    %525 = vector.shape_cast %524 : vector<1x8x512xf32> to vector<8x512xf32>
    %526 = arith.truncf %522 : vector<8x128xf32> to vector<8x128xbf16>
    %c0_176 = arith.constant 0 : index
    %c0_177 = arith.constant 0 : index
    %527 = vector.load %arg9[%c0_176, %c0_177] : memref<128x512xbf16, #tpu.memory_space<vmem>>, vector<128x512xbf16>
    %cst_178 = arith.constant dense<0.000000e+00> : vector<8x512xf32>
    %528 = tpu.matmul %526, %527, %cst_178 {dimension_numbers = #tpu.dot_dimension_numbers<[1], [0], [0], [1], [0, 0, 1, 1], [], []>} : vector<8x128xbf16>, vector<128x512xbf16>, vector<8x512xf32> -> vector<8x512xf32>
    %529 = arith.addf %525, %528 : vector<8x512xf32>
    %530 = vector.extract_strided_slice %529 {offsets = [0, 0], sizes = [8, 128], strides = [1, 1]} : vector<8x512xf32> to vector<8x128xf32>
    %531 = arith.negf %530 : vector<8x128xf32>
    %532 = math.exp %531 : vector<8x128xf32>
    %cst_179 = arith.constant 1.000000e+00 : f32
    %533 = vector.broadcast %cst_179 : f32 to vector<8x128xf32>
    %534 = arith.addf %533, %532 : vector<8x128xf32>
    %535 = arith.divf %533, %534 : vector<8x128xf32>
    %536 = vector.extract_strided_slice %529 {offsets = [0, 128], sizes = [8, 128], strides = [1, 1]} : vector<8x512xf32> to vector<8x128xf32>
    %537 = arith.negf %536 : vector<8x128xf32>
    %538 = math.exp %537 : vector<8x128xf32>
    %cst_180 = arith.constant 1.000000e+00 : f32
    %539 = vector.broadcast %cst_180 : f32 to vector<8x128xf32>
    %540 = arith.addf %539, %538 : vector<8x128xf32>
    %541 = arith.divf %539, %540 : vector<8x128xf32>
    %542 = vector.extract_strided_slice %529 {offsets = [0, 256], sizes = [8, 128], strides = [1, 1]} : vector<8x512xf32> to vector<8x128xf32>
    %543 = math.tanh %542 : vector<8x128xf32>
    %544 = vector.extract_strided_slice %529 {offsets = [0, 384], sizes = [8, 128], strides = [1, 1]} : vector<8x512xf32> to vector<8x128xf32>
    %545 = arith.negf %544 : vector<8x128xf32>
    %546 = math.exp %545 : vector<8x128xf32>
    %cst_181 = arith.constant 1.000000e+00 : f32
    %547 = vector.broadcast %cst_181 : f32 to vector<8x128xf32>
    %548 = arith.addf %547, %546 : vector<8x128xf32>
    %549 = arith.divf %547, %548 : vector<8x128xf32>
    %550 = arith.mulf %541, %520 : vector<8x128xf32>
    %551 = arith.mulf %535, %543 : vector<8x128xf32>
    %552 = arith.addf %550, %551 : vector<8x128xf32>
    %553 = math.tanh %552 : vector<8x128xf32>
    %554 = arith.mulf %549, %553 : vector<8x128xf32>
    %c7_i32_182 = arith.constant 7 : i32
    %555 = arith.index_cast %c7_i32_182 : i32 to index
    %c0_183 = arith.constant 0 : index
    %c0_184 = arith.constant 0 : index
    %556 = vector.load %arg19[%555, %c0_183, %c0_184] : memref<8x8x512xf32, #tpu.memory_space<vmem>>, vector<1x8x512xf32>
    %557 = vector.shape_cast %556 : vector<1x8x512xf32> to vector<8x512xf32>
    %558 = arith.truncf %554 : vector<8x128xf32> to vector<8x128xbf16>
    %c0_185 = arith.constant 0 : index
    %c0_186 = arith.constant 0 : index
    %559 = vector.load %arg9[%c0_185, %c0_186] : memref<128x512xbf16, #tpu.memory_space<vmem>>, vector<128x512xbf16>
    %cst_187 = arith.constant dense<0.000000e+00> : vector<8x512xf32>
    %560 = tpu.matmul %558, %559, %cst_187 {dimension_numbers = #tpu.dot_dimension_numbers<[1], [0], [0], [1], [0, 0, 1, 1], [], []>} : vector<8x128xbf16>, vector<128x512xbf16>, vector<8x512xf32> -> vector<8x512xf32>
    %561 = arith.addf %557, %560 : vector<8x512xf32>
    %562 = vector.extract_strided_slice %561 {offsets = [0, 0], sizes = [8, 128], strides = [1, 1]} : vector<8x512xf32> to vector<8x128xf32>
    %563 = arith.negf %562 : vector<8x128xf32>
    %564 = math.exp %563 : vector<8x128xf32>
    %cst_188 = arith.constant 1.000000e+00 : f32
    %565 = vector.broadcast %cst_188 : f32 to vector<8x128xf32>
    %566 = arith.addf %565, %564 : vector<8x128xf32>
    %567 = arith.divf %565, %566 : vector<8x128xf32>
    %568 = vector.extract_strided_slice %561 {offsets = [0, 128], sizes = [8, 128], strides = [1, 1]} : vector<8x512xf32> to vector<8x128xf32>
    %569 = arith.negf %568 : vector<8x128xf32>
    %570 = math.exp %569 : vector<8x128xf32>
    %cst_189 = arith.constant 1.000000e+00 : f32
    %571 = vector.broadcast %cst_189 : f32 to vector<8x128xf32>
    %572 = arith.addf %571, %570 : vector<8x128xf32>
    %573 = arith.divf %571, %572 : vector<8x128xf32>
    %574 = vector.extract_strided_slice %561 {offsets = [0, 256], sizes = [8, 128], strides = [1, 1]} : vector<8x512xf32> to vector<8x128xf32>
    %575 = math.tanh %574 : vector<8x128xf32>
    %576 = vector.extract_strided_slice %561 {offsets = [0, 384], sizes = [8, 128], strides = [1, 1]} : vector<8x512xf32> to vector<8x128xf32>
    %577 = arith.negf %576 : vector<8x128xf32>
    %578 = math.exp %577 : vector<8x128xf32>
    %cst_190 = arith.constant 1.000000e+00 : f32
    %579 = vector.broadcast %cst_190 : f32 to vector<8x128xf32>
    %580 = arith.addf %579, %578 : vector<8x128xf32>
    %581 = arith.divf %579, %580 : vector<8x128xf32>
    %582 = arith.mulf %573, %552 : vector<8x128xf32>
    %583 = arith.mulf %567, %575 : vector<8x128xf32>
    %584 = arith.addf %582, %583 : vector<8x128xf32>
    %585 = math.tanh %584 : vector<8x128xf32>
    %586 = arith.mulf %581, %585 : vector<8x128xf32>
    %c8_i32_191 = arith.constant 8 : i32
    %c1_192 = arith.constant 1 : index
    %c0_193 = arith.constant 0 : index
    %c0_194 = arith.constant 0 : index
    %587 = vector.load %arg16[%c1_192, %c0_193, %c0_194] : memref<2x8x128xf32, #tpu.memory_space<vmem>>, vector<1x8x128xf32>
    %588 = vector.shape_cast %587 : vector<1x8x128xf32> to vector<8x128xf32>
    %589 = vector.shape_cast %586 : vector<8x128xf32> to vector<1x8x128xf32>
    tpu.vector_store %arg16[%c1_192, %c0_193, %c0_194], %589 {strides = array<i32>} : memref<2x8x128xf32, #tpu.memory_space<vmem>>, vector<1x8x128xf32>,
    %c1_195 = arith.constant 1 : index
    %c0_196 = arith.constant 0 : index
    %c0_197 = arith.constant 0 : index
    %590 = vector.load %arg17[%c1_195, %c0_196, %c0_197] : memref<2x8x128xf32, #tpu.memory_space<vmem>>, vector<1x8x128xf32>
    %591 = vector.shape_cast %590 : vector<1x8x128xf32> to vector<8x128xf32>
    %592 = vector.shape_cast %584 : vector<8x128xf32> to vector<1x8x128xf32>
    tpu.vector_store %arg17[%c1_195, %c0_196, %c0_197], %592 {strides = array<i32>} : memref<2x8x128xf32, #tpu.memory_space<vmem>>, vector<1x8x128xf32>,
    %c0_i32_198 = arith.constant 0 : i32
    %593 = arith.cmpi eq, %arg1, %c0_i32_198 : i32
    %594 = arith.extui %593 : i1 to i32
    %c0_i32_199 = arith.constant 0 : i32
    %595 = arith.cmpi ne, %594, %c0_i32_199 : i32
    scf.if %595 {
      %c0_200 = arith.constant 0 : index
      %c0_201 = arith.constant 0 : index
      %c0_202 = arith.constant 0 : index
      %596 = vector.load %arg16[%c0_200, %c0_201, %c0_202] : memref<2x8x128xf32, #tpu.memory_space<vmem>>, vector<2x8x128xf32>
      %c0_203 = arith.constant 0 : index
      %c0_204 = arith.constant 0 : index
      %c0_205 = arith.constant 0 : index
      %597 = vector.load %arg14[%c0_203, %c0_204, %c0_205] : memref<2x8x128xf32, #tpu.memory_space<vmem>>, vector<2x8x128xf32>
      tpu.vector_store %arg14[%c0_203, %c0_204, %c0_205], %596 {strides = array<i32>} : memref<2x8x128xf32, #tpu.memory_space<vmem>>, vector<2x8x128xf32>,
      %c0_206 = arith.constant 0 : index
      %c0_207 = arith.constant 0 : index
      %c0_208 = arith.constant 0 : index
      %598 = vector.load %arg17[%c0_206, %c0_207, %c0_208] : memref<2x8x128xf32, #tpu.memory_space<vmem>>, vector<2x8x128xf32>
      %c0_209 = arith.constant 0 : index
      %c0_210 = arith.constant 0 : index
      %c0_211 = arith.constant 0 : index
      %599 = vector.load %arg15[%c0_209, %c0_210, %c0_211] : memref<2x8x128xf32, #tpu.memory_space<vmem>>, vector<2x8x128xf32>
      tpu.vector_store %arg15[%c0_209, %c0_210, %c0_211], %598 {strides = array<i32>} : memref<2x8x128xf32, #tpu.memory_space<vmem>>, vector<2x8x128xf32>,
      %c1_212 = arith.constant 1 : index
      %c0_213 = arith.constant 0 : index
      %c0_214 = arith.constant 0 : index
      %600 = vector.load %arg16[%c1_212, %c0_213, %c0_214] : memref<2x8x128xf32, #tpu.memory_space<vmem>>, vector<1x8x128xf32>
      %601 = vector.shape_cast %600 : vector<1x8x128xf32> to vector<8x128xf32>
      %602 = arith.truncf %601 : vector<8x128xf32> to vector<8x128xbf16>
      %c0_215 = arith.constant 0 : index
      %c0_216 = arith.constant 0 : index
      %603 = vector.load %arg11[%c0_215, %c0_216] : memref<128x128xbf16, #tpu.memory_space<vmem>>, vector<128x128xbf16>
      %cst_217 = arith.constant dense<0.000000e+00> : vector<8x128xf32>
      %604 = tpu.matmul %602, %603, %cst_217 {dimension_numbers = #tpu.dot_dimension_numbers<[1], [0], [0], [1], [0, 0, 1, 1], [], []>} : vector<8x128xbf16>, vector<128x128xbf16>, vector<8x128xf32> -> vector<8x128xf32>
      %c0_218 = arith.constant 0 : index
      %c0_219 = arith.constant 0 : index
      %605 = vector.load %arg12[%c0_218, %c0_219] : memref<1x128xf32, #tpu.memory_space<vmem>>, vector<1x128xf32>
      %606 = vector.broadcast %605 : vector<1x128xf32> to vector<8x128xf32>
      %607 = arith.addf %604, %606 : vector<8x128xf32>
      %cst_220 = arith.constant dense<0xFF800000> : vector<8xf32>
      %608 = vector.multi_reduction <maximumf>, %607, %cst_220 [1] : vector<8x128xf32> to vector<8xf32>
      %609 = vector.shape_cast %608 : vector<8xf32> to vector<8x1xf32>
      %610 = vector.broadcast %609 : vector<8x1xf32> to vector<8x128xf32>
      %611 = arith.subf %607, %610 : vector<8x128xf32>
      %612 = math.exp %611 : vector<8x128xf32>
      %cst_221 = arith.constant dense<0.000000e+00> : vector<8xf32>
      %613 = vector.multi_reduction <add>, %612, %cst_221 [1] : vector<8x128xf32> to vector<8xf32>
      %614 = vector.shape_cast %613 : vector<8xf32> to vector<8x1xf32>
      %615 = tpu.reciprocal %614 {approx = true} : vector<8x1xf32> -> vector<8x1xf32>
      %616 = vector.broadcast %615 : vector<8x1xf32> to vector<8x128xf32>
      %617 = arith.mulf %612, %616 : vector<8x128xf32>
      %c0_222 = arith.constant 0 : index
      %c0_223 = arith.constant 0 : index
      %618 = vector.load %arg13[%c0_222, %c0_223] : memref<8x128xf32, #tpu.memory_space<vmem>>, vector<8x128xf32>
      tpu.vector_store %arg13[%c0_222, %c0_223], %617 {strides = array<i32>} : memref<8x128xf32, #tpu.memory_space<vmem>>, vector<8x128xf32>,
    } else {
    }
    return
  }
  func.func @transform_0(%arg0: i32, %arg1: i32) -> (i32, i32, i32) {
    %c0_i32 = arith.constant 0 : i32
    %c0_i32_0 = arith.constant 0 : i32
    return %arg1, %arg0, %c0_i32 : i32, i32, i32
  }
  func.func @transform_1(%arg0: i32, %arg1: i32) -> (i32, i32, i32) {
    %c0_i32 = arith.constant 0 : i32
    %c0_i32_0 = arith.constant 0 : i32
    %c0_i32_1 = arith.constant 0 : i32
    return %c0_i32, %arg0, %c0_i32_0 : i32, i32, i32
  }
  func.func @transform_2(%arg0: i32, %arg1: i32) -> (i32, i32, i32) {
    %c0_i32 = arith.constant 0 : i32
    %c0_i32_0 = arith.constant 0 : i32
    %c0_i32_1 = arith.constant 0 : i32
    return %c0_i32, %arg0, %c0_i32_0 : i32, i32, i32
  }
  func.func @transform_3(%arg0: i32, %arg1: i32) -> (i32, i32) {
    %c0_i32 = arith.constant 0 : i32
    %c0_i32_0 = arith.constant 0 : i32
    %c0_i32_1 = arith.constant 0 : i32
    return %c0_i32, %c0_i32_0 : i32, i32
  }
  func.func @transform_4(%arg0: i32, %arg1: i32) -> (i32, i32) {
    %c0_i32 = arith.constant 0 : i32
    %c0_i32_0 = arith.constant 0 : i32
    %c0_i32_1 = arith.constant 0 : i32
    return %c0_i32, %c0_i32_0 : i32, i32
  }
  func.func @transform_5(%arg0: i32, %arg1: i32) -> (i32, i32) {
    %c0_i32 = arith.constant 0 : i32
    %c0_i32_0 = arith.constant 0 : i32
    %c0_i32_1 = arith.constant 0 : i32
    return %c0_i32, %c0_i32_0 : i32, i32
  }
  func.func @transform_6(%arg0: i32, %arg1: i32) -> (i32, i32) {
    %c0_i32 = arith.constant 0 : i32
    %c0_i32_0 = arith.constant 0 : i32
    %c0_i32_1 = arith.constant 0 : i32
    return %c0_i32, %c0_i32_0 : i32, i32
  }
  func.func @transform_7(%arg0: i32, %arg1: i32) -> (i32, i32) {
    %c0_i32 = arith.constant 0 : i32
    %c0_i32_0 = arith.constant 0 : i32
    %c0_i32_1 = arith.constant 0 : i32
    return %c0_i32, %c0_i32_0 : i32, i32
  }
  func.func @transform_8(%arg0: i32, %arg1: i32) -> (i32, i32) {
    %c0_i32 = arith.constant 0 : i32
    %c0_i32_0 = arith.constant 0 : i32
    %c0_i32_1 = arith.constant 0 : i32
    return %c0_i32, %c0_i32_0 : i32, i32
  }
  func.func @transform_9(%arg0: i32, %arg1: i32) -> (i32, i32) {
    %c0_i32 = arith.constant 0 : i32
    %c0_i32_0 = arith.constant 0 : i32
    %c0_i32_1 = arith.constant 0 : i32
    return %c0_i32, %c0_i32_0 : i32, i32
  }
  func.func @transform_10(%arg0: i32, %arg1: i32) -> (i32, i32) {
    %c0_i32 = arith.constant 0 : i32
    %c0_i32_0 = arith.constant 0 : i32
    %c0_i32_1 = arith.constant 0 : i32
    return %c0_i32, %c0_i32_0 : i32, i32
  }
  func.func @transform_11(%arg0: i32, %arg1: i32) -> (i32, i32) {
    %c0_i32 = arith.constant 0 : i32
    %c0_i32_0 = arith.constant 0 : i32
    return %arg0, %c0_i32 : i32, i32
  }
  func.func @transform_12(%arg0: i32, %arg1: i32) -> (i32, i32, i32) {
    %c0_i32 = arith.constant 0 : i32
    %c0_i32_0 = arith.constant 0 : i32
    %c0_i32_1 = arith.constant 0 : i32
    return %c0_i32, %arg0, %c0_i32_0 : i32, i32, i32
  }
  func.func @transform_13(%arg0: i32, %arg1: i32) -> (i32, i32, i32) {
    %c0_i32 = arith.constant 0 : i32
    %c0_i32_0 = arith.constant 0 : i32
    %c0_i32_1 = arith.constant 0 : i32
    return %c0_i32, %arg0, %c0_i32_0 : i32, i32, i32
  }
}

module attributes {stable_mosaic.version = 11 : i64} {
  func.func @kernel(%arg0: i32, %arg1: i32, %arg2: memref<8x8x128xbf16, #tpu.memory_space<vmem>>, %arg3: memref<2x8x128xf32, #tpu.memory_space<vmem>>, %arg4: memref<2x8x128xf32, #tpu.memory_space<vmem>>, %arg5: memref<128x512xbf16, #tpu.memory_space<vmem>>, %arg6: memref<128x512xbf16, #tpu.memory_space<vmem>>, %arg7: memref<1x512xf32, #tpu.memory_space<vmem>>, %arg8: memref<128x512xbf16, #tpu.memory_space<vmem>>, %arg9: memref<128x512xbf16, #tpu.memory_space<vmem>>, %arg10: memref<1x512xf32, #tpu.memory_space<vmem>>, %arg11: memref<128x128xbf16, #tpu.memory_space<vmem>>, %arg12: memref<1x128xf32, #tpu.memory_space<vmem>>, %arg13: memref<8x128xf32, #tpu.memory_space<vmem>>, %arg14: memref<2x8x128xf32, #tpu.memory_space<vmem>>, %arg15: memref<2x8x128xf32, #tpu.memory_space<vmem>>, %arg16: memref<2x8x128xf32, #tpu.memory_space<vmem>>, %arg17: memref<2x8x128xf32, #tpu.memory_space<vmem>>, %arg18: memref<8x8x128xbf16, #tpu.memory_space<vmem>>, %arg19: memref<8x8x512xf32, #tpu.memory_space<vmem>>) attributes {dimension_semantics = [#tpu.dimension_semantics<parallel>, #tpu.dimension_semantics<arbitrary>], iteration_bounds = array<i64: 1, 1>, scalar_prefetch = 0 : i64, scratch_operands = 4 : i64, tpu.core_type = #tpu.core_type<tc>, window_params = [{transform_indices = @transform_0, window_bounds = array<i64: 8, 8, 128>}, {transform_indices = @transform_1, window_bounds = array<i64: 2, 8, 128>}, {transform_indices = @transform_2, window_bounds = array<i64: 2, 8, 128>}, {pipeline_mode = #tpu.pipeline_mode<synchronous>, transform_indices = @transform_3, window_bounds = array<i64: 128, 512>}, {pipeline_mode = #tpu.pipeline_mode<synchronous>, transform_indices = @transform_4, window_bounds = array<i64: 128, 512>}, {pipeline_mode = #tpu.pipeline_mode<synchronous>, transform_indices = @transform_5, window_bounds = array<i64: 1, 512>}, {pipeline_mode = #tpu.pipeline_mode<synchronous>, transform_indices = @transform_6, window_bounds = array<i64: 128, 512>}, {pipeline_mode = #tpu.pipeline_mode<synchronous>, transform_indices = @transform_7, window_bounds = array<i64: 128, 512>}, {pipeline_mode = #tpu.pipeline_mode<synchronous>, transform_indices = @transform_8, window_bounds = array<i64: 1, 512>}, {pipeline_mode = #tpu.pipeline_mode<synchronous>, transform_indices = @transform_9, window_bounds = array<i64: 128, 128>}, {pipeline_mode = #tpu.pipeline_mode<synchronous>, transform_indices = @transform_10, window_bounds = array<i64: 1, 128>}, {transform_indices = @transform_11, window_bounds = array<i64: 8, 128>}, {transform_indices = @transform_12, window_bounds = array<i64: 2, 8, 128>}, {transform_indices = @transform_13, window_bounds = array<i64: 2, 8, 128>}]} {
    %c0_i32 = arith.constant 0 : i32
    %0 = arith.cmpi eq, %arg1, %c0_i32 : i32
    %1 = arith.extui %0 : i1 to i32
    %c0_i32_0 = arith.constant 0 : i32
    %2 = arith.cmpi ne, %1, %c0_i32_0 : i32
    scf.if %2 {
      %c0_200 = arith.constant 0 : index
      %c0_201 = arith.constant 0 : index
      %c0_202 = arith.constant 0 : index
      %596 = vector.load %arg3[%c0_200, %c0_201, %c0_202] : memref<2x8x128xf32, #tpu.memory_space<vmem>>, vector<2x8x128xf32>
      %c0_203 = arith.constant 0 : index
      %c0_204 = arith.constant 0 : index
      %c0_205 = arith.constant 0 : index
      %597 = vector.load %arg16[%c0_203, %c0_204, %c0_205] : memref<2x8x128xf32, #tpu.memory_space<vmem>>, vector<2x8x128xf32>
      tpu.vector_store %arg16[%c0_203, %c0_204, %c0_205], %596 {strides = array<i32>} : memref<2x8x128xf32, #tpu.memory_space<vmem>>, vector<2x8x128xf32>,
      %c0_206 = arith.constant 0 : index
      %c0_207 = arith.constant 0 : index
      %c0_208 = arith.constant 0 : index
      %598 = vector.load %arg4[%c0_206, %c0_207, %c0_208] : memref<2x8x128xf32, #tpu.memory_space<vmem>>, vector<2x8x128xf32>
      %c0_209 = arith.constant 0 : index
      %c0_210 = arith.constant 0 : index
      %c0_211 = arith.constant 0 : index
      %599 = vector.load %arg17[%c0_209, %c0_210, %c0_211] : memref<2x8x128xf32, #tpu.memory_space<vmem>>, vector<2x8x128xf32>
      tpu.vector_store %arg17[%c0_209, %c0_210, %c0_211], %598 {strides = array<i32>} : memref<2x8x128xf32, #tpu.memory_space<vmem>>, vector<2x8x128xf32>,
    } else {
    }
    %c0 = arith.constant 0 : index
    %c0_1 = arith.constant 0 : index
    %c0_2 = arith.constant 0 : index
    %3 = vector.load %arg2[%c0, %c0_1, %c0_2] : memref<8x8x128xbf16, #tpu.memory_space<vmem>>, vector<8x8x128xbf16>
    %4 = vector.shape_cast %3 : vector<8x8x128xbf16> to vector<64x128xbf16>
    %c0_3 = arith.constant 0 : index
    %c0_4 = arith.constant 0 : index
    %5 = vector.load %arg5[%c0_3, %c0_4] : memref<128x512xbf16, #tpu.memory_space<vmem>>, vector<128x512xbf16>
    %cst = arith.constant dense<0.000000e+00> : vector<64x512xf32>
    %6 = tpu.matmul %4, %5, %cst {dimension_numbers = #tpu.dot_dimension_numbers<[1], [0], [0], [1], [0, 0, 1, 1], [], []>} : vector<64x128xbf16>, vector<128x512xbf16>, vector<64x512xf32> -> vector<64x512xf32>
    %c0_5 = arith.constant 0 : index
    %c0_6 = arith.constant 0 : index
    %7 = vector.load %arg7[%c0_5, %c0_6] : memref<1x512xf32, #tpu.memory_space<vmem>>, vector<1x512xf32>
    %8 = vector.broadcast %7 : vector<1x512xf32> to vector<64x512xf32>
    %9 = arith.addf %6, %8 : vector<64x512xf32>
    %10 = vector.shape_cast %9 : vector<64x512xf32> to vector<8x8x512xf32>
    %c0_7 = arith.constant 0 : index
    %c0_8 = arith.constant 0 : index
    %c0_9 = arith.constant 0 : index
    %11 = vector.load %arg19[%c0_7, %c0_8, %c0_9] : memref<8x8x512xf32, #tpu.memory_space<vmem>>, vector<8x8x512xf32>
    tpu.vector_store %arg19[%c0_7, %c0_8, %c0_9], %10 {strides = array<i32>} : memref<8x8x512xf32, #tpu.memory_space<vmem>>, vector<8x8x512xf32>,
    %c0_10 = arith.constant 0 : index
    %c0_11 = arith.constant 0 : index
    %c0_12 = arith.constant 0 : index
    %12 = vector.load %arg16[%c0_10, %c0_11, %c0_12] : memref<2x8x128xf32, #tpu.memory_space<vmem>>, vector<1x8x128xf32>
    %13 = vector.shape_cast %12 : vector<1x8x128xf32> to vector<8x128xf32>
    %c0_13 = arith.constant 0 : index
    %c0_14 = arith.constant 0 : index
    %c0_15 = arith.constant 0 : index
    %14 = vector.load %arg17[%c0_13, %c0_14, %c0_15] : memref<2x8x128xf32, #tpu.memory_space<vmem>>, vector<1x8x128xf32>
    %15 = vector.shape_cast %14 : vector<1x8x128xf32> to vector<8x128xf32>
    %c0_i32_16 = arith.constant 0 : i32
    %16 = arith.index_cast %c0_i32_16 : i32 to index
    %c0_17 = arith.constant 0 : index
    %c0_18 = arith.constant 0 : index
    %17 = vector.load %arg19[%16, %c0_17, %c0_18] : memref<8x8x512xf32, #tpu.memory_space<vmem>>, vector<1x8x512xf32>
    %18 = vector.shape_cast %17 : vector<1x8x512xf32> to vector<8x512xf32>
    %19 = arith.truncf %13 : vector<8x128xf32> to vector<8x128xbf16>
    %c0_19 = arith.constant 0 : index
    %c0_20 = arith.constant 0 : index
    %20 = vector.load %arg6[%c0_19, %c0_20] : memref<128x512xbf16, #tpu.memory_space<vmem>>, vector<128x512xbf16>
    %cst_21 = arith.constant dense<0.000000e+00> : vector<8x512xf32>
    %21 = tpu.matmul %19, %20, %cst_21 {dimension_numbers = #tpu.dot_dimension_numbers<[1], [0], [0], [1], [0, 0, 1, 1], [], []>} : vector<8x128xbf16>, vector<128x512xbf16>, vector<8x512xf32> -> vector<8x512xf32>
    %22 = arith.addf %18, %21 : vector<8x512xf32>
    %23 = vector.extract_strided_slice %22 {offsets = [0, 0], sizes = [8, 128], strides = [1, 1]} : vector<8x512xf32> to vector<8x128xf32>
    %24 = arith.negf %23 : vector<8x128xf32>
    %25 = math.exp %24 : vector<8x128xf32>
    %cst_22 = arith.constant 1.000000e+00 : f32
    %26 = vector.broadcast %cst_22 : f32 to vector<8x128xf32>
    %27 = arith.addf %26, %25 : vector<8x128xf32>
    %28 = arith.divf %26, %27 : vector<8x128xf32>
    %29 = vector.extract_strided_slice %22 {offsets = [0, 128], sizes = [8, 128], strides = [1, 1]} : vector<8x512xf32> to vector<8x128xf32>
    %30 = arith.negf %29 : vector<8x128xf32>
    %31 = math.exp %30 : vector<8x128xf32>
    %cst_23 = arith.constant 1.000000e+00 : f32
    %32 = vector.broadcast %cst_23 : f32 to vector<8x128xf32>
    %33 = arith.addf %32, %31 : vector<8x128xf32>
    %34 = arith.divf %32, %33 : vector<8x128xf32>
    %35 = vector.extract_strided_slice %22 {offsets = [0, 256], sizes = [8, 128], strides = [1, 1]} : vector<8x512xf32> to vector<8x128xf32>
    %36 = math.tanh %35 : vector<8x128xf32>
    %37 = vector.extract_strided_slice %22 {offsets = [0, 384], sizes = [8, 128], strides = [1, 1]} : vector<8x512xf32> to vector<8x128xf32>
    %38 = arith.negf %37 : vector<8x128xf32>
    %39 = math.exp %38 : vector<8x128xf32>
    %cst_24 = arith.constant 1.000000e+00 : f32
    %40 = vector.broadcast %cst_24 : f32 to vector<8x128xf32>
    %41 = arith.addf %40, %39 : vector<8x128xf32>
    %42 = arith.divf %40, %41 : vector<8x128xf32>
    %43 = arith.mulf %34, %15 : vector<8x128xf32>
    %44 = arith.mulf %28, %36 : vector<8x128xf32>
    %45 = arith.addf %43, %44 : vector<8x128xf32>
    %46 = math.tanh %45 : vector<8x128xf32>
    %47 = arith.mulf %42, %46 : vector<8x128xf32>
    %48 = arith.truncf %47 : vector<8x128xf32> to vector<8x128xbf16>
    %49 = arith.index_cast %c0_i32_16 : i32 to index
    %c0_25 = arith.constant 0 : index
    %c0_26 = arith.constant 0 : index
    %50 = vector.load %arg18[%49, %c0_25, %c0_26] : memref<8x8x128xbf16, #tpu.memory_space<vmem>>, vector<1x8x128xbf16>
    %51 = vector.shape_cast %50 : vector<1x8x128xbf16> to vector<8x128xbf16>
    %52 = vector.shape_cast %48 : vector<8x128xbf16> to vector<1x8x128xbf16>
    tpu.vector_store %arg18[%49, %c0_25, %c0_26], %52 {strides = array<i32>} : memref<8x8x128xbf16, #tpu.memory_space<vmem>>, vector<1x8x128xbf16>,
    %c1_i32 = arith.constant 1 : i32
    %53 = arith.index_cast %c1_i32 : i32 to index
    %c0_27 = arith.constant 0 : index
    %c0_28 = arith.constant 0 : index
    %54 = vector.load %arg19[%53, %c0_27, %c0_28] : memref<8x8x512xf32, #tpu.memory_space<vmem>>, vector<1x8x512xf32>
    %55 = vector.shape_cast %54 : vector<1x8x512xf32> to vector<8x512xf32>
    %56 = arith.truncf %47 : vector<8x128xf32> to vector<8x128xbf16>
    %c0_29 = arith.constant 0 : index
    %c0_30 = arith.constant 0 : index
    %57 = vector.load %arg6[%c0_29, %c0_30] : memref<128x512xbf16, #tpu.memory_space<vmem>>, vector<128x512xbf16>
    %cst_31 = arith.constant dense<0.000000e+00> : vector<8x512xf32>
    %58 = tpu.matmul %56, %57, %cst_31 {dimension_numbers = #tpu.dot_dimension_numbers<[1], [0], [0], [1], [0, 0, 1, 1], [], []>} : vector<8x128xbf16>, vector<128x512xbf16>, vector<8x512xf32> -> vector<8x512xf32>
    %59 = arith.addf %55, %58 : vector<8x512xf32>
    %60 = vector.extract_strided_slice %59 {offsets = [0, 0], sizes = [8, 128], strides = [1, 1]} : vector<8x512xf32> to vector<8x128xf32>
    %61 = arith.negf %60 : vector<8x128xf32>
    %62 = math.exp %61 : vector<8x128xf32>
    %cst_32 = arith.constant 1.000000e+00 : f32
    %63 = vector.broadcast %cst_32 : f32 to vector<8x128xf32>
    %64 = arith.addf %63, %62 : vector<8x128xf32>
    %65 = arith.divf %63, %64 : vector<8x128xf32>
    %66 = vector.extract_strided_slice %59 {offsets = [0, 128], sizes = [8, 128], strides = [1, 1]} : vector<8x512xf32> to vector<8x128xf32>
    %67 = arith.negf %66 : vector<8x128xf32>
    %68 = math.exp %67 : vector<8x128xf32>
    %cst_33 = arith.constant 1.000000e+00 : f32
    %69 = vector.broadcast %cst_33 : f32 to vector<8x128xf32>
    %70 = arith.addf %69, %68 : vector<8x128xf32>
    %71 = arith.divf %69, %70 : vector<8x128xf32>
    %72 = vector.extract_strided_slice %59 {offsets = [0, 256], sizes = [8, 128], strides = [1, 1]} : vector<8x512xf32> to vector<8x128xf32>
    %73 = math.tanh %72 : vector<8x128xf32>
    %74 = vector.extract_strided_slice %59 {offsets = [0, 384], sizes = [8, 128], strides = [1, 1]} : vector<8x512xf32> to vector<8x128xf32>
    %75 = arith.negf %74 : vector<8x128xf32>
    %76 = math.exp %75 : vector<8x128xf32>
    %cst_34 = arith.constant 1.000000e+00 : f32
    %77 = vector.broadcast %cst_34 : f32 to vector<8x128xf32>
    %78 = arith.addf %77, %76 : vector<8x128xf32>
    %79 = arith.divf %77, %78 : vector<8x128xf32>
    %80 = arith.mulf %71, %45 : vector<8x128xf32>
    %81 = arith.mulf %65, %73 : vector<8x128xf32>
    %82 = arith.addf %80, %81 : vector<8x128xf32>
    %83 = math.tanh %82 : vector<8x128xf32>
    %84 = arith.mulf %79, %83 : vector<8x128xf32>
    %85 = arith.truncf %84 : vector<8x128xf32> to vector<8x128xbf16>
    %86 = arith.index_cast %c1_i32 : i32 to index
    %c0_35 = arith.constant 0 : index
    %c0_36 = arith.constant 0 : index
    %87 = vector.load %arg18[%86, %c0_35, %c0_36] : memref<8x8x128xbf16, #tpu.memory_space<vmem>>, vector<1x8x128xbf16>
    %88 = vector.shape_cast %87 : vector<1x8x128xbf16> to vector<8x128xbf16>
    %89 = vector.shape_cast %85 : vector<8x128xbf16> to vector<1x8x128xbf16>
    tpu.vector_store %arg18[%86, %c0_35, %c0_36], %89 {strides = array<i32>} : memref<8x8x128xbf16, #tpu.memory_space<vmem>>, vector<1x8x128xbf16>,
    %c2_i32 = arith.constant 2 : i32
    %90 = arith.index_cast %c2_i32 : i32 to index
    %c0_37 = arith.constant 0 : index
    %c0_38 = arith.constant 0 : index
    %91 = vector.load %arg19[%90, %c0_37, %c0_38] : memref<8x8x512xf32, #tpu.memory_space<vmem>>, vector<1x8x512xf32>
    %92 = vector.shape_cast %91 : vector<1x8x512xf32> to vector<8x512xf32>
    %93 = arith.truncf %84 : vector<8x128xf32> to vector<8x128xbf16>
    %c0_39 = arith.constant 0 : index
    %c0_40 = arith.constant 0 : index
    %94 = vector.load %arg6[%c0_39, %c0_40] : memref<128x512xbf16, #tpu.memory_space<vmem>>, vector<128x512xbf16>
    %cst_41 = arith.constant dense<0.000000e+00> : vector<8x512xf32>
    %95 = tpu.matmul %93, %94, %cst_41 {dimension_numbers = #tpu.dot_dimension_numbers<[1], [0], [0], [1], [0, 0, 1, 1], [], []>} : vector<8x128xbf16>, vector<128x512xbf16>, vector<8x512xf32> -> vector<8x512xf32>
    %96 = arith.addf %92, %95 : vector<8x512xf32>
    %97 = vector.extract_strided_slice %96 {offsets = [0, 0], sizes = [8, 128], strides = [1, 1]} : vector<8x512xf32> to vector<8x128xf32>
    %98 = arith.negf %97 : vector<8x128xf32>
    %99 = math.exp %98 : vector<8x128xf32>
    %cst_42 = arith.constant 1.000000e+00 : f32
    %100 = vector.broadcast %cst_42 : f32 to vector<8x128xf32>
    %101 = arith.addf %100, %99 : vector<8x128xf32>
    %102 = arith.divf %100, %101 : vector<8x128xf32>
    %103 = vector.extract_strided_slice %96 {offsets = [0, 128], sizes = [8, 128], strides = [1, 1]} : vector<8x512xf32> to vector<8x128xf32>
    %104 = arith.negf %103 : vector<8x128xf32>
    %105 = math.exp %104 : vector<8x128xf32>
    %cst_43 = arith.constant 1.000000e+00 : f32
    %106 = vector.broadcast %cst_43 : f32 to vector<8x128xf32>
    %107 = arith.addf %106, %105 : vector<8x128xf32>
    %108 = arith.divf %106, %107 : vector<8x128xf32>
    %109 = vector.extract_strided_slice %96 {offsets = [0, 256], sizes = [8, 128], strides = [1, 1]} : vector<8x512xf32> to vector<8x128xf32>
    %110 = math.tanh %109 : vector<8x128xf32>
    %111 = vector.extract_strided_slice %96 {offsets = [0, 384], sizes = [8, 128], strides = [1, 1]} : vector<8x512xf32> to vector<8x128xf32>
    %112 = arith.negf %111 : vector<8x128xf32>
    %113 = math.exp %112 : vector<8x128xf32>
    %cst_44 = arith.constant 1.000000e+00 : f32
    %114 = vector.broadcast %cst_44 : f32 to vector<8x128xf32>
    %115 = arith.addf %114, %113 : vector<8x128xf32>
    %116 = arith.divf %114, %115 : vector<8x128xf32>
    %117 = arith.mulf %108, %82 : vector<8x128xf32>
    %118 = arith.mulf %102, %110 : vector<8x128xf32>
    %119 = arith.addf %117, %118 : vector<8x128xf32>
    %120 = math.tanh %119 : vector<8x128xf32>
    %121 = arith.mulf %116, %120 : vector<8x128xf32>
    %122 = arith.truncf %121 : vector<8x128xf32> to vector<8x128xbf16>
    %123 = arith.index_cast %c2_i32 : i32 to index
    %c0_45 = arith.constant 0 : index
    %c0_46 = arith.constant 0 : index
    %124 = vector.load %arg18[%123, %c0_45, %c0_46] : memref<8x8x128xbf16, #tpu.memory_space<vmem>>, vector<1x8x128xbf16>
    %125 = vector.shape_cast %124 : vector<1x8x128xbf16> to vector<8x128xbf16>
    %126 = vector.shape_cast %122 : vector<8x128xbf16> to vector<1x8x128xbf16>
    tpu.vector_store %arg18[%123, %c0_45, %c0_46], %126 {strides = array<i32>} : memref<8x8x128xbf16, #tpu.memory_space<vmem>>, vector<1x8x128xbf16>,
    %c3_i32 = arith.constant 3 : i32
    %127 = arith.index_cast %c3_i32 : i32 to index
    %c0_47 = arith.constant 0 : index
    %c0_48 = arith.constant 0 : index
    %128 = vector.load %arg19[%127, %c0_47, %c0_48] : memref<8x8x512xf32, #tpu.memory_space<vmem>>, vector<1x8x512xf32>
    %129 = vector.shape_cast %128 : vector<1x8x512xf32> to vector<8x512xf32>
    %130 = arith.truncf %121 : vector<8x128xf32> to vector<8x128xbf16>
    %c0_49 = arith.constant 0 : index
    %c0_50 = arith.constant 0 : index
    %131 = vector.load %arg6[%c0_49, %c0_50] : memref<128x512xbf16, #tpu.memory_space<vmem>>, vector<128x512xbf16>
    %cst_51 = arith.constant dense<0.000000e+00> : vector<8x512xf32>
    %132 = tpu.matmul %130, %131, %cst_51 {dimension_numbers = #tpu.dot_dimension_numbers<[1], [0], [0], [1], [0, 0, 1, 1], [], []>} : vector<8x128xbf16>, vector<128x512xbf16>, vector<8x512xf32> -> vector<8x512xf32>
    %133 = arith.addf %129, %132 : vector<8x512xf32>
    %134 = vector.extract_strided_slice %133 {offsets = [0, 0], sizes = [8, 128], strides = [1, 1]} : vector<8x512xf32> to vector<8x128xf32>
    %135 = arith.negf %134 : vector<8x128xf32>
    %136 = math.exp %135 : vector<8x128xf32>
    %cst_52 = arith.constant 1.000000e+00 : f32
    %137 = vector.broadcast %cst_52 : f32 to vector<8x128xf32>
    %138 = arith.addf %137, %136 : vector<8x128xf32>
    %139 = arith.divf %137, %138 : vector<8x128xf32>
    %140 = vector.extract_strided_slice %133 {offsets = [0, 128], sizes = [8, 128], strides = [1, 1]} : vector<8x512xf32> to vector<8x128xf32>
    %141 = arith.negf %140 : vector<8x128xf32>
    %142 = math.exp %141 : vector<8x128xf32>
    %cst_53 = arith.constant 1.000000e+00 : f32
    %143 = vector.broadcast %cst_53 : f32 to vector<8x128xf32>
    %144 = arith.addf %143, %142 : vector<8x128xf32>
    %145 = arith.divf %143, %144 : vector<8x128xf32>
    %146 = vector.extract_strided_slice %133 {offsets = [0, 256], sizes = [8, 128], strides = [1, 1]} : vector<8x512xf32> to vector<8x128xf32>
    %147 = math.tanh %146 : vector<8x128xf32>
    %148 = vector.extract_strided_slice %133 {offsets = [0, 384], sizes = [8, 128], strides = [1, 1]} : vector<8x512xf32> to vector<8x128xf32>
    %149 = arith.negf %148 : vector<8x128xf32>
    %150 = math.exp %149 : vector<8x128xf32>
    %cst_54 = arith.constant 1.000000e+00 : f32
    %151 = vector.broadcast %cst_54 : f32 to vector<8x128xf32>
    %152 = arith.addf %151, %150 : vector<8x128xf32>
    %153 = arith.divf %151, %152 : vector<8x128xf32>
    %154 = arith.mulf %145, %119 : vector<8x128xf32>
    %155 = arith.mulf %139, %147 : vector<8x128xf32>
    %156 = arith.addf %154, %155 : vector<8x128xf32>
    %157 = math.tanh %156 : vector<8x128xf32>
    %158 = arith.mulf %153, %157 : vector<8x128xf32>
    %159 = arith.truncf %158 : vector<8x128xf32> to vector<8x128xbf16>
    %160 = arith.index_cast %c3_i32 : i32 to index
    %c0_55 = arith.constant 0 : index
    %c0_56 = arith.constant 0 : index
    %161 = vector.load %arg18[%160, %c0_55, %c0_56] : memref<8x8x128xbf16, #tpu.memory_space<vmem>>, vector<1x8x128xbf16>
    %162 = vector.shape_cast %161 : vector<1x8x128xbf16> to vector<8x128xbf16>
    %163 = vector.shape_cast %159 : vector<8x128xbf16> to vector<1x8x128xbf16>
    tpu.vector_store %arg18[%160, %c0_55, %c0_56], %163 {strides = array<i32>} : memref<8x8x128xbf16, #tpu.memory_space<vmem>>, vector<1x8x128xbf16>,
    %c4_i32 = arith.constant 4 : i32
    %164 = arith.index_cast %c4_i32 : i32 to index
    %c0_57 = arith.constant 0 : index
    %c0_58 = arith.constant 0 : index
    %165 = vector.load %arg19[%164, %c0_57, %c0_58] : memref<8x8x512xf32, #tpu.memory_space<vmem>>, vector<1x8x512xf32>
    %166 = vector.shape_cast %165 : vector<1x8x512xf32> to vector<8x512xf32>
    %167 = arith.truncf %158 : vector<8x128xf32> to vector<8x128xbf16>
    %c0_59 = arith.constant 0 : index
    %c0_60 = arith.constant 0 : index
    %168 = vector.load %arg6[%c0_59, %c0_60] : memref<128x512xbf16, #tpu.memory_space<vmem>>, vector<128x512xbf16>
    %cst_61 = arith.constant dense<0.000000e+00> : vector<8x512xf32>
    %169 = tpu.matmul %167, %168, %cst_61 {dimension_numbers = #tpu.dot_dimension_numbers<[1], [0], [0], [1], [0, 0, 1, 1], [], []>} : vector<8x128xbf16>, vector<128x512xbf16>, vector<8x512xf32> -> vector<8x512xf32>
    %170 = arith.addf %166, %169 : vector<8x512xf32>
    %171 = vector.extract_strided_slice %170 {offsets = [0, 0], sizes = [8, 128], strides = [1, 1]} : vector<8x512xf32> to vector<8x128xf32>
    %172 = arith.negf %171 : vector<8x128xf32>
    %173 = math.exp %172 : vector<8x128xf32>
    %cst_62 = arith.constant 1.000000e+00 : f32
    %174 = vector.broadcast %cst_62 : f32 to vector<8x128xf32>
    %175 = arith.addf %174, %173 : vector<8x128xf32>
    %176 = arith.divf %174, %175 : vector<8x128xf32>
    %177 = vector.extract_strided_slice %170 {offsets = [0, 128], sizes = [8, 128], strides = [1, 1]} : vector<8x512xf32> to vector<8x128xf32>
    %178 = arith.negf %177 : vector<8x128xf32>
    %179 = math.exp %178 : vector<8x128xf32>
    %cst_63 = arith.constant 1.000000e+00 : f32
    %180 = vector.broadcast %cst_63 : f32 to vector<8x128xf32>
    %181 = arith.addf %180, %179 : vector<8x128xf32>
    %182 = arith.divf %180, %181 : vector<8x128xf32>
    %183 = vector.extract_strided_slice %170 {offsets = [0, 256], sizes = [8, 128], strides = [1, 1]} : vector<8x512xf32> to vector<8x128xf32>
    %184 = math.tanh %183 : vector<8x128xf32>
    %185 = vector.extract_strided_slice %170 {offsets = [0, 384], sizes = [8, 128], strides = [1, 1]} : vector<8x512xf32> to vector<8x128xf32>
    %186 = arith.negf %185 : vector<8x128xf32>
    %187 = math.exp %186 : vector<8x128xf32>
    %cst_64 = arith.constant 1.000000e+00 : f32
    %188 = vector.broadcast %cst_64 : f32 to vector<8x128xf32>
    %189 = arith.addf %188, %187 : vector<8x128xf32>
    %190 = arith.divf %188, %189 : vector<8x128xf32>
    %191 = arith.mulf %182, %156 : vector<8x128xf32>
    %192 = arith.mulf %176, %184 : vector<8x128xf32>
    %193 = arith.addf %191, %192 : vector<8x128xf32>
    %194 = math.tanh %193 : vector<8x128xf32>
    %195 = arith.mulf %190, %194 : vector<8x128xf32>
    %196 = arith.truncf %195 : vector<8x128xf32> to vector<8x128xbf16>
    %197 = arith.index_cast %c4_i32 : i32 to index
    %c0_65 = arith.constant 0 : index
    %c0_66 = arith.constant 0 : index
    %198 = vector.load %arg18[%197, %c0_65, %c0_66] : memref<8x8x128xbf16, #tpu.memory_space<vmem>>, vector<1x8x128xbf16>
    %199 = vector.shape_cast %198 : vector<1x8x128xbf16> to vector<8x128xbf16>
    %200 = vector.shape_cast %196 : vector<8x128xbf16> to vector<1x8x128xbf16>
    tpu.vector_store %arg18[%197, %c0_65, %c0_66], %200 {strides = array<i32>} : memref<8x8x128xbf16, #tpu.memory_space<vmem>>, vector<1x8x128xbf16>,
    %c5_i32 = arith.constant 5 : i32
    %201 = arith.index_cast %c5_i32 : i32 to index
    %c0_67 = arith.constant 0 : index
    %c0_68 = arith.constant 0 : index
    %202 = vector.load %arg19[%201, %c0_67, %c0_68] : memref<8x8x512xf32, #tpu.memory_space<vmem>>, vector<1x8x512xf32>
    %203 = vector.shape_cast %202 : vector<1x8x512xf32> to vector<8x512xf32>
    %204 = arith.truncf %195 : vector<8x128xf32> to vector<8x128xbf16>
    %c0_69 = arith.constant 0 : index
    %c0_70 = arith.constant 0 : index
    %205 = vector.load %arg6[%c0_69, %c0_70] : memref<128x512xbf16, #tpu.memory_space<vmem>>, vector<128x512xbf16>
    %cst_71 = arith.constant dense<0.000000e+00> : vector<8x512xf32>
    %206 = tpu.matmul %204, %205, %cst_71 {dimension_numbers = #tpu.dot_dimension_numbers<[1], [0], [0], [1], [0, 0, 1, 1], [], []>} : vector<8x128xbf16>, vector<128x512xbf16>, vector<8x512xf32> -> vector<8x512xf32>
    %207 = arith.addf %203, %206 : vector<8x512xf32>
    %208 = vector.extract_strided_slice %207 {offsets = [0, 0], sizes = [8, 128], strides = [1, 1]} : vector<8x512xf32> to vector<8x128xf32>
    %209 = arith.negf %208 : vector<8x128xf32>
    %210 = math.exp %209 : vector<8x128xf32>
    %cst_72 = arith.constant 1.000000e+00 : f32
    %211 = vector.broadcast %cst_72 : f32 to vector<8x128xf32>
    %212 = arith.addf %211, %210 : vector<8x128xf32>
    %213 = arith.divf %211, %212 : vector<8x128xf32>
    %214 = vector.extract_strided_slice %207 {offsets = [0, 128], sizes = [8, 128], strides = [1, 1]} : vector<8x512xf32> to vector<8x128xf32>
    %215 = arith.negf %214 : vector<8x128xf32>
    %216 = math.exp %215 : vector<8x128xf32>
    %cst_73 = arith.constant 1.000000e+00 : f32
    %217 = vector.broadcast %cst_73 : f32 to vector<8x128xf32>
    %218 = arith.addf %217, %216 : vector<8x128xf32>
    %219 = arith.divf %217, %218 : vector<8x128xf32>
    %220 = vector.extract_strided_slice %207 {offsets = [0, 256], sizes = [8, 128], strides = [1, 1]} : vector<8x512xf32> to vector<8x128xf32>
    %221 = math.tanh %220 : vector<8x128xf32>
    %222 = vector.extract_strided_slice %207 {offsets = [0, 384], sizes = [8, 128], strides = [1, 1]} : vector<8x512xf32> to vector<8x128xf32>
    %223 = arith.negf %222 : vector<8x128xf32>
    %224 = math.exp %223 : vector<8x128xf32>
    %cst_74 = arith.constant 1.000000e+00 : f32
    %225 = vector.broadcast %cst_74 : f32 to vector<8x128xf32>
    %226 = arith.addf %225, %224 : vector<8x128xf32>
    %227 = arith.divf %225, %226 : vector<8x128xf32>
    %228 = arith.mulf %219, %193 : vector<8x128xf32>
    %229 = arith.mulf %213, %221 : vector<8x128xf32>
    %230 = arith.addf %228, %229 : vector<8x128xf32>
    %231 = math.tanh %230 : vector<8x128xf32>
    %232 = arith.mulf %227, %231 : vector<8x128xf32>
    %233 = arith.truncf %232 : vector<8x128xf32> to vector<8x128xbf16>
    %234 = arith.index_cast %c5_i32 : i32 to index
    %c0_75 = arith.constant 0 : index
    %c0_76 = arith.constant 0 : index
    %235 = vector.load %arg18[%234, %c0_75, %c0_76] : memref<8x8x128xbf16, #tpu.memory_space<vmem>>, vector<1x8x128xbf16>
    %236 = vector.shape_cast %235 : vector<1x8x128xbf16> to vector<8x128xbf16>
    %237 = vector.shape_cast %233 : vector<8x128xbf16> to vector<1x8x128xbf16>
    tpu.vector_store %arg18[%234, %c0_75, %c0_76], %237 {strides = array<i32>} : memref<8x8x128xbf16, #tpu.memory_space<vmem>>, vector<1x8x128xbf16>,
    %c6_i32 = arith.constant 6 : i32
    %238 = arith.index_cast %c6_i32 : i32 to index
    %c0_77 = arith.constant 0 : index
    %c0_78 = arith.constant 0 : index
    %239 = vector.load %arg19[%238, %c0_77, %c0_78] : memref<8x8x512xf32, #tpu.memory_space<vmem>>, vector<1x8x512xf32>
    %240 = vector.shape_cast %239 : vector<1x8x512xf32> to vector<8x512xf32>
    %241 = arith.truncf %232 : vector<8x128xf32> to vector<8x128xbf16>
    %c0_79 = arith.constant 0 : index
    %c0_80 = arith.constant 0 : index
    %242 = vector.load %arg6[%c0_79, %c0_80] : memref<128x512xbf16, #tpu.memory_space<vmem>>, vector<128x512xbf16>
    %cst_81 = arith.constant dense<0.000000e+00> : vector<8x512xf32>
    %243 = tpu.matmul %241, %242, %cst_81 {dimension_numbers = #tpu.dot_dimension_numbers<[1], [0], [0], [1], [0, 0, 1, 1], [], []>} : vector<8x128xbf16>, vector<128x512xbf16>, vector<8x512xf32> -> vector<8x512xf32>
    %244 = arith.addf %240, %243 : vector<8x512xf32>
    %245 = vector.extract_strided_slice %244 {offsets = [0, 0], sizes = [8, 128], strides = [1, 1]} : vector<8x512xf32> to vector<8x128xf32>
    %246 = arith.negf %245 : vector<8x128xf32>
    %247 = math.exp %246 : vector<8x128xf32>
    %cst_82 = arith.constant 1.000000e+00 : f32
    %248 = vector.broadcast %cst_82 : f32 to vector<8x128xf32>
    %249 = arith.addf %248, %247 : vector<8x128xf32>
    %250 = arith.divf %248, %249 : vector<8x128xf32>
    %251 = vector.extract_strided_slice %244 {offsets = [0, 128], sizes = [8, 128], strides = [1, 1]} : vector<8x512xf32> to vector<8x128xf32>
    %252 = arith.negf %251 : vector<8x128xf32>
    %253 = math.exp %252 : vector<8x128xf32>
    %cst_83 = arith.constant 1.000000e+00 : f32
    %254 = vector.broadcast %cst_83 : f32 to vector<8x128xf32>
    %255 = arith.addf %254, %253 : vector<8x128xf32>
    %256 = arith.divf %254, %255 : vector<8x128xf32>
    %257 = vector.extract_strided_slice %244 {offsets = [0, 256], sizes = [8, 128], strides = [1, 1]} : vector<8x512xf32> to vector<8x128xf32>
    %258 = math.tanh %257 : vector<8x128xf32>
    %259 = vector.extract_strided_slice %244 {offsets = [0, 384], sizes = [8, 128], strides = [1, 1]} : vector<8x512xf32> to vector<8x128xf32>
    %260 = arith.negf %259 : vector<8x128xf32>
    %261 = math.exp %260 : vector<8x128xf32>
    %cst_84 = arith.constant 1.000000e+00 : f32
    %262 = vector.broadcast %cst_84 : f32 to vector<8x128xf32>
    %263 = arith.addf %262, %261 : vector<8x128xf32>
    %264 = arith.divf %262, %263 : vector<8x128xf32>
    %265 = arith.mulf %256, %230 : vector<8x128xf32>
    %266 = arith.mulf %250, %258 : vector<8x128xf32>
    %267 = arith.addf %265, %266 : vector<8x128xf32>
    %268 = math.tanh %267 : vector<8x128xf32>
    %269 = arith.mulf %264, %268 : vector<8x128xf32>
    %270 = arith.truncf %269 : vector<8x128xf32> to vector<8x128xbf16>
    %271 = arith.index_cast %c6_i32 : i32 to index
    %c0_85 = arith.constant 0 : index
    %c0_86 = arith.constant 0 : index
    %272 = vector.load %arg18[%271, %c0_85, %c0_86] : memref<8x8x128xbf16, #tpu.memory_space<vmem>>, vector<1x8x128xbf16>
    %273 = vector.shape_cast %272 : vector<1x8x128xbf16> to vector<8x128xbf16>
    %274 = vector.shape_cast %270 : vector<8x128xbf16> to vector<1x8x128xbf16>
    tpu.vector_store %arg18[%271, %c0_85, %c0_86], %274 {strides = array<i32>} : memref<8x8x128xbf16, #tpu.memory_space<vmem>>, vector<1x8x128xbf16>,
    %c7_i32 = arith.constant 7 : i32
    %275 = arith.index_cast %c7_i32 : i32 to index
    %c0_87 = arith.constant 0 : index
    %c0_88 = arith.constant 0 : index
    %276 = vector.load %arg19[%275, %c0_87, %c0_88] : memref<8x8x512xf32, #tpu.memory_space<vmem>>, vector<1x8x512xf32>
    %277 = vector.shape_cast %276 : vector<1x8x512xf32> to vector<8x512xf32>
    %278 = arith.truncf %269 : vector<8x128xf32> to vector<8x128xbf16>
    %c0_89 = arith.constant 0 : index
    %c0_90 = arith.constant 0 : index
    %279 = vector.load %arg6[%c0_89, %c0_90] : memref<128x512xbf16, #tpu.memory_space<vmem>>, vector<128x512xbf16>
    %cst_91 = arith.constant dense<0.000000e+00> : vector<8x512xf32>
    %280 = tpu.matmul %278, %279, %cst_91 {dimension_numbers = #tpu.dot_dimension_numbers<[1], [0], [0], [1], [0, 0, 1, 1], [], []>} : vector<8x128xbf16>, vector<128x512xbf16>, vector<8x512xf32> -> vector<8x512xf32>
    %281 = arith.addf %277, %280 : vector<8x512xf32>
    %282 = vector.extract_strided_slice %281 {offsets = [0, 0], sizes = [8, 128], strides = [1, 1]} : vector<8x512xf32> to vector<8x128xf32>
    %283 = arith.negf %282 : vector<8x128xf32>
    %284 = math.exp %283 : vector<8x128xf32>
    %cst_92 = arith.constant 1.000000e+00 : f32
    %285 = vector.broadcast %cst_92 : f32 to vector<8x128xf32>
    %286 = arith.addf %285, %284 : vector<8x128xf32>
    %287 = arith.divf %285, %286 : vector<8x128xf32>
    %288 = vector.extract_strided_slice %281 {offsets = [0, 128], sizes = [8, 128], strides = [1, 1]} : vector<8x512xf32> to vector<8x128xf32>
    %289 = arith.negf %288 : vector<8x128xf32>
    %290 = math.exp %289 : vector<8x128xf32>
    %cst_93 = arith.constant 1.000000e+00 : f32
    %291 = vector.broadcast %cst_93 : f32 to vector<8x128xf32>
    %292 = arith.addf %291, %290 : vector<8x128xf32>
    %293 = arith.divf %291, %292 : vector<8x128xf32>
    %294 = vector.extract_strided_slice %281 {offsets = [0, 256], sizes = [8, 128], strides = [1, 1]} : vector<8x512xf32> to vector<8x128xf32>
    %295 = math.tanh %294 : vector<8x128xf32>
    %296 = vector.extract_strided_slice %281 {offsets = [0, 384], sizes = [8, 128], strides = [1, 1]} : vector<8x512xf32> to vector<8x128xf32>
    %297 = arith.negf %296 : vector<8x128xf32>
    %298 = math.exp %297 : vector<8x128xf32>
    %cst_94 = arith.constant 1.000000e+00 : f32
    %299 = vector.broadcast %cst_94 : f32 to vector<8x128xf32>
    %300 = arith.addf %299, %298 : vector<8x128xf32>
    %301 = arith.divf %299, %300 : vector<8x128xf32>
    %302 = arith.mulf %293, %267 : vector<8x128xf32>
    %303 = arith.mulf %287, %295 : vector<8x128xf32>
    %304 = arith.addf %302, %303 : vector<8x128xf32>
    %305 = math.tanh %304 : vector<8x128xf32>
    %306 = arith.mulf %301, %305 : vector<8x128xf32>
    %307 = arith.truncf %306 : vector<8x128xf32> to vector<8x128xbf16>
    %308 = arith.index_cast %c7_i32 : i32 to index
    %c0_95 = arith.constant 0 : index
    %c0_96 = arith.constant 0 : index
    %309 = vector.load %arg18[%308, %c0_95, %c0_96] : memref<8x8x128xbf16, #tpu.memory_space<vmem>>, vector<1x8x128xbf16>
    %310 = vector.shape_cast %309 : vector<1x8x128xbf16> to vector<8x128xbf16>
    %311 = vector.shape_cast %307 : vector<8x128xbf16> to vector<1x8x128xbf16>
    tpu.vector_store %arg18[%308, %c0_95, %c0_96], %311 {strides = array<i32>} : memref<8x8x128xbf16, #tpu.memory_space<vmem>>, vector<1x8x128xbf16>,
    %c8_i32 = arith.constant 8 : i32
    %c0_97 = arith.constant 0 : index
    %c0_98 = arith.constant 0 : index
    %c0_99 = arith.constant 0 : index
    %312 = vector.load %arg16[%c0_97, %c0_98, %c0_99] : memref<2x8x128xf32, #tpu.memory_space<vmem>>, vector<1x8x128xf32>
    %313 = vector.shape_cast %312 : vector<1x8x128xf32> to vector<8x128xf32>
    %314 = vector.shape_cast %306 : vector<8x128xf32> to vector<1x8x128xf32>
    tpu.vector_store %arg16[%c0_97, %c0_98, %c0_99], %314 {strides = array<i32>} : memref<2x8x128xf32, #tpu.memory_space<vmem>>, vector<1x8x128xf32>,
    %c0_100 = arith.constant 0 : index
    %c0_101 = arith.constant 0 : index
    %c0_102 = arith.constant 0 : index
    %315 = vector.load %arg17[%c0_100, %c0_101, %c0_102] : memref<2x8x128xf32, #tpu.memory_space<vmem>>, vector<1x8x128xf32>
    %316 = vector.shape_cast %315 : vector<1x8x128xf32> to vector<8x128xf32>
    %317 = vector.shape_cast %304 : vector<8x128xf32> to vector<1x8x128xf32>
    tpu.vector_store %arg17[%c0_100, %c0_101, %c0_102], %317 {strides = array<i32>} : memref<2x8x128xf32, #tpu.memory_space<vmem>>, vector<1x8x128xf32>,
    %c0_103 = arith.constant 0 : index
    %c0_104 = arith.constant 0 : index
    %c0_105 = arith.constant 0 : index
    %318 = vector.load %arg18[%c0_103, %c0_104, %c0_105] : memref<8x8x128xbf16, #tpu.memory_space<vmem>>, vector<8x8x128xbf16>
    %319 = vector.shape_cast %318 : vector<8x8x128xbf16> to vector<64x128xbf16>
    %c0_106 = arith.constant 0 : index
    %c0_107 = arith.constant 0 : index
    %320 = vector.load %arg8[%c0_106, %c0_107] : memref<128x512xbf16, #tpu.memory_space<vmem>>, vector<128x512xbf16>
    %cst_108 = arith.constant dense<0.000000e+00> : vector<64x512xf32>
    %321 = tpu.matmul %319, %320, %cst_108 {dimension_numbers = #tpu.dot_dimension_numbers<[1], [0], [0], [1], [0, 0, 1, 1], [], []>} : vector<64x128xbf16>, vector<128x512xbf16>, vector<64x512xf32> -> vector<64x512xf32>
    %c0_109 = arith.constant 0 : index
    %c0_110 = arith.constant 0 : index
    %322 = vector.load %arg10[%c0_109, %c0_110] : memref<1x512xf32, #tpu.memory_space<vmem>>, vector<1x512xf32>
    %323 = vector.broadcast %322 : vector<1x512xf32> to vector<64x512xf32>
    %324 = arith.addf %321, %323 : vector<64x512xf32>
    %325 = vector.shape_cast %324 : vector<64x512xf32> to vector<8x8x512xf32>
    %c0_111 = arith.constant 0 : index
    %c0_112 = arith.constant 0 : index
    %c0_113 = arith.constant 0 : index
    %326 = vector.load %arg19[%c0_111, %c0_112, %c0_113] : memref<8x8x512xf32, #tpu.memory_space<vmem>>, vector<8x8x512xf32>
    tpu.vector_store %arg19[%c0_111, %c0_112, %c0_113], %325 {strides = array<i32>} : memref<8x8x512xf32, #tpu.memory_space<vmem>>, vector<8x8x512xf32>,
    %c1 = arith.constant 1 : index
    %c0_114 = arith.constant 0 : index
    %c0_115 = arith.constant 0 : index
    %327 = vector.load %arg16[%c1, %c0_114, %c0_115] : memref<2x8x128xf32, #tpu.memory_space<vmem>>, vector<1x8x128xf32>
    %328 = vector.shape_cast %327 : vector<1x8x128xf32> to vector<8x128xf32>
    %c1_116 = arith.constant 1 : index
    %c0_117 = arith.constant 0 : index
    %c0_118 = arith.constant 0 : index
    %329 = vector.load %arg17[%c1_116, %c0_117, %c0_118] : memref<2x8x128xf32, #tpu.memory_space<vmem>>, vector<1x8x128xf32>
    %330 = vector.shape_cast %329 : vector<1x8x128xf32> to vector<8x128xf32>
    %c0_i32_119 = arith.constant 0 : i32
    %331 = arith.index_cast %c0_i32_119 : i32 to index
    %c0_120 = arith.constant 0 : index
    %c0_121 = arith.constant 0 : index
    %332 = vector.load %arg19[%331, %c0_120, %c0_121] : memref<8x8x512xf32, #tpu.memory_space<vmem>>, vector<1x8x512xf32>
    %333 = vector.shape_cast %332 : vector<1x8x512xf32> to vector<8x512xf32>
    %334 = arith.truncf %328 : vector<8x128xf32> to vector<8x128xbf16>
    %c0_122 = arith.constant 0 : index
    %c0_123 = arith.constant 0 : index
    %335 = vector.load %arg9[%c0_122, %c0_123] : memref<128x512xbf16, #tpu.memory_space<vmem>>, vector<128x512xbf16>
    %cst_124 = arith.constant dense<0.000000e+00> : vector<8x512xf32>
    %336 = tpu.matmul %334, %335, %cst_124 {dimension_numbers = #tpu.dot_dimension_numbers<[1], [0], [0], [1], [0, 0, 1, 1], [], []>} : vector<8x128xbf16>, vector<128x512xbf16>, vector<8x512xf32> -> vector<8x512xf32>
    %337 = arith.addf %333, %336 : vector<8x512xf32>
    %338 = vector.extract_strided_slice %337 {offsets = [0, 0], sizes = [8, 128], strides = [1, 1]} : vector<8x512xf32> to vector<8x128xf32>
    %339 = arith.negf %338 : vector<8x128xf32>
    %340 = math.exp %339 : vector<8x128xf32>
    %cst_125 = arith.constant 1.000000e+00 : f32
    %341 = vector.broadcast %cst_125 : f32 to vector<8x128xf32>
    %342 = arith.addf %341, %340 : vector<8x128xf32>
    %343 = arith.divf %341, %342 : vector<8x128xf32>
    %344 = vector.extract_strided_slice %337 {offsets = [0, 128], sizes = [8, 128], strides = [1, 1]} : vector<8x512xf32> to vector<8x128xf32>
    %345 = arith.negf %344 : vector<8x128xf32>
    %346 = math.exp %345 : vector<8x128xf32>
    %cst_126 = arith.constant 1.000000e+00 : f32
    %347 = vector.broadcast %cst_126 : f32 to vector<8x128xf32>
    %348 = arith.addf %347, %346 : vector<8x128xf32>
    %349 = arith.divf %347, %348 : vector<8x128xf32>
    %350 = vector.extract_strided_slice %337 {offsets = [0, 256], sizes = [8, 128], strides = [1, 1]} : vector<8x512xf32> to vector<8x128xf32>
    %351 = math.tanh %350 : vector<8x128xf32>
    %352 = vector.extract_strided_slice %337 {offsets = [0, 384], sizes = [8, 128], strides = [1, 1]} : vector<8x512xf32> to vector<8x128xf32>
    %353 = arith.negf %352 : vector<8x128xf32>
    %354 = math.exp %353 : vector<8x128xf32>
    %cst_127 = arith.constant 1.000000e+00 : f32
    %355 = vector.broadcast %cst_127 : f32 to vector<8x128xf32>
    %356 = arith.addf %355, %354 : vector<8x128xf32>
    %357 = arith.divf %355, %356 : vector<8x128xf32>
    %358 = arith.mulf %349, %330 : vector<8x128xf32>
    %359 = arith.mulf %343, %351 : vector<8x128xf32>
    %360 = arith.addf %358, %359 : vector<8x128xf32>
    %361 = math.tanh %360 : vector<8x128xf32>
    %362 = arith.mulf %357, %361 : vector<8x128xf32>
    %c1_i32_128 = arith.constant 1 : i32
    %363 = arith.index_cast %c1_i32_128 : i32 to index
    %c0_129 = arith.constant 0 : index
    %c0_130 = arith.constant 0 : index
    %364 = vector.load %arg19[%363, %c0_129, %c0_130] : memref<8x8x512xf32, #tpu.memory_space<vmem>>, vector<1x8x512xf32>
    %365 = vector.shape_cast %364 : vector<1x8x512xf32> to vector<8x512xf32>
    %366 = arith.truncf %362 : vector<8x128xf32> to vector<8x128xbf16>
    %c0_131 = arith.constant 0 : index
    %c0_132 = arith.constant 0 : index
    %367 = vector.load %arg9[%c0_131, %c0_132] : memref<128x512xbf16, #tpu.memory_space<vmem>>, vector<128x512xbf16>
    %cst_133 = arith.constant dense<0.000000e+00> : vector<8x512xf32>
    %368 = tpu.matmul %366, %367, %cst_133 {dimension_numbers = #tpu.dot_dimension_numbers<[1], [0], [0], [1], [0, 0, 1, 1], [], []>} : vector<8x128xbf16>, vector<128x512xbf16>, vector<8x512xf32> -> vector<8x512xf32>
    %369 = arith.addf %365, %368 : vector<8x512xf32>
    %370 = vector.extract_strided_slice %369 {offsets = [0, 0], sizes = [8, 128], strides = [1, 1]} : vector<8x512xf32> to vector<8x128xf32>
    %371 = arith.negf %370 : vector<8x128xf32>
    %372 = math.exp %371 : vector<8x128xf32>
    %cst_134 = arith.constant 1.000000e+00 : f32
    %373 = vector.broadcast %cst_134 : f32 to vector<8x128xf32>
    %374 = arith.addf %373, %372 : vector<8x128xf32>
    %375 = arith.divf %373, %374 : vector<8x128xf32>
    %376 = vector.extract_strided_slice %369 {offsets = [0, 128], sizes = [8, 128], strides = [1, 1]} : vector<8x512xf32> to vector<8x128xf32>
    %377 = arith.negf %376 : vector<8x128xf32>
    %378 = math.exp %377 : vector<8x128xf32>
    %cst_135 = arith.constant 1.000000e+00 : f32
    %379 = vector.broadcast %cst_135 : f32 to vector<8x128xf32>
    %380 = arith.addf %379, %378 : vector<8x128xf32>
    %381 = arith.divf %379, %380 : vector<8x128xf32>
    %382 = vector.extract_strided_slice %369 {offsets = [0, 256], sizes = [8, 128], strides = [1, 1]} : vector<8x512xf32> to vector<8x128xf32>
    %383 = math.tanh %382 : vector<8x128xf32>
    %384 = vector.extract_strided_slice %369 {offsets = [0, 384], sizes = [8, 128], strides = [1, 1]} : vector<8x512xf32> to vector<8x128xf32>
    %385 = arith.negf %384 : vector<8x128xf32>
    %386 = math.exp %385 : vector<8x128xf32>
    %cst_136 = arith.constant 1.000000e+00 : f32
    %387 = vector.broadcast %cst_136 : f32 to vector<8x128xf32>
    %388 = arith.addf %387, %386 : vector<8x128xf32>
    %389 = arith.divf %387, %388 : vector<8x128xf32>
    %390 = arith.mulf %381, %360 : vector<8x128xf32>
    %391 = arith.mulf %375, %383 : vector<8x128xf32>
    %392 = arith.addf %390, %391 : vector<8x128xf32>
    %393 = math.tanh %392 : vector<8x128xf32>
    %394 = arith.mulf %389, %393 : vector<8x128xf32>
    %c2_i32_137 = arith.constant 2 : i32
    %395 = arith.index_cast %c2_i32_137 : i32 to index
    %c0_138 = arith.constant 0 : index
    %c0_139 = arith.constant 0 : index
    %396 = vector.load %arg19[%395, %c0_138, %c0_139] : memref<8x8x512xf32, #tpu.memory_space<vmem>>, vector<1x8x512xf32>
    %397 = vector.shape_cast %396 : vector<1x8x512xf32> to vector<8x512xf32>
    %398 = arith.truncf %394 : vector<8x128xf32> to vector<8x128xbf16>
    %c0_140 = arith.constant 0 : index
    %c0_141 = arith.constant 0 : index
    %399 = vector.load %arg9[%c0_140, %c0_141] : memref<128x512xbf16, #tpu.memory_space<vmem>>, vector<128x512xbf16>
    %cst_142 = arith.constant dense<0.000000e+00> : vector<8x512xf32>
    %400 = tpu.matmul %398, %399, %cst_142 {dimension_numbers = #tpu.dot_dimension_numbers<[1], [0], [0], [1], [0, 0, 1, 1], [], []>} : vector<8x128xbf16>, vector<128x512xbf16>, vector<8x512xf32> -> vector<8x512xf32>
    %401 = arith.addf %397, %400 : vector<8x512xf32>
    %402 = vector.extract_strided_slice %401 {offsets = [0, 0], sizes = [8, 128], strides = [1, 1]} : vector<8x512xf32> to vector<8x128xf32>
    %403 = arith.negf %402 : vector<8x128xf32>
    %404 = math.exp %403 : vector<8x128xf32>
    %cst_143 = arith.constant 1.000000e+00 : f32
    %405 = vector.broadcast %cst_143 : f32 to vector<8x128xf32>
    %406 = arith.addf %405, %404 : vector<8x128xf32>
    %407 = arith.divf %405, %406 : vector<8x128xf32>
    %408 = vector.extract_strided_slice %401 {offsets = [0, 128], sizes = [8, 128], strides = [1, 1]} : vector<8x512xf32> to vector<8x128xf32>
    %409 = arith.negf %408 : vector<8x128xf32>
    %410 = math.exp %409 : vector<8x128xf32>
    %cst_144 = arith.constant 1.000000e+00 : f32
    %411 = vector.broadcast %cst_144 : f32 to vector<8x128xf32>
    %412 = arith.addf %411, %410 : vector<8x128xf32>
    %413 = arith.divf %411, %412 : vector<8x128xf32>
    %414 = vector.extract_strided_slice %401 {offsets = [0, 256], sizes = [8, 128], strides = [1, 1]} : vector<8x512xf32> to vector<8x128xf32>
    %415 = math.tanh %414 : vector<8x128xf32>
    %416 = vector.extract_strided_slice %401 {offsets = [0, 384], sizes = [8, 128], strides = [1, 1]} : vector<8x512xf32> to vector<8x128xf32>
    %417 = arith.negf %416 : vector<8x128xf32>
    %418 = math.exp %417 : vector<8x128xf32>
    %cst_145 = arith.constant 1.000000e+00 : f32
    %419 = vector.broadcast %cst_145 : f32 to vector<8x128xf32>
    %420 = arith.addf %419, %418 : vector<8x128xf32>
    %421 = arith.divf %419, %420 : vector<8x128xf32>
    %422 = arith.mulf %413, %392 : vector<8x128xf32>
    %423 = arith.mulf %407, %415 : vector<8x128xf32>
    %424 = arith.addf %422, %423 : vector<8x128xf32>
    %425 = math.tanh %424 : vector<8x128xf32>
    %426 = arith.mulf %421, %425 : vector<8x128xf32>
    %c3_i32_146 = arith.constant 3 : i32
    %427 = arith.index_cast %c3_i32_146 : i32 to index
    %c0_147 = arith.constant 0 : index
    %c0_148 = arith.constant 0 : index
    %428 = vector.load %arg19[%427, %c0_147, %c0_148] : memref<8x8x512xf32, #tpu.memory_space<vmem>>, vector<1x8x512xf32>
    %429 = vector.shape_cast %428 : vector<1x8x512xf32> to vector<8x512xf32>
    %430 = arith.truncf %426 : vector<8x128xf32> to vector<8x128xbf16>
    %c0_149 = arith.constant 0 : index
    %c0_150 = arith.constant 0 : index
    %431 = vector.load %arg9[%c0_149, %c0_150] : memref<128x512xbf16, #tpu.memory_space<vmem>>, vector<128x512xbf16>
    %cst_151 = arith.constant dense<0.000000e+00> : vector<8x512xf32>
    %432 = tpu.matmul %430, %431, %cst_151 {dimension_numbers = #tpu.dot_dimension_numbers<[1], [0], [0], [1], [0, 0, 1, 1], [], []>} : vector<8x128xbf16>, vector<128x512xbf16>, vector<8x512xf32> -> vector<8x512xf32>
    %433 = arith.addf %429, %432 : vector<8x512xf32>
    %434 = vector.extract_strided_slice %433 {offsets = [0, 0], sizes = [8, 128], strides = [1, 1]} : vector<8x512xf32> to vector<8x128xf32>
    %435 = arith.negf %434 : vector<8x128xf32>
    %436 = math.exp %435 : vector<8x128xf32>
    %cst_152 = arith.constant 1.000000e+00 : f32
    %437 = vector.broadcast %cst_152 : f32 to vector<8x128xf32>
    %438 = arith.addf %437, %436 : vector<8x128xf32>
    %439 = arith.divf %437, %438 : vector<8x128xf32>
    %440 = vector.extract_strided_slice %433 {offsets = [0, 128], sizes = [8, 128], strides = [1, 1]} : vector<8x512xf32> to vector<8x128xf32>
    %441 = arith.negf %440 : vector<8x128xf32>
    %442 = math.exp %441 : vector<8x128xf32>
    %cst_153 = arith.constant 1.000000e+00 : f32
    %443 = vector.broadcast %cst_153 : f32 to vector<8x128xf32>
    %444 = arith.addf %443, %442 : vector<8x128xf32>
    %445 = arith.divf %443, %444 : vector<8x128xf32>
    %446 = vector.extract_strided_slice %433 {offsets = [0, 256], sizes = [8, 128], strides = [1, 1]} : vector<8x512xf32> to vector<8x128xf32>
    %447 = math.tanh %446 : vector<8x128xf32>
    %448 = vector.extract_strided_slice %433 {offsets = [0, 384], sizes = [8, 128], strides = [1, 1]} : vector<8x512xf32> to vector<8x128xf32>
    %449 = arith.negf %448 : vector<8x128xf32>
    %450 = math.exp %449 : vector<8x128xf32>
    %cst_154 = arith.constant 1.000000e+00 : f32
    %451 = vector.broadcast %cst_154 : f32 to vector<8x128xf32>
    %452 = arith.addf %451, %450 : vector<8x128xf32>
    %453 = arith.divf %451, %452 : vector<8x128xf32>
    %454 = arith.mulf %445, %424 : vector<8x128xf32>
    %455 = arith.mulf %439, %447 : vector<8x128xf32>
    %456 = arith.addf %454, %455 : vector<8x128xf32>
    %457 = math.tanh %456 : vector<8x128xf32>
    %458 = arith.mulf %453, %457 : vector<8x128xf32>
    %c4_i32_155 = arith.constant 4 : i32
    %459 = arith.index_cast %c4_i32_155 : i32 to index
    %c0_156 = arith.constant 0 : index
    %c0_157 = arith.constant 0 : index
    %460 = vector.load %arg19[%459, %c0_156, %c0_157] : memref<8x8x512xf32, #tpu.memory_space<vmem>>, vector<1x8x512xf32>
    %461 = vector.shape_cast %460 : vector<1x8x512xf32> to vector<8x512xf32>
    %462 = arith.truncf %458 : vector<8x128xf32> to vector<8x128xbf16>
    %c0_158 = arith.constant 0 : index
    %c0_159 = arith.constant 0 : index
    %463 = vector.load %arg9[%c0_158, %c0_159] : memref<128x512xbf16, #tpu.memory_space<vmem>>, vector<128x512xbf16>
    %cst_160 = arith.constant dense<0.000000e+00> : vector<8x512xf32>
    %464 = tpu.matmul %462, %463, %cst_160 {dimension_numbers = #tpu.dot_dimension_numbers<[1], [0], [0], [1], [0, 0, 1, 1], [], []>} : vector<8x128xbf16>, vector<128x512xbf16>, vector<8x512xf32> -> vector<8x512xf32>
    %465 = arith.addf %461, %464 : vector<8x512xf32>
    %466 = vector.extract_strided_slice %465 {offsets = [0, 0], sizes = [8, 128], strides = [1, 1]} : vector<8x512xf32> to vector<8x128xf32>
    %467 = arith.negf %466 : vector<8x128xf32>
    %468 = math.exp %467 : vector<8x128xf32>
    %cst_161 = arith.constant 1.000000e+00 : f32
    %469 = vector.broadcast %cst_161 : f32 to vector<8x128xf32>
    %470 = arith.addf %469, %468 : vector<8x128xf32>
    %471 = arith.divf %469, %470 : vector<8x128xf32>
    %472 = vector.extract_strided_slice %465 {offsets = [0, 128], sizes = [8, 128], strides = [1, 1]} : vector<8x512xf32> to vector<8x128xf32>
    %473 = arith.negf %472 : vector<8x128xf32>
    %474 = math.exp %473 : vector<8x128xf32>
    %cst_162 = arith.constant 1.000000e+00 : f32
    %475 = vector.broadcast %cst_162 : f32 to vector<8x128xf32>
    %476 = arith.addf %475, %474 : vector<8x128xf32>
    %477 = arith.divf %475, %476 : vector<8x128xf32>
    %478 = vector.extract_strided_slice %465 {offsets = [0, 256], sizes = [8, 128], strides = [1, 1]} : vector<8x512xf32> to vector<8x128xf32>
    %479 = math.tanh %478 : vector<8x128xf32>
    %480 = vector.extract_strided_slice %465 {offsets = [0, 384], sizes = [8, 128], strides = [1, 1]} : vector<8x512xf32> to vector<8x128xf32>
    %481 = arith.negf %480 : vector<8x128xf32>
    %482 = math.exp %481 : vector<8x128xf32>
    %cst_163 = arith.constant 1.000000e+00 : f32
    %483 = vector.broadcast %cst_163 : f32 to vector<8x128xf32>
    %484 = arith.addf %483, %482 : vector<8x128xf32>
    %485 = arith.divf %483, %484 : vector<8x128xf32>
    %486 = arith.mulf %477, %456 : vector<8x128xf32>
    %487 = arith.mulf %471, %479 : vector<8x128xf32>
    %488 = arith.addf %486, %487 : vector<8x128xf32>
    %489 = math.tanh %488 : vector<8x128xf32>
    %490 = arith.mulf %485, %489 : vector<8x128xf32>
    %c5_i32_164 = arith.constant 5 : i32
    %491 = arith.index_cast %c5_i32_164 : i32 to index
    %c0_165 = arith.constant 0 : index
    %c0_166 = arith.constant 0 : index
    %492 = vector.load %arg19[%491, %c0_165, %c0_166] : memref<8x8x512xf32, #tpu.memory_space<vmem>>, vector<1x8x512xf32>
    %493 = vector.shape_cast %492 : vector<1x8x512xf32> to vector<8x512xf32>
    %494 = arith.truncf %490 : vector<8x128xf32> to vector<8x128xbf16>
    %c0_167 = arith.constant 0 : index
    %c0_168 = arith.constant 0 : index
    %495 = vector.load %arg9[%c0_167, %c0_168] : memref<128x512xbf16, #tpu.memory_space<vmem>>, vector<128x512xbf16>
    %cst_169 = arith.constant dense<0.000000e+00> : vector<8x512xf32>
    %496 = tpu.matmul %494, %495, %cst_169 {dimension_numbers = #tpu.dot_dimension_numbers<[1], [0], [0], [1], [0, 0, 1, 1], [], []>} : vector<8x128xbf16>, vector<128x512xbf16>, vector<8x512xf32> -> vector<8x512xf32>
    %497 = arith.addf %493, %496 : vector<8x512xf32>
    %498 = vector.extract_strided_slice %497 {offsets = [0, 0], sizes = [8, 128], strides = [1, 1]} : vector<8x512xf32> to vector<8x128xf32>
    %499 = arith.negf %498 : vector<8x128xf32>
    %500 = math.exp %499 : vector<8x128xf32>
    %cst_170 = arith.constant 1.000000e+00 : f32
    %501 = vector.broadcast %cst_170 : f32 to vector<8x128xf32>
    %502 = arith.addf %501, %500 : vector<8x128xf32>
    %503 = arith.divf %501, %502 : vector<8x128xf32>
    %504 = vector.extract_strided_slice %497 {offsets = [0, 128], sizes = [8, 128], strides = [1, 1]} : vector<8x512xf32> to vector<8x128xf32>
    %505 = arith.negf %504 : vector<8x128xf32>
    %506 = math.exp %505 : vector<8x128xf32>
    %cst_171 = arith.constant 1.000000e+00 : f32
    %507 = vector.broadcast %cst_171 : f32 to vector<8x128xf32>
    %508 = arith.addf %507, %506 : vector<8x128xf32>
    %509 = arith.divf %507, %508 : vector<8x128xf32>
    %510 = vector.extract_strided_slice %497 {offsets = [0, 256], sizes = [8, 128], strides = [1, 1]} : vector<8x512xf32> to vector<8x128xf32>
    %511 = math.tanh %510 : vector<8x128xf32>
    %512 = vector.extract_strided_slice %497 {offsets = [0, 384], sizes = [8, 128], strides = [1, 1]} : vector<8x512xf32> to vector<8x128xf32>
    %513 = arith.negf %512 : vector<8x128xf32>
    %514 = math.exp %513 : vector<8x128xf32>
    %cst_172 = arith.constant 1.000000e+00 : f32
    %515 = vector.broadcast %cst_172 : f32 to vector<8x128xf32>
    %516 = arith.addf %515, %514 : vector<8x128xf32>
    %517 = arith.divf %515, %516 : vector<8x128xf32>
    %518 = arith.mulf %509, %488 : vector<8x128xf32>
    %519 = arith.mulf %503, %511 : vector<8x128xf32>
    %520 = arith.addf %518, %519 : vector<8x128xf32>
    %521 = math.tanh %520 : vector<8x128xf32>
    %522 = arith.mulf %517, %521 : vector<8x128xf32>
    %c6_i32_173 = arith.constant 6 : i32
    %523 = arith.index_cast %c6_i32_173 : i32 to index
    %c0_174 = arith.constant 0 : index
    %c0_175 = arith.constant 0 : index
    %524 = vector.load %arg19[%523, %c0_174, %c0_175] : memref<8x8x512xf32, #tpu.memory_space<vmem>>, vector<1x8x512xf32>
    %525 = vector.shape_cast %524 : vector<1x8x512xf32> to vector<8x512xf32>
    %526 = arith.truncf %522 : vector<8x128xf32> to vector<8x128xbf16>
    %c0_176 = arith.constant 0 : index
    %c0_177 = arith.constant 0 : index
    %527 = vector.load %arg9[%c0_176, %c0_177] : memref<128x512xbf16, #tpu.memory_space<vmem>>, vector<128x512xbf16>
    %cst_178 = arith.constant dense<0.000000e+00> : vector<8x512xf32>
    %528 = tpu.matmul %526, %527, %cst_178 {dimension_numbers = #tpu.dot_dimension_numbers<[1], [0], [0], [1], [0, 0, 1, 1], [], []>} : vector<8x128xbf16>, vector<128x512xbf16>, vector<8x512xf32> -> vector<8x512xf32>
    %529 = arith.addf %525, %528 : vector<8x512xf32>
    %530 = vector.extract_strided_slice %529 {offsets = [0, 0], sizes = [8, 128], strides = [1, 1]} : vector<8x512xf32> to vector<8x128xf32>
    %531 = arith.negf %530 : vector<8x128xf32>
    %532 = math.exp %531 : vector<8x128xf32>
    %cst_179 = arith.constant 1.000000e+00 : f32
    %533 = vector.broadcast %cst_179 : f32 to vector<8x128xf32>
    %534 = arith.addf %533, %532 : vector<8x128xf32>
    %535 = arith.divf %533, %534 : vector<8x128xf32>
    %536 = vector.extract_strided_slice %529 {offsets = [0, 128], sizes = [8, 128], strides = [1, 1]} : vector<8x512xf32> to vector<8x128xf32>
    %537 = arith.negf %536 : vector<8x128xf32>
    %538 = math.exp %537 : vector<8x128xf32>
    %cst_180 = arith.constant 1.000000e+00 : f32
    %539 = vector.broadcast %cst_180 : f32 to vector<8x128xf32>
    %540 = arith.addf %539, %538 : vector<8x128xf32>
    %541 = arith.divf %539, %540 : vector<8x128xf32>
    %542 = vector.extract_strided_slice %529 {offsets = [0, 256], sizes = [8, 128], strides = [1, 1]} : vector<8x512xf32> to vector<8x128xf32>
    %543 = math.tanh %542 : vector<8x128xf32>
    %544 = vector.extract_strided_slice %529 {offsets = [0, 384], sizes = [8, 128], strides = [1, 1]} : vector<8x512xf32> to vector<8x128xf32>
    %545 = arith.negf %544 : vector<8x128xf32>
    %546 = math.exp %545 : vector<8x128xf32>
    %cst_181 = arith.constant 1.000000e+00 : f32
    %547 = vector.broadcast %cst_181 : f32 to vector<8x128xf32>
    %548 = arith.addf %547, %546 : vector<8x128xf32>
    %549 = arith.divf %547, %548 : vector<8x128xf32>
    %550 = arith.mulf %541, %520 : vector<8x128xf32>
    %551 = arith.mulf %535, %543 : vector<8x128xf32>
    %552 = arith.addf %550, %551 : vector<8x128xf32>
    %553 = math.tanh %552 : vector<8x128xf32>
    %554 = arith.mulf %549, %553 : vector<8x128xf32>
    %c7_i32_182 = arith.constant 7 : i32
    %555 = arith.index_cast %c7_i32_182 : i32 to index
    %c0_183 = arith.constant 0 : index
    %c0_184 = arith.constant 0 : index
    %556 = vector.load %arg19[%555, %c0_183, %c0_184] : memref<8x8x512xf32, #tpu.memory_space<vmem>>, vector<1x8x512xf32>
    %557 = vector.shape_cast %556 : vector<1x8x512xf32> to vector<8x512xf32>
    %558 = arith.truncf %554 : vector<8x128xf32> to vector<8x128xbf16>
    %c0_185 = arith.constant 0 : index
    %c0_186 = arith.constant 0 : index
    %559 = vector.load %arg9[%c0_185, %c0_186] : memref<128x512xbf16, #tpu.memory_space<vmem>>, vector<128x512xbf16>
    %cst_187 = arith.constant dense<0.000000e+00> : vector<8x512xf32>
    %560 = tpu.matmul %558, %559, %cst_187 {dimension_numbers = #tpu.dot_dimension_numbers<[1], [0], [0], [1], [0, 0, 1, 1], [], []>} : vector<8x128xbf16>, vector<128x512xbf16>, vector<8x512xf32> -> vector<8x512xf32>
    %561 = arith.addf %557, %560 : vector<8x512xf32>
    %562 = vector.extract_strided_slice %561 {offsets = [0, 0], sizes = [8, 128], strides = [1, 1]} : vector<8x512xf32> to vector<8x128xf32>
    %563 = arith.negf %562 : vector<8x128xf32>
    %564 = math.exp %563 : vector<8x128xf32>
    %cst_188 = arith.constant 1.000000e+00 : f32
    %565 = vector.broadcast %cst_188 : f32 to vector<8x128xf32>
    %566 = arith.addf %565, %564 : vector<8x128xf32>
    %567 = arith.divf %565, %566 : vector<8x128xf32>
    %568 = vector.extract_strided_slice %561 {offsets = [0, 128], sizes = [8, 128], strides = [1, 1]} : vector<8x512xf32> to vector<8x128xf32>
    %569 = arith.negf %568 : vector<8x128xf32>
    %570 = math.exp %569 : vector<8x128xf32>
    %cst_189 = arith.constant 1.000000e+00 : f32
    %571 = vector.broadcast %cst_189 : f32 to vector<8x128xf32>
    %572 = arith.addf %571, %570 : vector<8x128xf32>
    %573 = arith.divf %571, %572 : vector<8x128xf32>
    %574 = vector.extract_strided_slice %561 {offsets = [0, 256], sizes = [8, 128], strides = [1, 1]} : vector<8x512xf32> to vector<8x128xf32>
    %575 = math.tanh %574 : vector<8x128xf32>
    %576 = vector.extract_strided_slice %561 {offsets = [0, 384], sizes = [8, 128], strides = [1, 1]} : vector<8x512xf32> to vector<8x128xf32>
    %577 = arith.negf %576 : vector<8x128xf32>
    %578 = math.exp %577 : vector<8x128xf32>
    %cst_190 = arith.constant 1.000000e+00 : f32
    %579 = vector.broadcast %cst_190 : f32 to vector<8x128xf32>
    %580 = arith.addf %579, %578 : vector<8x128xf32>
    %581 = arith.divf %579, %580 : vector<8x128xf32>
    %582 = arith.mulf %573, %552 : vector<8x128xf32>
    %583 = arith.mulf %567, %575 : vector<8x128xf32>
    %584 = arith.addf %582, %583 : vector<8x128xf32>
    %585 = math.tanh %584 : vector<8x128xf32>
    %586 = arith.mulf %581, %585 : vector<8x128xf32>
    %c8_i32_191 = arith.constant 8 : i32
    %c1_192 = arith.constant 1 : index
    %c0_193 = arith.constant 0 : index
    %c0_194 = arith.constant 0 : index
    %587 = vector.load %arg16[%c1_192, %c0_193, %c0_194] : memref<2x8x128xf32, #tpu.memory_space<vmem>>, vector<1x8x128xf32>
    %588 = vector.shape_cast %587 : vector<1x8x128xf32> to vector<8x128xf32>
    %589 = vector.shape_cast %586 : vector<8x128xf32> to vector<1x8x128xf32>
    tpu.vector_store %arg16[%c1_192, %c0_193, %c0_194], %589 {strides = array<i32>} : memref<2x8x128xf32, #tpu.memory_space<vmem>>, vector<1x8x128xf32>,
    %c1_195 = arith.constant 1 : index
    %c0_196 = arith.constant 0 : index
    %c0_197 = arith.constant 0 : index
    %590 = vector.load %arg17[%c1_195, %c0_196, %c0_197] : memref<2x8x128xf32, #tpu.memory_space<vmem>>, vector<1x8x128xf32>
    %591 = vector.shape_cast %590 : vector<1x8x128xf32> to vector<8x128xf32>
    %592 = vector.shape_cast %584 : vector<8x128xf32> to vector<1x8x128xf32>
    tpu.vector_store %arg17[%c1_195, %c0_196, %c0_197], %592 {strides = array<i32>} : memref<2x8x128xf32, #tpu.memory_space<vmem>>, vector<1x8x128xf32>,
    %c0_i32_198 = arith.constant 0 : i32
    %593 = arith.cmpi eq, %arg1, %c0_i32_198 : i32
    %594 = arith.extui %593 : i1 to i32
    %c0_i32_199 = arith.constant 0 : i32
    %595 = arith.cmpi ne, %594, %c0_i32_199 : i32
    scf.if %595 {
      %c0_200 = arith.constant 0 : index
      %c0_201 = arith.constant 0 : index
      %c0_202 = arith.constant 0 : index
      %596 = vector.load %arg16[%c0_200, %c0_201, %c0_202] : memref<2x8x128xf32, #tpu.memory_space<vmem>>, vector<2x8x128xf32>
      %c0_203 = arith.constant 0 : index
      %c0_204 = arith.constant 0 : index
      %c0_205 = arith.constant 0 : index
      %597 = vector.load %arg14[%c0_203, %c0_204, %c0_205] : memref<2x8x128xf32, #tpu.memory_space<vmem>>, vector<2x8x128xf32>
      tpu.vector_store %arg14[%c0_203, %c0_204, %c0_205], %596 {strides = array<i32>} : memref<2x8x128xf32, #tpu.memory_space<vmem>>, vector<2x8x128xf32>,
      %c0_206 = arith.constant 0 : index
      %c0_207 = arith.constant 0 : index
      %c0_208 = arith.constant 0 : index
      %598 = vector.load %arg17[%c0_206, %c0_207, %c0_208] : memref<2x8x128xf32, #tpu.memory_space<vmem>>, vector<2x8x128xf32>
      %c0_209 = arith.constant 0 : index
      %c0_210 = arith.constant 0 : index
      %c0_211 = arith.constant 0 : index
      %599 = vector.load %arg15[%c0_209, %c0_210, %c0_211] : memref<2x8x128xf32, #tpu.memory_space<vmem>>, vector<2x8x128xf32>
      tpu.vector_store %arg15[%c0_209, %c0_210, %c0_211], %598 {strides = array<i32>} : memref<2x8x128xf32, #tpu.memory_space<vmem>>, vector<2x8x128xf32>,
      %c1_212 = arith.constant 1 : index
      %c0_213 = arith.constant 0 : index
      %c0_214 = arith.constant 0 : index
      %600 = vector.load %arg16[%c1_212, %c0_213, %c0_214] : memref<2x8x128xf32, #tpu.memory_space<vmem>>, vector<1x8x128xf32>
      %601 = vector.shape_cast %600 : vector<1x8x128xf32> to vector<8x128xf32>
      %602 = arith.truncf %601 : vector<8x128xf32> to vector<8x128xbf16>
      %c0_215 = arith.constant 0 : index
      %c0_216 = arith.constant 0 : index
      %603 = vector.load %arg11[%c0_215, %c0_216] : memref<128x128xbf16, #tpu.memory_space<vmem>>, vector<128x128xbf16>
      %cst_217 = arith.constant dense<0.000000e+00> : vector<8x128xf32>
      %604 = tpu.matmul %602, %603, %cst_217 {dimension_numbers = #tpu.dot_dimension_numbers<[1], [0], [0], [1], [0, 0, 1, 1], [], []>} : vector<8x128xbf16>, vector<128x128xbf16>, vector<8x128xf32> -> vector<8x128xf32>
      %c0_218 = arith.constant 0 : index
      %c0_219 = arith.constant 0 : index
      %605 = vector.load %arg12[%c0_218, %c0_219] : memref<1x128xf32, #tpu.memory_space<vmem>>, vector<1x128xf32>
      %606 = vector.broadcast %605 : vector<1x128xf32> to vector<8x128xf32>
      %607 = arith.addf %604, %606 : vector<8x128xf32>
      %cst_220 = arith.constant dense<0xFF800000> : vector<8xf32>
      %608 = vector.multi_reduction <maximumf>, %607, %cst_220 [1] : vector<8x128xf32> to vector<8xf32>
      %609 = vector.shape_cast %608 : vector<8xf32> to vector<8x1xf32>
      %610 = vector.broadcast %609 : vector<8x1xf32> to vector<8x128xf32>
      %611 = arith.subf %607, %610 : vector<8x128xf32>
      %612 = math.exp %611 : vector<8x128xf32>
      %cst_221 = arith.constant dense<0.000000e+00> : vector<8xf32>
      %613 = vector.multi_reduction <add>, %612, %cst_221 [1] : vector<8x128xf32> to vector<8xf32>
      %614 = vector.shape_cast %613 : vector<8xf32> to vector<8x1xf32>
      %615 = tpu.reciprocal %614 {approx = true} : vector<8x1xf32> -> vector<8x1xf32>
      %616 = vector.broadcast %615 : vector<8x1xf32> to vector<8x128xf32>
      %617 = arith.mulf %612, %616 : vector<8x128xf32>
      %c0_222 = arith.constant 0 : index
      %c0_223 = arith.constant 0 : index
      %618 = vector.load %arg13[%c0_222, %c0_223] : memref<8x128xf32, #tpu.memory_space<vmem>>, vector<8x128xf32>
      tpu.vector_store %arg13[%c0_222, %c0_223], %617 {strides = array<i32>} : memref<8x128xf32, #tpu.memory_space<vmem>>, vector<8x128xf32>,
    } else {
    }
    return
  }
  func.func @transform_0(%arg0: i32, %arg1: i32) -> (i32, i32, i32) {
    %c0_i32 = arith.constant 0 : i32
    %c0_i32_0 = arith.constant 0 : i32
    return %arg1, %arg0, %c0_i32 : i32, i32, i32
  }
  func.func @transform_1(%arg0: i32, %arg1: i32) -> (i32, i32, i32) {
    %c0_i32 = arith.constant 0 : i32
    %c0_i32_0 = arith.constant 0 : i32
    %c0_i32_1 = arith.constant 0 : i32
    return %c0_i32, %arg0, %c0_i32_0 : i32, i32, i32
  }
  func.func @transform_2(%arg0: i32, %arg1: i32) -> (i32, i32, i32) {
    %c0_i32 = arith.constant 0 : i32
    %c0_i32_0 = arith.constant 0 : i32
    %c0_i32_1 = arith.constant 0 : i32
    return %c0_i32, %arg0, %c0_i32_0 : i32, i32, i32
  }
  func.func @transform_3(%arg0: i32, %arg1: i32) -> (i32, i32) {
    %c0_i32 = arith.constant 0 : i32
    %c0_i32_0 = arith.constant 0 : i32
    %c0_i32_1 = arith.constant 0 : i32
    return %c0_i32, %c0_i32_0 : i32, i32
  }
  func.func @transform_4(%arg0: i32, %arg1: i32) -> (i32, i32) {
    %c0_i32 = arith.constant 0 : i32
    %c0_i32_0 = arith.constant 0 : i32
    %c0_i32_1 = arith.constant 0 : i32
    return %c0_i32, %c0_i32_0 : i32, i32
  }
  func.func @transform_5(%arg0: i32, %arg1: i32) -> (i32, i32) {
    %c0_i32 = arith.constant 0 : i32
    %c0_i32_0 = arith.constant 0 : i32
    %c0_i32_1 = arith.constant 0 : i32
    return %c0_i32, %c0_i32_0 : i32, i32
  }
  func.func @transform_6(%arg0: i32, %arg1: i32) -> (i32, i32) {
    %c0_i32 = arith.constant 0 : i32
    %c0_i32_0 = arith.constant 0 : i32
    %c0_i32_1 = arith.constant 0 : i32
    return %c0_i32, %c0_i32_0 : i32, i32
  }
  func.func @transform_7(%arg0: i32, %arg1: i32) -> (i32, i32) {
    %c0_i32 = arith.constant 0 : i32
    %c0_i32_0 = arith.constant 0 : i32
    %c0_i32_1 = arith.constant 0 : i32
    return %c0_i32, %c0_i32_0 : i32, i32
  }
  func.func @transform_8(%arg0: i32, %arg1: i32) -> (i32, i32) {
    %c0_i32 = arith.constant 0 : i32
    %c0_i32_0 = arith.constant 0 : i32
    %c0_i32_1 = arith.constant 0 : i32
    return %c0_i32, %c0_i32_0 : i32, i32
  }
  func.func @transform_9(%arg0: i32, %arg1: i32) -> (i32, i32) {
    %c0_i32 = arith.constant 0 : i32
    %c0_i32_0 = arith.constant 0 : i32
    %c0_i32_1 = arith.constant 0 : i32
    return %c0_i32, %c0_i32_0 : i32, i32
  }
  func.func @transform_10(%arg0: i32, %arg1: i32) -> (i32, i32) {
    %c0_i32 = arith.constant 0 : i32
    %c0_i32_0 = arith.constant 0 : i32
    %c0_i32_1 = arith.constant 0 : i32
    return %c0_i32, %c0_i32_0 : i32, i32
  }
  func.func @transform_11(%arg0: i32, %arg1: i32) -> (i32, i32) {
    %c0_i32 = arith.constant 0 : i32
    %c0_i32_0 = arith.constant 0 : i32
    return %arg0, %c0_i32 : i32, i32
  }
  func.func @transform_12(%arg0: i32, %arg1: i32) -> (i32, i32, i32) {
    %c0_i32 = arith.constant 0 : i32
    %c0_i32_0 = arith.constant 0 : i32
    %c0_i32_1 = arith.constant 0 : i32
    return %c0_i32, %arg0, %c0_i32_0 : i32, i32, i32
  }
  func.func @transform_13(%arg0: i32, %arg1: i32) -> (i32, i32, i32) {
    %c0_i32 = arith.constant 0 : i32
    %c0_i32_0 = arith.constant 0 : i32
    %c0_i32_1 = arith.constant 0 : i32
    return %c0_i32, %arg0, %c0_i32_0 : i32, i32, i32
  }
}

</mosaic_0001>

<bundles_post_ra>
// kernel: tpu_custom_call.1
= control target key start
LH: loop header
LB: loop body
LE: loop exit
PB: predicated region body
PF: predicated region fallthrough
CT: control target
= control target key end

     0   :  { %19 = vsyncpa [#allocation7], 0  ;;  %s7479_s0 = inlined_call_operand.vmem [shape: bf16[8,8,128], index: 0, kind: input, shape index: {}]   ;;  %s7480_s1 = inlined_call_operand.hbm [shape: f32[2,8,128], index: 1, kind: input, shape index: {}, may-alias: {1,12}]   ;;  %s7481_s2 = inlined_call_operand.hbm [shape: f32[2,8,128], index: 2, kind: input, shape index: {}, may-alias: {2,13}]   ;;  %s7482_s3 = inlined_call_operand.hbm [shape: bf16[128,512], index: 3, kind: input, shape index: {}]   ;;  %s7483_s4 = inlined_call_operand.hbm [shape: bf16[128,512], index: 4, kind: input, shape index: {}]   ;;  %s7484_s5 = inlined_call_operand.hbm [shape: f32[1,512], index: 5, kind: input, shape index: {}]   ;;  %s7485_s6 = inlined_call_operand.hbm [shape: bf16[128,512], index: 6, kind: input, shape index: {}]   ;;  %s7486_s7 = inlined_call_operand.hbm [shape: bf16[128,512], index: 7, kind: input, shape index: {}]   ;;  %s7487_s8 = inlined_call_operand.hbm [shape: f32[1,512], index: 8, kind: input, shape index: {}]   ;;  %s7488_s9 = inlined_call_operand.vmem [shape: bf16[128,128], index: 9, kind: input, shape index: {}]   ;;  %s7489_s10 = inlined_call_operand.vmem [shape: f32[1,128], index: 10, kind: input, shape index: {}]   ;;  %s7490_s11 = inlined_call_operand.hbm [shape: f32[8,128], index: 11, kind: output, shape index: {0}]   ;;  %s7491_s12 = inlined_call_operand.hbm [shape: f32[2,8,128], index: 12, kind: output, shape index: {1}, may-alias: {1,12}]   ;;  %s7492_s13 = inlined_call_operand.hbm [shape: f32[2,8,128], index: 13, kind: output, shape index: {2}, may-alias: {2,13}]  }
   0x1   :  { %20 = vsyncpa [#allocation10], 0 }
   0x2   :  { %21 = vsyncpa [#allocation13], 0 }
   0x3   :  { %22 = vsyncpa [#allocation16], 0 }
   0x4   :  { %23 = vsyncpa [#allocation19], 0 }
   0x5   :  { %24 = vsyncpa [#allocation8], 0 }
   0x6   :  { %25 = vsyncpa [#allocation22], 0  ;;  %s6062_s25 = smov [#allocation9]   ;;  %s5806_s29 = scalar_lea.hbm %s7481_s2, 256 }
   0x7   :  { %s45_s26 = sshll.u32 %s6062_s25, 4  ;;  %p5807_p0 = scmp.ne.s32.totalorder %s7481_s2, %s5806_s29  ;;  %s46_s26 = int_to_ptr.vmem [resolvable:$true] %s45_s26 }
   0x8   :  { %p5810_p1 = scmp.lt.u32.totalorder %s5806_s29, %s7481_s2 }
   0xa   :  { %p5812_p2 = pnand %p5810_p1, %p5807_p0 }
   0xc   :  { %5815 = shalt.err (!%p5812_p2)
}
   0xd   :  { %s5816_s17 = scalar_lea.vmem %s46_s26, 256  ;;  %p5821_p4 = scmp.lt.s32.totalorder %s46_s26, %s46_s26 }
   0xe   :  { %p5817_p3 = scmp.ne.s32.totalorder %s46_s26, %s5816_s17  ;;  %p5822_p5 = scmp.lt.s32.totalorder %s5816_s17, %s5816_s17 }
  0x10   :  { %p5823_p6 = por %p5822_p5, %p5821_p4 }
  0x12   :  { %p5824_p7 = pnand %p5823_p6, %p5817_p3 }
  0x14   :  { %5827 = shalt.err (!%p5824_p7)
}
  0x15   :  { %s6063_s18 = smov 128   ;;  %s6064_s19 = smov 8  }
  0x16   :  { %51 = dma.hbm_to_vmem [thread:$0]  %s7481_s2, 256, %s46_s26, [#allocation10], %s6063_s18, %s6063_s18, %s6064_s19  }
  0x17   :  { %s6065_s22 = smov [#allocation12]   ;;  %s6066_s24 = smov [#allocation15]  }
  0x18   :  { %s69_s23 = sshll.u32 %s6065_s22, 4  ;;  %s91_s25 = sshll.u32 %s6066_s24, 4  ;;  %s70_s23 = int_to_ptr.vmem [resolvable:$true] %s69_s23  ;;  %s92_s25 = int_to_ptr.vmem [resolvable:$true] %s91_s25 }
  0x19   :  { %s5828_s29 = scalar_lea.hbm %s7483_s4, 4096 }
  0x1a   :  { %p5829_p8 = scmp.ne.s32.totalorder %s7483_s4, %s5828_s29  ;;  %p5832_p9 = scmp.lt.u32.totalorder %s5828_s29, %s7483_s4 }
  0x1c   :  { %p5834_p10 = pnand %p5832_p9, %p5829_p8 }
  0x1e   :  { %5837 = shalt.err (!%p5834_p10)
}
  0x1f   :  { %s5838_s2 = scalar_lea.vmem %s70_s23, 4096  ;;  %p5843_p12 = scmp.lt.s32.totalorder %s70_s23, %s70_s23 }
  0x20   :  { %p5839_p11 = scmp.ne.s32.totalorder %s70_s23, %s5838_s2  ;;  %p5844_p13 = scmp.lt.s32.totalorder %s5838_s2, %s5838_s2 }
  0x22   :  { %p5845_p0 = por %p5844_p13, %p5843_p12 }
  0x24   :  { %p5846_p1 = pnand %p5845_p0, %p5839_p11 }
  0x26   :  { %5849 = shalt.err (!%p5846_p1)
}
  0x27   :  { %s6067_s26 = smov 256   ;;  %s6068_s17 = smov 16  }
  0x28   :  { %75 = dma.hbm_to_vmem [thread:$0]  %s7483_s4, 4096, %s70_s23, [#allocation13], %s6067_s26, %s6067_s26, %s6068_s17  }
  0x29   :  { %s5850_s27 = scalar_lea.hbm %s7485_s6, 4096 }
  0x2a   :  { %p5851_p2 = scmp.ne.s32.totalorder %s7485_s6, %s5850_s27  ;;  %p5854_p3 = scmp.lt.u32.totalorder %s5850_s27, %s7485_s6 }
  0x2c   :  { %p5856_p4 = pnand %p5854_p3, %p5851_p2 }
  0x2e   :  { %5859 = shalt.err (!%p5856_p4)
}
  0x2f   :  { %s5860_s15 = scalar_lea.vmem %s92_s25, 4096  ;;  %p5865_p6 = scmp.lt.s32.totalorder %s92_s25, %s92_s25 }
  0x30   :  { %p5861_p5 = scmp.ne.s32.totalorder %s92_s25, %s5860_s15  ;;  %p5866_p7 = scmp.lt.s32.totalorder %s5860_s15, %s5860_s15 }
  0x32   :  { %p5867_p8 = por %p5866_p7, %p5865_p6 }
  0x34   :  { %p5868_p9 = pnand %p5867_p8, %p5861_p5 }
  0x36   :  { %5871 = shalt.err (!%p5868_p9)
}
  0x37   :  { %97 = dma.hbm_to_vmem [thread:$0]  %s7485_s6, 4096, %s92_s25, [#allocation16], %s6067_s26, %s6067_s26, %s6068_s17  }
  0x38   :  { %s6069_s16 = smov [#allocation6]   ;;  %s6070_s20 = smov [#allocation11]  }
  0x39   :  { %s33_s2 = sshll.u32 %s6069_s16, 4  ;;  %s57_s21 = sshll.u32 %s6070_s20, 4  ;;  %s34_s2 = int_to_ptr.vmem [resolvable:$true] %s33_s2  ;;  %s58_s21 = int_to_ptr.vmem [resolvable:$true] %s57_s21 }
  0x3a   :  { %s5872_s27 = scalar_lea.hbm %s7480_s1, 256 }
  0x3b   :  { %p5873_p10 = scmp.ne.s32.totalorder %s7480_s1, %s5872_s27  ;;  %p5876_p11 = scmp.lt.u32.totalorder %s5872_s27, %s7480_s1 }
  0x3d   :  { %p5878_p12 = pnand %p5876_p11, %p5873_p10 }
  0x3f   :  { %5881 = shalt.err (!%p5878_p12)
}
  0x40   :  { %s5882_s6 = scalar_lea.vmem %s34_s2, 256  ;;  %p5887_p0 = scmp.lt.s32.totalorder %s34_s2, %s34_s2 }
  0x41   :  { %p5883_p13 = scmp.ne.s32.totalorder %s34_s2, %s5882_s6  ;;  %p5888_p1 = scmp.lt.s32.totalorder %s5882_s6, %s5882_s6 }
  0x43   :  { %p5889_p2 = por %p5888_p1, %p5887_p0 }
  0x45   :  { %p5890_p3 = pnand %p5889_p2, %p5883_p13 }
  0x47   :  { %5893 = shalt.err (!%p5890_p3)
}
  0x48   :  { %39 = dma.hbm_to_vmem [thread:$0]  %s7480_s1, 256, %s34_s2, [#allocation7], %s6063_s18, %s6063_s18, %s6064_s19  }
  0x49   :  { %s5894_s16 = scalar_lea.hbm %s7482_s3, 4096 }
  0x4a   :  { %p5895_p4 = scmp.ne.s32.totalorder %s7482_s3, %s5894_s16  ;;  %p5898_p5 = scmp.lt.u32.totalorder %s5894_s16, %s7482_s3 }
  0x4c   :  { %p5900_p6 = pnand %p5898_p5, %p5895_p4 }
  0x4e   :  { %5903 = shalt.err (!%p5900_p6)
}
  0x4f   :  { %s5904_s28 = scalar_lea.vmem %s58_s21, 4096  ;;  %p5909_p8 = scmp.lt.s32.totalorder %s58_s21, %s58_s21 }
  0x50   :  { %p5905_p7 = scmp.ne.s32.totalorder %s58_s21, %s5904_s28  ;;  %p5910_p9 = scmp.lt.s32.totalorder %s5904_s28, %s5904_s28 }
  0x52   :  { %p5911_p10 = por %p5910_p9, %p5909_p8 }
  0x54   :  { %p5912_p11 = pnand %p5911_p10, %p5905_p7 }
  0x56   :  { %5915 = shalt.err (!%p5912_p11)
}
  0x57   :  { %63 = dma.hbm_to_vmem [thread:$0]  %s7482_s3, 4096, %s58_s21, [#allocation10], %s6067_s26, %s6067_s26, %s6068_s17  }
  0x58   :  { %s6071_s29 = smov [#allocation14]   ;;  %s6072_s14 = smov [#allocation17]  }
  0x59   :  { %s82_s30 = sshll.u32 %s6071_s29, 4  ;;  %s103_s6 = sshll.u32 %s6072_s14, 4  ;;  %s83_s30 = int_to_ptr.vmem [resolvable:$true] %s82_s30  ;;  %s104_s6 = int_to_ptr.vmem [resolvable:$true] %s103_s6 }
  0x5a   :  { %s5916_s4 = scalar_lea.hbm %s7484_s5, 64 }
  0x5b   :  { %p5917_p12 = scmp.ne.s32.totalorder %s7484_s5, %s5916_s4  ;;  %p5920_p13 = scmp.lt.u32.totalorder %s5916_s4, %s7484_s5 }
  0x5d   :  { %p5922_p0 = pnand %p5920_p13, %p5917_p12 }
  0x5f   :  { %5925 = shalt.err (!%p5922_p0)
}
  0x60   :  { %s5926_s3 = scalar_lea.vmem %s83_s30, 64  ;;  %p5931_p2 = scmp.lt.s32.totalorder %s83_s30, %s83_s30 }
  0x61   :  { %p5927_p1 = scmp.ne.s32.totalorder %s83_s30, %s5926_s3  ;;  %p5932_p3 = scmp.lt.s32.totalorder %s5926_s3, %s5926_s3 }
  0x63   :  { %p5933_p4 = por %p5932_p3, %p5931_p2 }
  0x65   :  { %p5934_p5 = pnand %p5933_p4, %p5927_p1 }
  0x67   :  { %5937 = shalt.err (!%p5934_p5)
}
  0x68   :  { %85 = dma.hbm_to_vmem [thread:$0]  %s7484_s5, 64, %s83_s30, [#allocation13]  }
  0x69   :  { %s5938_s1 = scalar_lea.hbm %s7486_s7, 4096 }
  0x6a   :  { %p5939_p6 = scmp.ne.s32.totalorder %s7486_s7, %s5938_s1  ;;  %p5942_p7 = scmp.lt.u32.totalorder %s5938_s1, %s7486_s7 }
  0x6c   :  { %p5944_p8 = pnand %p5942_p7, %p5939_p6 }
  0x6e   :  { %5947 = shalt.err (!%p5944_p8)
}
  0x6f   :  { %s5948_s15 = scalar_lea.vmem %s104_s6, 4096  ;;  %p5953_p10 = scmp.lt.s32.totalorder %s104_s6, %s104_s6 }
  0x70   :  { %p5949_p9 = scmp.ne.s32.totalorder %s104_s6, %s5948_s15  ;;  %p5954_p11 = scmp.lt.s32.totalorder %s5948_s15, %s5948_s15 }
  0x72   :  { %p5955_p12 = por %p5954_p11, %p5953_p10 }
  0x74   :  { %p5956_p13 = pnand %p5955_p12, %p5949_p9 }
  0x76   :  { %5959 = shalt.err (!%p5956_p13)
}
  0x77   :  { %109 = dma.hbm_to_vmem [thread:$0]  %s7486_s7, 4096, %s104_s6, [#allocation16], %s6067_s26, %s6067_s26, %s6068_s17  }
  0x78   :  { %s6073_s4 = smov [#allocation18]   ;;  %s5960_s22 = scalar_lea.hbm %s7487_s8, 64 }
  0x79   :  { %s116_s23 = sshll.u32 %s6073_s4, 4  ;;  %p5961_p0 = scmp.ne.s32.totalorder %s7487_s8, %s5960_s22  ;;  %s117_s23 = int_to_ptr.vmem [resolvable:$true] %s116_s23 }
  0x7a   :  { %p5964_p1 = scmp.lt.u32.totalorder %s5960_s22, %s7487_s8 }
  0x7c   :  { %p5966_p2 = pnand %p5964_p1, %p5961_p0 }
  0x7e   :  { %5969 = shalt.err (!%p5966_p2)
}
  0x7f   :  { %s5970_s28 = scalar_lea.vmem %s117_s23, 64  ;;  %p5975_p4 = scmp.lt.s32.totalorder %s117_s23, %s117_s23 }
  0x80   :  { %p5971_p3 = scmp.ne.s32.totalorder %s117_s23, %s5970_s28  ;;  %p5976_p5 = scmp.lt.s32.totalorder %s5970_s28, %s5970_s28 }
  0x82   :  { %p5977_p6 = por %p5976_p5, %p5975_p4 }
  0x84   :  { %p5978_p7 = pnand %p5977_p6, %p5971_p3 }
  0x86   :  { %5981 = shalt.err (!%p5978_p7)
}
  0x87   :  { %119 = dma.hbm_to_vmem [thread:$0]  %s7487_s8, 64, %s117_s23, [#allocation19]  }
  0x88   :  { %6048 = dma.done.wait [#allocation7], 256  }
  0x89   :  { %6049 = vsyncadd [#allocation7], 4294967040 }
  0x8a   :  { %6050 = dma.done.wait [#allocation10], 4352  }
  0x8b   :  { %6051 = vsyncadd [#allocation10], 4294962944 }
  0x8c   :  { %6052 = dma.done.wait [#allocation13], 4160  }
  0x8d   :  { %6053 = vsyncadd [#allocation13], 4294963136 }
  0x8e   :  { %6054 = dma.done.wait [#allocation16], 8192  }
  0x8f   :  { %6055 = vsyncadd [#allocation16], 4294959104 }
  0x90   :  { %6056 = dma.done.wait [#allocation19], 64  }
  0x91   :  { %6057 = vsyncadd [#allocation19], 4294967232  ;;  %v7497_v0 = vmov 0   ;;  %v5258_v1 = vld [vmem:[#allocation11 + $0x4] ss:$16 sps:$4 sm:$0xff]   ;;  %v5319_v44 = vld [vmem:[%s7479_s0 + $0x8] sm:$0xff]  }
  0x92   :  { %439 = vmatprep.mubr.bf16.mxu0 %v7497_v0  ;;  %512 = vmatprep.mubr.bf16.mxu1 %v7497_v0  ;;  %v5260_v2 = vld [vmem:[#allocation11 + $0xc] ss:$16 sps:$4 sm:$0xff]   ;;  %v5262_v3 = vld [vmem:[#allocation11] ss:$16 sps:$4 sm:$0xff]   ;;  %v5263_v4 = vld [vmem:[#allocation11 + $0x8] ss:$16 sps:$4 sm:$0xff]  }
  0x93   :  { %407 = vmatprep.subr.bf16.mxu0 %v5258_v1  ;;  %480 = vmatprep.subr.bf16.mxu1 %v5260_v2  ;;  %v5264_v5 = vld [vmem:[#allocation11 + $0x24] ss:$16 sps:$4 sm:$0xff]   ;;  %v5266_v6 = vld [vmem:[#allocation11 + $0x2c] ss:$16 sps:$4 sm:$0xff]   ;;  %v5268_v7 = vld [vmem:[#allocation11 + $0x20] ss:$16 sps:$4 sm:$0xff]  }
  0x94   :  { %408 = vmatpush1.bf16.msra.mxu0 %v5262_v3  ;;  %481 = vmatpush1.bf16.msra.mxu1 %v5263_v4  ;;  %v5269_v8 = vld [vmem:[#allocation11 + $0x28] ss:$16 sps:$4 sm:$0xff]   ;;  %v5270_v9 = vld [vmem:[#allocation11 + $0x44] ss:$16 sps:$4 sm:$0xff]   ;;  %v5272_v10 = vld [vmem:[#allocation11 + $0x4c] ss:$16 sps:$4 sm:$0xff]  }
  0x95   :  { %409 = vmatprep.subr.bf16.mxu0 %v5264_v5  ;;  %482 = vmatprep.subr.bf16.mxu1 %v5266_v6  ;;  %v5274_v11 = vld [vmem:[#allocation11 + $0x40] ss:$16 sps:$4 sm:$0xff]   ;;  %v5275_v12 = vld [vmem:[#allocation11 + $0x48] ss:$16 sps:$4 sm:$0xff]   ;;  %v5276_v13 = vld [vmem:[#allocation11 + $0x64] ss:$16 sps:$4 sm:$0xff]  }
  0x96   :  { %v5278_v14 = vld [vmem:[#allocation11 + $0x6c] ss:$16 sps:$4 sm:$0xff]   ;;  %v5280_v15 = vld [vmem:[#allocation11 + $0x60] ss:$16 sps:$4 sm:$0xff]   ;;  %v5281_v16 = vld [vmem:[#allocation11 + $0x68] ss:$16 sps:$4 sm:$0xff]  }
  0x97   :  { %v5282_v17 = vld [vmem:[#allocation11 + $0x84] ss:$16 sps:$4 sm:$0xff]   ;;  %v5284_v18 = vld [vmem:[#allocation11 + $0x8c] ss:$16 sps:$4 sm:$0xff]   ;;  %v5286_v19 = vld [vmem:[#allocation11 + $0x80] ss:$16 sps:$4 sm:$0xff]  }
  0x98   :  { %410 = vmatpush1.bf16.msra.mxu0 %v5268_v7  ;;  %483 = vmatpush1.bf16.msra.mxu1 %v5269_v8  ;;  %v5287_v20 = vld [vmem:[#allocation11 + $0x88] ss:$16 sps:$4 sm:$0xff]   ;;  %v5288_v21 = vld [vmem:[#allocation11 + $0xa4] ss:$16 sps:$4 sm:$0xff]   ;;  %v5290_v22 = vld [vmem:[#allocation11 + $0xac] ss:$16 sps:$4 sm:$0xff]   ;;  %v203_v8 = vlaneseq }
  0x99   :  { %411 = vmatprep.subr.bf16.mxu0 %v5270_v9  ;;  %484 = vmatprep.subr.bf16.mxu1 %v5272_v10  ;;  %v5292_v23 = vld [vmem:[#allocation11 + $0xa0] ss:$16 sps:$4 sm:$0xff]   ;;  %v5293_v24 = vld [vmem:[#allocation11 + $0xa8] ss:$16 sps:$4 sm:$0xff]   ;;  %v5294_v25 = vld [vmem:[#allocation11 + $0xc4] ss:$16 sps:$4 sm:$0xff]  }
  0x9a   :  { %v5296_v26 = vld [vmem:[#allocation11 + $0xcc] ss:$16 sps:$4 sm:$0xff]   ;;  %v5298_v27 = vld [vmem:[#allocation11 + $0xc0] ss:$16 sps:$4 sm:$0xff]   ;;  %v5299_v28 = vld [vmem:[#allocation11 + $0xc8] ss:$16 sps:$4 sm:$0xff]  }
  0x9b   :  { %v5300_v29 = vld [vmem:[#allocation11 + $0xe4] ss:$16 sps:$4 sm:$0xff]   ;;  %v5302_v30 = vld [vmem:[#allocation11 + $0xec] ss:$16 sps:$4 sm:$0xff]   ;;  %v5304_v31 = vld [vmem:[#allocation11 + $0xe0] ss:$16 sps:$4 sm:$0xff]  }
  0x9c   :  { %412 = vmatpush1.bf16.msra.mxu0 %v5274_v11  ;;  %485 = vmatpush1.bf16.msra.mxu1 %v5275_v12  ;;  %v5305_v32 = vld [vmem:[#allocation11 + $0xe8] ss:$16 sps:$4 sm:$0xff]   ;;  %v6266_v33 = vld [vmem:[#allocation12 + $0x4] ss:$16 sps:$4 sm:$0xff]   ;;  %v6268_v34 = vld [vmem:[#allocation12 + $0xc] ss:$16 sps:$4 sm:$0xff]  }
  0x9d   :  { %413 = vmatprep.subr.bf16.mxu0 %v5276_v13  ;;  %486 = vmatprep.subr.bf16.mxu1 %v5278_v14  ;;  %v5306_v35 = vld [vmem:[%s7479_s0] sm:$0xff]   ;;  %v6275_v37 = vld [vmem:[#allocation12 + $0x8] ss:$16 sps:$4 sm:$0xff]   ;;  %v6281_v39 = vld [vmem:[#allocation12 + $0x2c] ss:$16 sps:$4 sm:$0xff]   ;;  %v6418_v9 = vshrl.u32 %v203_v8, 7 }
  0x9e   :  { %v6273_v36 = vld [vmem:[#allocation12] ss:$16 sps:$4 sm:$0xff]   ;;  %v6279_v38 = vld [vmem:[#allocation12 + $0x24] ss:$16 sps:$4 sm:$0xff]   ;;  %v6287_v41 = vld [vmem:[#allocation12 + $0x28] ss:$16 sps:$4 sm:$0xff]  }
  0x9f   :  { %v6283_v40 = vld [vmem:[#allocation12 + $0x20] ss:$16 sps:$4 sm:$0xff]   ;;  %v6291_v42 = vld [vmem:[#allocation12 + $0x44] ss:$16 sps:$4 sm:$0xff]   ;;  %v6293_v43 = vld [vmem:[#allocation12 + $0x4c] ss:$16 sps:$4 sm:$0xff]  }
  0xa0   :  { %414 = vmatpush1.bf16.msra.mxu0 %v5280_v15  ;;  %487 = vmatpush1.bf16.msra.mxu1 %v5281_v16  ;;  %v6300_v45 = vld [vmem:[#allocation12 + $0x40] ss:$16 sps:$4 sm:$0xff]   ;;  %v6302_v46 = vld [vmem:[#allocation12 + $0x48] ss:$16 sps:$4 sm:$0xff]   ;;  %v6306_v47 = vld [vmem:[#allocation12 + $0x64] ss:$16 sps:$4 sm:$0xff]  }
  0xa1   :  { %415 = vmatprep.subr.bf16.mxu0 %v5282_v17  ;;  %488 = vmatprep.subr.bf16.mxu1 %v5284_v18  ;;  %v6310_v48 = vld [vmem:[#allocation12 + $0x6c] ss:$16 sps:$4 sm:$0xff]   ;;  %v6312_v49 = vld [vmem:[#allocation12 + $0x60] ss:$16 sps:$4 sm:$0xff]   ;;  %v6314_v50 = vld [vmem:[#allocation12 + $0x68] ss:$16 sps:$4 sm:$0xff]  }
  0xa2   :  { %v6318_v51 = vld [vmem:[#allocation12 + $0x84] ss:$16 sps:$4 sm:$0xff]   ;;  %v6322_v52 = vld [vmem:[#allocation12 + $0x8c] ss:$16 sps:$4 sm:$0xff]   ;;  %v6329_v54 = vld [vmem:[#allocation12 + $0x80] ss:$16 sps:$4 sm:$0xff]  }
  0xa3   :  { %v5332_v53 = vld [vmem:[%s7479_s0 + $0x10] sm:$0xff]   ;;  %v6331_v55 = vld [vmem:[#allocation12 + $0x88] ss:$16 sps:$4 sm:$0xff]   ;;  %v6335_v57 = vld [vmem:[#allocation12 + $0xac] ss:$16 sps:$4 sm:$0xff]   ;;  %7501 = vst [vmem:[#allocation31_spill] sm:$0xff] %v6418_v9 }
  0xa4   :  { %416 = vmatpush1.bf16.msra.mxu0 %v5286_v19  ;;  %489 = vmatpush1.bf16.msra.mxu1 %v5287_v20  ;;  %v6333_v56 = vld [vmem:[#allocation12 + $0xa4] ss:$16 sps:$4 sm:$0xff]   ;;  %v6341_v58 = vld [vmem:[#allocation12 + $0xa0] ss:$16 sps:$4 sm:$0xff]   ;;  %v6343_v59 = vld [vmem:[#allocation12 + $0xa8] ss:$16 sps:$4 sm:$0xff]  }
  0xa5   :  { %417 = vmatprep.subr.bf16.mxu0 %v5288_v21  ;;  %490 = vmatprep.subr.bf16.mxu1 %v5290_v22  ;;  %v6345_v60 = vld [vmem:[#allocation12 + $0xc4] ss:$16 sps:$4 sm:$0xff]   ;;  %v6347_v61 = vld [vmem:[#allocation12 + $0xcc] ss:$16 sps:$4 sm:$0xff]   ;;  %v6358_v63 = vld [vmem:[#allocation12 + $0xc0] ss:$16 sps:$4 sm:$0xff]  }
  0xa6   :  { %v5345_v62 = vld [vmem:[%s7479_s0 + $0x18] sm:$0xff]   ;;  %v6362_v2 = vld [vmem:[#allocation12 + $0xe4] ss:$16 sps:$4 sm:$0xff]   ;;  %v6370_v4 = vld [vmem:[#allocation12 + $0xe0] ss:$16 sps:$4 sm:$0xff]   ;;  %v7495_v10 = vsub.s32 2, %v6418_v9 }
  0xa7   :  { %v6360_v1 = vld [vmem:[#allocation12 + $0xc8] ss:$16 sps:$4 sm:$0xff]   ;;  %v6364_v3 = vld [vmem:[#allocation12 + $0xec] ss:$16 sps:$4 sm:$0xff]   ;;  %v153_v6 = vld [vmem:[#allocation6] sm:$0xff]  ;;  %v7493_v11 = vsub.s32 3, %v6418_v9 }
  0xa8   :  { %418 = vmatpush1.bf16.msra.mxu0 %v5292_v23  ;;  %491 = vmatpush1.bf16.msra.mxu1 %v5293_v24  ;;  %v6372_v5 = vld [vmem:[#allocation12 + $0xe8] ss:$16 sps:$4 sm:$0xff]   ;;  %v591_v7 = vpack.c.bf16 %v153_v6, %v153_v6  ;;  %v7496_v12 = vsub.s32 0, %v6418_v9  ;;  %v201_v13 = vld [vmem:[#allocation14] sm:$0xf]  ;;  %v7494_v14 = vsub.s32 1, %v6418_v9 }
  0xa9   :  { %419 = vmatprep.subr.bf16.mxu0 %v5294_v25  ;;  %492 = vmatprep.subr.bf16.mxu1 %v5296_v26  ;;  %v6426_v15 = vrot.slane %v201_v13, %v7495_v10  ;;  %v6434_v18 = vrot.slane %v201_v13, %v7493_v11  ;;  %vm6076_vm0 = vmmov 0   ;;  %s6077_s17 = smov [#allocation21]  }
  0xaa   :  { %v206_v19 = vrot.slane %v201_v13, %v7496_v12  ;;  %v210_v22 = vrot.slane %v201_v13, %v7494_v14  ;;  %s4759_s6 = sshll.u32 %s6077_s17, 4  ;;  %s4760_s6 = int_to_ptr.vmem [resolvable:$true] %s4759_s6 }
  0xab   :  { %s5982_s1 = scalar_lea.vmem %s4760_s6, 256  ;;  %p5987_p9 = scmp.lt.s32.totalorder %s4760_s6, %s4760_s6 }
  0xac   :  { %420 = vmatpush1.bf16.msra.mxu0 %v5298_v27  ;;  %493 = vmatpush1.bf16.msra.mxu1 %v5299_v28  ;;  %p5983_p8 = scmp.ne.s32.totalorder %s4760_s6, %s5982_s1  ;;  %p5988_p10 = scmp.lt.s32.totalorder %s5982_s1, %s5982_s1 }
  0xad   :  { %421 = vmatprep.subr.bf16.mxu0 %v5300_v29  ;;  %494 = vmatprep.subr.bf16.mxu1 %v5302_v30 }
  0xae   :  { %p5989_p11 = por %p5988_p10, %p5987_p9 }
  0xb0   :  { %422 = vmatpush1.bf16.msra.mxu0 %v5304_v31  ;;  %495 = vmatpush1.bf16.msra.mxu1 %v5305_v32  ;;  %p5990_p12 = pnand %p5989_p11, %p5983_p8 }
  0xb1   :  { %784 = vmatprep.subr.bf16.mxu0 %v6266_v33  ;;  %825 = vmatprep.subr.bf16.mxu1 %v6268_v34 }
  0xb3   :  { %440 = vmatmul.mubr.bf16.vlgmr.msra.gmra.mrb[0].mxu0 %v5306_v35  ;;  %513 = vmatmul.mubr.bf16.vlgmr.msra.gmra.mrb[0].mxu1 %v5306_v35 }
  0xb4   :  { %785 = vmatpush1.bf16.msra.mxu0 %v6273_v36  ;;  %826 = vmatpush1.bf16.msra.mxu1 %v6275_v37 }
  0xb5   :  { %786 = vmatprep.subr.bf16.mxu0 %v6279_v38  ;;  %827 = vmatprep.subr.bf16.mxu1 %v6281_v39 }
  0xb6   :  { %449 = vmatprep.mubr.bf16.mxu0 %v7497_v0  ;;  %522 = vmatprep.mubr.bf16.mxu1 %v7497_v0 }
  0xb8   :  { %787 = vmatpush1.bf16.msra.mxu0 %v6283_v40  ;;  %828 = vmatpush1.bf16.msra.mxu1 %v6287_v41 }
  0xb9   :  { %788 = vmatprep.subr.bf16.mxu0 %v6291_v42  ;;  %829 = vmatprep.subr.bf16.mxu1 %v6293_v43 }
  0xbb   :  { %450 = vmatmul.mubr.bf16.gmra.mrb[4].mxu0 %v5319_v44  ;;  %523 = vmatmul.mubr.bf16.gmra.mrb[4].mxu1 %v5319_v44 }
  0xbc   :  { %789 = vmatpush1.bf16.msra.mxu0 %v6300_v45  ;;  %830 = vmatpush1.bf16.msra.mxu1 %v6302_v46 }
  0xbd   :  { %790 = vmatprep.subr.bf16.mxu0 %v6306_v47  ;;  %831 = vmatprep.subr.bf16.mxu1 %v6310_v48 }
  0xbe   :  { %459 = vmatprep.mubr.bf16.mxu0 %v7497_v0  ;;  %532 = vmatprep.mubr.bf16.mxu1 %v7497_v0 }
  0xc0   :  { %791 = vmatpush1.bf16.msra.mxu0 %v6312_v49  ;;  %832 = vmatpush1.bf16.msra.mxu1 %v6314_v50 }
  0xc1   :  { %792 = vmatprep.subr.bf16.mxu0 %v6318_v51  ;;  %833 = vmatprep.subr.bf16.mxu1 %v6322_v52 }
  0xc3   :  { %460 = vmatmul.mubr.bf16.gmra.mrb[8].mxu0 %v5332_v53  ;;  %533 = vmatmul.mubr.bf16.gmra.mrb[8].mxu1 %v5332_v53 }
  0xc4   :  { %793 = vmatpush1.bf16.msra.mxu0 %v6329_v54  ;;  %834 = vmatpush1.bf16.msra.mxu1 %v6331_v55 }
  0xc5   :  { %794 = vmatprep.subr.bf16.mxu0 %v6333_v56  ;;  %835 = vmatprep.subr.bf16.mxu1 %v6335_v57 }
  0xc6   :  { %469 = vmatprep.mubr.bf16.mxu0 %v7497_v0  ;;  %542 = vmatprep.mubr.bf16.mxu1 %v7497_v0 }
  0xc8   :  { %795 = vmatpush1.bf16.msra.mxu0 %v6341_v58  ;;  %836 = vmatpush1.bf16.msra.mxu1 %v6343_v59 }
  0xc9   :  { %796 = vmatprep.subr.bf16.mxu0 %v6345_v60  ;;  %837 = vmatprep.subr.bf16.mxu1 %v6347_v61 }
  0xcb   :  { %470 = vmatmul.mubr.bf16.gmra.mrb[12].mxu0 %v5345_v62  ;;  %543 = vmatmul.mubr.bf16.gmra.mrb[12].mxu1 %v5345_v62 }
  0xcc   :  { %797 = vmatpush1.bf16.msra.mxu0 %v6358_v63  ;;  %838 = vmatpush1.bf16.msra.mxu1 %v6360_v1 }
  0xcd   :  { %798 = vmatprep.subr.bf16.mxu0 %v6362_v2  ;;  %839 = vmatprep.subr.bf16.mxu1 %v6364_v3 }
  0xce   :  { %816 = vmatprep.mubr.bf16.mxu0 %v7497_v0  ;;  %857 = vmatprep.mubr.bf16.mxu1 %v7497_v0 }
  0xd0   :  { %799 = vmatpush1.bf16.msra.mxu0 %v6370_v4  ;;  %840 = vmatpush1.bf16.msra.mxu1 %v6372_v5 }
  0xd1   :  { %1093 = vmatprep.subr.bf16.mxu0 %v6266_v33  ;;  %1134 = vmatprep.subr.bf16.mxu1 %v6268_v34 }
  0xd3   :  { %817 = vmatmul.mubr.bf16.vlgmr.msra.gmra.mrb[16].mxu0 %v591_v7  ;;  %858 = vmatmul.mubr.bf16.vlgmr.msra.gmra.mrb[16].mxu1 %v591_v7 }
  0xd4   :  { %1094 = vmatpush1.bf16.msra.mxu0 %v6273_v36  ;;  %1135 = vmatpush1.bf16.msra.mxu1 %v6275_v37 }
  0xd5   :  { %1095 = vmatprep.subr.bf16.mxu0 %v6279_v38  ;;  %1136 = vmatprep.subr.bf16.mxu1 %v6281_v39 }
  0xd6   :  { %1125 = vmatprep.mubr.bf16.mxu0 %v7497_v0  ;;  %1166 = vmatprep.mubr.bf16.mxu1 %v7497_v0 }
  0xd8   :  { %1096 = vmatpush1.bf16.msra.mxu0 %v6283_v40  ;;  %1137 = vmatpush1.bf16.msra.mxu1 %v6287_v41 }
  0xd9   :  { %1097 = vmatprep.subr.bf16.mxu0 %v6291_v42  ;;  %1138 = vmatprep.subr.bf16.mxu1 %v6293_v43 }
  0xdc   :  { %1098 = vmatpush1.bf16.msra.mxu0 %v6300_v45  ;;  %1139 = vmatpush1.bf16.msra.mxu1 %v6302_v46 }
  0xdd   :  { %1099 = vmatprep.subr.bf16.mxu0 %v6306_v47  ;;  %1140 = vmatprep.subr.bf16.mxu1 %v6310_v48 }
  0xe0   :  { %1100 = vmatpush1.bf16.msra.mxu0 %v6312_v49  ;;  %1141 = vmatpush1.bf16.msra.mxu1 %v6314_v50 }
  0xe1   :  { %1101 = vmatprep.subr.bf16.mxu0 %v6318_v51  ;;  %1142 = vmatprep.subr.bf16.mxu1 %v6322_v52 }
  0xe4   :  { %1102 = vmatpush1.bf16.msra.mxu0 %v6329_v54  ;;  %1143 = vmatpush1.bf16.msra.mxu1 %v6331_v55 }
  0xe5   :  { %1103 = vmatprep.subr.bf16.mxu0 %v6333_v56  ;;  %1144 = vmatprep.subr.bf16.mxu1 %v6335_v57 }
  0xe8   :  { %1104 = vmatpush1.bf16.msra.mxu0 %v6341_v58  ;;  %1145 = vmatpush1.bf16.msra.mxu1 %v6343_v59 }
  0xe9   :  { %1105 = vmatprep.subr.bf16.mxu0 %v6345_v60  ;;  %1146 = vmatprep.subr.bf16.mxu1 %v6347_v61 }
  0xec   :  { %1106 = vmatpush1.bf16.msra.mxu0 %v6358_v63  ;;  %1147 = vmatpush1.bf16.msra.mxu1 %v6360_v1 }
  0xed   :  { %1107 = vmatprep.subr.bf16.mxu0 %v6362_v2  ;;  %1148 = vmatprep.subr.bf16.mxu1 %v6364_v3 }
  0xf0   :  { %1108 = vmatpush1.bf16.msra.mxu0 %v6370_v4  ;;  %1149 = vmatpush1.bf16.msra.mxu1 %v6372_v5 }
  0xf1   :  { %1403 = vmatprep.subr.bf16.mxu0 %v6266_v33  ;;  %1444 = vmatprep.subr.bf16.mxu1 %v6268_v34 }
 0x186   :  { %v6428_v16 = vpop.f32.mrb[0].mxu0  ;;  %v6430_v17 = vpop.f32.mrb[0].mxu1 }
 0x187   :  { %v443_v20 = vpop.f32.mrb[1].mxu0  ;;  %v516_v21 = vpop.f32.mrb[1].mxu1 }
 0x188   :  { %v445_v23 = vpop.f32.mrb[2].mxu0  ;;  %v518_v24 = vpop.f32.mrb[2].mxu1 }
 0x189   :  { %v6440_v25 = vadd.f32 %v445_v23, %v206_v19  ;;  %v447_v26 = vpop.f32.mrb[3].mxu0  ;;  %v6443_v27 = vadd.f32 %v518_v24, %v6426_v15  ;;  %v520_v28 = vpop.f32.mrb[3].mxu1 }
 0x18a   :  { %v6445_v29 = vadd.f32 %v447_v26, %v210_v22  ;;  %v6448_v30 = vadd.f32 %v520_v28, %v6434_v18 }
 0x18e   :  { %v451_v31 = vpop.f32.mrb[4].mxu0  ;;  %v524_v32 = vpop.f32.mrb[4].mxu1 }
 0x18f   :  { %v6450_v35 = vadd.f32 %v451_v31, %v206_v19  ;;  %v453_v44 = vpop.f32.mrb[5].mxu0  ;;  %v6453_v53 = vadd.f32 %v524_v32, %v6426_v15  ;;  %v526_v62 = vpop.f32.mrb[5].mxu1 }
 0x190   :  { %v6455_v6 = vadd.f32 %v453_v44, %v210_v22  ;;  %v455_v7 = vpop.f32.mrb[6].mxu0  ;;  %v6458_v8 = vadd.f32 %v526_v62, %v6434_v18  ;;  %v528_v13 = vpop.f32.mrb[6].mxu1 }
 0x191   :  { %v6460_v23 = vadd.f32 %v455_v7, %v206_v19  ;;  %v457_v24 = vpop.f32.mrb[7].mxu0  ;;  %v6463_v26 = vadd.f32 %v528_v13, %v6426_v15  ;;  %v530_v28 = vpop.f32.mrb[7].mxu1 }
 0x192   :  { %7502 = vst [vmem:[#allocation32_spill] sm:$0xff] %v6458_v8  ;;  %v6465_v31 = vadd.f32 %v457_v24, %v210_v22  ;;  %v6468_v32 = vadd.f32 %v530_v28, %v6434_v18 }
 0x193   :  { %7503 = vst [vmem:[#allocation33_spill] sm:$0xff] %v6460_v23  ;;  %7504 = vst [vmem:[#allocation34_spill] sm:$0xff] %v6463_v26 }
 0x194   :  { %7505 = vst [vmem:[#allocation35_spill] sm:$0xff] %v6465_v31  ;;  %7506 = vst [vmem:[#allocation36_spill] sm:$0xff] %v6468_v32 }
 0x196   :  { %v461_v11 = vpop.f32.mrb[8].mxu0  ;;  %v534_v44 = vpop.f32.mrb[8].mxu1 }
 0x197   :  { %v6470_v14 = vadd.f32 %v461_v11, %v206_v19  ;;  %v463_v10 = vpop.f32.mrb[9].mxu0  ;;  %v6473_v62 = vadd.f32 %v534_v44, %v6426_v15  ;;  %v536_v7 = vpop.f32.mrb[9].mxu1 }
 0x198   :  { %v6475_v12 = vadd.f32 %v463_v10, %v210_v22  ;;  %v465_v0 = vpop.f32.mrb[10].mxu0  ;;  %v6478_v13 = vadd.f32 %v536_v7, %v6434_v18  ;;  %v538_v24 = vpop.f32.mrb[10].mxu1 }
 0x199   :  { %7507 = vst [vmem:[#allocation37_spill] sm:$0xff] %v6470_v14  ;;  %7508 = vst [vmem:[#allocation38_spill] sm:$0xff] %v6473_v62  ;;  %v6480_v9 = vadd.f32 %v465_v0, %v206_v19  ;;  %v467_v28 = vpop.f32.mrb[11].mxu0  ;;  %v6483_v32 = vadd.f32 %v538_v24, %v6426_v15  ;;  %v540_v11 = vpop.f32.mrb[11].mxu1 }
 0x19a   :  { %7509 = vst [vmem:[#allocation39_spill] sm:$0xff] %v6475_v12  ;;  %7510 = vst [vmem:[#allocation40_spill] sm:$0xff] %v6478_v13  ;;  %v6485_v14 = vadd.f32 %v467_v28, %v210_v22  ;;  %v6488_v44 = vadd.f32 %v540_v11, %v6434_v18 }
 0x19b   :  { %7511 = vst [vmem:[#allocation41_spill] sm:$0xff] %v6480_v9  ;;  %7512 = vst [vmem:[#allocation42_spill] sm:$0xff] %v6483_v32 }
 0x19c   :  { %7513 = vst [vmem:[#allocation43_spill] sm:$0xff] %v6485_v14  ;;  %7514 = vst [vmem:[#allocation44_spill] sm:$0xff] %v6488_v44 }
 0x19e   :  { %v471_v62 = vpop.f32.mrb[12].mxu0  ;;  %v544_v10 = vpop.f32.mrb[12].mxu1 }
 0x19f   :  { %v6490_v12 = vadd.f32 %v471_v62, %v206_v19  ;;  %v473_v31 = vpop.f32.mrb[13].mxu0  ;;  %v6493_v7 = vadd.f32 %v544_v10, %v6426_v15  ;;  %v546_v0 = vpop.f32.mrb[13].mxu1 }
 0x1a0   :  { %v6495_v9 = vadd.f32 %v473_v31, %v210_v22  ;;  %v475_v13 = vpop.f32.mrb[14].mxu0  ;;  %v6498_v24 = vadd.f32 %v546_v0, %v6434_v18  ;;  %v548_v28 = vpop.f32.mrb[14].mxu1  ;;  %v442_v31 = vadd.f32 %v6428_v16, %v206_v19  ;;  %v444_v0 = vadd.f32 %v443_v20, %v210_v22 }
 0x1a1   :  { %7515 = vst [vmem:[#allocation45_spill] sm:$0xff] %v6490_v12  ;;  %7516 = vst [vmem:[#allocation46_spill] sm:$0xff] %v6493_v7  ;;  %v6500_v14 = vadd.f32 %v475_v13, %v206_v19  ;;  %v477_v11 = vpop.f32.mrb[15].mxu0  ;;  %v6503_v44 = vadd.f32 %v548_v28, %v6426_v15  ;;  %v550_v62 = vpop.f32.mrb[15].mxu1 }
 0x1a2   :  { %7517 = vst [vmem:[#allocation47_spill] sm:$0xff] %v6495_v9  ;;  %7518 = vst [vmem:[#allocation48_spill] sm:$0xff] %v6498_v24  ;;  %v6505_v12 = vadd.f32 %v477_v11, %v210_v22  ;;  %v6508_v10 = vadd.f32 %v550_v62, %v6434_v18  ;;  %v515_v9 = vadd.f32 %v6430_v17, %v6426_v15 }
 0x1a3   :  { %7519 = vst [vmem:[#allocation49_spill] sm:$0xff] %v6500_v14  ;;  %7520 = vst [vmem:[#allocation50_spill] sm:$0xff] %v6503_v44  ;;  %v517_v24 = vadd.f32 %v516_v21, %v6434_v18  ;;  %v157_v21 = vld [vmem:[#allocation9] sm:$0xff] }
 0x1a4   :  { %7521 = vst [vmem:[#allocation51_spill] sm:$0xff] %v6505_v12  ;;  %7522 = vst [vmem:[#allocation52_spill] sm:$0xff] %v6508_v10 }
 0x1a6   :  { %v818_v13 = vpop.f32.mrb[16].mxu0  ;;  %v859_v14 = vpop.f32.mrb[16].mxu1 }
 0x1a7   :  { %v866_v7 = vadd.f32 %v818_v13, %v442_v31  ;;  %v868_v32 = vadd.f32 %v859_v14, %v515_v9  ;;  %v820_v28 = vpop.f32.mrb[17].mxu0  ;;  %v861_v44 = vpop.f32.mrb[17].mxu1  ;;  %v7523_v31 = vmov 0  }
 0x1a8   :  { %v867_v26 = vadd.f32 %v820_v28, %v444_v0  ;;  %v869_v11 = vadd.f32 %v861_v44, %v517_v24  ;;  %v822_v12 = vpop.f32.mrb[18].mxu0  ;;  %v863_v23 = vpop.f32.mrb[18].mxu1 }
 0x1a9   :  { %v4862_v62 = vmul.f32 -1.442695, %v866_v7  ;;  %v823_v10 = vpop.f32.mrb[19].mxu0  ;;  %v864_v8 = vpop.f32.mrb[19].mxu1 }
 0x1aa   :  { %v4863_v16 = vmul.f32 -1.442695, %v867_v26  ;;  %v4864_v15 = vmul.f32 -1.442695, %v869_v11 }
 0x1ab   :  { %5514 = vpow2.f32 %v4862_v62 }
 0x1ac   :  { %5516 = vpow2.f32 %v4863_v16 }
 0x1ad   :  { %5518 = vpow2.f32 %v4864_v15 }
 0x1ae   :  { %5520 = vtanh.f32 %v868_v32 }
 0x1b5   :  { %v5515_v17 = vpop.eup %5514 }
 0x1b6   :  { %v5517_v19 = vpop.eup %5516  ;;  %v873_v18 = vadd.f32 1.0, %v5515_v17 }
 0x1b7   :  { %v879_v20 = vadd.f32 1.0, %v5517_v19  ;;  %v5519_v9 = vpop.eup %5518 }
 0x1b8   :  { %5522 = vrcp.f32 %v873_v18  ;;  %v5521_v14 = vpop.eup %5520  ;;  %v886_v44 = vadd.f32 1.0, %v5519_v9 }
 0x1b9   :  { %5524 = vrcp.f32 %v879_v20 }
 0x1ba   :  { %5526 = vrcp.f32 %v886_v44 }
 0x1c2   :  { %v5523_v12 = vpop.eup %5522 }
 0x1c3   :  { %v5525_v22 = vpop.eup %5524  ;;  %v890_v23 = vmul.f32 %v5523_v12, %v5521_v14 }
 0x1c4   :  { %v889_v8 = vmul.f32 %v5525_v22, %v157_v21  ;;  %v5527_v7 = vpop.eup %5526 }
 0x1c6   :  { %v6514_v26 = vadd.f32 %v890_v23, %v889_v8 }
 0x1c8   :  { %5528 = vtanh.f32 %v6514_v26 }
 0x1d2   :  { %v5529_v24 = vpop.eup %5528 }
 0x1d3   :  { %v893_v10 = vmul.f32 %v5529_v24, %v5527_v7 }
 0x1d5   :  { %v894_v32 = vpack.c.bf16 %v893_v10, %v893_v10 }
 0x1d7   :  { %895 = vst [vmem:[#allocation4] sm:$0xf] %v894_v32  ;;  %1126 = vmatmul.mubr.bf16.vlgmr.msra.gmra.mrb[20].mxu0 %v894_v32  ;;  %1167 = vmatmul.mubr.bf16.vlgmr.msra.gmra.mrb[20].mxu1 %v894_v32 }
 0x1d8   :  { %1404 = vmatpush1.bf16.msra.mxu0 %v6273_v36  ;;  %1445 = vmatpush1.bf16.msra.mxu1 %v6275_v37 }
 0x1d9   :  { %1405 = vmatprep.subr.bf16.mxu0 %v6279_v38  ;;  %1446 = vmatprep.subr.bf16.mxu1 %v6281_v39 }
 0x1da   :  { %1435 = vmatprep.mubr.bf16.mxu0 %v7523_v31  ;;  %1476 = vmatprep.mubr.bf16.mxu1 %v7523_v31 }
 0x1dc   :  { %1406 = vmatpush1.bf16.msra.mxu0 %v6283_v40  ;;  %1447 = vmatpush1.bf16.msra.mxu1 %v6287_v41 }
 0x1dd   :  { %1407 = vmatprep.subr.bf16.mxu0 %v6291_v42  ;;  %1448 = vmatprep.subr.bf16.mxu1 %v6293_v43 }
 0x1e0   :  { %1408 = vmatpush1.bf16.msra.mxu0 %v6300_v45  ;;  %1449 = vmatpush1.bf16.msra.mxu1 %v6302_v46 }
 0x1e1   :  { %1409 = vmatprep.subr.bf16.mxu0 %v6306_v47  ;;  %1450 = vmatprep.subr.bf16.mxu1 %v6310_v48 }
 0x1e4   :  { %1410 = vmatpush1.bf16.msra.mxu0 %v6312_v49  ;;  %1451 = vmatpush1.bf16.msra.mxu1 %v6314_v50 }
 0x1e5   :  { %1411 = vmatprep.subr.bf16.mxu0 %v6318_v51  ;;  %1452 = vmatprep.subr.bf16.mxu1 %v6322_v52 }
 0x1e8   :  { %1412 = vmatpush1.bf16.msra.mxu0 %v6329_v54  ;;  %1453 = vmatpush1.bf16.msra.mxu1 %v6331_v55 }
 0x1e9   :  { %1413 = vmatprep.subr.bf16.mxu0 %v6333_v56  ;;  %1454 = vmatprep.subr.bf16.mxu1 %v6335_v57 }
 0x1ec   :  { %1414 = vmatpush1.bf16.msra.mxu0 %v6341_v58  ;;  %1455 = vmatpush1.bf16.msra.mxu1 %v6343_v59 }
 0x1ed   :  { %1415 = vmatprep.subr.bf16.mxu0 %v6345_v60  ;;  %1456 = vmatprep.subr.bf16.mxu1 %v6347_v61 }
 0x1f0   :  { %1416 = vmatpush1.bf16.msra.mxu0 %v6358_v63  ;;  %1457 = vmatpush1.bf16.msra.mxu1 %v6360_v1 }
 0x1f1   :  { %1417 = vmatprep.subr.bf16.mxu0 %v6362_v2  ;;  %1458 = vmatprep.subr.bf16.mxu1 %v6364_v3 }
 0x1f4   :  { %1418 = vmatpush1.bf16.msra.mxu0 %v6370_v4  ;;  %1459 = vmatpush1.bf16.msra.mxu1 %v6372_v5 }
 0x1f5   :  { %1713 = vmatprep.subr.bf16.mxu0 %v6266_v33  ;;  %1754 = vmatprep.subr.bf16.mxu1 %v6268_v34 }
 0x2aa   :  { %v1127_v0 = vpop.f32.mrb[20].mxu0  ;;  %v1168_v13 = vpop.f32.mrb[20].mxu1 }
 0x2ab   :  { %v1175_v28 = vadd.f32 %v1127_v0, %v6440_v25  ;;  %v1177_v11 = vadd.f32 %v1168_v13, %v6443_v27  ;;  %v1129_v62 = vpop.f32.mrb[21].mxu0  ;;  %v1170_v16 = vpop.f32.mrb[21].mxu1 }
 0x2ac   :  { %v1176_v15 = vadd.f32 %v1129_v62, %v6445_v29  ;;  %v1178_v17 = vadd.f32 %v1170_v16, %v6448_v30  ;;  %v1131_v19 = vpop.f32.mrb[22].mxu0  ;;  %v1172_v18 = vpop.f32.mrb[22].mxu1  ;;  %v6613_v62 = vld [vmem:[#allocation12 + $0x24] ss:$16 sps:$4 sm:$0xff]   ;;  %v6615_v16 = vld [vmem:[#allocation12 + $0x2c] ss:$16 sps:$4 sm:$0xff]  }
 0x2ad   :  { %v4897_v20 = vmul.f32 -1.442695, %v1175_v28  ;;  %v1132_v9 = vpop.f32.mrb[23].mxu0  ;;  %v1173_v14 = vpop.f32.mrb[23].mxu1  ;;  %v6605_v28 = vld [vmem:[#allocation12] ss:$16 sps:$4 sm:$0xff]  }
 0x2ae   :  { %v4898_v33 = vmul.f32 -1.442695, %v1176_v15  ;;  %v4899_v34 = vmul.f32 -1.442695, %v1178_v17  ;;  %v6617_v15 = vld [vmem:[#allocation12 + $0x20] ss:$16 sps:$4 sm:$0xff]  }
 0x2af   :  { %5530 = vpow2.f32 %v4897_v20  ;;  %v6619_v17 = vld [vmem:[#allocation12 + $0x28] ss:$16 sps:$4 sm:$0xff]   ;;  %v6625_v19 = vld [vmem:[#allocation12 + $0x44] ss:$16 sps:$4 sm:$0xff]   ;;  %v6627_v18 = vld [vmem:[#allocation12 + $0x4c] ss:$16 sps:$4 sm:$0xff]  }
 0x2b0   :  { %5532 = vpow2.f32 %v4898_v33  ;;  %v6629_v20 = vld [vmem:[#allocation12 + $0x40] ss:$16 sps:$4 sm:$0xff]   ;;  %v6631_v9 = vld [vmem:[#allocation12 + $0x48] ss:$16 sps:$4 sm:$0xff]   ;;  %v6637_v14 = vld [vmem:[#allocation12 + $0x64] ss:$16 sps:$4 sm:$0xff]  }
 0x2b1   :  { %5534 = vpow2.f32 %v4899_v34  ;;  %v6639_v33 = vld [vmem:[#allocation12 + $0x6c] ss:$16 sps:$4 sm:$0xff]   ;;  %v6641_v34 = vld [vmem:[#allocation12 + $0x60] ss:$16 sps:$4 sm:$0xff]  }
 0x2b2   :  { %5536 = vtanh.f32 %v1177_v11  ;;  %v6607_v11 = vld [vmem:[#allocation12 + $0x8] ss:$16 sps:$4 sm:$0xff]  }
 0x2b9   :  { %v5531_v21 = vpop.eup %5530 }
 0x2ba   :  { %v5533_v12 = vpop.eup %5532  ;;  %v1182_v25 = vadd.f32 1.0, %v5531_v21  ;;  %v6643_v21 = vld [vmem:[#allocation12 + $0x68] ss:$16 sps:$4 sm:$0xff]  }
 0x2bb   :  { %v1188_v27 = vadd.f32 1.0, %v5533_v12  ;;  %v5535_v29 = vpop.eup %5534  ;;  %v6649_v12 = vld [vmem:[#allocation12 + $0x80] ss:$16 sps:$4 sm:$0xff]  }
 0x2bc   :  { %5538 = vrcp.f32 %v1182_v25  ;;  %v5537_v22 = vpop.eup %5536  ;;  %v1195_v8 = vadd.f32 1.0, %v5535_v29  ;;  %v6651_v25 = vld [vmem:[#allocation12 + $0x84] ss:$16 sps:$4 sm:$0xff]   ;;  %v6655_v29 = vld [vmem:[#allocation12 + $0x8c] ss:$16 sps:$4 sm:$0xff]  }
 0x2bd   :  { %5540 = vrcp.f32 %v1188_v27  ;;  %v6653_v27 = vld [vmem:[#allocation12 + $0x88] ss:$16 sps:$4 sm:$0xff]  }
 0x2be   :  { %5542 = vrcp.f32 %v1195_v8  ;;  %v6670_v8 = vld [vmem:[#allocation12 + $0xc4] ss:$16 sps:$4 sm:$0xff]  }
 0x2c6   :  { %v5539_v30 = vpop.eup %5538 }
 0x2c7   :  { %v5541_v23 = vpop.eup %5540  ;;  %v1199_v44 = vmul.f32 %v5539_v30, %v5537_v22  ;;  %v6657_v22 = vld [vmem:[#allocation12 + $0xa4] ss:$16 sps:$4 sm:$0xff]   ;;  %v6660_v30 = vld [vmem:[#allocation12 + $0xac] ss:$16 sps:$4 sm:$0xff]  }
 0x2c8   :  { %v1198_v7 = vmul.f32 %v5541_v23, %v6514_v26  ;;  %v5543_v10 = vpop.eup %5542  ;;  %v6603_v26 = vld [vmem:[#allocation12 + $0xc] ss:$16 sps:$4 sm:$0xff]   ;;  %v6664_v23 = vld [vmem:[#allocation12 + $0xa0] ss:$16 sps:$4 sm:$0xff]  }
 0x2ca   :  { %v6556_v24 = vadd.f32 %v1199_v44, %v1198_v7  ;;  %v6668_v44 = vld [vmem:[#allocation12 + $0xa8] ss:$16 sps:$4 sm:$0xff]   ;;  %v6673_v7 = vld [vmem:[#allocation12 + $0xcc] ss:$16 sps:$4 sm:$0xff]  }
 0x2cc   :  { %5544 = vtanh.f32 %v6556_v24 }
 0x2d6   :  { %v5545_v32 = vpop.eup %5544 }
 0x2d7   :  { %v1202_v0 = vmul.f32 %v5545_v32, %v5543_v10  ;;  %v6680_v10 = vld [vmem:[#allocation12 + $0xc8] ss:$16 sps:$4 sm:$0xff]   ;;  %v6682_v32 = vld [vmem:[#allocation12 + $0xe4] ss:$16 sps:$4 sm:$0xff]  }
 0x2d9   :  { %v1203_v13 = vpack.c.bf16 %v1202_v0, %v1202_v0  ;;  %v6685_v0 = vld [vmem:[#allocation12 + $0xec] ss:$16 sps:$4 sm:$0xff]  }
 0x2db   :  { %1205 = vst [vmem:[#allocation4 + $0x4] sm:$0xf] %v1203_v13  ;;  %1436 = vmatmul.mubr.bf16.vlgmr.msra.gmra.mrb[24].mxu0 %v1203_v13  ;;  %1477 = vmatmul.mubr.bf16.vlgmr.msra.gmra.mrb[24].mxu1 %v1203_v13  ;;  %v6688_v13 = vld [vmem:[#allocation12 + $0xe0] ss:$16 sps:$4 sm:$0xff]  }
 0x2dc   :  { %1714 = vmatpush1.bf16.msra.mxu0 %v6273_v36  ;;  %1755 = vmatpush1.bf16.msra.mxu1 %v6275_v37 }
 0x2dd   :  { %1715 = vmatprep.subr.bf16.mxu0 %v6279_v38  ;;  %1756 = vmatprep.subr.bf16.mxu1 %v6281_v39 }
 0x2de   :  { %1745 = vmatprep.mubr.bf16.mxu0 %v7523_v31  ;;  %1786 = vmatprep.mubr.bf16.mxu1 %v7523_v31 }
 0x2e0   :  { %1716 = vmatpush1.bf16.msra.mxu0 %v6283_v40  ;;  %1757 = vmatpush1.bf16.msra.mxu1 %v6287_v41 }
 0x2e1   :  { %1717 = vmatprep.subr.bf16.mxu0 %v6291_v42  ;;  %1758 = vmatprep.subr.bf16.mxu1 %v6293_v43  ;;  %v7524_v43 = vld [vmem:[#allocation32_spill] sm:$0xff] }
 0x2e4   :  { %1718 = vmatpush1.bf16.msra.mxu0 %v6300_v45  ;;  %1759 = vmatpush1.bf16.msra.mxu1 %v6302_v46 }
 0x2e5   :  { %1719 = vmatprep.subr.bf16.mxu0 %v6306_v47  ;;  %1760 = vmatprep.subr.bf16.mxu1 %v6310_v48 }
 0x2e8   :  { %1720 = vmatpush1.bf16.msra.mxu0 %v6312_v49  ;;  %1761 = vmatpush1.bf16.msra.mxu1 %v6314_v50 }
 0x2e9   :  { %1721 = vmatprep.subr.bf16.mxu0 %v6318_v51  ;;  %1762 = vmatprep.subr.bf16.mxu1 %v6322_v52 }
 0x2ec   :  { %1722 = vmatpush1.bf16.msra.mxu0 %v6329_v54  ;;  %1763 = vmatpush1.bf16.msra.mxu1 %v6331_v55 }
 0x2ed   :  { %1723 = vmatprep.subr.bf16.mxu0 %v6333_v56  ;;  %1764 = vmatprep.subr.bf16.mxu1 %v6335_v57 }
 0x2f0   :  { %1724 = vmatpush1.bf16.msra.mxu0 %v6341_v58  ;;  %1765 = vmatpush1.bf16.msra.mxu1 %v6343_v59 }
 0x2f1   :  { %1725 = vmatprep.subr.bf16.mxu0 %v6345_v60  ;;  %1766 = vmatprep.subr.bf16.mxu1 %v6347_v61 }
 0x2f4   :  { %1726 = vmatpush1.bf16.msra.mxu0 %v6358_v63  ;;  %1767 = vmatpush1.bf16.msra.mxu1 %v6360_v1 }
 0x2f5   :  { %1727 = vmatprep.subr.bf16.mxu0 %v6362_v2  ;;  %1768 = vmatprep.subr.bf16.mxu1 %v6364_v3 }
 0x2f8   :  { %1728 = vmatpush1.bf16.msra.mxu0 %v6370_v4  ;;  %1769 = vmatpush1.bf16.msra.mxu1 %v6372_v5 }
 0x2f9   :  { %2064 = vmatprep.subr.bf16.mxu1 %v6603_v26 }
 0x3ae   :  { %v1437_v36 = vpop.f32.mrb[24].mxu0  ;;  %v1478_v37 = vpop.f32.mrb[24].mxu1 }
 0x3af   :  { %v1485_v38 = vadd.f32 %v1437_v36, %v6450_v35  ;;  %v1487_v39 = vadd.f32 %v1478_v37, %v6453_v53  ;;  %v1439_v40 = vpop.f32.mrb[25].mxu0  ;;  %v1480_v41 = vpop.f32.mrb[25].mxu1  ;;  %v6692_v36 = vld [vmem:[#allocation12 + $0xe8] ss:$16 sps:$4 sm:$0xff]  }
 0x3b0   :  { %v1486_v42 = vadd.f32 %v1439_v40, %v6455_v6  ;;  %v1488_v45 = vadd.f32 %v1480_v41, %v7524_v43  ;;  %v1441_v46 = vpop.f32.mrb[26].mxu0  ;;  %v1482_v47 = vpop.f32.mrb[26].mxu1  ;;  %v6601_v6 = vld [vmem:[#allocation12 + $0x4] ss:$16 sps:$4 sm:$0xff]   ;;  %v7526_v41 = vld [vmem:[#allocation34_spill] sm:$0xff] }
 0x3b1   :  { %v4932_v48 = vmul.f32 -1.442695, %v1485_v38  ;;  %v1442_v49 = vpop.f32.mrb[27].mxu0  ;;  %v1483_v50 = vpop.f32.mrb[27].mxu1  ;;  %2023 = vmatprep.subr.bf16.mxu0 %v6601_v6  ;;  %v7527_v46 = vld [vmem:[#allocation35_spill] sm:$0xff] }
 0x3b2   :  { %v4933_v51 = vmul.f32 -1.442695, %v1486_v42  ;;  %v4934_v52 = vmul.f32 -1.442695, %v1488_v45 }
 0x3b3   :  { %5546 = vpow2.f32 %v4932_v48  ;;  %v7528_v48 = vld [vmem:[#allocation36_spill] sm:$0xff] }
 0x3b4   :  { %5548 = vpow2.f32 %v4933_v51 }
 0x3b5   :  { %5550 = vpow2.f32 %v4934_v52 }
 0x3b6   :  { %5552 = vtanh.f32 %v1487_v39  ;;  %v7525_v39 = vld [vmem:[#allocation33_spill] sm:$0xff] }
 0x3bd   :  { %v5547_v54 = vpop.eup %5546 }
 0x3be   :  { %v5549_v55 = vpop.eup %5548  ;;  %v1492_v56 = vadd.f32 1.0, %v5547_v54 }
 0x3bf   :  { %v1498_v57 = vadd.f32 1.0, %v5549_v55  ;;  %v5551_v58 = vpop.eup %5550 }
 0x3c0   :  { %5554 = vrcp.f32 %v1492_v56  ;;  %v5553_v59 = vpop.eup %5552  ;;  %v1505_v1 = vadd.f32 1.0, %v5551_v58 }
 0x3c1   :  { %5556 = vrcp.f32 %v1498_v57 }
 0x3c2   :  { %5558 = vrcp.f32 %v1505_v1 }
 0x3ca   :  { %v5555_v60 = vpop.eup %5554 }
 0x3cb   :  { %v5557_v61 = vpop.eup %5556  ;;  %v1509_v63 = vmul.f32 %v5555_v60, %v5553_v59 }
 0x3cc   :  { %v1508_v2 = vmul.f32 %v5557_v61, %v6556_v24  ;;  %v5559_v4 = vpop.eup %5558  ;;  %v6676_v24 = vld [vmem:[#allocation12 + $0xc0] ss:$16 sps:$4 sm:$0xff]  }
 0x3ce   :  { %v6596_v3 = vadd.f32 %v1509_v63, %v1508_v2 }
 0x3d0   :  { %5560 = vtanh.f32 %v6596_v3 }
 0x3da   :  { %v5561_v5 = vpop.eup %5560 }
 0x3db   :  { %v1512_v35 = vmul.f32 %v5561_v5, %v5559_v4 }
 0x3dd   :  { %v1513_v53 = vpack.c.bf16 %v1512_v35, %v1512_v35 }
 0x3df   :  { %1515 = vst [vmem:[#allocation4 + $0x8] sm:$0xf] %v1513_v53  ;;  %1746 = vmatmul.mubr.bf16.vlgmr.msra.gmra.mrb[28].mxu0 %v1513_v53  ;;  %1787 = vmatmul.mubr.bf16.vlgmr.msra.gmra.mrb[28].mxu1 %v1513_v53 }
 0x3e0   :  { %2055 = vmatprep.mubr.bf16.mxu0 %v7523_v31  ;;  %2096 = vmatprep.mubr.bf16.mxu1 %v7523_v31 }
 0x3e1   :  { %2024 = vmatpush1.bf16.msra.mxu0 %v6605_v28  ;;  %2065 = vmatpush1.bf16.msra.mxu1 %v6607_v11 }
 0x3e2   :  { %2025 = vmatprep.subr.bf16.mxu0 %v6613_v62  ;;  %2066 = vmatprep.subr.bf16.mxu1 %v6615_v16 }
 0x3e5   :  { %2026 = vmatpush1.bf16.msra.mxu0 %v6617_v15  ;;  %2067 = vmatpush1.bf16.msra.mxu1 %v6619_v17 }
 0x3e6   :  { %2027 = vmatprep.subr.bf16.mxu0 %v6625_v19  ;;  %2068 = vmatprep.subr.bf16.mxu1 %v6627_v18 }
 0x3e9   :  { %2028 = vmatpush1.bf16.msra.mxu0 %v6629_v20  ;;  %2069 = vmatpush1.bf16.msra.mxu1 %v6631_v9 }
 0x3ea   :  { %2029 = vmatprep.subr.bf16.mxu0 %v6637_v14  ;;  %2070 = vmatprep.subr.bf16.mxu1 %v6639_v33 }
 0x3ed   :  { %2030 = vmatpush1.bf16.msra.mxu0 %v6641_v34  ;;  %2071 = vmatpush1.bf16.msra.mxu1 %v6643_v21 }
 0x3ee   :  { %2031 = vmatprep.subr.bf16.mxu0 %v6651_v25  ;;  %2072 = vmatprep.subr.bf16.mxu1 %v6655_v29 }
 0x3f1   :  { %2032 = vmatpush1.bf16.msra.mxu0 %v6649_v12  ;;  %2073 = vmatpush1.bf16.msra.mxu1 %v6653_v27 }
 0x3f2   :  { %2033 = vmatprep.subr.bf16.mxu0 %v6657_v22  ;;  %2074 = vmatprep.subr.bf16.mxu1 %v6660_v30 }
 0x3f5   :  { %2034 = vmatpush1.bf16.msra.mxu0 %v6664_v23  ;;  %2075 = vmatpush1.bf16.msra.mxu1 %v6668_v44 }
 0x3f6   :  { %2035 = vmatprep.subr.bf16.mxu0 %v6670_v8  ;;  %2076 = vmatprep.subr.bf16.mxu1 %v6673_v7 }
 0x3f9   :  { %2036 = vmatpush1.bf16.msra.mxu0 %v6676_v24  ;;  %2077 = vmatpush1.bf16.msra.mxu1 %v6680_v10 }
 0x3fa   :  { %2037 = vmatprep.subr.bf16.mxu0 %v6682_v32  ;;  %2078 = vmatprep.subr.bf16.mxu1 %v6685_v0 }
 0x3fd   :  { %2038 = vmatpush1.bf16.msra.mxu0 %v6688_v13  ;;  %2079 = vmatpush1.bf16.msra.mxu1 %v6692_v36 }
 0x3fe   :  { %2333 = vmatprep.subr.bf16.mxu0 %v6601_v6  ;;  %2374 = vmatprep.subr.bf16.mxu1 %v6603_v26 }
 0x4b2   :  { %v1747_v37 = vpop.f32.mrb[28].mxu0  ;;  %v1788_v38 = vpop.f32.mrb[28].mxu1 }
 0x4b3   :  { %v1795_v40 = vadd.f32 %v1747_v37, %v7525_v39  ;;  %v1797_v42 = vadd.f32 %v1788_v38, %v7526_v41  ;;  %v1749_v43 = vpop.f32.mrb[29].mxu0  ;;  %v1790_v45 = vpop.f32.mrb[29].mxu1 }
 0x4b4   :  { %v1796_v47 = vadd.f32 %v1749_v43, %v7527_v46  ;;  %v1798_v49 = vadd.f32 %v1790_v45, %v7528_v48  ;;  %v1751_v50 = vpop.f32.mrb[30].mxu0  ;;  %v1792_v51 = vpop.f32.mrb[30].mxu1  ;;  %v7529_v43 = vld [vmem:[#allocation37_spill] sm:$0xff]  ;;  %v7530_v46 = vld [vmem:[#allocation38_spill] sm:$0xff] }
 0x4b5   :  { %v4967_v52 = vmul.f32 -1.442695, %v1795_v40  ;;  %v1752_v54 = vpop.f32.mrb[31].mxu0  ;;  %v1793_v55 = vpop.f32.mrb[31].mxu1  ;;  %v7531_v50 = vld [vmem:[#allocation39_spill] sm:$0xff] }
 0x4b6   :  { %v4968_v56 = vmul.f32 -1.442695, %v1796_v47  ;;  %v4969_v57 = vmul.f32 -1.442695, %v1798_v49 }
 0x4b7   :  { %5562 = vpow2.f32 %v4967_v52  ;;  %v7532_v52 = vld [vmem:[#allocation40_spill] sm:$0xff] }
 0x4b8   :  { %5564 = vpow2.f32 %v4968_v56 }
 0x4b9   :  { %5566 = vpow2.f32 %v4969_v57 }
 0x4ba   :  { %5568 = vtanh.f32 %v1797_v42 }
 0x4c1   :  { %v5563_v58 = vpop.eup %5562 }
 0x4c2   :  { %v5565_v59 = vpop.eup %5564  ;;  %v1802_v60 = vadd.f32 1.0, %v5563_v58 }
 0x4c3   :  { %v1808_v61 = vadd.f32 1.0, %v5565_v59  ;;  %v5567_v63 = vpop.eup %5566 }
 0x4c4   :  { %5570 = vrcp.f32 %v1802_v60  ;;  %v5569_v1 = vpop.eup %5568  ;;  %v1815_v35 = vadd.f32 1.0, %v5567_v63 }
 0x4c5   :  { %5572 = vrcp.f32 %v1808_v61 }
 0x4c6   :  { %5574 = vrcp.f32 %v1815_v35 }
 0x4ce   :  { %v5571_v2 = vpop.eup %5570 }
 0x4cf   :  { %v5573_v4 = vpop.eup %5572  ;;  %v1819_v5 = vmul.f32 %v5571_v2, %v5569_v1 }
 0x4d0   :  { %v1818_v53 = vmul.f32 %v5573_v4, %v6596_v3  ;;  %v5575_v38 = vpop.eup %5574 }
 0x4d2   :  { %v6704_v37 = vadd.f32 %v1819_v5, %v1818_v53 }
 0x4d4   :  { %5576 = vtanh.f32 %v6704_v37 }
 0x4de   :  { %v5577_v39 = vpop.eup %5576 }
 0x4df   :  { %v1822_v40 = vmul.f32 %v5577_v39, %v5575_v38 }
 0x4e1   :  { %v1823_v41 = vpack.c.bf16 %v1822_v40, %v1822_v40 }
 0x4e3   :  { %1825 = vst [vmem:[#allocation4 + $0xc] sm:$0xf] %v1823_v41  ;;  %2056 = vmatmul.mubr.bf16.vlgmr.msra.gmra.mrb[32].mxu0 %v1823_v41  ;;  %2097 = vmatmul.mubr.bf16.vlgmr.msra.gmra.mrb[32].mxu1 %v1823_v41 }
 0x4e4   :  { %2334 = vmatpush1.bf16.msra.mxu0 %v6605_v28  ;;  %2375 = vmatpush1.bf16.msra.mxu1 %v6607_v11 }
 0x4e5   :  { %2335 = vmatprep.subr.bf16.mxu0 %v6613_v62  ;;  %2376 = vmatprep.subr.bf16.mxu1 %v6615_v16 }
 0x4e6   :  { %2365 = vmatprep.mubr.bf16.mxu0 %v7523_v31  ;;  %2406 = vmatprep.mubr.bf16.mxu1 %v7523_v31 }
 0x4e8   :  { %2336 = vmatpush1.bf16.msra.mxu0 %v6617_v15  ;;  %2377 = vmatpush1.bf16.msra.mxu1 %v6619_v17 }
 0x4e9   :  { %2337 = vmatprep.subr.bf16.mxu0 %v6625_v19  ;;  %2378 = vmatprep.subr.bf16.mxu1 %v6627_v18 }
 0x4ec   :  { %2338 = vmatpush1.bf16.msra.mxu0 %v6629_v20  ;;  %2379 = vmatpush1.bf16.msra.mxu1 %v6631_v9 }
 0x4ed   :  { %2339 = vmatprep.subr.bf16.mxu0 %v6637_v14  ;;  %2380 = vmatprep.subr.bf16.mxu1 %v6639_v33 }
 0x4f0   :  { %2340 = vmatpush1.bf16.msra.mxu0 %v6641_v34  ;;  %2381 = vmatpush1.bf16.msra.mxu1 %v6643_v21 }
 0x4f1   :  { %2341 = vmatprep.subr.bf16.mxu0 %v6651_v25  ;;  %2382 = vmatprep.subr.bf16.mxu1 %v6655_v29 }
 0x4f4   :  { %2342 = vmatpush1.bf16.msra.mxu0 %v6649_v12  ;;  %2383 = vmatpush1.bf16.msra.mxu1 %v6653_v27 }
 0x4f5   :  { %2343 = vmatprep.subr.bf16.mxu0 %v6657_v22  ;;  %2384 = vmatprep.subr.bf16.mxu1 %v6660_v30 }
 0x4f8   :  { %2344 = vmatpush1.bf16.msra.mxu0 %v6664_v23  ;;  %2385 = vmatpush1.bf16.msra.mxu1 %v6668_v44 }
 0x4f9   :  { %2345 = vmatprep.subr.bf16.mxu0 %v6670_v8  ;;  %2386 = vmatprep.subr.bf16.mxu1 %v6673_v7 }
 0x4fc   :  { %2346 = vmatpush1.bf16.msra.mxu0 %v6676_v24  ;;  %2387 = vmatpush1.bf16.msra.mxu1 %v6680_v10 }
 0x4fd   :  { %2347 = vmatprep.subr.bf16.mxu0 %v6682_v32  ;;  %2388 = vmatprep.subr.bf16.mxu1 %v6685_v0 }
 0x500   :  { %2348 = vmatpush1.bf16.msra.mxu0 %v6688_v13  ;;  %2389 = vmatpush1.bf16.msra.mxu1 %v6692_v36 }
 0x501   :  { %2643 = vmatprep.subr.bf16.mxu0 %v6601_v6  ;;  %2684 = vmatprep.subr.bf16.mxu1 %v6603_v26 }
 0x5b6   :  { %v2057_v3 = vpop.f32.mrb[32].mxu0  ;;  %v2098_v42 = vpop.f32.mrb[32].mxu1 }
 0x5b7   :  { %v2105_v45 = vadd.f32 %v2057_v3, %v7529_v43  ;;  %v2107_v47 = vadd.f32 %v2098_v42, %v7530_v46  ;;  %v2059_v48 = vpop.f32.mrb[33].mxu0  ;;  %v2100_v49 = vpop.f32.mrb[33].mxu1 }
 0x5b8   :  { %v2106_v51 = vadd.f32 %v2059_v48, %v7531_v50  ;;  %v2108_v54 = vadd.f32 %v2100_v49, %v7532_v52  ;;  %v2061_v55 = vpop.f32.mrb[34].mxu0  ;;  %v2102_v56 = vpop.f32.mrb[34].mxu1  ;;  %v7533_v48 = vld [vmem:[#allocation41_spill] sm:$0xff]  ;;  %v7534_v50 = vld [vmem:[#allocation42_spill] sm:$0xff] }
 0x5b9   :  { %v5002_v57 = vmul.f32 -1.442695, %v2105_v45  ;;  %v2062_v58 = vpop.f32.mrb[35].mxu0  ;;  %v2103_v59 = vpop.f32.mrb[35].mxu1  ;;  %v7535_v55 = vld [vmem:[#allocation43_spill] sm:$0xff] }
 0x5ba   :  { %v5003_v60 = vmul.f32 -1.442695, %v2106_v51  ;;  %v5004_v61 = vmul.f32 -1.442695, %v2108_v54 }
 0x5bb   :  { %5578 = vpow2.f32 %v5002_v57  ;;  %v7536_v57 = vld [vmem:[#allocation44_spill] sm:$0xff] }
 0x5bc   :  { %5580 = vpow2.f32 %v5003_v60 }
 0x5bd   :  { %5582 = vpow2.f32 %v5004_v61 }
 0x5be   :  { %5584 = vtanh.f32 %v2107_v47 }
 0x5c5   :  { %v5579_v63 = vpop.eup %5578 }
 0x5c6   :  { %v5581_v1 = vpop.eup %5580  ;;  %v2112_v2 = vadd.f32 1.0, %v5579_v63 }
 0x5c7   :  { %v2118_v4 = vadd.f32 1.0, %v5581_v1  ;;  %v5583_v5 = vpop.eup %5582 }
 0x5c8   :  { %5586 = vrcp.f32 %v2112_v2  ;;  %v5585_v35 = vpop.eup %5584  ;;  %v2125_v40 = vadd.f32 1.0, %v5583_v5 }
 0x5c9   :  { %5588 = vrcp.f32 %v2118_v4 }
 0x5ca   :  { %5590 = vrcp.f32 %v2125_v40 }
 0x5d2   :  { %v5587_v53 = vpop.eup %5586 }
 0x5d3   :  { %v5589_v38 = vpop.eup %5588  ;;  %v2129_v39 = vmul.f32 %v5587_v53, %v5585_v35 }
 0x5d4   :  { %v2128_v41 = vmul.f32 %v5589_v38, %v6704_v37  ;;  %v5591_v42 = vpop.eup %5590 }
 0x5d6   :  { %v6746_v3 = vadd.f32 %v2129_v39, %v2128_v41 }
 0x5d8   :  { %5592 = vtanh.f32 %v6746_v3 }
 0x5e2   :  { %v5593_v43 = vpop.eup %5592 }
 0x5e3   :  { %v2132_v45 = vmul.f32 %v5593_v43, %v5591_v42 }
 0x5e5   :  { %v2133_v46 = vpack.c.bf16 %v2132_v45, %v2132_v45 }
 0x5e7   :  { %2135 = vst [vmem:[#allocation4 + $0x10] sm:$0xf] %v2133_v46  ;;  %2366 = vmatmul.mubr.bf16.vlgmr.msra.gmra.mrb[36].mxu0 %v2133_v46  ;;  %2407 = vmatmul.mubr.bf16.vlgmr.msra.gmra.mrb[36].mxu1 %v2133_v46 }
 0x5e8   :  { %2644 = vmatpush1.bf16.msra.mxu0 %v6605_v28  ;;  %2685 = vmatpush1.bf16.msra.mxu1 %v6607_v11 }
 0x5e9   :  { %2645 = vmatprep.subr.bf16.mxu0 %v6613_v62  ;;  %2686 = vmatprep.subr.bf16.mxu1 %v6615_v16 }
 0x5ea   :  { %2675 = vmatprep.mubr.bf16.mxu0 %v7523_v31  ;;  %2716 = vmatprep.mubr.bf16.mxu1 %v7523_v31 }
 0x5ec   :  { %2646 = vmatpush1.bf16.msra.mxu0 %v6617_v15  ;;  %2687 = vmatpush1.bf16.msra.mxu1 %v6619_v17 }
 0x5ed   :  { %2647 = vmatprep.subr.bf16.mxu0 %v6625_v19  ;;  %2688 = vmatprep.subr.bf16.mxu1 %v6627_v18 }
 0x5f0   :  { %2648 = vmatpush1.bf16.msra.mxu0 %v6629_v20  ;;  %2689 = vmatpush1.bf16.msra.mxu1 %v6631_v9 }
 0x5f1   :  { %2649 = vmatprep.subr.bf16.mxu0 %v6637_v14  ;;  %2690 = vmatprep.subr.bf16.mxu1 %v6639_v33 }
 0x5f4   :  { %2650 = vmatpush1.bf16.msra.mxu0 %v6641_v34  ;;  %2691 = vmatpush1.bf16.msra.mxu1 %v6643_v21 }
 0x5f5   :  { %2651 = vmatprep.subr.bf16.mxu0 %v6651_v25  ;;  %2692 = vmatprep.subr.bf16.mxu1 %v6655_v29 }
 0x5f8   :  { %2652 = vmatpush1.bf16.msra.mxu0 %v6649_v12  ;;  %2693 = vmatpush1.bf16.msra.mxu1 %v6653_v27 }
 0x5f9   :  { %2653 = vmatprep.subr.bf16.mxu0 %v6657_v22  ;;  %2694 = vmatprep.subr.bf16.mxu1 %v6660_v30 }
 0x5fc   :  { %2654 = vmatpush1.bf16.msra.mxu0 %v6664_v23  ;;  %2695 = vmatpush1.bf16.msra.mxu1 %v6668_v44 }
 0x5fd   :  { %2655 = vmatprep.subr.bf16.mxu0 %v6670_v8  ;;  %2696 = vmatprep.subr.bf16.mxu1 %v6673_v7 }
 0x600   :  { %2656 = vmatpush1.bf16.msra.mxu0 %v6676_v24  ;;  %2697 = vmatpush1.bf16.msra.mxu1 %v6680_v10 }
 0x601   :  { %2657 = vmatprep.subr.bf16.mxu0 %v6682_v32  ;;  %2698 = vmatprep.subr.bf16.mxu1 %v6685_v0 }
 0x604   :  { %2658 = vmatpush1.bf16.msra.mxu0 %v6688_v13  ;;  %2699 = vmatpush1.bf16.msra.mxu1 %v6692_v36 }
 0x605   :  { %2953 = vmatprep.subr.bf16.mxu0 %v6601_v6  ;;  %2994 = vmatprep.subr.bf16.mxu1 %v6603_v26 }
 0x6ba   :  { %v2367_v37 = vpop.f32.mrb[36].mxu0  ;;  %v2408_v47 = vpop.f32.mrb[36].mxu1 }
 0x6bb   :  { %v2415_v49 = vadd.f32 %v2367_v37, %v7533_v48  ;;  %v2417_v51 = vadd.f32 %v2408_v47, %v7534_v50  ;;  %v2369_v52 = vpop.f32.mrb[37].mxu0  ;;  %v2410_v54 = vpop.f32.mrb[37].mxu1 }
 0x6bc   :  { %v2416_v56 = vadd.f32 %v2369_v52, %v7535_v55  ;;  %v2418_v58 = vadd.f32 %v2410_v54, %v7536_v57  ;;  %v2371_v59 = vpop.f32.mrb[38].mxu0  ;;  %v2412_v60 = vpop.f32.mrb[38].mxu1  ;;  %v5406_v55 = vld [vmem:[#allocation15] ss:$16 sps:$4 sm:$0xff]  }
 0x6bd   :  { %v5037_v61 = vmul.f32 -1.442695, %v2415_v49  ;;  %v2372_v63 = vpop.f32.mrb[39].mxu0  ;;  %v2413_v1 = vpop.f32.mrb[39].mxu1  ;;  %v5417_v59 = vld [vmem:[#allocation15 + $0x2c] ss:$16 sps:$4 sm:$0xff]  }
 0x6be   :  { %v5038_v6 = vmul.f32 -1.442695, %v2416_v56  ;;  %v5039_v26 = vmul.f32 -1.442695, %v2418_v58  ;;  %v5409_v56 = vld [vmem:[#allocation15 + $0x8] ss:$16 sps:$4 sm:$0xff]  }
 0x6bf   :  { %5594 = vpow2.f32 %v5037_v61  ;;  %v5414_v58 = vld [vmem:[#allocation15 + $0x24] ss:$16 sps:$4 sm:$0xff]   ;;  %v5412_v60 = vld [vmem:[#allocation15 + $0x20] ss:$16 sps:$4 sm:$0xff]   ;;  %v5415_v61 = vld [vmem:[#allocation15 + $0x28] ss:$16 sps:$4 sm:$0xff]  }
 0x6c0   :  { %5596 = vpow2.f32 %v5038_v6  ;;  %v5420_v63 = vld [vmem:[#allocation15 + $0x44] ss:$16 sps:$4 sm:$0xff]   ;;  %v5423_v1 = vld [vmem:[#allocation15 + $0x4c] ss:$16 sps:$4 sm:$0xff]   ;;  %v5418_v6 = vld [vmem:[#allocation15 + $0x40] ss:$16 sps:$4 sm:$0xff]  }
 0x6c1   :  { %5598 = vpow2.f32 %v5039_v26  ;;  %v5421_v26 = vld [vmem:[#allocation15 + $0x48] ss:$16 sps:$4 sm:$0xff]  }
 0x6c2   :  { %5600 = vtanh.f32 %v2417_v51 }
 0x6c9   :  { %v5595_v2 = vpop.eup %5594 }
 0x6ca   :  { %v5597_v4 = vpop.eup %5596  ;;  %v2422_v5 = vadd.f32 1.0, %v5595_v2  ;;  %v5426_v2 = vld [vmem:[#allocation15 + $0x64] ss:$16 sps:$4 sm:$0xff]  }
 0x6cb   :  { %v2428_v35 = vadd.f32 1.0, %v5597_v4  ;;  %v5599_v53 = vpop.eup %5598  ;;  %v5429_v4 = vld [vmem:[#allocation15 + $0x6c] ss:$16 sps:$4 sm:$0xff]  }
 0x6cc   :  { %5602 = vrcp.f32 %v2422_v5  ;;  %v5601_v38 = vpop.eup %5600  ;;  %v2435_v42 = vadd.f32 1.0, %v5599_v53  ;;  %v5424_v5 = vld [vmem:[#allocation15 + $0x60] ss:$16 sps:$4 sm:$0xff]   ;;  %v5432_v53 = vld [vmem:[#allocation15 + $0x84] ss:$16 sps:$4 sm:$0xff]  }
 0x6cd   :  { %5604 = vrcp.f32 %v2428_v35  ;;  %v5427_v35 = vld [vmem:[#allocation15 + $0x68] ss:$16 sps:$4 sm:$0xff]  }
 0x6ce   :  { %5606 = vrcp.f32 %v2435_v42  ;;  %v5441_v42 = vld [vmem:[#allocation15 + $0xac] ss:$16 sps:$4 sm:$0xff]  }
 0x6d6   :  { %v5603_v39 = vpop.eup %5602 }
 0x6d7   :  { %v5605_v40 = vpop.eup %5604  ;;  %v2439_v41 = vmul.f32 %v5603_v39, %v5601_v38  ;;  %v5435_v38 = vld [vmem:[#allocation15 + $0x8c] ss:$16 sps:$4 sm:$0xff]   ;;  %v5430_v39 = vld [vmem:[#allocation15 + $0x80] ss:$16 sps:$4 sm:$0xff]  }
 0x6d8   :  { %v2438_v43 = vmul.f32 %v5605_v40, %v6746_v3  ;;  %v5607_v46 = vpop.eup %5606  ;;  %v5433_v40 = vld [vmem:[#allocation15 + $0x88] ss:$16 sps:$4 sm:$0xff]  }
 0x6da   :  { %v6788_v45 = vadd.f32 %v2439_v41, %v2438_v43  ;;  %v5438_v41 = vld [vmem:[#allocation15 + $0xa4] ss:$16 sps:$4 sm:$0xff]   ;;  %v5436_v43 = vld [vmem:[#allocation15 + $0xa0] ss:$16 sps:$4 sm:$0xff]  }
 0x6dc   :  { %5608 = vtanh.f32 %v6788_v45 }
 0x6e6   :  { %v5609_v37 = vpop.eup %5608 }
 0x6e7   :  { %v2442_v47 = vmul.f32 %v5609_v37, %v5607_v46  ;;  %v5444_v46 = vld [vmem:[#allocation15 + $0xc4] ss:$16 sps:$4 sm:$0xff]   ;;  %v5447_v37 = vld [vmem:[#allocation15 + $0xcc] ss:$16 sps:$4 sm:$0xff]  }
 0x6e9   :  { %v2443_v48 = vpack.c.bf16 %v2442_v47, %v2442_v47  ;;  %v5442_v47 = vld [vmem:[#allocation15 + $0xc0] ss:$16 sps:$4 sm:$0xff]  }
 0x6eb   :  { %2445 = vst [vmem:[#allocation4 + $0x14] sm:$0xf] %v2443_v48  ;;  %2676 = vmatmul.mubr.bf16.vlgmr.msra.gmra.mrb[40].mxu0 %v2443_v48  ;;  %2717 = vmatmul.mubr.bf16.vlgmr.msra.gmra.mrb[40].mxu1 %v2443_v48  ;;  %v5445_v48 = vld [vmem:[#allocation15 + $0xc8] ss:$16 sps:$4 sm:$0xff]  }
 0x6ec   :  { %2954 = vmatpush1.bf16.msra.mxu0 %v6605_v28  ;;  %2995 = vmatpush1.bf16.msra.mxu1 %v6607_v11  ;;  %v5408_v28 = vld [vmem:[#allocation15 + $0x4] ss:$16 sps:$4 sm:$0xff]   ;;  %v5411_v11 = vld [vmem:[#allocation15 + $0xc] ss:$16 sps:$4 sm:$0xff]  }
 0x6ed   :  { %2955 = vmatprep.subr.bf16.mxu0 %v6613_v62  ;;  %2996 = vmatprep.subr.bf16.mxu1 %v6615_v16 }
 0x6ee   :  { %2985 = vmatprep.mubr.bf16.mxu0 %v7523_v31  ;;  %3026 = vmatprep.mubr.bf16.mxu1 %v7523_v31 }
 0x6f0   :  { %2956 = vmatpush1.bf16.msra.mxu0 %v6617_v15  ;;  %2997 = vmatpush1.bf16.msra.mxu1 %v6619_v17  ;;  %v7537_v15 = vld [vmem:[#allocation45_spill] sm:$0xff] }
 0x6f1   :  { %2957 = vmatprep.subr.bf16.mxu0 %v6625_v19  ;;  %2998 = vmatprep.subr.bf16.mxu1 %v6627_v18  ;;  %v7538_v19 = vld [vmem:[#allocation46_spill] sm:$0xff] }
 0x6f4   :  { %2958 = vmatpush1.bf16.msra.mxu0 %v6629_v20  ;;  %2999 = vmatpush1.bf16.msra.mxu1 %v6631_v9 }
 0x6f5   :  { %2959 = vmatprep.subr.bf16.mxu0 %v6637_v14  ;;  %3000 = vmatprep.subr.bf16.mxu1 %v6639_v33  ;;  %v7539_v14 = vld [vmem:[#allocation47_spill] sm:$0xff] }
 0x6f8   :  { %2960 = vmatpush1.bf16.msra.mxu0 %v6641_v34  ;;  %3001 = vmatpush1.bf16.msra.mxu1 %v6643_v21  ;;  %v7540_v34 = vld [vmem:[#allocation48_spill] sm:$0xff] }
 0x6f9   :  { %2961 = vmatprep.subr.bf16.mxu0 %v6651_v25  ;;  %3002 = vmatprep.subr.bf16.mxu1 %v6655_v29 }
 0x6fc   :  { %2962 = vmatpush1.bf16.msra.mxu0 %v6649_v12  ;;  %3003 = vmatpush1.bf16.msra.mxu1 %v6653_v27 }
 0x6fd   :  { %2963 = vmatprep.subr.bf16.mxu0 %v6657_v22  ;;  %3004 = vmatprep.subr.bf16.mxu1 %v6660_v30 }
 0x700   :  { %2964 = vmatpush1.bf16.msra.mxu0 %v6664_v23  ;;  %3005 = vmatpush1.bf16.msra.mxu1 %v6668_v44 }
 0x701   :  { %2965 = vmatprep.subr.bf16.mxu0 %v6670_v8  ;;  %3006 = vmatprep.subr.bf16.mxu1 %v6673_v7 }
 0x704   :  { %2966 = vmatpush1.bf16.msra.mxu0 %v6676_v24  ;;  %3007 = vmatpush1.bf16.msra.mxu1 %v6680_v10 }
 0x705   :  { %2967 = vmatprep.subr.bf16.mxu0 %v6682_v32  ;;  %3008 = vmatprep.subr.bf16.mxu1 %v6685_v0 }
 0x708   :  { %2968 = vmatpush1.bf16.msra.mxu0 %v6688_v13  ;;  %3009 = vmatpush1.bf16.msra.mxu1 %v6692_v36 }
 0x709   :  { %3314 = vmatprep.subr.bf16.mxu0 %v5408_v28  ;;  %3387 = vmatprep.subr.bf16.mxu1 %v5411_v11  ;;  %v5450_v28 = vld [vmem:[#allocation15 + $0xe4] ss:$16 sps:$4 sm:$0xff]   ;;  %v5453_v11 = vld [vmem:[#allocation15 + $0xec] ss:$16 sps:$4 sm:$0xff]  }
 0x7be   :  { %v2677_v62 = vpop.f32.mrb[40].mxu0  ;;  %v2718_v16 = vpop.f32.mrb[40].mxu1 }
 0x7bf   :  { %v2725_v17 = vadd.f32 %v2677_v62, %v7537_v15  ;;  %v2727_v18 = vadd.f32 %v2718_v16, %v7538_v19  ;;  %v2679_v20 = vpop.f32.mrb[41].mxu0  ;;  %v2720_v9 = vpop.f32.mrb[41].mxu1  ;;  %v5448_v62 = vld [vmem:[#allocation15 + $0xe0] ss:$16 sps:$4 sm:$0xff]   ;;  %v5451_v16 = vld [vmem:[#allocation15 + $0xe8] ss:$16 sps:$4 sm:$0xff]  }
 0x7c0   :  { %v2726_v33 = vadd.f32 %v2679_v20, %v7539_v14  ;;  %v2728_v21 = vadd.f32 %v2720_v9, %v7540_v34  ;;  %v2681_v12 = vpop.f32.mrb[42].mxu0  ;;  %v2722_v25 = vpop.f32.mrb[42].mxu1  ;;  %v5454_v15 = vld [vmem:[#allocation4] sm:$0xff]   ;;  %v5456_v19 = vld [vmem:[#allocation4 + $0x10] sm:$0xff]   ;;  %v6845_v14 = vld [vmem:[#allocation17 + $0x8] ss:$16 sps:$4 sm:$0xff]  }
 0x7c1   :  { %v5072_v27 = vmul.f32 -1.442695, %v2725_v17  ;;  %v2682_v29 = vpop.f32.mrb[43].mxu0  ;;  %v2723_v22 = vpop.f32.mrb[43].mxu1  ;;  %v5455_v17 = vld [vmem:[#allocation4 + $0x8] sm:$0xff]  }
 0x7c2   :  { %v5073_v30 = vmul.f32 -1.442695, %v2726_v33  ;;  %v5074_v23 = vmul.f32 -1.442695, %v2728_v21  ;;  %v6841_v20 = vld [vmem:[#allocation17 + $0xc] ss:$16 sps:$4 sm:$0xff]  }
 0x7c3   :  { %5610 = vpow2.f32 %v5072_v27  ;;  %v6843_v9 = vld [vmem:[#allocation17] ss:$16 sps:$4 sm:$0xff]   ;;  %v6851_v33 = vld [vmem:[#allocation17 + $0x24] ss:$16 sps:$4 sm:$0xff]   ;;  %v6853_v34 = vld [vmem:[#allocation17 + $0x2c] ss:$16 sps:$4 sm:$0xff]  }
 0x7c4   :  { %5612 = vpow2.f32 %v5073_v30  ;;  %v6855_v21 = vld [vmem:[#allocation17 + $0x20] ss:$16 sps:$4 sm:$0xff]   ;;  %v6857_v12 = vld [vmem:[#allocation17 + $0x28] ss:$16 sps:$4 sm:$0xff]   ;;  %v6863_v25 = vld [vmem:[#allocation17 + $0x44] ss:$16 sps:$4 sm:$0xff]  }
 0x7c5   :  { %5614 = vpow2.f32 %v5074_v23  ;;  %v6865_v27 = vld [vmem:[#allocation17 + $0x4c] ss:$16 sps:$4 sm:$0xff]   ;;  %v6867_v29 = vld [vmem:[#allocation17 + $0x40] ss:$16 sps:$4 sm:$0xff]   ;;  %v6869_v22 = vld [vmem:[#allocation17 + $0x48] ss:$16 sps:$4 sm:$0xff]  }
 0x7c6   :  { %5616 = vtanh.f32 %v2727_v18  ;;  %v6839_v18 = vld [vmem:[#allocation17 + $0x4] ss:$16 sps:$4 sm:$0xff]   ;;  %v6877_v23 = vld [vmem:[#allocation17 + $0x6c] ss:$16 sps:$4 sm:$0xff]  }
 0x7c7   :  { %v6875_v30 = vld [vmem:[#allocation17 + $0x64] ss:$16 sps:$4 sm:$0xff]  }
 0x7cd   :  { %v5611_v44 = vpop.eup %5610 }
 0x7ce   :  { %v5613_v8 = vpop.eup %5612  ;;  %v2732_v7 = vadd.f32 1.0, %v5611_v44  ;;  %v6879_v44 = vld [vmem:[#allocation17 + $0x60] ss:$16 sps:$4 sm:$0xff]  }
 0x7cf   :  { %v2738_v24 = vadd.f32 1.0, %v5613_v8  ;;  %v5615_v10 = vpop.eup %5614  ;;  %v6881_v8 = vld [vmem:[#allocation17 + $0x68] ss:$16 sps:$4 sm:$0xff]  }
 0x7d0   :  { %5618 = vrcp.f32 %v2732_v7  ;;  %v5617_v32 = vpop.eup %5616  ;;  %v2745_v3 = vadd.f32 1.0, %v5615_v10  ;;  %v6887_v7 = vld [vmem:[#allocation17 + $0x84] ss:$16 sps:$4 sm:$0xff]   ;;  %v6891_v10 = vld [vmem:[#allocation17 + $0x80] ss:$16 sps:$4 sm:$0xff]  }
 0x7d1   :  { %5620 = vrcp.f32 %v2738_v24  ;;  %v6889_v24 = vld [vmem:[#allocation17 + $0x8c] ss:$16 sps:$4 sm:$0xff]  }
 0x7d2   :  { %5622 = vrcp.f32 %v2745_v3  ;;  %v6905_v3 = vld [vmem:[#allocation17 + $0xa8] ss:$16 sps:$4 sm:$0xff]  }
 0x7da   :  { %v5619_v0 = vpop.eup %5618 }
 0x7db   :  { %v5621_v13 = vpop.eup %5620  ;;  %v2749_v36 = vmul.f32 %v5619_v0, %v5617_v32  ;;  %v6893_v32 = vld [vmem:[#allocation17 + $0x88] ss:$16 sps:$4 sm:$0xff]   ;;  %v6899_v0 = vld [vmem:[#allocation17 + $0xa4] ss:$16 sps:$4 sm:$0xff]  }
 0x7dc   :  { %v2748_v49 = vmul.f32 %v5621_v13, %v6788_v45  ;;  %v5623_v51 = vpop.eup %5622  ;;  %v5439_v45 = vld [vmem:[#allocation15 + $0xa8] ss:$16 sps:$4 sm:$0xff]   ;;  %v6901_v13 = vld [vmem:[#allocation17 + $0xac] ss:$16 sps:$4 sm:$0xff]  }
 0x7de   :  { %v6828_v50 = vadd.f32 %v2749_v36, %v2748_v49  ;;  %v6903_v36 = vld [vmem:[#allocation17 + $0xa0] ss:$16 sps:$4 sm:$0xff]   ;;  %v6911_v49 = vld [vmem:[#allocation17 + $0xc4] ss:$16 sps:$4 sm:$0xff]  }
 0x7e0   :  { %5624 = vtanh.f32 %v6828_v50 }
 0x7ea   :  { %v5625_v52 = vpop.eup %5624 }
 0x7eb   :  { %v2752_v54 = vmul.f32 %v5625_v52, %v5623_v51  ;;  %v6913_v51 = vld [vmem:[#allocation17 + $0xcc] ss:$16 sps:$4 sm:$0xff]   ;;  %v6915_v52 = vld [vmem:[#allocation17 + $0xc0] ss:$16 sps:$4 sm:$0xff]  }
 0x7ed   :  { %v2753_v57 = vpack.c.bf16 %v2752_v54, %v2752_v54  ;;  %v6917_v54 = vld [vmem:[#allocation17 + $0xc8] ss:$16 sps:$4 sm:$0xff]  }
 0x7ef   :  { %2755 = vst [vmem:[#allocation4 + $0x18] sm:$0xf] %v2753_v57  ;;  %2986 = vmatmul.mubr.bf16.vlgmr.msra.gmra.mrb[44].mxu0 %v2753_v57  ;;  %3027 = vmatmul.mubr.bf16.vlgmr.msra.gmra.mrb[44].mxu1 %v2753_v57  ;;  %v6927_v57 = vld [vmem:[#allocation17 + $0xe0] ss:$16 sps:$4 sm:$0xff]  }
 0x7f0   :  { %3315 = vmatpush1.bf16.msra.mxu0 %v5406_v55  ;;  %3388 = vmatpush1.bf16.msra.mxu1 %v5409_v56  ;;  %v6919_v55 = vld [vmem:[#allocation17 + $0xe4] ss:$16 sps:$4 sm:$0xff]   ;;  %v6923_v56 = vld [vmem:[#allocation17 + $0xec] ss:$16 sps:$4 sm:$0xff]  }
 0x7f1   :  { %3316 = vmatprep.subr.bf16.mxu0 %v5414_v58  ;;  %3389 = vmatprep.subr.bf16.mxu1 %v5417_v59  ;;  %v6929_v58 = vld [vmem:[#allocation17 + $0xe8] ss:$16 sps:$4 sm:$0xff]  }
 0x7f2   :  { %3346 = vmatprep.mubr.bf16.mxu0 %v7523_v31  ;;  %3419 = vmatprep.mubr.bf16.mxu1 %v7523_v31 }
 0x7f4   :  { %3317 = vmatpush1.bf16.msra.mxu0 %v5412_v60  ;;  %3390 = vmatpush1.bf16.msra.mxu1 %v5415_v61  ;;  %v7541_v61 = vld [vmem:[#allocation49_spill] sm:$0xff] }
 0x7f5   :  { %3318 = vmatprep.subr.bf16.mxu0 %v5420_v63  ;;  %3391 = vmatprep.subr.bf16.mxu1 %v5423_v1  ;;  %v7542_v1 = vld [vmem:[#allocation50_spill] sm:$0xff] }
 0x7f8   :  { %3319 = vmatpush1.bf16.msra.mxu0 %v5418_v6  ;;  %3392 = vmatpush1.bf16.msra.mxu1 %v5421_v26 }
 0x7f9   :  { %3320 = vmatprep.subr.bf16.mxu0 %v5426_v2  ;;  %3393 = vmatprep.subr.bf16.mxu1 %v5429_v4  ;;  %v7543_v4 = vld [vmem:[#allocation51_spill] sm:$0xff] }
 0x7fc   :  { %3321 = vmatpush1.bf16.msra.mxu0 %v5424_v5  ;;  %3394 = vmatpush1.bf16.msra.mxu1 %v5427_v35  ;;  %v7544_v35 = vld [vmem:[#allocation52_spill] sm:$0xff] }
 0x7fd   :  { %3322 = vmatprep.subr.bf16.mxu0 %v5432_v53  ;;  %3395 = vmatprep.subr.bf16.mxu1 %v5435_v38 }
 0x800   :  { %3323 = vmatpush1.bf16.msra.mxu0 %v5430_v39  ;;  %3396 = vmatpush1.bf16.msra.mxu1 %v5433_v40 }
 0x801   :  { %3324 = vmatprep.subr.bf16.mxu0 %v5438_v41  ;;  %3397 = vmatprep.subr.bf16.mxu1 %v5441_v42 }
 0x804   :  { %3325 = vmatpush1.bf16.msra.mxu0 %v5436_v43  ;;  %3398 = vmatpush1.bf16.msra.mxu1 %v5439_v45 }
 0x805   :  { %3326 = vmatprep.subr.bf16.mxu0 %v5444_v46  ;;  %3399 = vmatprep.subr.bf16.mxu1 %v5447_v37 }
 0x808   :  { %3327 = vmatpush1.bf16.msra.mxu0 %v5442_v47  ;;  %3400 = vmatpush1.bf16.msra.mxu1 %v5445_v48 }
 0x809   :  { %3328 = vmatprep.subr.bf16.mxu0 %v5450_v28  ;;  %3401 = vmatprep.subr.bf16.mxu1 %v5453_v11 }
 0x80c   :  { %3329 = vmatpush1.bf16.msra.mxu0 %v5448_v62  ;;  %3402 = vmatpush1.bf16.msra.mxu1 %v5451_v16 }
 0x80d   :  { %3693 = vmatprep.subr.bf16.mxu0 %v6839_v18  ;;  %3734 = vmatprep.subr.bf16.mxu1 %v6841_v20 }
 0x80f   :  { %3347 = vmatmul.mubr.bf16.vlgmr.msra.gmra.mrb[48].mxu0 %v5454_v15  ;;  %3420 = vmatmul.mubr.bf16.vlgmr.msra.gmra.mrb[48].mxu1 %v5454_v15 }
 0x810   :  { %3356 = vmatprep.mubr.bf16.mxu0 %v7523_v31  ;;  %3429 = vmatprep.mubr.bf16.mxu1 %v7523_v31 }
 0x811   :  { %3694 = vmatpush1.bf16.msra.mxu0 %v6843_v9  ;;  %3735 = vmatpush1.bf16.msra.mxu1 %v6845_v14 }
 0x812   :  { %3695 = vmatprep.subr.bf16.mxu0 %v6851_v33  ;;  %3736 = vmatprep.subr.bf16.mxu1 %v6853_v34 }
 0x815   :  { %3696 = vmatpush1.bf16.msra.mxu0 %v6855_v21  ;;  %3737 = vmatpush1.bf16.msra.mxu1 %v6857_v12 }
 0x816   :  { %3697 = vmatprep.subr.bf16.mxu0 %v6863_v25  ;;  %3738 = vmatprep.subr.bf16.mxu1 %v6865_v27 }
 0x817   :  { %3357 = vmatmul.mubr.bf16.gmra.mrb[52].mxu0 %v5455_v17  ;;  %3430 = vmatmul.mubr.bf16.gmra.mrb[52].mxu1 %v5455_v17 }
 0x818   :  { %3366 = vmatprep.mubr.bf16.mxu0 %v7523_v31  ;;  %3439 = vmatprep.mubr.bf16.mxu1 %v7523_v31 }
 0x819   :  { %3698 = vmatpush1.bf16.msra.mxu0 %v6867_v29  ;;  %3739 = vmatpush1.bf16.msra.mxu1 %v6869_v22 }
 0x81a   :  { %3699 = vmatprep.subr.bf16.mxu0 %v6875_v30  ;;  %3740 = vmatprep.subr.bf16.mxu1 %v6877_v23 }
 0x81d   :  { %3700 = vmatpush1.bf16.msra.mxu0 %v6879_v44  ;;  %3741 = vmatpush1.bf16.msra.mxu1 %v6881_v8 }
 0x81e   :  { %3701 = vmatprep.subr.bf16.mxu0 %v6887_v7  ;;  %3742 = vmatprep.subr.bf16.mxu1 %v6889_v24 }
 0x81f   :  { %3367 = vmatmul.mubr.bf16.gmra.mrb[56].mxu0 %v5456_v19  ;;  %3440 = vmatmul.mubr.bf16.gmra.mrb[56].mxu1 %v5456_v19 }
 0x820   :  { %3376 = vmatprep.mubr.bf16.mxu0 %v7523_v31  ;;  %3449 = vmatprep.mubr.bf16.mxu1 %v7523_v31 }
 0x821   :  { %3702 = vmatpush1.bf16.msra.mxu0 %v6891_v10  ;;  %3743 = vmatpush1.bf16.msra.mxu1 %v6893_v32 }
 0x822   :  { %3703 = vmatprep.subr.bf16.mxu0 %v6899_v0  ;;  %3744 = vmatprep.subr.bf16.mxu1 %v6901_v13 }
 0x825   :  { %3704 = vmatpush1.bf16.msra.mxu0 %v6903_v36  ;;  %3745 = vmatpush1.bf16.msra.mxu1 %v6905_v3 }
 0x826   :  { %3705 = vmatprep.subr.bf16.mxu0 %v6911_v49  ;;  %3746 = vmatprep.subr.bf16.mxu1 %v6913_v51 }
 0x829   :  { %3706 = vmatpush1.bf16.msra.mxu0 %v6915_v52  ;;  %3747 = vmatpush1.bf16.msra.mxu1 %v6917_v54 }
 0x82a   :  { %3707 = vmatprep.subr.bf16.mxu0 %v6919_v55  ;;  %3748 = vmatprep.subr.bf16.mxu1 %v6923_v56 }
 0x82d   :  { %3708 = vmatpush1.bf16.msra.mxu0 %v6927_v57  ;;  %3749 = vmatpush1.bf16.msra.mxu1 %v6929_v58 }
 0x82e   :  { %3808 = vmatprep.subr.bf16.mxu0 %v6839_v18  ;;  %3849 = vmatprep.subr.bf16.mxu1 %v6841_v20 }
 0x8c2   :  { %v2987_v59 = vpop.f32.mrb[44].mxu0  ;;  %v3028_v60 = vpop.f32.mrb[44].mxu1 }
 0x8c3   :  { %v3035_v63 = vadd.f32 %v2987_v59, %v7541_v61  ;;  %v3037_v6 = vadd.f32 %v3028_v60, %v7542_v1  ;;  %v2989_v26 = vpop.f32.mrb[45].mxu0  ;;  %v3030_v2 = vpop.f32.mrb[45].mxu1 }
 0x8c4   :  { %v3036_v5 = vadd.f32 %v2989_v26, %v7543_v4  ;;  %v3038_v53 = vadd.f32 %v3030_v2, %v7544_v35  ;;  %v2991_v38 = vpop.f32.mrb[46].mxu0  ;;  %v3032_v39 = vpop.f32.mrb[46].mxu1 }
 0x8c5   :  { %v5107_v40 = vmul.f32 -1.442695, %v3035_v63  ;;  %v2992_v41 = vpop.f32.mrb[47].mxu0  ;;  %v3033_v42 = vpop.f32.mrb[47].mxu1 }
 0x8c6   :  { %v5108_v43 = vmul.f32 -1.442695, %v3036_v5  ;;  %v5109_v45 = vmul.f32 -1.442695, %v3038_v53 }
 0x8c7   :  { %5626 = vpow2.f32 %v5107_v40 }
 0x8c8   :  { %5628 = vpow2.f32 %v5108_v43 }
 0x8c9   :  { %5630 = vpow2.f32 %v5109_v45 }
 0x8ca   :  { %5632 = vtanh.f32 %v3037_v6 }
 0x8d1   :  { %v5627_v46 = vpop.eup %5626 }
 0x8d2   :  { %v5629_v37 = vpop.eup %5628  ;;  %v3042_v47 = vadd.f32 1.0, %v5627_v46 }
 0x8d3   :  { %v3048_v48 = vadd.f32 1.0, %v5629_v37  ;;  %v5631_v28 = vpop.eup %5630 }
 0x8d4   :  { %5634 = vrcp.f32 %v3042_v47  ;;  %v5633_v11 = vpop.eup %5632  ;;  %v3055_v17 = vadd.f32 1.0, %v5631_v28 }
 0x8d5   :  { %5636 = vrcp.f32 %v3048_v48 }
 0x8d6   :  { %5638 = vrcp.f32 %v3055_v17 }
 0x8de   :  { %v5635_v62 = vpop.eup %5634 }
 0x8df   :  { %v5637_v16 = vpop.eup %5636  ;;  %v3059_v15 = vmul.f32 %v5635_v62, %v5633_v11 }
 0x8e0   :  { %v3058_v19 = vmul.f32 %v5637_v16, %v6828_v50  ;;  %v5639_v40 = vpop.eup %5638 }
 0x8e2   :  { %v3060_v59 = vadd.f32 %v3059_v15, %v3058_v19  ;;  %v6942_v60 = vpop.f32.mrb[48].mxu0  ;;  %v6944_v61 = vpop.f32.mrb[48].mxu1  ;;  %v154_v19 = vld [vmem:[#allocation6 + $0x8] sm:$0xff] }
 0x8e3   :  { %v6946_v63 = vpop.f32.mrb[49].mxu0  ;;  %v6948_v1 = vpop.f32.mrb[49].mxu1 }
 0x8e4   :  { %5640 = vtanh.f32 %v3060_v59  ;;  %4619 = vst [vmem:[#allocation23] sm:$0xff] %v3060_v59  ;;  %v6950_v6 = vpop.f32.mrb[50].mxu0  ;;  %v6952_v26 = vpop.f32.mrb[50].mxu1  ;;  %v3500_v59 = vpack.c.bf16 %v154_v19, %v154_v19 }
 0x8e5   :  { %v6954_v2 = vpop.f32.mrb[51].mxu0  ;;  %v6956_v4 = vpop.f32.mrb[51].mxu1 }
 0x8ea   :  { %v6958_v50 = vpop.f32.mrb[52].mxu0  ;;  %v6960_v5 = vpop.f32.mrb[52].mxu1 }
 0x8eb   :  { %7545 = vst [vmem:[#allocation32_spill] sm:$0xff] %v6960_v5  ;;  %v6962_v35 = vpop.f32.mrb[53].mxu0  ;;  %v6964_v53 = vpop.f32.mrb[53].mxu1 }
 0x8ec   :  { %7546 = vst [vmem:[#allocation33_spill] sm:$0xff] %v6962_v35  ;;  %7547 = vst [vmem:[#allocation34_spill] sm:$0xff] %v6964_v53  ;;  %v6966_v38 = vpop.f32.mrb[54].mxu0  ;;  %v6968_v39 = vpop.f32.mrb[54].mxu1 }
 0x8ed   :  { %7548 = vst [vmem:[#allocation35_spill] sm:$0xff] %v6966_v38  ;;  %7549 = vst [vmem:[#allocation36_spill] sm:$0xff] %v6968_v39  ;;  %v6970_v41 = vpop.f32.mrb[55].mxu0  ;;  %v6972_v42 = vpop.f32.mrb[55].mxu1 }
 0x8ee   :  { %7550 = vst [vmem:[#allocation37_spill] sm:$0xff] %v6970_v41  ;;  %7551 = vst [vmem:[#allocation38_spill] sm:$0xff] %v6972_v42  ;;  %v5641_v43 = vpop.eup %5640 }
 0x8ef   :  { %v3062_v45 = vmul.f32 %v5641_v43, %v5639_v40  ;;  %v3108_v40 = vld [vmem:[#allocation18] sm:$0xf] }
 0x8f1   :  { %v3063_v46 = vpack.c.bf16 %v3062_v45, %v3062_v45  ;;  %4615 = vst [vmem:[#allocation21] sm:$0xff] %v3062_v45 }
 0x8f2   :  { %v6974_v37 = vpop.f32.mrb[56].mxu0  ;;  %v6976_v47 = vpop.f32.mrb[56].mxu1 }
 0x8f3   :  { %7552 = vst [vmem:[#allocation39_spill] sm:$0xff] %v6974_v37  ;;  %7553 = vst [vmem:[#allocation40_spill] sm:$0xff] %v6976_v47  ;;  %v6978_v48 = vpop.f32.mrb[57].mxu0  ;;  %v6980_v28 = vpop.f32.mrb[57].mxu1 }
 0x8f4   :  { %3065 = vst [vmem:[#allocation4 + $0x1c] sm:$0xf] %v3063_v46  ;;  %7554 = vst [vmem:[#allocation41_spill] sm:$0xff] %v6978_v48  ;;  %v6982_v11 = vpop.f32.mrb[58].mxu0  ;;  %v6984_v62 = vpop.f32.mrb[58].mxu1 }
 0x8f5   :  { %7555 = vst [vmem:[#allocation42_spill] sm:$0xff] %v6980_v28  ;;  %7556 = vst [vmem:[#allocation43_spill] sm:$0xff] %v6982_v11  ;;  %v6986_v16 = vpop.f32.mrb[59].mxu0  ;;  %v6988_v15 = vpop.f32.mrb[59].mxu1 }
 0x8f6   :  { %7557 = vst [vmem:[#allocation44_spill] sm:$0xff] %v6984_v62  ;;  %7558 = vst [vmem:[#allocation45_spill] sm:$0xff] %v6986_v16 }
 0x8f7   :  { %7559 = vst [vmem:[#allocation46_spill] sm:$0xff] %v6988_v15  ;;  %v7566_v15 = vld [vmem:[#allocation31_spill] sm:$0xff] }
 0x8f8   :  { %v7567_v16 = vsub.s32 0, %v7566_v15  ;;  %v7568_v11 = vsub.s32 2, %v7566_v15 }
 0x8fa   :  { %v7040_v62 = vrot.slane %v3108_v40, %v7567_v16  ;;  %v7044_v28 = vrot.slane %v3108_v40, %v7568_v11 }
 0x8fb   :  { %v5493_v17 = vld [vmem:[#allocation4 + $0x18] sm:$0xff]  }
 0x8fc   :  { %3377 = vmatmul.mubr.bf16.gmra.mrb[60].mxu0 %v5493_v17  ;;  %3450 = vmatmul.mubr.bf16.gmra.mrb[60].mxu1 %v5493_v17  ;;  %v3349_v16 = vadd.f32 %v6942_v60, %v7040_v62 }
 0x8fd   :  { %3725 = vmatprep.mubr.bf16.mxu0 %v7523_v31  ;;  %3766 = vmatprep.mubr.bf16.mxu1 %v7523_v31 }
 0x904   :  { %3726 = vmatmul.mubr.bf16.vlgmr.msra.gmra.mrb[64].mxu0 %v3500_v59  ;;  %3767 = vmatmul.mubr.bf16.vlgmr.msra.gmra.mrb[64].mxu1 %v3500_v59 }
 0x905   :  { %3809 = vmatpush1.bf16.msra.mxu0 %v6843_v9  ;;  %3850 = vmatpush1.bf16.msra.mxu1 %v6845_v14 }
 0x906   :  { %3810 = vmatprep.subr.bf16.mxu0 %v6851_v33  ;;  %3851 = vmatprep.subr.bf16.mxu1 %v6853_v34 }
 0x907   :  { %3840 = vmatprep.mubr.bf16.mxu0 %v7523_v31  ;;  %3881 = vmatprep.mubr.bf16.mxu1 %v7523_v31 }
 0x909   :  { %3811 = vmatpush1.bf16.msra.mxu0 %v6855_v21  ;;  %3852 = vmatpush1.bf16.msra.mxu1 %v6857_v12 }
 0x90a   :  { %3812 = vmatprep.subr.bf16.mxu0 %v6863_v25  ;;  %3853 = vmatprep.subr.bf16.mxu1 %v6865_v27 }
 0x90d   :  { %3813 = vmatpush1.bf16.msra.mxu0 %v6867_v29  ;;  %3854 = vmatpush1.bf16.msra.mxu1 %v6869_v22 }
 0x90e   :  { %3814 = vmatprep.subr.bf16.mxu0 %v6875_v30  ;;  %3855 = vmatprep.subr.bf16.mxu1 %v6877_v23 }
 0x911   :  { %3815 = vmatpush1.bf16.msra.mxu0 %v6879_v44  ;;  %3856 = vmatpush1.bf16.msra.mxu1 %v6881_v8 }
 0x912   :  { %3816 = vmatprep.subr.bf16.mxu0 %v6887_v7  ;;  %3857 = vmatprep.subr.bf16.mxu1 %v6889_v24 }
 0x915   :  { %3817 = vmatpush1.bf16.msra.mxu0 %v6891_v10  ;;  %3858 = vmatpush1.bf16.msra.mxu1 %v6893_v32 }
 0x916   :  { %3818 = vmatprep.subr.bf16.mxu0 %v6899_v0  ;;  %3859 = vmatprep.subr.bf16.mxu1 %v6901_v13 }
 0x919   :  { %3819 = vmatpush1.bf16.msra.mxu0 %v6903_v36  ;;  %3860 = vmatpush1.bf16.msra.mxu1 %v6905_v3 }
 0x91a   :  { %3820 = vmatprep.subr.bf16.mxu0 %v6911_v49  ;;  %3861 = vmatprep.subr.bf16.mxu1 %v6913_v51 }
 0x91d   :  { %3821 = vmatpush1.bf16.msra.mxu0 %v6915_v52  ;;  %3862 = vmatpush1.bf16.msra.mxu1 %v6917_v54 }
 0x91e   :  { %3822 = vmatprep.subr.bf16.mxu0 %v6919_v55  ;;  %3863 = vmatprep.subr.bf16.mxu1 %v6923_v56 }
 0x921   :  { %3823 = vmatpush1.bf16.msra.mxu0 %v6927_v57  ;;  %3864 = vmatpush1.bf16.msra.mxu1 %v6929_v58 }
 0x922   :  { %3923 = vmatprep.subr.bf16.mxu0 %v6839_v18  ;;  %3964 = vmatprep.subr.bf16.mxu1 %v6841_v20 }
 0x9cf   :  { %v7026_v43 = vpop.f32.mrb[60].mxu0  ;;  %v7028_v45 = vpop.f32.mrb[60].mxu1 }
 0x9d0   :  { %7560 = vst [vmem:[#allocation47_spill] sm:$0xff] %v7026_v43  ;;  %7561 = vst [vmem:[#allocation48_spill] sm:$0xff] %v7028_v45  ;;  %v7030_v46 = vpop.f32.mrb[61].mxu0  ;;  %v7032_v17 = vpop.f32.mrb[61].mxu1 }
 0x9d1   :  { %7562 = vst [vmem:[#allocation49_spill] sm:$0xff] %v7030_v46  ;;  %7563 = vst [vmem:[#allocation50_spill] sm:$0xff] %v7032_v17  ;;  %v7034_v19 = vpop.f32.mrb[62].mxu0  ;;  %v7036_v59 = vpop.f32.mrb[62].mxu1  ;;  %v7571_v46 = vsub.s32 1, %v7566_v15 }
 0x9d2   :  { %7564 = vst [vmem:[#allocation51_spill] sm:$0xff] %v7034_v19  ;;  %7565 = vst [vmem:[#allocation52_spill] sm:$0xff] %v7036_v59  ;;  %v7046_v48 = vpop.f32.mrb[63].mxu0  ;;  %v7048_v43 = vpop.f32.mrb[63].mxu1  ;;  %v7572_v19 = vsub.s32 3, %v7566_v15  ;;  %v3422_v59 = vadd.f32 %v6944_v61, %v7044_v28 }
 0x9d3   :  { %7569 = vst [vmem:[#allocation31_spill] sm:$0xff] %v7046_v48  ;;  %7570 = vst [vmem:[#allocation53_spill] sm:$0xff] %v7048_v43  ;;  %v7052_v45 = vrot.slane %v3108_v40, %v7571_v46 }
 0x9d4   :  { %v7056_v17 = vrot.slane %v3108_v40, %v7572_v19 }
 0x9d5   :  { %v3351_v11 = vadd.f32 %v6946_v63, %v7052_v45 }
 0x9d6   :  { %v3424_v43 = vadd.f32 %v6948_v1, %v7056_v17 }
 0x9d7   :  { %v3727_v48 = vpop.f32.mrb[64].mxu0  ;;  %v3768_v47 = vpop.f32.mrb[64].mxu1 }
 0x9d8   :  { %v3775_v46 = vadd.f32 %v3727_v48, %v3349_v16  ;;  %v3777_v37 = vadd.f32 %v3768_v47, %v3422_v59  ;;  %v3729_v42 = vpop.f32.mrb[65].mxu0  ;;  %v3770_v15 = vpop.f32.mrb[65].mxu1 }
 0x9d9   :  { %v3776_v40 = vadd.f32 %v3729_v42, %v3351_v11  ;;  %v3778_v19 = vadd.f32 %v3770_v15, %v3424_v43  ;;  %v3731_v41 = vpop.f32.mrb[66].mxu0  ;;  %v3772_v39 = vpop.f32.mrb[66].mxu1  ;;  %v158_v43 = vld [vmem:[#allocation9 + $0x8] sm:$0xff]  ;;  %v3426_v15 = vadd.f32 %v6952_v26, %v7044_v28 }
 0x9da   :  { %v5178_v60 = vmul.f32 -1.442695, %v3775_v46  ;;  %v3732_v38 = vpop.f32.mrb[67].mxu0  ;;  %v3773_v53 = vpop.f32.mrb[67].mxu1 }
 0x9db   :  { %v5179_v61 = vmul.f32 -1.442695, %v3776_v40  ;;  %v5180_v63 = vmul.f32 -1.442695, %v3778_v19  ;;  %v3355_v40 = vadd.f32 %v6954_v2, %v7052_v45  ;;  %v3428_v19 = vadd.f32 %v6956_v4, %v7056_v17 }
 0x9dc   :  { %5642 = vpow2.f32 %v5178_v60 }
 0x9dd   :  { %5644 = vpow2.f32 %v5179_v61 }
 0x9de   :  { %5646 = vpow2.f32 %v5180_v63 }
 0x9df   :  { %5648 = vtanh.f32 %v3777_v37 }
 0x9e6   :  { %v5643_v35 = vpop.eup %5642 }
 0x9e7   :  { %v5645_v5 = vpop.eup %5644  ;;  %v3782_v1 = vadd.f32 1.0, %v5643_v35 }
 0x9e8   :  { %v3788_v48 = vadd.f32 1.0, %v5645_v5  ;;  %v5647_v47 = vpop.eup %5646  ;;  %v3353_v5 = vadd.f32 %v6950_v6, %v7040_v62 }
 0x9e9   :  { %5650 = vrcp.f32 %v3782_v1  ;;  %v5649_v42 = vpop.eup %5648  ;;  %v3795_v38 = vadd.f32 1.0, %v5647_v47 }
 0x9ea   :  { %5652 = vrcp.f32 %v3788_v48 }
 0x9eb   :  { %5654 = vrcp.f32 %v3795_v38 }
 0x9f3   :  { %v5651_v41 = vpop.eup %5650 }
 0x9f4   :  { %v5653_v39 = vpop.eup %5652  ;;  %v3799_v59 = vmul.f32 %v5651_v41, %v5649_v42 }
 0x9f5   :  { %v3798_v53 = vmul.f32 %v5653_v39, %v158_v43  ;;  %v5655_v11 = vpop.eup %5654 }
 0x9f7   :  { %v7066_v16 = vadd.f32 %v3799_v59, %v3798_v53 }
 0x9f9   :  { %5656 = vtanh.f32 %v7066_v16 }
 0xa03   :  { %v5657_v35 = vpop.eup %5656 }
 0xa04   :  { %v3802_v46 = vmul.f32 %v5657_v35, %v5655_v11 }
 0xa06   :  { %v3807_v37 = vpack.c.bf16 %v3802_v46, %v3802_v46 }
 0xa08   :  { %3841 = vmatmul.mubr.bf16.vlgmr.msra.gmra.mrb[68].mxu0 %v3807_v37  ;;  %3882 = vmatmul.mubr.bf16.vlgmr.msra.gmra.mrb[68].mxu1 %v3807_v37 }
 0xa09   :  { %3924 = vmatpush1.bf16.msra.mxu0 %v6843_v9  ;;  %3965 = vmatpush1.bf16.msra.mxu1 %v6845_v14 }
 0xa0a   :  { %3925 = vmatprep.subr.bf16.mxu0 %v6851_v33  ;;  %3966 = vmatprep.subr.bf16.mxu1 %v6853_v34 }
 0xa0b   :  { %3955 = vmatprep.mubr.bf16.mxu0 %v7523_v31  ;;  %3996 = vmatprep.mubr.bf16.mxu1 %v7523_v31 }
 0xa0d   :  { %3926 = vmatpush1.bf16.msra.mxu0 %v6855_v21  ;;  %3967 = vmatpush1.bf16.msra.mxu1 %v6857_v12 }
 0xa0e   :  { %3927 = vmatprep.subr.bf16.mxu0 %v6863_v25  ;;  %3968 = vmatprep.subr.bf16.mxu1 %v6865_v27 }
 0xa11   :  { %3928 = vmatpush1.bf16.msra.mxu0 %v6867_v29  ;;  %3969 = vmatpush1.bf16.msra.mxu1 %v6869_v22 }
 0xa12   :  { %3929 = vmatprep.subr.bf16.mxu0 %v6875_v30  ;;  %3970 = vmatprep.subr.bf16.mxu1 %v6877_v23 }
 0xa15   :  { %3930 = vmatpush1.bf16.msra.mxu0 %v6879_v44  ;;  %3971 = vmatpush1.bf16.msra.mxu1 %v6881_v8 }
 0xa16   :  { %3931 = vmatprep.subr.bf16.mxu0 %v6887_v7  ;;  %3972 = vmatprep.subr.bf16.mxu1 %v6889_v24 }
 0xa19   :  { %3932 = vmatpush1.bf16.msra.mxu0 %v6891_v10  ;;  %3973 = vmatpush1.bf16.msra.mxu1 %v6893_v32 }
 0xa1a   :  { %3933 = vmatprep.subr.bf16.mxu0 %v6899_v0  ;;  %3974 = vmatprep.subr.bf16.mxu1 %v6901_v13 }
 0xa1d   :  { %3934 = vmatpush1.bf16.msra.mxu0 %v6903_v36  ;;  %3975 = vmatpush1.bf16.msra.mxu1 %v6905_v3 }
 0xa1e   :  { %3935 = vmatprep.subr.bf16.mxu0 %v6911_v49  ;;  %3976 = vmatprep.subr.bf16.mxu1 %v6913_v51 }
 0xa21   :  { %3936 = vmatpush1.bf16.msra.mxu0 %v6915_v52  ;;  %3977 = vmatpush1.bf16.msra.mxu1 %v6917_v54 }
 0xa22   :  { %3937 = vmatprep.subr.bf16.mxu0 %v6919_v55  ;;  %3978 = vmatprep.subr.bf16.mxu1 %v6923_v56 }
 0xa25   :  { %3938 = vmatpush1.bf16.msra.mxu0 %v6927_v57  ;;  %3979 = vmatpush1.bf16.msra.mxu1 %v6929_v58 }
 0xa26   :  { %4038 = vmatprep.subr.bf16.mxu0 %v6839_v18  ;;  %4079 = vmatprep.subr.bf16.mxu1 %v6841_v20 }
 0xadb   :  { %v3842_v60 = vpop.f32.mrb[68].mxu0  ;;  %v3883_v61 = vpop.f32.mrb[68].mxu1 }
 0xadc   :  { %v3890_v63 = vadd.f32 %v3842_v60, %v3353_v5  ;;  %v3892_v1 = vadd.f32 %v3883_v61, %v3426_v15  ;;  %v3844_v48 = vpop.f32.mrb[69].mxu0  ;;  %v3885_v47 = vpop.f32.mrb[69].mxu1 }
 0xadd   :  { %v3891_v42 = vadd.f32 %v3844_v48, %v3355_v40  ;;  %v3893_v43 = vadd.f32 %v3885_v47, %v3428_v19  ;;  %v3846_v41 = vpop.f32.mrb[70].mxu0  ;;  %v3887_v39 = vpop.f32.mrb[70].mxu1 }
 0xade   :  { %v5181_v6 = vmul.f32 -1.442695, %v3890_v63  ;;  %v3847_v59 = vpop.f32.mrb[71].mxu0  ;;  %v3888_v38 = vpop.f32.mrb[71].mxu1  ;;  %v7574_v41 = vld [vmem:[#allocation33_spill] sm:$0xff] }
 0xadf   :  { %v5182_v26 = vmul.f32 -1.442695, %v3891_v42  ;;  %v5183_v2 = vmul.f32 -1.442695, %v3893_v43  ;;  %v7573_v42 = vld [vmem:[#allocation32_spill] sm:$0xff]  ;;  %v3361_v39 = vadd.f32 %v7574_v41, %v7052_v45 }
 0xae0   :  { %5658 = vpow2.f32 %v5181_v6  ;;  %v3432_v43 = vadd.f32 %v7573_v42, %v7044_v28  ;;  %v7575_v6 = vld [vmem:[#allocation34_spill] sm:$0xff] }
 0xae1   :  { %5660 = vpow2.f32 %v5182_v26  ;;  %v3434_v59 = vadd.f32 %v7575_v6, %v7056_v17 }
 0xae2   :  { %5662 = vpow2.f32 %v5183_v2 }
 0xae3   :  { %5664 = vtanh.f32 %v3892_v1 }
 0xaea   :  { %v5659_v53 = vpop.eup %5658 }
 0xaeb   :  { %v5661_v11 = vpop.eup %5660  ;;  %v3897_v4 = vadd.f32 1.0, %v5659_v53 }
 0xaec   :  { %v3903_v35 = vadd.f32 1.0, %v5661_v11  ;;  %v5663_v46 = vpop.eup %5662 }
 0xaed   :  { %5666 = vrcp.f32 %v3897_v4  ;;  %v5665_v37 = vpop.eup %5664  ;;  %v3910_v19 = vadd.f32 1.0, %v5663_v46 }
 0xaee   :  { %5668 = vrcp.f32 %v3903_v35 }
 0xaef   :  { %5670 = vrcp.f32 %v3910_v19 }
 0xaf7   :  { %v5667_v5 = vpop.eup %5666 }
 0xaf8   :  { %v5669_v15 = vpop.eup %5668  ;;  %v3914_v40 = vmul.f32 %v5667_v5, %v5665_v37 }
 0xaf9   :  { %v3913_v60 = vmul.f32 %v5669_v15, %v7066_v16  ;;  %v5671_v63 = vpop.eup %5670  ;;  %v3359_v16 = vadd.f32 %v6958_v50, %v7040_v62 }
 0xafb   :  { %v7112_v61 = vadd.f32 %v3914_v40, %v3913_v60 }
 0xafd   :  { %5672 = vtanh.f32 %v7112_v61 }
 0xb07   :  { %v5673_v48 = vpop.eup %5672 }
 0xb08   :  { %v3917_v47 = vmul.f32 %v5673_v48, %v5671_v63 }
 0xb0a   :  { %v3922_v1 = vpack.c.bf16 %v3917_v47, %v3917_v47 }
 0xb0c   :  { %3956 = vmatmul.mubr.bf16.vlgmr.msra.gmra.mrb[72].mxu0 %v3922_v1  ;;  %3997 = vmatmul.mubr.bf16.vlgmr.msra.gmra.mrb[72].mxu1 %v3922_v1 }
 0xb0d   :  { %4039 = vmatpush1.bf16.msra.mxu0 %v6843_v9  ;;  %4080 = vmatpush1.bf16.msra.mxu1 %v6845_v14 }
 0xb0e   :  { %4040 = vmatprep.subr.bf16.mxu0 %v6851_v33  ;;  %4081 = vmatprep.subr.bf16.mxu1 %v6853_v34 }
 0xb0f   :  { %4070 = vmatprep.mubr.bf16.mxu0 %v7523_v31  ;;  %4111 = vmatprep.mubr.bf16.mxu1 %v7523_v31 }
 0xb11   :  { %4041 = vmatpush1.bf16.msra.mxu0 %v6855_v21  ;;  %4082 = vmatpush1.bf16.msra.mxu1 %v6857_v12 }
 0xb12   :  { %4042 = vmatprep.subr.bf16.mxu0 %v6863_v25  ;;  %4083 = vmatprep.subr.bf16.mxu1 %v6865_v27 }
 0xb15   :  { %4043 = vmatpush1.bf16.msra.mxu0 %v6867_v29  ;;  %4084 = vmatpush1.bf16.msra.mxu1 %v6869_v22 }
 0xb16   :  { %4044 = vmatprep.subr.bf16.mxu0 %v6875_v30  ;;  %4085 = vmatprep.subr.bf16.mxu1 %v6877_v23 }
 0xb19   :  { %4045 = vmatpush1.bf16.msra.mxu0 %v6879_v44  ;;  %4086 = vmatpush1.bf16.msra.mxu1 %v6881_v8 }
 0xb1a   :  { %4046 = vmatprep.subr.bf16.mxu0 %v6887_v7  ;;  %4087 = vmatprep.subr.bf16.mxu1 %v6889_v24 }
 0xb1d   :  { %4047 = vmatpush1.bf16.msra.mxu0 %v6891_v10  ;;  %4088 = vmatpush1.bf16.msra.mxu1 %v6893_v32 }
 0xb1e   :  { %4048 = vmatprep.subr.bf16.mxu0 %v6899_v0  ;;  %4089 = vmatprep.subr.bf16.mxu1 %v6901_v13 }
 0xb21   :  { %4049 = vmatpush1.bf16.msra.mxu0 %v6903_v36  ;;  %4090 = vmatpush1.bf16.msra.mxu1 %v6905_v3 }
 0xb22   :  { %4050 = vmatprep.subr.bf16.mxu0 %v6911_v49  ;;  %4091 = vmatprep.subr.bf16.mxu1 %v6913_v51 }
 0xb25   :  { %4051 = vmatpush1.bf16.msra.mxu0 %v6915_v52  ;;  %4092 = vmatpush1.bf16.msra.mxu1 %v6917_v54 }
 0xb26   :  { %4052 = vmatprep.subr.bf16.mxu0 %v6919_v55  ;;  %4093 = vmatprep.subr.bf16.mxu1 %v6923_v56 }
 0xb29   :  { %4053 = vmatpush1.bf16.msra.mxu0 %v6927_v57  ;;  %4094 = vmatpush1.bf16.msra.mxu1 %v6929_v58 }
 0xb2a   :  { %4153 = vmatprep.subr.bf16.mxu0 %v6839_v18  ;;  %4194 = vmatprep.subr.bf16.mxu1 %v6841_v20 }
 0xbdf   :  { %v3957_v38 = vpop.f32.mrb[72].mxu0  ;;  %v3998_v26 = vpop.f32.mrb[72].mxu1 }
 0xbe0   :  { %v4005_v2 = vadd.f32 %v3957_v38, %v3359_v16  ;;  %v4007_v53 = vadd.f32 %v3998_v26, %v3432_v43  ;;  %v3959_v11 = vpop.f32.mrb[73].mxu0  ;;  %v4000_v4 = vpop.f32.mrb[73].mxu1 }
 0xbe1   :  { %v4006_v35 = vadd.f32 %v3959_v11, %v3361_v39  ;;  %v4008_v46 = vadd.f32 %v4000_v4, %v3434_v59  ;;  %v3961_v37 = vpop.f32.mrb[74].mxu0  ;;  %v4002_v5 = vpop.f32.mrb[74].mxu1 }
 0xbe2   :  { %v5184_v50 = vmul.f32 -1.442695, %v4005_v2  ;;  %v3962_v15 = vpop.f32.mrb[75].mxu0  ;;  %v4003_v40 = vpop.f32.mrb[75].mxu1  ;;  %v7578_v37 = vld [vmem:[#allocation37_spill] sm:$0xff] }
 0xbe3   :  { %v5185_v19 = vmul.f32 -1.442695, %v4006_v35  ;;  %v5186_v60 = vmul.f32 -1.442695, %v4008_v46  ;;  %v7577_v35 = vld [vmem:[#allocation36_spill] sm:$0xff]  ;;  %v3365_v5 = vadd.f32 %v7578_v37, %v7052_v45 }
 0xbe4   :  { %5674 = vpow2.f32 %v5184_v50  ;;  %v3436_v46 = vadd.f32 %v7577_v35, %v7044_v28  ;;  %v7579_v50 = vld [vmem:[#allocation38_spill] sm:$0xff] }
 0xbe5   :  { %5676 = vpow2.f32 %v5185_v19  ;;  %v3438_v15 = vadd.f32 %v7579_v50, %v7056_v17 }
 0xbe6   :  { %5678 = vpow2.f32 %v5186_v60 }
 0xbe7   :  { %5680 = vtanh.f32 %v4007_v53 }
 0xbee   :  { %v5675_v63 = vpop.eup %5674 }
 0xbef   :  { %v5677_v48 = vpop.eup %5676  ;;  %v4012_v47 = vadd.f32 1.0, %v5675_v63 }
 0xbf0   :  { %v4018_v1 = vadd.f32 1.0, %v5677_v48  ;;  %v5679_v16 = vpop.eup %5678 }
 0xbf1   :  { %5682 = vrcp.f32 %v4012_v47  ;;  %v5681_v42 = vpop.eup %5680  ;;  %v4025_v6 = vadd.f32 1.0, %v5679_v16 }
 0xbf2   :  { %5684 = vrcp.f32 %v4018_v1 }
 0xbf3   :  { %5686 = vrcp.f32 %v4025_v6 }
 0xbfb   :  { %v5683_v43 = vpop.eup %5682 }
 0xbfc   :  { %v5685_v41 = vpop.eup %5684  ;;  %v4029_v39 = vmul.f32 %v5683_v43, %v5681_v42 }
 0xbfd   :  { %v4028_v59 = vmul.f32 %v5685_v41, %v7112_v61  ;;  %v5687_v26 = vpop.eup %5686  ;;  %v7576_v61 = vld [vmem:[#allocation35_spill] sm:$0xff] }
 0xbfe   :  { %v3363_v4 = vadd.f32 %v7576_v61, %v7040_v62 }
 0xbff   :  { %v7158_v38 = vadd.f32 %v4029_v39, %v4028_v59 }
 0xc01   :  { %5688 = vtanh.f32 %v7158_v38 }
 0xc0b   :  { %v5689_v2 = vpop.eup %5688 }
 0xc0c   :  { %v4032_v11 = vmul.f32 %v5689_v2, %v5687_v26 }
 0xc0e   :  { %v4037_v53 = vpack.c.bf16 %v4032_v11, %v4032_v11 }
 0xc10   :  { %4071 = vmatmul.mubr.bf16.vlgmr.msra.gmra.mrb[76].mxu0 %v4037_v53  ;;  %4112 = vmatmul.mubr.bf16.vlgmr.msra.gmra.mrb[76].mxu1 %v4037_v53 }
 0xc11   :  { %4154 = vmatpush1.bf16.msra.mxu0 %v6843_v9  ;;  %4195 = vmatpush1.bf16.msra.mxu1 %v6845_v14 }
 0xc12   :  { %4155 = vmatprep.subr.bf16.mxu0 %v6851_v33  ;;  %4196 = vmatprep.subr.bf16.mxu1 %v6853_v34 }
 0xc13   :  { %4185 = vmatprep.mubr.bf16.mxu0 %v7523_v31  ;;  %4226 = vmatprep.mubr.bf16.mxu1 %v7523_v31 }
 0xc15   :  { %4156 = vmatpush1.bf16.msra.mxu0 %v6855_v21  ;;  %4197 = vmatpush1.bf16.msra.mxu1 %v6857_v12 }
 0xc16   :  { %4157 = vmatprep.subr.bf16.mxu0 %v6863_v25  ;;  %4198 = vmatprep.subr.bf16.mxu1 %v6865_v27 }
 0xc19   :  { %4158 = vmatpush1.bf16.msra.mxu0 %v6867_v29  ;;  %4199 = vmatpush1.bf16.msra.mxu1 %v6869_v22 }
 0xc1a   :  { %4159 = vmatprep.subr.bf16.mxu0 %v6875_v30  ;;  %4200 = vmatprep.subr.bf16.mxu1 %v6877_v23 }
 0xc1d   :  { %4160 = vmatpush1.bf16.msra.mxu0 %v6879_v44  ;;  %4201 = vmatpush1.bf16.msra.mxu1 %v6881_v8 }
 0xc1e   :  { %4161 = vmatprep.subr.bf16.mxu0 %v6887_v7  ;;  %4202 = vmatprep.subr.bf16.mxu1 %v6889_v24 }
 0xc21   :  { %4162 = vmatpush1.bf16.msra.mxu0 %v6891_v10  ;;  %4203 = vmatpush1.bf16.msra.mxu1 %v6893_v32 }
 0xc22   :  { %4163 = vmatprep.subr.bf16.mxu0 %v6899_v0  ;;  %4204 = vmatprep.subr.bf16.mxu1 %v6901_v13 }
 0xc25   :  { %4164 = vmatpush1.bf16.msra.mxu0 %v6903_v36  ;;  %4205 = vmatpush1.bf16.msra.mxu1 %v6905_v3 }
 0xc26   :  { %4165 = vmatprep.subr.bf16.mxu0 %v6911_v49  ;;  %4206 = vmatprep.subr.bf16.mxu1 %v6913_v51 }
 0xc29   :  { %4166 = vmatpush1.bf16.msra.mxu0 %v6915_v52  ;;  %4207 = vmatpush1.bf16.msra.mxu1 %v6917_v54 }
 0xc2a   :  { %4167 = vmatprep.subr.bf16.mxu0 %v6919_v55  ;;  %4208 = vmatprep.subr.bf16.mxu1 %v6923_v56 }
 0xc2d   :  { %4168 = vmatpush1.bf16.msra.mxu0 %v6927_v57  ;;  %4209 = vmatpush1.bf16.msra.mxu1 %v6929_v58 }
 0xc2e   :  { %4268 = vmatprep.subr.bf16.mxu0 %v6839_v18  ;;  %4309 = vmatprep.subr.bf16.mxu1 %v6841_v20 }
 0xce3   :  { %v4072_v40 = vpop.f32.mrb[76].mxu0  ;;  %v4113_v19 = vpop.f32.mrb[76].mxu1 }
 0xce4   :  { %v4120_v60 = vadd.f32 %v4072_v40, %v3363_v4  ;;  %v4122_v63 = vadd.f32 %v4113_v19, %v3436_v46  ;;  %v4074_v48 = vpop.f32.mrb[77].mxu0  ;;  %v4115_v47 = vpop.f32.mrb[77].mxu1 }
 0xce5   :  { %v4121_v1 = vadd.f32 %v4074_v48, %v3365_v5  ;;  %v4123_v16 = vadd.f32 %v4115_v47, %v3438_v15  ;;  %v4076_v42 = vpop.f32.mrb[78].mxu0  ;;  %v4117_v43 = vpop.f32.mrb[78].mxu1 }
 0xce6   :  { %v5187_v41 = vmul.f32 -1.442695, %v4120_v60  ;;  %v4077_v39 = vpop.f32.mrb[79].mxu0  ;;  %v4118_v6 = vpop.f32.mrb[79].mxu1 }
 0xce7   :  { %v5188_v59 = vmul.f32 -1.442695, %v4121_v1  ;;  %v5189_v26 = vmul.f32 -1.442695, %v4123_v16  ;;  %v7253_v39 = vld [vmem:[#allocation17] ss:$16 sps:$4 sm:$0xff]  }
 0xce8   :  { %5690 = vpow2.f32 %v5187_v41  ;;  %v7256_v6 = vld [vmem:[#allocation17 + $0x8] ss:$16 sps:$4 sm:$0xff]  }
 0xce9   :  { %5692 = vpow2.f32 %v5188_v59  ;;  %v7259_v59 = vld [vmem:[#allocation17 + $0x24] ss:$16 sps:$4 sm:$0xff]  }
 0xcea   :  { %5694 = vpow2.f32 %v5189_v26  ;;  %v7262_v26 = vld [vmem:[#allocation17 + $0x2c] ss:$16 sps:$4 sm:$0xff]  }
 0xceb   :  { %5696 = vtanh.f32 %v4122_v63 }
 0xcf2   :  { %v5691_v2 = vpop.eup %5690 }
 0xcf3   :  { %v5693_v11 = vpop.eup %5692  ;;  %v4127_v53 = vadd.f32 1.0, %v5691_v2  ;;  %v7267_v2 = vld [vmem:[#allocation17 + $0x20] ss:$16 sps:$4 sm:$0xff]  }
 0xcf4   :  { %v4133_v61 = vadd.f32 1.0, %v5693_v11  ;;  %v5695_v4 = vpop.eup %5694  ;;  %v7270_v11 = vld [vmem:[#allocation17 + $0x28] ss:$16 sps:$4 sm:$0xff]  }
 0xcf5   :  { %5698 = vrcp.f32 %v4127_v53  ;;  %v5697_v35 = vpop.eup %5696  ;;  %v4140_v50 = vadd.f32 1.0, %v5695_v4  ;;  %v7273_v53 = vld [vmem:[#allocation17 + $0x44] ss:$16 sps:$4 sm:$0xff]   ;;  %v7279_v4 = vld [vmem:[#allocation17 + $0x40] ss:$16 sps:$4 sm:$0xff]  }
 0xcf6   :  { %5700 = vrcp.f32 %v4133_v61  ;;  %v7276_v61 = vld [vmem:[#allocation17 + $0x4c] ss:$16 sps:$4 sm:$0xff]  }
 0xcf7   :  { %5702 = vrcp.f32 %v4140_v50  ;;  %v7294_v50 = vld [vmem:[#allocation17 + $0x68] ss:$16 sps:$4 sm:$0xff]  }
 0xcff   :  { %v5699_v46 = vpop.eup %5698 }
 0xd00   :  { %v5701_v37 = vpop.eup %5700  ;;  %v4144_v5 = vmul.f32 %v5699_v46, %v5697_v35  ;;  %v7282_v35 = vld [vmem:[#allocation17 + $0x48] ss:$16 sps:$4 sm:$0xff]   ;;  %v7285_v46 = vld [vmem:[#allocation17 + $0x64] ss:$16 sps:$4 sm:$0xff]  }
 0xd01   :  { %v4143_v15 = vmul.f32 %v5701_v37, %v7158_v38  ;;  %v5703_v19 = vpop.eup %5702  ;;  %v7288_v37 = vld [vmem:[#allocation17 + $0x6c] ss:$16 sps:$4 sm:$0xff]  }
 0xd03   :  { %v7204_v40 = vadd.f32 %v4144_v5, %v4143_v15  ;;  %v7291_v5 = vld [vmem:[#allocation17 + $0x60] ss:$16 sps:$4 sm:$0xff]   ;;  %v7297_v15 = vld [vmem:[#allocation17 + $0x84] ss:$16 sps:$4 sm:$0xff]  }
 0xd05   :  { %5704 = vtanh.f32 %v7204_v40 }
 0xd0f   :  { %v5705_v60 = vpop.eup %5704 }
 0xd10   :  { %v4147_v48 = vmul.f32 %v5705_v60, %v5703_v19  ;;  %v7303_v19 = vld [vmem:[#allocation17 + $0x80] ss:$16 sps:$4 sm:$0xff]   ;;  %v7306_v60 = vld [vmem:[#allocation17 + $0x88] ss:$16 sps:$4 sm:$0xff]  }
 0xd12   :  { %v4152_v63 = vpack.c.bf16 %v4147_v48, %v4147_v48  ;;  %v7309_v48 = vld [vmem:[#allocation17 + $0xa4] ss:$16 sps:$4 sm:$0xff]  }
 0xd14   :  { %4186 = vmatmul.mubr.bf16.vlgmr.msra.gmra.mrb[80].mxu0 %v4152_v63  ;;  %4227 = vmatmul.mubr.bf16.vlgmr.msra.gmra.mrb[80].mxu1 %v4152_v63  ;;  %v7312_v63 = vld [vmem:[#allocation17 + $0xac] ss:$16 sps:$4 sm:$0xff]  }
 0xd15   :  { %4269 = vmatpush1.bf16.msra.mxu0 %v6843_v9  ;;  %4310 = vmatpush1.bf16.msra.mxu1 %v6845_v14  ;;  %v7580_v9 = vld [vmem:[#allocation39_spill] sm:$0xff] }
 0xd16   :  { %4270 = vmatprep.subr.bf16.mxu0 %v6851_v33  ;;  %4311 = vmatprep.subr.bf16.mxu1 %v6853_v34  ;;  %v3369_v14 = vadd.f32 %v7580_v9, %v7040_v62  ;;  %v7581_v33 = vld [vmem:[#allocation40_spill] sm:$0xff]  ;;  %v7315_v9 = vld [vmem:[#allocation17 + $0xa0] ss:$16 sps:$4 sm:$0xff]  }
 0xd17   :  { %4300 = vmatprep.mubr.bf16.mxu0 %v7523_v31  ;;  %4341 = vmatprep.mubr.bf16.mxu1 %v7523_v31  ;;  %v3442_v34 = vadd.f32 %v7581_v33, %v7044_v28  ;;  %v7321_v33 = vld [vmem:[#allocation17 + $0xc4] ss:$16 sps:$4 sm:$0xff]  }
 0xd19   :  { %4271 = vmatpush1.bf16.msra.mxu0 %v6855_v21  ;;  %4312 = vmatpush1.bf16.msra.mxu1 %v6857_v12  ;;  %v7582_v21 = vld [vmem:[#allocation41_spill] sm:$0xff] }
 0xd1a   :  { %4272 = vmatprep.subr.bf16.mxu0 %v6863_v25  ;;  %4313 = vmatprep.subr.bf16.mxu1 %v6865_v27  ;;  %v3371_v12 = vadd.f32 %v7582_v21, %v7052_v45  ;;  %v7583_v25 = vld [vmem:[#allocation42_spill] sm:$0xff]  ;;  %v7327_v21 = vld [vmem:[#allocation17 + $0xc0] ss:$16 sps:$4 sm:$0xff]  }
 0xd1b   :  { %v3444_v27 = vadd.f32 %v7583_v25, %v7056_v17  ;;  %v7333_v25 = vld [vmem:[#allocation17 + $0xe4] ss:$16 sps:$4 sm:$0xff]  }
 0xd1d   :  { %4273 = vmatpush1.bf16.msra.mxu0 %v6867_v29  ;;  %4314 = vmatpush1.bf16.msra.mxu1 %v6869_v22 }
 0xd1e   :  { %4274 = vmatprep.subr.bf16.mxu0 %v6875_v30  ;;  %4315 = vmatprep.subr.bf16.mxu1 %v6877_v23 }
 0xd21   :  { %4275 = vmatpush1.bf16.msra.mxu0 %v6879_v44  ;;  %4316 = vmatpush1.bf16.msra.mxu1 %v6881_v8 }
 0xd22   :  { %4276 = vmatprep.subr.bf16.mxu0 %v6887_v7  ;;  %4317 = vmatprep.subr.bf16.mxu1 %v6889_v24 }
 0xd25   :  { %4277 = vmatpush1.bf16.msra.mxu0 %v6891_v10  ;;  %4318 = vmatpush1.bf16.msra.mxu1 %v6893_v32 }
 0xd26   :  { %4278 = vmatprep.subr.bf16.mxu0 %v6899_v0  ;;  %4319 = vmatprep.subr.bf16.mxu1 %v6901_v13 }
 0xd29   :  { %4279 = vmatpush1.bf16.msra.mxu0 %v6903_v36  ;;  %4320 = vmatpush1.bf16.msra.mxu1 %v6905_v3 }
 0xd2a   :  { %4280 = vmatprep.subr.bf16.mxu0 %v6911_v49  ;;  %4321 = vmatprep.subr.bf16.mxu1 %v6913_v51 }
 0xd2d   :  { %4281 = vmatpush1.bf16.msra.mxu0 %v6915_v52  ;;  %4322 = vmatpush1.bf16.msra.mxu1 %v6917_v54 }
 0xd2e   :  { %4282 = vmatprep.subr.bf16.mxu0 %v6919_v55  ;;  %4323 = vmatprep.subr.bf16.mxu1 %v6923_v56 }
 0xd31   :  { %4283 = vmatpush1.bf16.msra.mxu0 %v6927_v57  ;;  %4324 = vmatpush1.bf16.msra.mxu1 %v6929_v58 }
 0xd32   :  { %4383 = vmatprep.subr.bf16.mxu0 %v6839_v18  ;;  %4424 = vmatprep.subr.bf16.mxu1 %v6841_v20 }
 0xde7   :  { %v4187_v29 = vpop.f32.mrb[80].mxu0  ;;  %v4228_v22 = vpop.f32.mrb[80].mxu1 }
 0xde8   :  { %v4235_v30 = vadd.f32 %v4187_v29, %v3369_v14  ;;  %v4237_v23 = vadd.f32 %v4228_v22, %v3442_v34  ;;  %v4189_v44 = vpop.f32.mrb[81].mxu0  ;;  %v4230_v18 = vpop.f32.mrb[81].mxu1  ;;  %v7318_v14 = vld [vmem:[#allocation17 + $0xa8] ss:$16 sps:$4 sm:$0xff]   ;;  %v7324_v34 = vld [vmem:[#allocation17 + $0xcc] ss:$16 sps:$4 sm:$0xff]  }
 0xde9   :  { %v4236_v8 = vadd.f32 %v4189_v44, %v3371_v12  ;;  %v4238_v20 = vadd.f32 %v4230_v18, %v3444_v27  ;;  %v4191_v7 = vpop.f32.mrb[82].mxu0  ;;  %v4232_v24 = vpop.f32.mrb[82].mxu1  ;;  %v7330_v12 = vld [vmem:[#allocation17 + $0xc8] ss:$16 sps:$4 sm:$0xff]   ;;  %v7336_v27 = vld [vmem:[#allocation17 + $0xec] ss:$16 sps:$4 sm:$0xff]  }
 0xdea   :  { %v5190_v10 = vmul.f32 -1.442695, %v4235_v30  ;;  %v4192_v32 = vpop.f32.mrb[83].mxu0  ;;  %v4233_v0 = vpop.f32.mrb[83].mxu1  ;;  %v7339_v29 = vld [vmem:[#allocation17 + $0xe0] ss:$16 sps:$4 sm:$0xff]  }
 0xdeb   :  { %v5191_v13 = vmul.f32 -1.442695, %v4236_v8  ;;  %v5192_v36 = vmul.f32 -1.442695, %v4238_v20  ;;  %v7342_v22 = vld [vmem:[#allocation17 + $0xe8] ss:$16 sps:$4 sm:$0xff]  }
 0xdec   :  { %5706 = vpow2.f32 %v5190_v10  ;;  %v5804_v30 = vld [vmem:[#allocation17 + $0x4] ss:$16 sps:$4 sm:$0xff]   ;;  %v7584_v44 = vld [vmem:[#allocation43_spill] sm:$0xff]  ;;  %v7586_v7 = vld [vmem:[#allocation45_spill] sm:$0xff] }
 0xded   :  { %5708 = vpow2.f32 %v5191_v13  ;;  %v3373_v18 = vadd.f32 %v7584_v44, %v7040_v62  ;;  %v7585_v8 = vld [vmem:[#allocation44_spill] sm:$0xff]  ;;  %v3375_v24 = vadd.f32 %v7586_v7, %v7052_v45  ;;  %v7587_v10 = vld [vmem:[#allocation46_spill] sm:$0xff] }
 0xdee   :  { %5710 = vpow2.f32 %v5192_v36  ;;  %v3446_v20 = vadd.f32 %v7585_v8, %v7044_v28  ;;  %v3448_v32 = vadd.f32 %v7587_v10, %v7056_v17 }
 0xdef   :  { %5712 = vtanh.f32 %v4237_v23  ;;  %v5805_v23 = vld [vmem:[#allocation17 + $0xc] ss:$16 sps:$4 sm:$0xff]  }
 0xdf6   :  { %v5707_v3 = vpop.eup %5706 }
 0xdf7   :  { %v5709_v49 = vpop.eup %5708  ;;  %v4242_v51 = vadd.f32 1.0, %v5707_v3 }
 0xdf8   :  { %v4248_v52 = vadd.f32 1.0, %v5709_v49  ;;  %v5711_v54 = vpop.eup %5710 }
 0xdf9   :  { %5714 = vrcp.f32 %v4242_v51  ;;  %v5713_v55 = vpop.eup %5712  ;;  %v4255_v38 = vadd.f32 1.0, %v5711_v54 }
 0xdfa   :  { %5716 = vrcp.f32 %v4248_v52 }
 0xdfb   :  { %5718 = vrcp.f32 %v4255_v38 }
 0xe03   :  { %v5715_v56 = vpop.eup %5714 }
 0xe04   :  { %v5717_v57 = vpop.eup %5716  ;;  %v4259_v58 = vmul.f32 %v5715_v56, %v5713_v55 }
 0xe05   :  { %v4258_v47 = vmul.f32 %v5717_v57, %v7204_v40  ;;  %v5719_v16 = vpop.eup %5718  ;;  %v7300_v40 = vld [vmem:[#allocation17 + $0x8c] ss:$16 sps:$4 sm:$0xff]  }
 0xe07   :  { %v7250_v1 = vadd.f32 %v4259_v58, %v4258_v47 }
 0xe09   :  { %5720 = vtanh.f32 %v7250_v1 }
 0xe13   :  { %v5721_v42 = vpop.eup %5720 }
 0xe14   :  { %v4262_v43 = vmul.f32 %v5721_v42, %v5719_v16 }
 0xe16   :  { %v4267_v41 = vpack.c.bf16 %v4262_v43, %v4262_v43 }
 0xe18   :  { %4301 = vmatmul.mubr.bf16.vlgmr.msra.gmra.mrb[84].mxu0 %v4267_v41  ;;  %4342 = vmatmul.mubr.bf16.vlgmr.msra.gmra.mrb[84].mxu1 %v4267_v41 }
 0xe19   :  { %4384 = vmatpush1.bf16.msra.mxu0 %v7253_v39  ;;  %4425 = vmatpush1.bf16.msra.mxu1 %v7256_v6 }
 0xe1a   :  { %4385 = vmatprep.subr.bf16.mxu0 %v7259_v59  ;;  %4426 = vmatprep.subr.bf16.mxu1 %v7262_v26 }
 0xe1b   :  { %4415 = vmatprep.mubr.bf16.mxu0 %v7523_v31  ;;  %4456 = vmatprep.mubr.bf16.mxu1 %v7523_v31 }
 0xe1d   :  { %4386 = vmatpush1.bf16.msra.mxu0 %v7267_v2  ;;  %4427 = vmatpush1.bf16.msra.mxu1 %v7270_v11 }
 0xe1e   :  { %4387 = vmatprep.subr.bf16.mxu0 %v7273_v53  ;;  %4428 = vmatprep.subr.bf16.mxu1 %v7276_v61 }
 0xe21   :  { %4388 = vmatpush1.bf16.msra.mxu0 %v7279_v4  ;;  %4429 = vmatpush1.bf16.msra.mxu1 %v7282_v35 }
 0xe22   :  { %4389 = vmatprep.subr.bf16.mxu0 %v7285_v46  ;;  %4430 = vmatprep.subr.bf16.mxu1 %v7288_v37 }
 0xe25   :  { %4390 = vmatpush1.bf16.msra.mxu0 %v7291_v5  ;;  %4431 = vmatpush1.bf16.msra.mxu1 %v7294_v50 }
 0xe26   :  { %4391 = vmatprep.subr.bf16.mxu0 %v7297_v15  ;;  %4432 = vmatprep.subr.bf16.mxu1 %v7300_v40 }
 0xe29   :  { %4392 = vmatpush1.bf16.msra.mxu0 %v7303_v19  ;;  %4433 = vmatpush1.bf16.msra.mxu1 %v7306_v60 }
 0xe2a   :  { %4393 = vmatprep.subr.bf16.mxu0 %v7309_v48  ;;  %4434 = vmatprep.subr.bf16.mxu1 %v7312_v63 }
 0xe2d   :  { %4394 = vmatpush1.bf16.msra.mxu0 %v7315_v9  ;;  %4435 = vmatpush1.bf16.msra.mxu1 %v7318_v14 }
 0xe2e   :  { %4395 = vmatprep.subr.bf16.mxu0 %v7321_v33  ;;  %4436 = vmatprep.subr.bf16.mxu1 %v7324_v34 }
 0xe31   :  { %4396 = vmatpush1.bf16.msra.mxu0 %v7327_v21  ;;  %4437 = vmatpush1.bf16.msra.mxu1 %v7330_v12 }
 0xe32   :  { %4397 = vmatprep.subr.bf16.mxu0 %v7333_v25  ;;  %4438 = vmatprep.subr.bf16.mxu1 %v7336_v27 }
 0xe35   :  { %4398 = vmatpush1.bf16.msra.mxu0 %v7339_v29  ;;  %4439 = vmatpush1.bf16.msra.mxu1 %v7342_v22 }
 0xe36   :  { %4498 = vmatprep.subr.bf16.mxu0 %v5804_v30  ;;  %4539 = vmatprep.subr.bf16.mxu1 %v5805_v23 }
 0xeeb   :  { %v4302_v0 = vpop.f32.mrb[84].mxu0  ;;  %v4343_v13 = vpop.f32.mrb[84].mxu1 }
 0xeec   :  { %v4350_v36 = vadd.f32 %v4302_v0, %v3373_v18  ;;  %v4352_v3 = vadd.f32 %v4343_v13, %v3446_v20  ;;  %v4304_v49 = vpop.f32.mrb[85].mxu0  ;;  %v4345_v51 = vpop.f32.mrb[85].mxu1 }
 0xeed   :  { %v4351_v52 = vadd.f32 %v4304_v49, %v3375_v24  ;;  %v4353_v54 = vadd.f32 %v4345_v51, %v3448_v32  ;;  %v4306_v55 = vpop.f32.mrb[86].mxu0  ;;  %v4347_v56 = vpop.f32.mrb[86].mxu1 }
 0xeee   :  { %v5193_v57 = vmul.f32 -1.442695, %v4350_v36  ;;  %v4307_v58 = vpop.f32.mrb[87].mxu0  ;;  %v4348_v38 = vpop.f32.mrb[87].mxu1 }
 0xeef   :  { %v5194_v47 = vmul.f32 -1.442695, %v4351_v52  ;;  %v5195_v16 = vmul.f32 -1.442695, %v4353_v54  ;;  %v6075_v58 = vmov 0.0   ;;  %v5507_v38 = vld [vmem:[%s7488_s9 + $0x8] sm:$0xff]  }
 0xef0   :  { %5722 = vpow2.f32 %v5193_v57  ;;  %v5506_v57 = vld [vmem:[%s7488_s9] sm:$0xff]  }
 0xef1   :  { %5724 = vpow2.f32 %v5194_v47  ;;  %v5508_v47 = vld [vmem:[%s7488_s9 + $0x10] sm:$0xff]  }
 0xef2   :  { %5726 = vpow2.f32 %v5195_v16  ;;  %v5509_v16 = vld [vmem:[%s7488_s9 + $0x18] sm:$0xff]  }
 0xef3   :  { %5728 = vtanh.f32 %v4352_v3 }
 0xefa   :  { %v5723_v42 = vpop.eup %5722 }
 0xefb   :  { %v5725_v43 = vpop.eup %5724  ;;  %v4357_v41 = vadd.f32 1.0, %v5723_v42  ;;  %v5510_v42 = vld [vmem:[%s7488_s9 + $0x20] sm:$0xff]  }
 0xefc   :  { %v4363_v30 = vadd.f32 1.0, %v5725_v43  ;;  %v5727_v23 = vpop.eup %5726  ;;  %v5511_v43 = vld [vmem:[%s7488_s9 + $0x28] sm:$0xff]  }
 0xefd   :  { %5730 = vrcp.f32 %v4357_v41  ;;  %v5729_v44 = vpop.eup %5728  ;;  %v4370_v7 = vadd.f32 1.0, %v5727_v23  ;;  %v5512_v41 = vld [vmem:[%s7488_s9 + $0x30] sm:$0xff]  }
 0xefe   :  { %5732 = vrcp.f32 %v4363_v30  ;;  %v5513_v30 = vld [vmem:[%s7488_s9 + $0x38] sm:$0xff]   ;;  %v7592_v23 = vld [vmem:[#allocation51_spill] sm:$0xff] }
 0xeff   :  { %5734 = vrcp.f32 %v4370_v7 }
 0xf07   :  { %v5731_v18 = vpop.eup %5730 }
 0xf08   :  { %v5733_v8 = vpop.eup %5732  ;;  %v4374_v20 = vmul.f32 %v5731_v18, %v5729_v44  ;;  %v3383_v44 = vadd.f32 %v7592_v23, %v7040_v62  ;;  %v7593_v18 = vld [vmem:[#allocation52_spill] sm:$0xff] }
 0xf09   :  { %v4373_v24 = vmul.f32 %v5733_v8, %v7250_v1  ;;  %v5735_v32 = vpop.eup %5734  ;;  %v3456_v8 = vadd.f32 %v7593_v18, %v7044_v28 }
 0xf0b   :  { %v7354_v10 = vadd.f32 %v4374_v20, %v4373_v24  ;;  %v7594_v20 = vld [vmem:[#allocation31_spill] sm:$0xff]  ;;  %v7595_v24 = vld [vmem:[#allocation53_spill] sm:$0xff] }
 0xf0c   :  { %v3385_v7 = vadd.f32 %v7594_v20, %v7052_v45 }
 0xf0d   :  { %5736 = vtanh.f32 %v7354_v10 }
 0xf17   :  { %v5737_v0 = vpop.eup %5736 }
 0xf18   :  { %v4377_v13 = vmul.f32 %v5737_v0, %v5735_v32 }
 0xf1a   :  { %v4382_v36 = vpack.c.bf16 %v4377_v13, %v4377_v13 }
 0xf1c   :  { %4416 = vmatmul.mubr.bf16.vlgmr.msra.gmra.mrb[88].mxu0 %v4382_v36  ;;  %4457 = vmatmul.mubr.bf16.vlgmr.msra.gmra.mrb[88].mxu1 %v4382_v36 }
 0xf1d   :  { %4499 = vmatpush1.bf16.msra.mxu0 %v7253_v39  ;;  %4540 = vmatpush1.bf16.msra.mxu1 %v7256_v6  ;;  %v7589_v39 = vld [vmem:[#allocation48_spill] sm:$0xff] }
 0xf1e   :  { %4500 = vmatprep.subr.bf16.mxu0 %v7259_v59  ;;  %4541 = vmatprep.subr.bf16.mxu1 %v7262_v26  ;;  %v3452_v6 = vadd.f32 %v7589_v39, %v7044_v28  ;;  %v7590_v59 = vld [vmem:[#allocation49_spill] sm:$0xff] }
 0xf1f   :  { %4530 = vmatprep.mubr.bf16.mxu0 %v7523_v31  ;;  %4571 = vmatprep.mubr.bf16.mxu1 %v7523_v31  ;;  %v7588_v31 = vld [vmem:[#allocation47_spill] sm:$0xff]  ;;  %v3381_v26 = vadd.f32 %v7590_v59, %v7052_v45 }
 0xf20   :  { %v3379_v1 = vadd.f32 %v7588_v31, %v7040_v62 }
 0xf21   :  { %4501 = vmatpush1.bf16.msra.mxu0 %v7267_v2  ;;  %4542 = vmatpush1.bf16.msra.mxu1 %v7270_v11  ;;  %v7591_v2 = vld [vmem:[#allocation50_spill] sm:$0xff] }
 0xf22   :  { %4502 = vmatprep.subr.bf16.mxu0 %v7273_v53  ;;  %4543 = vmatprep.subr.bf16.mxu1 %v7276_v61  ;;  %v3454_v11 = vadd.f32 %v7591_v2, %v7056_v17 }
 0xf25   :  { %4503 = vmatpush1.bf16.msra.mxu0 %v7279_v4  ;;  %4544 = vmatpush1.bf16.msra.mxu1 %v7282_v35 }
 0xf26   :  { %4504 = vmatprep.subr.bf16.mxu0 %v7285_v46  ;;  %4545 = vmatprep.subr.bf16.mxu1 %v7288_v37 }
 0xf29   :  { %4505 = vmatpush1.bf16.msra.mxu0 %v7291_v5  ;;  %4546 = vmatpush1.bf16.msra.mxu1 %v7294_v50 }
 0xf2a   :  { %4506 = vmatprep.subr.bf16.mxu0 %v7297_v15  ;;  %4547 = vmatprep.subr.bf16.mxu1 %v7300_v40 }
 0xf2d   :  { %4507 = vmatpush1.bf16.msra.mxu0 %v7303_v19  ;;  %4548 = vmatpush1.bf16.msra.mxu1 %v7306_v60 }
 0xf2e   :  { %4508 = vmatprep.subr.bf16.mxu0 %v7309_v48  ;;  %4549 = vmatprep.subr.bf16.mxu1 %v7312_v63 }
 0xf31   :  { %4509 = vmatpush1.bf16.msra.mxu0 %v7315_v9  ;;  %4550 = vmatpush1.bf16.msra.mxu1 %v7318_v14 }
 0xf32   :  { %4510 = vmatprep.subr.bf16.mxu0 %v7321_v33  ;;  %4551 = vmatprep.subr.bf16.mxu1 %v7324_v34 }
 0xf35   :  { %4511 = vmatpush1.bf16.msra.mxu0 %v7327_v21  ;;  %4552 = vmatpush1.bf16.msra.mxu1 %v7330_v12 }
 0xf36   :  { %4512 = vmatprep.subr.bf16.mxu0 %v7333_v25  ;;  %4553 = vmatprep.subr.bf16.mxu1 %v7336_v27 }
 0xf39   :  { %4513 = vmatpush1.bf16.msra.mxu0 %v7339_v29  ;;  %4554 = vmatpush1.bf16.msra.mxu1 %v7342_v22 }
 0xf3a   :  { %5220 = vmatprep.subr.bf16.mxu0 %v6075_v58 }
 0xfef   :  { %v4417_v53 = vpop.f32.mrb[88].mxu0  ;;  %v4458_v61 = vpop.f32.mrb[88].mxu1 }
 0xff0   :  { %v4465_v4 = vadd.f32 %v4417_v53, %v3379_v1  ;;  %v4467_v35 = vadd.f32 %v4458_v61, %v3452_v6  ;;  %v4419_v46 = vpop.f32.mrb[89].mxu0  ;;  %v4460_v37 = vpop.f32.mrb[89].mxu1 }
 0xff1   :  { %v4466_v5 = vadd.f32 %v4419_v46, %v3381_v26  ;;  %v4468_v50 = vadd.f32 %v4460_v37, %v3454_v11  ;;  %v4421_v15 = vpop.f32.mrb[90].mxu0  ;;  %v4462_v40 = vpop.f32.mrb[90].mxu1 }
 0xff2   :  { %v5196_v19 = vmul.f32 -1.442695, %v4465_v4  ;;  %v4422_v60 = vpop.f32.mrb[91].mxu0  ;;  %v4463_v48 = vpop.f32.mrb[91].mxu1 }
 0xff3   :  { %v5197_v63 = vmul.f32 -1.442695, %v4466_v5  ;;  %v5198_v9 = vmul.f32 -1.442695, %v4468_v50 }
 0xff4   :  { %5738 = vpow2.f32 %v5196_v19 }
 0xff5   :  { %5740 = vpow2.f32 %v5197_v63 }
 0xff6   :  { %5742 = vpow2.f32 %v5198_v9 }
 0xff7   :  { %5744 = vtanh.f32 %v4467_v35 }
 0xffe   :  { %v5739_v14 = vpop.eup %5738 }
 0xfff   :  { %v5741_v33 = vpop.eup %5740  ;;  %v4472_v34 = vadd.f32 1.0, %v5739_v14  ;;  %v5202_v14 = vld [vmem:[%s7489_s10] ss:$0 sm:$0xff] }
0x1000   :  { %v4478_v21 = vadd.f32 1.0, %v5741_v33  ;;  %v5743_v12 = vpop.eup %5742 }
0x1001   :  { %5746 = vrcp.f32 %v4472_v34  ;;  %v5745_v25 = vpop.eup %5744  ;;  %v4485_v3 = vadd.f32 1.0, %v5743_v12 }
0x1002   :  { %5748 = vrcp.f32 %v4478_v21 }
0x1003   :  { %5750 = vrcp.f32 %v4485_v3 }
0x100b   :  { %v5747_v27 = vpop.eup %5746 }
0x100c   :  { %v5749_v29 = vpop.eup %5748  ;;  %v4489_v22 = vmul.f32 %v5747_v27, %v5745_v25 }
0x100d   :  { %v4488_v49 = vmul.f32 %v5749_v29, %v7354_v10  ;;  %v5751_v52 = vpop.eup %5750  ;;  %v3458_v10 = vadd.f32 %v7595_v24, %v7056_v17 }
0x100f   :  { %v7398_v51 = vadd.f32 %v4489_v22, %v4488_v49 }
0x1011   :  { %5752 = vtanh.f32 %v7398_v51 }
0x101b   :  { %v5753_v54 = vpop.eup %5752 }
0x101c   :  { %v4492_v55 = vmul.f32 %v5753_v54, %v5751_v52 }
0x101e   :  { %v4497_v56 = vpack.c.bf16 %v4492_v55, %v4492_v55 }
0x1020   :  { %4531 = vmatmul.mubr.bf16.vlgmr.msra.gmra.mrb[92].mxu0 %v4497_v56  ;;  %4572 = vmatmul.mubr.bf16.vlgmr.msra.gmra.mrb[92].mxu1 %v4497_v56 }
0x1021   :  { %5221 = vmatpush3.bf16.msra.mxu0 %v5506_v57  ;;  %5236 = vmatprep.mubr.msk.bf16.mxu0 %vm6076_vm0, %v6075_v58 }
0x1022   :  { %5222 = vmatprep.subr.bf16.mxu0 %v6075_v58 }
0x1025   :  { %5223 = vmatpush3.bf16.msra.mxu0 %v5507_v38 }
0x1026   :  { %5224 = vmatprep.subr.bf16.mxu0 %v6075_v58 }
0x1029   :  { %5225 = vmatpush3.bf16.msra.mxu0 %v5508_v47 }
0x102a   :  { %5226 = vmatprep.subr.bf16.mxu0 %v6075_v58 }
0x102d   :  { %5227 = vmatpush3.bf16.msra.mxu0 %v5509_v16 }
0x102e   :  { %5228 = vmatprep.subr.bf16.mxu0 %v6075_v58 }
0x1031   :  { %5229 = vmatpush3.bf16.msra.mxu0 %v5510_v42 }
0x1032   :  { %5230 = vmatprep.subr.bf16.mxu0 %v6075_v58 }
0x1035   :  { %5231 = vmatpush3.bf16.msra.mxu0 %v5511_v43 }
0x1036   :  { %5232 = vmatprep.subr.bf16.mxu0 %v6075_v58 }
0x1039   :  { %5233 = vmatpush3.bf16.msra.mxu0 %v5512_v41 }
0x103a   :  { %5234 = vmatprep.subr.bf16.mxu0 %v6075_v58 }
0x103d   :  { %5235 = vmatpush3.bf16.msra.mxu0 %v5513_v30 }
0x10f3   :  { %v4532_v32 = vpop.f32.mrb[92].mxu0  ;;  %v4573_v0 = vpop.f32.mrb[92].mxu1 }
0x10f4   :  { %v4580_v13 = vadd.f32 %v4532_v32, %v3383_v44  ;;  %v4582_v36 = vadd.f32 %v4573_v0, %v3456_v8  ;;  %v4534_v31 = vpop.f32.mrb[93].mxu0  ;;  %v4575_v1 = vpop.f32.mrb[93].mxu1 }
0x10f5   :  { %v4581_v39 = vadd.f32 %v4534_v31, %v3385_v7  ;;  %v4583_v6 = vadd.f32 %v4575_v1, %v3458_v10  ;;  %v4536_v59 = vpop.f32.mrb[94].mxu0  ;;  %v4577_v26 = vpop.f32.mrb[94].mxu1 }
0x10f6   :  { %v5199_v62 = vmul.f32 -1.442695, %v4580_v13  ;;  %v4537_v2 = vpop.f32.mrb[95].mxu0  ;;  %v4578_v11 = vpop.f32.mrb[95].mxu1 }
0x10f7   :  { %v5200_v28 = vmul.f32 -1.442695, %v4581_v39  ;;  %v5201_v45 = vmul.f32 -1.442695, %v4583_v6 }
0x10f8   :  { %5754 = vpow2.f32 %v5199_v62 }
0x10f9   :  { %5756 = vpow2.f32 %v5200_v28 }
0x10fa   :  { %5758 = vpow2.f32 %v5201_v45 }
0x10fb   :  { %5760 = vtanh.f32 %v4582_v36 }
0x1102   :  { %v5755_v53 = vpop.eup %5754 }
0x1103   :  { %v5757_v61 = vpop.eup %5756  ;;  %v4587_v17 = vadd.f32 1.0, %v5755_v53 }
0x1104   :  { %v4593_v4 = vadd.f32 1.0, %v5757_v61  ;;  %v5759_v35 = vpop.eup %5758 }
0x1105   :  { %5762 = vrcp.f32 %v4587_v17  ;;  %v5761_v46 = vpop.eup %5760  ;;  %v4600_v15 = vadd.f32 1.0, %v5759_v35 }
0x1106   :  { %5764 = vrcp.f32 %v4593_v4 }
0x1107   :  { %5766 = vrcp.f32 %v4600_v15 }
0x110f   :  { %v5763_v37 = vpop.eup %5762 }
0x1110   :  { %v5765_v5 = vpop.eup %5764  ;;  %v4604_v50 = vmul.f32 %v5763_v37, %v5761_v46 }
0x1111   :  { %v4603_v40 = vmul.f32 %v5765_v5, %v7398_v51  ;;  %v5767_v60 = vpop.eup %5766 }
0x1113   :  { %v4605_v19 = vadd.f32 %v4604_v50, %v4603_v40 }
0x1115   :  { %5768 = vtanh.f32 %v4605_v19  ;;  %4620 = vst [vmem:[#allocation23 + $0x8] sm:$0xff] %v4605_v19 }
0x111f   :  { %v5769_v48 = vpop.eup %5768 }
0x1120   :  { %v4607_v63 = vmul.f32 %v5769_v48, %v5767_v60 }
0x1122   :  { %v4622_v9 = vpack.c.bf16 %v4607_v63, %v4607_v63  ;;  %4616 = vst [vmem:[#allocation21 + $0x8] sm:$0xff] %v4607_v63 }
0x1124   :  { %5237 = vmatmul.mubr.bf16.vlgmr.msra.gmra.mrb[96].mxu0 %v4622_v9 }
0x11f7   :  { %v4728_v33 = vpop.f32.mrb[96].mxu0 }
0x11f8   :  { %v4729_v34 = vadd.f32 %v5202_v14, %v4728_v33  ;;  %v5238_v21 = vpop.f32.mrb[97].mxu0 }
0x11f9   :  { %v4731_v12 = vpop.f32.mrb[98].mxu0 }
0x11fa   :  { %4734 = vmax.xlane.f32.xlu0 %v4729_v34  ;;  %v5239_v25 = vpop.f32.mrb[99].mxu0 }
0x1287   :  { %v4735_v27 = vpop.xlane.xlu0 %4734 }
0x1288   :  { %v4736_v29 = vsub.f32 %v4729_v34, %v4735_v27 }
0x128a   :  { %v4737_v22 = vmul.f32 1.442695, %v4736_v29 }
0x128c   :  { %5770 = vpow2.f32 %v4737_v22 }
0x1296   :  { %v5771_v3 = vpop.eup %5770 }
0x1297   :  { %4739 = vadd.xlane.f32.xlu0 %v5771_v3 }
0x1298   :  { %5993 = shalt.err (!%p5990_p12)
}
0x1299   :  { %s5994_s29 = scalar_lea.hbm %s7491_s12, 256 }
0x129a   :  { %p5995_p13 = scmp.ne.s32.totalorder %s7491_s12, %s5994_s29  ;;  %p5998_p0 = scmp.lt.u32.totalorder %s5994_s29, %s7491_s12 }
0x129c   :  { %p6000_p1 = pnand %p5998_p0, %p5995_p13 }
0x129e   :  { %6003 = shalt.err (!%p6000_p1)
}
0x129f   :  { %4765 = dma.vmem_to_hbm [thread:$0]  %s4760_s6, 256, %s7491_s12, [#allocation22], %s6063_s18, %s6063_s18, %s6064_s19  }
0x12a0   :  { %s6078_s4 = smov [#allocation23]  }
0x12a1   :  { %s4771_s23 = sshll.u32 %s6078_s4, 4  ;;  %s4772_s23 = int_to_ptr.vmem [resolvable:$true] %s4771_s23 }
0x12a2   :  { %s6004_s16 = scalar_lea.vmem %s4772_s23, 256  ;;  %p6009_p3 = scmp.lt.s32.totalorder %s4772_s23, %s4772_s23 }
0x12a3   :  { %p6005_p2 = scmp.ne.s32.totalorder %s4772_s23, %s6004_s16  ;;  %p6010_p4 = scmp.lt.s32.totalorder %s6004_s16, %s6004_s16 }
0x12a5   :  { %p6011_p5 = por %p6010_p4, %p6009_p3 }
0x12a7   :  { %p6012_p6 = pnand %p6011_p5, %p6005_p2 }
0x12a9   :  { %6015 = shalt.err (!%p6012_p6)
}
0x12aa   :  { %s6016_s3 = scalar_lea.hbm %s7492_s13, 256 }
0x12ab   :  { %p6017_p7 = scmp.ne.s32.totalorder %s7492_s13, %s6016_s3  ;;  %p6020_p8 = scmp.lt.u32.totalorder %s6016_s3, %s7492_s13 }
0x12ad   :  { %p6022_p9 = pnand %p6020_p8, %p6017_p7 }
0x12af   :  { %6025 = shalt.err (!%p6022_p9)
}
0x12b0   :  { %4777 = dma.vmem_to_hbm [thread:$0]  %s4772_s23, 256, %s7492_s13, [#allocation22], %s6063_s18, %s6063_s18, %s6064_s19  }
0x12b1   :  { %s6079_s26 = smov [#allocation20]  }
0x12b2   :  { %s4750_s9 = sshll.u32 %s6079_s26, 4  ;;  %s4751_s9 = int_to_ptr.vmem [resolvable:$true] %s4750_s9 }
0x12b3   :  { %s6026_s8 = scalar_lea.vmem %s4751_s9, 128  ;;  %p6031_p11 = scmp.lt.s32.totalorder %s4751_s9, %s4751_s9 }
0x12b4   :  { %p6027_p10 = scmp.ne.s32.totalorder %s4751_s9, %s6026_s8  ;;  %p6032_p12 = scmp.lt.s32.totalorder %s6026_s8, %s6026_s8 }
0x12b6   :  { %p6033_p13 = por %p6032_p12, %p6031_p11 }
0x12b8   :  { %p6034_p0 = pnand %p6033_p13, %p6027_p10 }
0x1324   :  { %v4740_v49 = vpop.xlane.xlu0 %4739 }
0x1325   :  { %5772 = vrcp.f32 %v4740_v49 }
0x132f   :  { %v5773_v51 = vpop.eup %5772 }
0x1330   :  { %v4742_v52 = vmul.f32 %v5773_v51, %v5771_v3 }
0x1332   :  { %4743 = vst [vmem:[#allocation20] sm:$0xff] %v4742_v52 }
0x1333   :  { %6037 = shalt.err (!%p6034_p0)
}
0x1334   :  { %s6038_s1 = scalar_lea.hbm %s7490_s11, 128 }
0x1335   :  { %p6039_p1 = scmp.ne.s32.totalorder %s7490_s11, %s6038_s1  ;;  %p6042_p2 = scmp.lt.u32.totalorder %s6038_s1, %s7490_s11 }
0x1337   :  { %p6044_p3 = pnand %p6042_p2, %p6039_p1 }
0x1339   :  { %6047 = shalt.err (!%p6044_p3)
}
0x133a   :  { %4753 = dma.vmem_to_hbm [thread:$0]  %s4751_s9, 128, %s7490_s11, [#allocation8]  }
0x133b   :  { %6058 = dma.done.wait [#allocation8], 128  }
0x133c   :  { %6059 = vsyncadd [#allocation8], 4294967168 }
0x133d   :  { %6060 = dma.done.wait [#allocation22], 512  }
0x133e   :  { %6061 = vsyncadd [#allocation22], 4294966784 }
0x133f   :  { %4787 = vsyncpa [#allocation7], 1 }
0x1340   :  { %4788 = vsyncpa [#allocation10], 1 }
0x1341   :  { %4789 = vsyncpa [#allocation13], 1 }
0x1342   :  { %4790 = vsyncpa [#allocation16], 1 }
0x1343   :  { %4791 = vsyncpa [#allocation19], 1 }
0x1344   :  { %4792 = vsyncpa [#allocation8], 1 }
0x1345   :  { %4793 = vsyncpa [#allocation22], 1 }

// kernel: tpu_custom_call.1
= control target key start
LH: loop header
LB: loop body
LE: loop exit
PB: predicated region body
PF: predicated region fallthrough
CT: control target
= control target key end

     0   :  { %19 = vsyncpa [#allocation7], 0  ;;  %s7479_s0 = inlined_call_operand.vmem [shape: bf16[8,8,128], index: 0, kind: input, shape index: {}]   ;;  %s7480_s1 = inlined_call_operand.hbm [shape: f32[2,8,128], index: 1, kind: input, shape index: {}, may-alias: {1,12}]   ;;  %s7481_s2 = inlined_call_operand.hbm [shape: f32[2,8,128], index: 2, kind: input, shape index: {}, may-alias: {2,13}]   ;;  %s7482_s3 = inlined_call_operand.hbm [shape: bf16[128,512], index: 3, kind: input, shape index: {}]   ;;  %s7483_s4 = inlined_call_operand.hbm [shape: bf16[128,512], index: 4, kind: input, shape index: {}]   ;;  %s7484_s5 = inlined_call_operand.hbm [shape: f32[1,512], index: 5, kind: input, shape index: {}]   ;;  %s7485_s6 = inlined_call_operand.hbm [shape: bf16[128,512], index: 6, kind: input, shape index: {}]   ;;  %s7486_s7 = inlined_call_operand.hbm [shape: bf16[128,512], index: 7, kind: input, shape index: {}]   ;;  %s7487_s8 = inlined_call_operand.hbm [shape: f32[1,512], index: 8, kind: input, shape index: {}]   ;;  %s7488_s9 = inlined_call_operand.vmem [shape: bf16[128,128], index: 9, kind: input, shape index: {}]   ;;  %s7489_s10 = inlined_call_operand.vmem [shape: f32[1,128], index: 10, kind: input, shape index: {}]   ;;  %s7490_s11 = inlined_call_operand.hbm [shape: f32[8,128], index: 11, kind: output, shape index: {0}]   ;;  %s7491_s12 = inlined_call_operand.hbm [shape: f32[2,8,128], index: 12, kind: output, shape index: {1}, may-alias: {1,12}]   ;;  %s7492_s13 = inlined_call_operand.hbm [shape: f32[2,8,128], index: 13, kind: output, shape index: {2}, may-alias: {2,13}]  }
   0x1   :  { %20 = vsyncpa [#allocation10], 0 }
   0x2   :  { %21 = vsyncpa [#allocation13], 0 }
   0x3   :  { %22 = vsyncpa [#allocation16], 0 }
   0x4   :  { %23 = vsyncpa [#allocation19], 0 }
   0x5   :  { %24 = vsyncpa [#allocation8], 0 }
   0x6   :  { %25 = vsyncpa [#allocation22], 0  ;;  %s6062_s25 = smov [#allocation9]   ;;  %s5806_s29 = scalar_lea.hbm %s7481_s2, 256 }
   0x7   :  { %s45_s26 = sshll.u32 %s6062_s25, 4  ;;  %p5807_p0 = scmp.ne.s32.totalorder %s7481_s2, %s5806_s29  ;;  %s46_s26 = int_to_ptr.vmem [resolvable:$true] %s45_s26 }
   0x8   :  { %p5810_p1 = scmp.lt.u32.totalorder %s5806_s29, %s7481_s2 }
   0xa   :  { %p5812_p2 = pnand %p5810_p1, %p5807_p0 }
   0xc   :  { %5815 = shalt.err (!%p5812_p2)
}
   0xd   :  { %s5816_s17 = scalar_lea.vmem %s46_s26, 256  ;;  %p5821_p4 = scmp.lt.s32.totalorder %s46_s26, %s46_s26 }
   0xe   :  { %p5817_p3 = scmp.ne.s32.totalorder %s46_s26, %s5816_s17  ;;  %p5822_p5 = scmp.lt.s32.totalorder %s5816_s17, %s5816_s17 }
  0x10   :  { %p5823_p6 = por %p5822_p5, %p5821_p4 }
  0x12   :  { %p5824_p7 = pnand %p5823_p6, %p5817_p3 }
  0x14   :  { %5827 = shalt.err (!%p5824_p7)
}
  0x15   :  { %s6063_s18 = smov 128   ;;  %s6064_s19 = smov 8  }
  0x16   :  { %51 = dma.hbm_to_vmem [thread:$0]  %s7481_s2, 256, %s46_s26, [#allocation10], %s6063_s18, %s6063_s18, %s6064_s19  }
  0x17   :  { %s6065_s22 = smov [#allocation12]   ;;  %s6066_s24 = smov [#allocation15]  }
  0x18   :  { %s69_s23 = sshll.u32 %s6065_s22, 4  ;;  %s91_s25 = sshll.u32 %s6066_s24, 4  ;;  %s70_s23 = int_to_ptr.vmem [resolvable:$true] %s69_s23  ;;  %s92_s25 = int_to_ptr.vmem [resolvable:$true] %s91_s25 }
  0x19   :  { %s5828_s29 = scalar_lea.hbm %s7483_s4, 4096 }
  0x1a   :  { %p5829_p8 = scmp.ne.s32.totalorder %s7483_s4, %s5828_s29  ;;  %p5832_p9 = scmp.lt.u32.totalorder %s5828_s29, %s7483_s4 }
  0x1c   :  { %p5834_p10 = pnand %p5832_p9, %p5829_p8 }
  0x1e   :  { %5837 = shalt.err (!%p5834_p10)
}
  0x1f   :  { %s5838_s2 = scalar_lea.vmem %s70_s23, 4096  ;;  %p5843_p12 = scmp.lt.s32.totalorder %s70_s23, %s70_s23 }
  0x20   :  { %p5839_p11 = scmp.ne.s32.totalorder %s70_s23, %s5838_s2  ;;  %p5844_p13 = scmp.lt.s32.totalorder %s5838_s2, %s5838_s2 }
  0x22   :  { %p5845_p0 = por %p5844_p13, %p5843_p12 }
  0x24   :  { %p5846_p1 = pnand %p5845_p0, %p5839_p11 }
  0x26   :  { %5849 = shalt.err (!%p5846_p1)
}
  0x27   :  { %s6067_s26 = smov 256   ;;  %s6068_s17 = smov 16  }
  0x28   :  { %75 = dma.hbm_to_vmem [thread:$0]  %s7483_s4, 4096, %s70_s23, [#allocation13], %s6067_s26, %s6067_s26, %s6068_s17  }
  0x29   :  { %s5850_s27 = scalar_lea.hbm %s7485_s6, 4096 }
  0x2a   :  { %p5851_p2 = scmp.ne.s32.totalorder %s7485_s6, %s5850_s27  ;;  %p5854_p3 = scmp.lt.u32.totalorder %s5850_s27, %s7485_s6 }
  0x2c   :  { %p5856_p4 = pnand %p5854_p3, %p5851_p2 }
  0x2e   :  { %5859 = shalt.err (!%p5856_p4)
}
  0x2f   :  { %s5860_s15 = scalar_lea.vmem %s92_s25, 4096  ;;  %p5865_p6 = scmp.lt.s32.totalorder %s92_s25, %s92_s25 }
  0x30   :  { %p5861_p5 = scmp.ne.s32.totalorder %s92_s25, %s5860_s15  ;;  %p5866_p7 = scmp.lt.s32.totalorder %s5860_s15, %s5860_s15 }
  0x32   :  { %p5867_p8 = por %p5866_p7, %p5865_p6 }
  0x34   :  { %p5868_p9 = pnand %p5867_p8, %p5861_p5 }
  0x36   :  { %5871 = shalt.err (!%p5868_p9)
}
  0x37   :  { %97 = dma.hbm_to_vmem [thread:$0]  %s7485_s6, 4096, %s92_s25, [#allocation16], %s6067_s26, %s6067_s26, %s6068_s17  }
  0x38   :  { %s6069_s16 = smov [#allocation6]   ;;  %s6070_s20 = smov [#allocation11]  }
  0x39   :  { %s33_s2 = sshll.u32 %s6069_s16, 4  ;;  %s57_s21 = sshll.u32 %s6070_s20, 4  ;;  %s34_s2 = int_to_ptr.vmem [resolvable:$true] %s33_s2  ;;  %s58_s21 = int_to_ptr.vmem [resolvable:$true] %s57_s21 }
  0x3a   :  { %s5872_s27 = scalar_lea.hbm %s7480_s1, 256 }
  0x3b   :  { %p5873_p10 = scmp.ne.s32.totalorder %s7480_s1, %s5872_s27  ;;  %p5876_p11 = scmp.lt.u32.totalorder %s5872_s27, %s7480_s1 }
  0x3d   :  { %p5878_p12 = pnand %p5876_p11, %p5873_p10 }
  0x3f   :  { %5881 = shalt.err (!%p5878_p12)
}
  0x40   :  { %s5882_s6 = scalar_lea.vmem %s34_s2, 256  ;;  %p5887_p0 = scmp.lt.s32.totalorder %s34_s2, %s34_s2 }
  0x41   :  { %p5883_p13 = scmp.ne.s32.totalorder %s34_s2, %s5882_s6  ;;  %p5888_p1 = scmp.lt.s32.totalorder %s5882_s6, %s5882_s6 }
  0x43   :  { %p5889_p2 = por %p5888_p1, %p5887_p0 }
  0x45   :  { %p5890_p3 = pnand %p5889_p2, %p5883_p13 }
  0x47   :  { %5893 = shalt.err (!%p5890_p3)
}
  0x48   :  { %39 = dma.hbm_to_vmem [thread:$0]  %s7480_s1, 256, %s34_s2, [#allocation7], %s6063_s18, %s6063_s18, %s6064_s19  }
  0x49   :  { %s5894_s16 = scalar_lea.hbm %s7482_s3, 4096 }
  0x4a   :  { %p5895_p4 = scmp.ne.s32.totalorder %s7482_s3, %s5894_s16  ;;  %p5898_p5 = scmp.lt.u32.totalorder %s5894_s16, %s7482_s3 }
  0x4c   :  { %p5900_p6 = pnand %p5898_p5, %p5895_p4 }
  0x4e   :  { %5903 = shalt.err (!%p5900_p6)
}
  0x4f   :  { %s5904_s28 = scalar_lea.vmem %s58_s21, 4096  ;;  %p5909_p8 = scmp.lt.s32.totalorder %s58_s21, %s58_s21 }
  0x50   :  { %p5905_p7 = scmp.ne.s32.totalorder %s58_s21, %s5904_s28  ;;  %p5910_p9 = scmp.lt.s32.totalorder %s5904_s28, %s5904_s28 }
  0x52   :  { %p5911_p10 = por %p5910_p9, %p5909_p8 }
  0x54   :  { %p5912_p11 = pnand %p5911_p10, %p5905_p7 }
  0x56   :  { %5915 = shalt.err (!%p5912_p11)
}
  0x57   :  { %63 = dma.hbm_to_vmem [thread:$0]  %s7482_s3, 4096, %s58_s21, [#allocation10], %s6067_s26, %s6067_s26, %s6068_s17  }
  0x58   :  { %s6071_s29 = smov [#allocation14]   ;;  %s6072_s14 = smov [#allocation17]  }
  0x59   :  { %s82_s30 = sshll.u32 %s6071_s29, 4  ;;  %s103_s6 = sshll.u32 %s6072_s14, 4  ;;  %s83_s30 = int_to_ptr.vmem [resolvable:$true] %s82_s30  ;;  %s104_s6 = int_to_ptr.vmem [resolvable:$true] %s103_s6 }
  0x5a   :  { %s5916_s4 = scalar_lea.hbm %s7484_s5, 64 }
  0x5b   :  { %p5917_p12 = scmp.ne.s32.totalorder %s7484_s5, %s5916_s4  ;;  %p5920_p13 = scmp.lt.u32.totalorder %s5916_s4, %s7484_s5 }
  0x5d   :  { %p5922_p0 = pnand %p5920_p13, %p5917_p12 }
  0x5f   :  { %5925 = shalt.err (!%p5922_p0)
}
  0x60   :  { %s5926_s3 = scalar_lea.vmem %s83_s30, 64  ;;  %p5931_p2 = scmp.lt.s32.totalorder %s83_s30, %s83_s30 }
  0x61   :  { %p5927_p1 = scmp.ne.s32.totalorder %s83_s30, %s5926_s3  ;;  %p5932_p3 = scmp.lt.s32.totalorder %s5926_s3, %s5926_s3 }
  0x63   :  { %p5933_p4 = por %p5932_p3, %p5931_p2 }
  0x65   :  { %p5934_p5 = pnand %p5933_p4, %p5927_p1 }
  0x67   :  { %5937 = shalt.err (!%p5934_p5)
}
  0x68   :  { %85 = dma.hbm_to_vmem [thread:$0]  %s7484_s5, 64, %s83_s30, [#allocation13]  }
  0x69   :  { %s5938_s1 = scalar_lea.hbm %s7486_s7, 4096 }
  0x6a   :  { %p5939_p6 = scmp.ne.s32.totalorder %s7486_s7, %s5938_s1  ;;  %p5942_p7 = scmp.lt.u32.totalorder %s5938_s1, %s7486_s7 }
  0x6c   :  { %p5944_p8 = pnand %p5942_p7, %p5939_p6 }
  0x6e   :  { %5947 = shalt.err (!%p5944_p8)
}
  0x6f   :  { %s5948_s15 = scalar_lea.vmem %s104_s6, 4096  ;;  %p5953_p10 = scmp.lt.s32.totalorder %s104_s6, %s104_s6 }
  0x70   :  { %p5949_p9 = scmp.ne.s32.totalorder %s104_s6, %s5948_s15  ;;  %p5954_p11 = scmp.lt.s32.totalorder %s5948_s15, %s5948_s15 }
  0x72   :  { %p5955_p12 = por %p5954_p11, %p5953_p10 }
  0x74   :  { %p5956_p13 = pnand %p5955_p12, %p5949_p9 }
  0x76   :  { %5959 = shalt.err (!%p5956_p13)
}
  0x77   :  { %109 = dma.hbm_to_vmem [thread:$0]  %s7486_s7, 4096, %s104_s6, [#allocation16], %s6067_s26, %s6067_s26, %s6068_s17  }
  0x78   :  { %s6073_s4 = smov [#allocation18]   ;;  %s5960_s22 = scalar_lea.hbm %s7487_s8, 64 }
  0x79   :  { %s116_s23 = sshll.u32 %s6073_s4, 4  ;;  %p5961_p0 = scmp.ne.s32.totalorder %s7487_s8, %s5960_s22  ;;  %s117_s23 = int_to_ptr.vmem [resolvable:$true] %s116_s23 }
  0x7a   :  { %p5964_p1 = scmp.lt.u32.totalorder %s5960_s22, %s7487_s8 }
  0x7c   :  { %p5966_p2 = pnand %p5964_p1, %p5961_p0 }
  0x7e   :  { %5969 = shalt.err (!%p5966_p2)
}
  0x7f   :  { %s5970_s28 = scalar_lea.vmem %s117_s23, 64  ;;  %p5975_p4 = scmp.lt.s32.totalorder %s117_s23, %s117_s23 }
  0x80   :  { %p5971_p3 = scmp.ne.s32.totalorder %s117_s23, %s5970_s28  ;;  %p5976_p5 = scmp.lt.s32.totalorder %s5970_s28, %s5970_s28 }
  0x82   :  { %p5977_p6 = por %p5976_p5, %p5975_p4 }
  0x84   :  { %p5978_p7 = pnand %p5977_p6, %p5971_p3 }
  0x86   :  { %5981 = shalt.err (!%p5978_p7)
}
  0x87   :  { %119 = dma.hbm_to_vmem [thread:$0]  %s7487_s8, 64, %s117_s23, [#allocation19]  }
  0x88   :  { %6048 = dma.done.wait [#allocation7], 256  }
  0x89   :  { %6049 = vsyncadd [#allocation7], 4294967040 }
  0x8a   :  { %6050 = dma.done.wait [#allocation10], 4352  }
  0x8b   :  { %6051 = vsyncadd [#allocation10], 4294962944 }
  0x8c   :  { %6052 = dma.done.wait [#allocation13], 4160  }
  0x8d   :  { %6053 = vsyncadd [#allocation13], 4294963136 }
  0x8e   :  { %6054 = dma.done.wait [#allocation16], 8192  }
  0x8f   :  { %6055 = vsyncadd [#allocation16], 4294959104 }
  0x90   :  { %6056 = dma.done.wait [#allocation19], 64  }
  0x91   :  { %6057 = vsyncadd [#allocation19], 4294967232  ;;  %v7497_v0 = vmov 0   ;;  %v5258_v1 = vld [vmem:[#allocation11 + $0x4] ss:$16 sps:$4 sm:$0xff]   ;;  %v5319_v44 = vld [vmem:[%s7479_s0 + $0x8] sm:$0xff]  }
  0x92   :  { %439 = vmatprep.mubr.bf16.mxu0 %v7497_v0  ;;  %512 = vmatprep.mubr.bf16.mxu1 %v7497_v0  ;;  %v5260_v2 = vld [vmem:[#allocation11 + $0xc] ss:$16 sps:$4 sm:$0xff]   ;;  %v5262_v3 = vld [vmem:[#allocation11] ss:$16 sps:$4 sm:$0xff]   ;;  %v5263_v4 = vld [vmem:[#allocation11 + $0x8] ss:$16 sps:$4 sm:$0xff]  }
  0x93   :  { %407 = vmatprep.subr.bf16.mxu0 %v5258_v1  ;;  %480 = vmatprep.subr.bf16.mxu1 %v5260_v2  ;;  %v5264_v5 = vld [vmem:[#allocation11 + $0x24] ss:$16 sps:$4 sm:$0xff]   ;;  %v5266_v6 = vld [vmem:[#allocation11 + $0x2c] ss:$16 sps:$4 sm:$0xff]   ;;  %v5268_v7 = vld [vmem:[#allocation11 + $0x20] ss:$16 sps:$4 sm:$0xff]  }
  0x94   :  { %408 = vmatpush1.bf16.msra.mxu0 %v5262_v3  ;;  %481 = vmatpush1.bf16.msra.mxu1 %v5263_v4  ;;  %v5269_v8 = vld [vmem:[#allocation11 + $0x28] ss:$16 sps:$4 sm:$0xff]   ;;  %v5270_v9 = vld [vmem:[#allocation11 + $0x44] ss:$16 sps:$4 sm:$0xff]   ;;  %v5272_v10 = vld [vmem:[#allocation11 + $0x4c] ss:$16 sps:$4 sm:$0xff]  }
  0x95   :  { %409 = vmatprep.subr.bf16.mxu0 %v5264_v5  ;;  %482 = vmatprep.subr.bf16.mxu1 %v5266_v6  ;;  %v5274_v11 = vld [vmem:[#allocation11 + $0x40] ss:$16 sps:$4 sm:$0xff]   ;;  %v5275_v12 = vld [vmem:[#allocation11 + $0x48] ss:$16 sps:$4 sm:$0xff]   ;;  %v5276_v13 = vld [vmem:[#allocation11 + $0x64] ss:$16 sps:$4 sm:$0xff]  }
  0x96   :  { %v5278_v14 = vld [vmem:[#allocation11 + $0x6c] ss:$16 sps:$4 sm:$0xff]   ;;  %v5280_v15 = vld [vmem:[#allocation11 + $0x60] ss:$16 sps:$4 sm:$0xff]   ;;  %v5281_v16 = vld [vmem:[#allocation11 + $0x68] ss:$16 sps:$4 sm:$0xff]  }
  0x97   :  { %v5282_v17 = vld [vmem:[#allocation11 + $0x84] ss:$16 sps:$4 sm:$0xff]   ;;  %v5284_v18 = vld [vmem:[#allocation11 + $0x8c] ss:$16 sps:$4 sm:$0xff]   ;;  %v5286_v19 = vld [vmem:[#allocation11 + $0x80] ss:$16 sps:$4 sm:$0xff]  }
  0x98   :  { %410 = vmatpush1.bf16.msra.mxu0 %v5268_v7  ;;  %483 = vmatpush1.bf16.msra.mxu1 %v5269_v8  ;;  %v5287_v20 = vld [vmem:[#allocation11 + $0x88] ss:$16 sps:$4 sm:$0xff]   ;;  %v5288_v21 = vld [vmem:[#allocation11 + $0xa4] ss:$16 sps:$4 sm:$0xff]   ;;  %v5290_v22 = vld [vmem:[#allocation11 + $0xac] ss:$16 sps:$4 sm:$0xff]   ;;  %v203_v8 = vlaneseq }
  0x99   :  { %411 = vmatprep.subr.bf16.mxu0 %v5270_v9  ;;  %484 = vmatprep.subr.bf16.mxu1 %v5272_v10  ;;  %v5292_v23 = vld [vmem:[#allocation11 + $0xa0] ss:$16 sps:$4 sm:$0xff]   ;;  %v5293_v24 = vld [vmem:[#allocation11 + $0xa8] ss:$16 sps:$4 sm:$0xff]   ;;  %v5294_v25 = vld [vmem:[#allocation11 + $0xc4] ss:$16 sps:$4 sm:$0xff]  }
  0x9a   :  { %v5296_v26 = vld [vmem:[#allocation11 + $0xcc] ss:$16 sps:$4 sm:$0xff]   ;;  %v5298_v27 = vld [vmem:[#allocation11 + $0xc0] ss:$16 sps:$4 sm:$0xff]   ;;  %v5299_v28 = vld [vmem:[#allocation11 + $0xc8] ss:$16 sps:$4 sm:$0xff]  }
  0x9b   :  { %v5300_v29 = vld [vmem:[#allocation11 + $0xe4] ss:$16 sps:$4 sm:$0xff]   ;;  %v5302_v30 = vld [vmem:[#allocation11 + $0xec] ss:$16 sps:$4 sm:$0xff]   ;;  %v5304_v31 = vld [vmem:[#allocation11 + $0xe0] ss:$16 sps:$4 sm:$0xff]  }
  0x9c   :  { %412 = vmatpush1.bf16.msra.mxu0 %v5274_v11  ;;  %485 = vmatpush1.bf16.msra.mxu1 %v5275_v12  ;;  %v5305_v32 = vld [vmem:[#allocation11 + $0xe8] ss:$16 sps:$4 sm:$0xff]   ;;  %v6266_v33 = vld [vmem:[#allocation12 + $0x4] ss:$16 sps:$4 sm:$0xff]   ;;  %v6268_v34 = vld [vmem:[#allocation12 + $0xc] ss:$16 sps:$4 sm:$0xff]  }
  0x9d   :  { %413 = vmatprep.subr.bf16.mxu0 %v5276_v13  ;;  %486 = vmatprep.subr.bf16.mxu1 %v5278_v14  ;;  %v5306_v35 = vld [vmem:[%s7479_s0] sm:$0xff]   ;;  %v6275_v37 = vld [vmem:[#allocation12 + $0x8] ss:$16 sps:$4 sm:$0xff]   ;;  %v6281_v39 = vld [vmem:[#allocation12 + $0x2c] ss:$16 sps:$4 sm:$0xff]   ;;  %v6418_v9 = vshrl.u32 %v203_v8, 7 }
  0x9e   :  { %v6273_v36 = vld [vmem:[#allocation12] ss:$16 sps:$4 sm:$0xff]   ;;  %v6279_v38 = vld [vmem:[#allocation12 + $0x24] ss:$16 sps:$4 sm:$0xff]   ;;  %v6287_v41 = vld [vmem:[#allocation12 + $0x28] ss:$16 sps:$4 sm:$0xff]  }
  0x9f   :  { %v6283_v40 = vld [vmem:[#allocation12 + $0x20] ss:$16 sps:$4 sm:$0xff]   ;;  %v6291_v42 = vld [vmem:[#allocation12 + $0x44] ss:$16 sps:$4 sm:$0xff]   ;;  %v6293_v43 = vld [vmem:[#allocation12 + $0x4c] ss:$16 sps:$4 sm:$0xff]  }
  0xa0   :  { %414 = vmatpush1.bf16.msra.mxu0 %v5280_v15  ;;  %487 = vmatpush1.bf16.msra.mxu1 %v5281_v16  ;;  %v6300_v45 = vld [vmem:[#allocation12 + $0x40] ss:$16 sps:$4 sm:$0xff]   ;;  %v6302_v46 = vld [vmem:[#allocation12 + $0x48] ss:$16 sps:$4 sm:$0xff]   ;;  %v6306_v47 = vld [vmem:[#allocation12 + $0x64] ss:$16 sps:$4 sm:$0xff]  }
  0xa1   :  { %415 = vmatprep.subr.bf16.mxu0 %v5282_v17  ;;  %488 = vmatprep.subr.bf16.mxu1 %v5284_v18  ;;  %v6310_v48 = vld [vmem:[#allocation12 + $0x6c] ss:$16 sps:$4 sm:$0xff]   ;;  %v6312_v49 = vld [vmem:[#allocation12 + $0x60] ss:$16 sps:$4 sm:$0xff]   ;;  %v6314_v50 = vld [vmem:[#allocation12 + $0x68] ss:$16 sps:$4 sm:$0xff]  }
  0xa2   :  { %v6318_v51 = vld [vmem:[#allocation12 + $0x84] ss:$16 sps:$4 sm:$0xff]   ;;  %v6322_v52 = vld [vmem:[#allocation12 + $0x8c] ss:$16 sps:$4 sm:$0xff]   ;;  %v6329_v54 = vld [vmem:[#allocation12 + $0x80] ss:$16 sps:$4 sm:$0xff]  }
  0xa3   :  { %v5332_v53 = vld [vmem:[%s7479_s0 + $0x10] sm:$0xff]   ;;  %v6331_v55 = vld [vmem:[#allocation12 + $0x88] ss:$16 sps:$4 sm:$0xff]   ;;  %v6335_v57 = vld [vmem:[#allocation12 + $0xac] ss:$16 sps:$4 sm:$0xff]   ;;  %7501 = vst [vmem:[#allocation31_spill] sm:$0xff] %v6418_v9 }
  0xa4   :  { %416 = vmatpush1.bf16.msra.mxu0 %v5286_v19  ;;  %489 = vmatpush1.bf16.msra.mxu1 %v5287_v20  ;;  %v6333_v56 = vld [vmem:[#allocation12 + $0xa4] ss:$16 sps:$4 sm:$0xff]   ;;  %v6341_v58 = vld [vmem:[#allocation12 + $0xa0] ss:$16 sps:$4 sm:$0xff]   ;;  %v6343_v59 = vld [vmem:[#allocation12 + $0xa8] ss:$16 sps:$4 sm:$0xff]  }
  0xa5   :  { %417 = vmatprep.subr.bf16.mxu0 %v5288_v21  ;;  %490 = vmatprep.subr.bf16.mxu1 %v5290_v22  ;;  %v6345_v60 = vld [vmem:[#allocation12 + $0xc4] ss:$16 sps:$4 sm:$0xff]   ;;  %v6347_v61 = vld [vmem:[#allocation12 + $0xcc] ss:$16 sps:$4 sm:$0xff]   ;;  %v6358_v63 = vld [vmem:[#allocation12 + $0xc0] ss:$16 sps:$4 sm:$0xff]  }
  0xa6   :  { %v5345_v62 = vld [vmem:[%s7479_s0 + $0x18] sm:$0xff]   ;;  %v6362_v2 = vld [vmem:[#allocation12 + $0xe4] ss:$16 sps:$4 sm:$0xff]   ;;  %v6370_v4 = vld [vmem:[#allocation12 + $0xe0] ss:$16 sps:$4 sm:$0xff]   ;;  %v7495_v10 = vsub.s32 2, %v6418_v9 }
  0xa7   :  { %v6360_v1 = vld [vmem:[#allocation12 + $0xc8] ss:$16 sps:$4 sm:$0xff]   ;;  %v6364_v3 = vld [vmem:[#allocation12 + $0xec] ss:$16 sps:$4 sm:$0xff]   ;;  %v153_v6 = vld [vmem:[#allocation6] sm:$0xff]  ;;  %v7493_v11 = vsub.s32 3, %v6418_v9 }
  0xa8   :  { %418 = vmatpush1.bf16.msra.mxu0 %v5292_v23  ;;  %491 = vmatpush1.bf16.msra.mxu1 %v5293_v24  ;;  %v6372_v5 = vld [vmem:[#allocation12 + $0xe8] ss:$16 sps:$4 sm:$0xff]   ;;  %v591_v7 = vpack.c.bf16 %v153_v6, %v153_v6  ;;  %v7496_v12 = vsub.s32 0, %v6418_v9  ;;  %v201_v13 = vld [vmem:[#allocation14] sm:$0xf]  ;;  %v7494_v14 = vsub.s32 1, %v6418_v9 }
  0xa9   :  { %419 = vmatprep.subr.bf16.mxu0 %v5294_v25  ;;  %492 = vmatprep.subr.bf16.mxu1 %v5296_v26  ;;  %v6426_v15 = vrot.slane %v201_v13, %v7495_v10  ;;  %v6434_v18 = vrot.slane %v201_v13, %v7493_v11  ;;  %vm6076_vm0 = vmmov 0   ;;  %s6077_s17 = smov [#allocation21]  }
  0xaa   :  { %v206_v19 = vrot.slane %v201_v13, %v7496_v12  ;;  %v210_v22 = vrot.slane %v201_v13, %v7494_v14  ;;  %s4759_s6 = sshll.u32 %s6077_s17, 4  ;;  %s4760_s6 = int_to_ptr.vmem [resolvable:$true] %s4759_s6 }
  0xab   :  { %s5982_s1 = scalar_lea.vmem %s4760_s6, 256  ;;  %p5987_p9 = scmp.lt.s32.totalorder %s4760_s6, %s4760_s6 }
  0xac   :  { %420 = vmatpush1.bf16.msra.mxu0 %v5298_v27  ;;  %493 = vmatpush1.bf16.msra.mxu1 %v5299_v28  ;;  %p5983_p8 = scmp.ne.s32.totalorder %s4760_s6, %s5982_s1  ;;  %p5988_p10 = scmp.lt.s32.totalorder %s5982_s1, %s5982_s1 }
  0xad   :  { %421 = vmatprep.subr.bf16.mxu0 %v5300_v29  ;;  %494 = vmatprep.subr.bf16.mxu1 %v5302_v30 }
  0xae   :  { %p5989_p11 = por %p5988_p10, %p5987_p9 }
  0xb0   :  { %422 = vmatpush1.bf16.msra.mxu0 %v5304_v31  ;;  %495 = vmatpush1.bf16.msra.mxu1 %v5305_v32  ;;  %p5990_p12 = pnand %p5989_p11, %p5983_p8 }
  0xb1   :  { %784 = vmatprep.subr.bf16.mxu0 %v6266_v33  ;;  %825 = vmatprep.subr.bf16.mxu1 %v6268_v34 }
  0xb3   :  { %440 = vmatmul.mubr.bf16.vlgmr.msra.gmra.mrb[0].mxu0 %v5306_v35  ;;  %513 = vmatmul.mubr.bf16.vlgmr.msra.gmra.mrb[0].mxu1 %v5306_v35 }
  0xb4   :  { %785 = vmatpush1.bf16.msra.mxu0 %v6273_v36  ;;  %826 = vmatpush1.bf16.msra.mxu1 %v6275_v37 }
  0xb5   :  { %786 = vmatprep.subr.bf16.mxu0 %v6279_v38  ;;  %827 = vmatprep.subr.bf16.mxu1 %v6281_v39 }
  0xb6   :  { %449 = vmatprep.mubr.bf16.mxu0 %v7497_v0  ;;  %522 = vmatprep.mubr.bf16.mxu1 %v7497_v0 }
  0xb8   :  { %787 = vmatpush1.bf16.msra.mxu0 %v6283_v40  ;;  %828 = vmatpush1.bf16.msra.mxu1 %v6287_v41 }
  0xb9   :  { %788 = vmatprep.subr.bf16.mxu0 %v6291_v42  ;;  %829 = vmatprep.subr.bf16.mxu1 %v6293_v43 }
  0xbb   :  { %450 = vmatmul.mubr.bf16.gmra.mrb[4].mxu0 %v5319_v44  ;;  %523 = vmatmul.mubr.bf16.gmra.mrb[4].mxu1 %v5319_v44 }
  0xbc   :  { %789 = vmatpush1.bf16.msra.mxu0 %v6300_v45  ;;  %830 = vmatpush1.bf16.msra.mxu1 %v6302_v46 }
  0xbd   :  { %790 = vmatprep.subr.bf16.mxu0 %v6306_v47  ;;  %831 = vmatprep.subr.bf16.mxu1 %v6310_v48 }
  0xbe   :  { %459 = vmatprep.mubr.bf16.mxu0 %v7497_v0  ;;  %532 = vmatprep.mubr.bf16.mxu1 %v7497_v0 }
  0xc0   :  { %791 = vmatpush1.bf16.msra.mxu0 %v6312_v49  ;;  %832 = vmatpush1.bf16.msra.mxu1 %v6314_v50 }
  0xc1   :  { %792 = vmatprep.subr.bf16.mxu0 %v6318_v51  ;;  %833 = vmatprep.subr.bf16.mxu1 %v6322_v52 }
  0xc3   :  { %460 = vmatmul.mubr.bf16.gmra.mrb[8].mxu0 %v5332_v53  ;;  %533 = vmatmul.mubr.bf16.gmra.mrb[8].mxu1 %v5332_v53 }
  0xc4   :  { %793 = vmatpush1.bf16.msra.mxu0 %v6329_v54  ;;  %834 = vmatpush1.bf16.msra.mxu1 %v6331_v55 }
  0xc5   :  { %794 = vmatprep.subr.bf16.mxu0 %v6333_v56  ;;  %835 = vmatprep.subr.bf16.mxu1 %v6335_v57 }
  0xc6   :  { %469 = vmatprep.mubr.bf16.mxu0 %v7497_v0  ;;  %542 = vmatprep.mubr.bf16.mxu1 %v7497_v0 }
  0xc8   :  { %795 = vmatpush1.bf16.msra.mxu0 %v6341_v58  ;;  %836 = vmatpush1.bf16.msra.mxu1 %v6343_v59 }
  0xc9   :  { %796 = vmatprep.subr.bf16.mxu0 %v6345_v60  ;;  %837 = vmatprep.subr.bf16.mxu1 %v6347_v61 }
  0xcb   :  { %470 = vmatmul.mubr.bf16.gmra.mrb[12].mxu0 %v5345_v62  ;;  %543 = vmatmul.mubr.bf16.gmra.mrb[12].mxu1 %v5345_v62 }
  0xcc   :  { %797 = vmatpush1.bf16.msra.mxu0 %v6358_v63  ;;  %838 = vmatpush1.bf16.msra.mxu1 %v6360_v1 }
  0xcd   :  { %798 = vmatprep.subr.bf16.mxu0 %v6362_v2  ;;  %839 = vmatprep.subr.bf16.mxu1 %v6364_v3 }
  0xce   :  { %816 = vmatprep.mubr.bf16.mxu0 %v7497_v0  ;;  %857 = vmatprep.mubr.bf16.mxu1 %v7497_v0 }
  0xd0   :  { %799 = vmatpush1.bf16.msra.mxu0 %v6370_v4  ;;  %840 = vmatpush1.bf16.msra.mxu1 %v6372_v5 }
  0xd1   :  { %1093 = vmatprep.subr.bf16.mxu0 %v6266_v33  ;;  %1134 = vmatprep.subr.bf16.mxu1 %v6268_v34 }
  0xd3   :  { %817 = vmatmul.mubr.bf16.vlgmr.msra.gmra.mrb[16].mxu0 %v591_v7  ;;  %858 = vmatmul.mubr.bf16.vlgmr.msra.gmra.mrb[16].mxu1 %v591_v7 }
  0xd4   :  { %1094 = vmatpush1.bf16.msra.mxu0 %v6273_v36  ;;  %1135 = vmatpush1.bf16.msra.mxu1 %v6275_v37 }
  0xd5   :  { %1095 = vmatprep.subr.bf16.mxu0 %v6279_v38  ;;  %1136 = vmatprep.subr.bf16.mxu1 %v6281_v39 }
  0xd6   :  { %1125 = vmatprep.mubr.bf16.mxu0 %v7497_v0  ;;  %1166 = vmatprep.mubr.bf16.mxu1 %v7497_v0 }
  0xd8   :  { %1096 = vmatpush1.bf16.msra.mxu0 %v6283_v40  ;;  %1137 = vmatpush1.bf16.msra.mxu1 %v6287_v41 }
  0xd9   :  { %1097 = vmatprep.subr.bf16.mxu0 %v6291_v42  ;;  %1138 = vmatprep.subr.bf16.mxu1 %v6293_v43 }
  0xdc   :  { %1098 = vmatpush1.bf16.msra.mxu0 %v6300_v45  ;;  %1139 = vmatpush1.bf16.msra.mxu1 %v6302_v46 }
  0xdd   :  { %1099 = vmatprep.subr.bf16.mxu0 %v6306_v47  ;;  %1140 = vmatprep.subr.bf16.mxu1 %v6310_v48 }
  0xe0   :  { %1100 = vmatpush1.bf16.msra.mxu0 %v6312_v49  ;;  %1141 = vmatpush1.bf16.msra.mxu1 %v6314_v50 }
  0xe1   :  { %1101 = vmatprep.subr.bf16.mxu0 %v6318_v51  ;;  %1142 = vmatprep.subr.bf16.mxu1 %v6322_v52 }
  0xe4   :  { %1102 = vmatpush1.bf16.msra.mxu0 %v6329_v54  ;;  %1143 = vmatpush1.bf16.msra.mxu1 %v6331_v55 }
  0xe5   :  { %1103 = vmatprep.subr.bf16.mxu0 %v6333_v56  ;;  %1144 = vmatprep.subr.bf16.mxu1 %v6335_v57 }
  0xe8   :  { %1104 = vmatpush1.bf16.msra.mxu0 %v6341_v58  ;;  %1145 = vmatpush1.bf16.msra.mxu1 %v6343_v59 }
  0xe9   :  { %1105 = vmatprep.subr.bf16.mxu0 %v6345_v60  ;;  %1146 = vmatprep.subr.bf16.mxu1 %v6347_v61 }
  0xec   :  { %1106 = vmatpush1.bf16.msra.mxu0 %v6358_v63  ;;  %1147 = vmatpush1.bf16.msra.mxu1 %v6360_v1 }
  0xed   :  { %1107 = vmatprep.subr.bf16.mxu0 %v6362_v2  ;;  %1148 = vmatprep.subr.bf16.mxu1 %v6364_v3 }
  0xf0   :  { %1108 = vmatpush1.bf16.msra.mxu0 %v6370_v4  ;;  %1149 = vmatpush1.bf16.msra.mxu1 %v6372_v5 }
  0xf1   :  { %1403 = vmatprep.subr.bf16.mxu0 %v6266_v33  ;;  %1444 = vmatprep.subr.bf16.mxu1 %v6268_v34 }
 0x186   :  { %v6428_v16 = vpop.f32.mrb[0].mxu0  ;;  %v6430_v17 = vpop.f32.mrb[0].mxu1 }
 0x187   :  { %v443_v20 = vpop.f32.mrb[1].mxu0  ;;  %v516_v21 = vpop.f32.mrb[1].mxu1 }
 0x188   :  { %v445_v23 = vpop.f32.mrb[2].mxu0  ;;  %v518_v24 = vpop.f32.mrb[2].mxu1 }
 0x189   :  { %v6440_v25 = vadd.f32 %v445_v23, %v206_v19  ;;  %v447_v26 = vpop.f32.mrb[3].mxu0  ;;  %v6443_v27 = vadd.f32 %v518_v24, %v6426_v15  ;;  %v520_v28 = vpop.f32.mrb[3].mxu1 }
 0x18a   :  { %v6445_v29 = vadd.f32 %v447_v26, %v210_v22  ;;  %v6448_v30 = vadd.f32 %v520_v28, %v6434_v18 }
 0x18e   :  { %v451_v31 = vpop.f32.mrb[4].mxu0  ;;  %v524_v32 = vpop.f32.mrb[4].mxu1 }
 0x18f   :  { %v6450_v35 = vadd.f32 %v451_v31, %v206_v19  ;;  %v453_v44 = vpop.f32.mrb[5].mxu0  ;;  %v6453_v53 = vadd.f32 %v524_v32, %v6426_v15  ;;  %v526_v62 = vpop.f32.mrb[5].mxu1 }
 0x190   :  { %v6455_v6 = vadd.f32 %v453_v44, %v210_v22  ;;  %v455_v7 = vpop.f32.mrb[6].mxu0  ;;  %v6458_v8 = vadd.f32 %v526_v62, %v6434_v18  ;;  %v528_v13 = vpop.f32.mrb[6].mxu1 }
 0x191   :  { %v6460_v23 = vadd.f32 %v455_v7, %v206_v19  ;;  %v457_v24 = vpop.f32.mrb[7].mxu0  ;;  %v6463_v26 = vadd.f32 %v528_v13, %v6426_v15  ;;  %v530_v28 = vpop.f32.mrb[7].mxu1 }
 0x192   :  { %7502 = vst [vmem:[#allocation32_spill] sm:$0xff] %v6458_v8  ;;  %v6465_v31 = vadd.f32 %v457_v24, %v210_v22  ;;  %v6468_v32 = vadd.f32 %v530_v28, %v6434_v18 }
 0x193   :  { %7503 = vst [vmem:[#allocation33_spill] sm:$0xff] %v6460_v23  ;;  %7504 = vst [vmem:[#allocation34_spill] sm:$0xff] %v6463_v26 }
 0x194   :  { %7505 = vst [vmem:[#allocation35_spill] sm:$0xff] %v6465_v31  ;;  %7506 = vst [vmem:[#allocation36_spill] sm:$0xff] %v6468_v32 }
 0x196   :  { %v461_v11 = vpop.f32.mrb[8].mxu0  ;;  %v534_v44 = vpop.f32.mrb[8].mxu1 }
 0x197   :  { %v6470_v14 = vadd.f32 %v461_v11, %v206_v19  ;;  %v463_v10 = vpop.f32.mrb[9].mxu0  ;;  %v6473_v62 = vadd.f32 %v534_v44, %v6426_v15  ;;  %v536_v7 = vpop.f32.mrb[9].mxu1 }
 0x198   :  { %v6475_v12 = vadd.f32 %v463_v10, %v210_v22  ;;  %v465_v0 = vpop.f32.mrb[10].mxu0  ;;  %v6478_v13 = vadd.f32 %v536_v7, %v6434_v18  ;;  %v538_v24 = vpop.f32.mrb[10].mxu1 }
 0x199   :  { %7507 = vst [vmem:[#allocation37_spill] sm:$0xff] %v6470_v14  ;;  %7508 = vst [vmem:[#allocation38_spill] sm:$0xff] %v6473_v62  ;;  %v6480_v9 = vadd.f32 %v465_v0, %v206_v19  ;;  %v467_v28 = vpop.f32.mrb[11].mxu0  ;;  %v6483_v32 = vadd.f32 %v538_v24, %v6426_v15  ;;  %v540_v11 = vpop.f32.mrb[11].mxu1 }
 0x19a   :  { %7509 = vst [vmem:[#allocation39_spill] sm:$0xff] %v6475_v12  ;;  %7510 = vst [vmem:[#allocation40_spill] sm:$0xff] %v6478_v13  ;;  %v6485_v14 = vadd.f32 %v467_v28, %v210_v22  ;;  %v6488_v44 = vadd.f32 %v540_v11, %v6434_v18 }
 0x19b   :  { %7511 = vst [vmem:[#allocation41_spill] sm:$0xff] %v6480_v9  ;;  %7512 = vst [vmem:[#allocation42_spill] sm:$0xff] %v6483_v32 }
 0x19c   :  { %7513 = vst [vmem:[#allocation43_spill] sm:$0xff] %v6485_v14  ;;  %7514 = vst [vmem:[#allocation44_spill] sm:$0xff] %v6488_v44 }
 0x19e   :  { %v471_v62 = vpop.f32.mrb[12].mxu0  ;;  %v544_v10 = vpop.f32.mrb[12].mxu1 }
 0x19f   :  { %v6490_v12 = vadd.f32 %v471_v62, %v206_v19  ;;  %v473_v31 = vpop.f32.mrb[13].mxu0  ;;  %v6493_v7 = vadd.f32 %v544_v10, %v6426_v15  ;;  %v546_v0 = vpop.f32.mrb[13].mxu1 }
 0x1a0   :  { %v6495_v9 = vadd.f32 %v473_v31, %v210_v22  ;;  %v475_v13 = vpop.f32.mrb[14].mxu0  ;;  %v6498_v24 = vadd.f32 %v546_v0, %v6434_v18  ;;  %v548_v28 = vpop.f32.mrb[14].mxu1  ;;  %v442_v31 = vadd.f32 %v6428_v16, %v206_v19  ;;  %v444_v0 = vadd.f32 %v443_v20, %v210_v22 }
 0x1a1   :  { %7515 = vst [vmem:[#allocation45_spill] sm:$0xff] %v6490_v12  ;;  %7516 = vst [vmem:[#allocation46_spill] sm:$0xff] %v6493_v7  ;;  %v6500_v14 = vadd.f32 %v475_v13, %v206_v19  ;;  %v477_v11 = vpop.f32.mrb[15].mxu0  ;;  %v6503_v44 = vadd.f32 %v548_v28, %v6426_v15  ;;  %v550_v62 = vpop.f32.mrb[15].mxu1 }
 0x1a2   :  { %7517 = vst [vmem:[#allocation47_spill] sm:$0xff] %v6495_v9  ;;  %7518 = vst [vmem:[#allocation48_spill] sm:$0xff] %v6498_v24  ;;  %v6505_v12 = vadd.f32 %v477_v11, %v210_v22  ;;  %v6508_v10 = vadd.f32 %v550_v62, %v6434_v18  ;;  %v515_v9 = vadd.f32 %v6430_v17, %v6426_v15 }
 0x1a3   :  { %7519 = vst [vmem:[#allocation49_spill] sm:$0xff] %v6500_v14  ;;  %7520 = vst [vmem:[#allocation50_spill] sm:$0xff] %v6503_v44  ;;  %v517_v24 = vadd.f32 %v516_v21, %v6434_v18  ;;  %v157_v21 = vld [vmem:[#allocation9] sm:$0xff] }
 0x1a4   :  { %7521 = vst [vmem:[#allocation51_spill] sm:$0xff] %v6505_v12  ;;  %7522 = vst [vmem:[#allocation52_spill] sm:$0xff] %v6508_v10 }
 0x1a6   :  { %v818_v13 = vpop.f32.mrb[16].mxu0  ;;  %v859_v14 = vpop.f32.mrb[16].mxu1 }
 0x1a7   :  { %v866_v7 = vadd.f32 %v818_v13, %v442_v31  ;;  %v868_v32 = vadd.f32 %v859_v14, %v515_v9  ;;  %v820_v28 = vpop.f32.mrb[17].mxu0  ;;  %v861_v44 = vpop.f32.mrb[17].mxu1  ;;  %v7523_v31 = vmov 0  }
 0x1a8   :  { %v867_v26 = vadd.f32 %v820_v28, %v444_v0  ;;  %v869_v11 = vadd.f32 %v861_v44, %v517_v24  ;;  %v822_v12 = vpop.f32.mrb[18].mxu0  ;;  %v863_v23 = vpop.f32.mrb[18].mxu1 }
 0x1a9   :  { %v4862_v62 = vmul.f32 -1.442695, %v866_v7  ;;  %v823_v10 = vpop.f32.mrb[19].mxu0  ;;  %v864_v8 = vpop.f32.mrb[19].mxu1 }
 0x1aa   :  { %v4863_v16 = vmul.f32 -1.442695, %v867_v26  ;;  %v4864_v15 = vmul.f32 -1.442695, %v869_v11 }
 0x1ab   :  { %5514 = vpow2.f32 %v4862_v62 }
 0x1ac   :  { %5516 = vpow2.f32 %v4863_v16 }
 0x1ad   :  { %5518 = vpow2.f32 %v4864_v15 }
 0x1ae   :  { %5520 = vtanh.f32 %v868_v32 }
 0x1b5   :  { %v5515_v17 = vpop.eup %5514 }
 0x1b6   :  { %v5517_v19 = vpop.eup %5516  ;;  %v873_v18 = vadd.f32 1.0, %v5515_v17 }
 0x1b7   :  { %v879_v20 = vadd.f32 1.0, %v5517_v19  ;;  %v5519_v9 = vpop.eup %5518 }
 0x1b8   :  { %5522 = vrcp.f32 %v873_v18  ;;  %v5521_v14 = vpop.eup %5520  ;;  %v886_v44 = vadd.f32 1.0, %v5519_v9 }
 0x1b9   :  { %5524 = vrcp.f32 %v879_v20 }
 0x1ba   :  { %5526 = vrcp.f32 %v886_v44 }
 0x1c2   :  { %v5523_v12 = vpop.eup %5522 }
 0x1c3   :  { %v5525_v22 = vpop.eup %5524  ;;  %v890_v23 = vmul.f32 %v5523_v12, %v5521_v14 }
 0x1c4   :  { %v889_v8 = vmul.f32 %v5525_v22, %v157_v21  ;;  %v5527_v7 = vpop.eup %5526 }
 0x1c6   :  { %v6514_v26 = vadd.f32 %v890_v23, %v889_v8 }
 0x1c8   :  { %5528 = vtanh.f32 %v6514_v26 }
 0x1d2   :  { %v5529_v24 = vpop.eup %5528 }
 0x1d3   :  { %v893_v10 = vmul.f32 %v5529_v24, %v5527_v7 }
 0x1d5   :  { %v894_v32 = vpack.c.bf16 %v893_v10, %v893_v10 }
 0x1d7   :  { %895 = vst [vmem:[#allocation4] sm:$0xf] %v894_v32  ;;  %1126 = vmatmul.mubr.bf16.vlgmr.msra.gmra.mrb[20].mxu0 %v894_v32  ;;  %1167 = vmatmul.mubr.bf16.vlgmr.msra.gmra.mrb[20].mxu1 %v894_v32 }
 0x1d8   :  { %1404 = vmatpush1.bf16.msra.mxu0 %v6273_v36  ;;  %1445 = vmatpush1.bf16.msra.mxu1 %v6275_v37 }
 0x1d9   :  { %1405 = vmatprep.subr.bf16.mxu0 %v6279_v38  ;;  %1446 = vmatprep.subr.bf16.mxu1 %v6281_v39 }
 0x1da   :  { %1435 = vmatprep.mubr.bf16.mxu0 %v7523_v31  ;;  %1476 = vmatprep.mubr.bf16.mxu1 %v7523_v31 }
 0x1dc   :  { %1406 = vmatpush1.bf16.msra.mxu0 %v6283_v40  ;;  %1447 = vmatpush1.bf16.msra.mxu1 %v6287_v41 }
 0x1dd   :  { %1407 = vmatprep.subr.bf16.mxu0 %v6291_v42  ;;  %1448 = vmatprep.subr.bf16.mxu1 %v6293_v43 }
 0x1e0   :  { %1408 = vmatpush1.bf16.msra.mxu0 %v6300_v45  ;;  %1449 = vmatpush1.bf16.msra.mxu1 %v6302_v46 }
 0x1e1   :  { %1409 = vmatprep.subr.bf16.mxu0 %v6306_v47  ;;  %1450 = vmatprep.subr.bf16.mxu1 %v6310_v48 }
 0x1e4   :  { %1410 = vmatpush1.bf16.msra.mxu0 %v6312_v49  ;;  %1451 = vmatpush1.bf16.msra.mxu1 %v6314_v50 }
 0x1e5   :  { %1411 = vmatprep.subr.bf16.mxu0 %v6318_v51  ;;  %1452 = vmatprep.subr.bf16.mxu1 %v6322_v52 }
 0x1e8   :  { %1412 = vmatpush1.bf16.msra.mxu0 %v6329_v54  ;;  %1453 = vmatpush1.bf16.msra.mxu1 %v6331_v55 }
 0x1e9   :  { %1413 = vmatprep.subr.bf16.mxu0 %v6333_v56  ;;  %1454 = vmatprep.subr.bf16.mxu1 %v6335_v57 }
 0x1ec   :  { %1414 = vmatpush1.bf16.msra.mxu0 %v6341_v58  ;;  %1455 = vmatpush1.bf16.msra.mxu1 %v6343_v59 }
 0x1ed   :  { %1415 = vmatprep.subr.bf16.mxu0 %v6345_v60  ;;  %1456 = vmatprep.subr.bf16.mxu1 %v6347_v61 }
 0x1f0   :  { %1416 = vmatpush1.bf16.msra.mxu0 %v6358_v63  ;;  %1457 = vmatpush1.bf16.msra.mxu1 %v6360_v1 }
 0x1f1   :  { %1417 = vmatprep.subr.bf16.mxu0 %v6362_v2  ;;  %1458 = vmatprep.subr.bf16.mxu1 %v6364_v3 }
 0x1f4   :  { %1418 = vmatpush1.bf16.msra.mxu0 %v6370_v4  ;;  %1459 = vmatpush1.bf16.msra.mxu1 %v6372_v5 }
 0x1f5   :  { %1713 = vmatprep.subr.bf16.mxu0 %v6266_v33  ;;  %1754 = vmatprep.subr.bf16.mxu1 %v6268_v34 }
 0x2aa   :  { %v1127_v0 = vpop.f32.mrb[20].mxu0  ;;  %v1168_v13 = vpop.f32.mrb[20].mxu1 }
 0x2ab   :  { %v1175_v28 = vadd.f32 %v1127_v0, %v6440_v25  ;;  %v1177_v11 = vadd.f32 %v1168_v13, %v6443_v27  ;;  %v1129_v62 = vpop.f32.mrb[21].mxu0  ;;  %v1170_v16 = vpop.f32.mrb[21].mxu1 }
 0x2ac   :  { %v1176_v15 = vadd.f32 %v1129_v62, %v6445_v29  ;;  %v1178_v17 = vadd.f32 %v1170_v16, %v6448_v30  ;;  %v1131_v19 = vpop.f32.mrb[22].mxu0  ;;  %v1172_v18 = vpop.f32.mrb[22].mxu1  ;;  %v6613_v62 = vld [vmem:[#allocation12 + $0x24] ss:$16 sps:$4 sm:$0xff]   ;;  %v6615_v16 = vld [vmem:[#allocation12 + $0x2c] ss:$16 sps:$4 sm:$0xff]  }
 0x2ad   :  { %v4897_v20 = vmul.f32 -1.442695, %v1175_v28  ;;  %v1132_v9 = vpop.f32.mrb[23].mxu0  ;;  %v1173_v14 = vpop.f32.mrb[23].mxu1  ;;  %v6605_v28 = vld [vmem:[#allocation12] ss:$16 sps:$4 sm:$0xff]  }
 0x2ae   :  { %v4898_v33 = vmul.f32 -1.442695, %v1176_v15  ;;  %v4899_v34 = vmul.f32 -1.442695, %v1178_v17  ;;  %v6617_v15 = vld [vmem:[#allocation12 + $0x20] ss:$16 sps:$4 sm:$0xff]  }
 0x2af   :  { %5530 = vpow2.f32 %v4897_v20  ;;  %v6619_v17 = vld [vmem:[#allocation12 + $0x28] ss:$16 sps:$4 sm:$0xff]   ;;  %v6625_v19 = vld [vmem:[#allocation12 + $0x44] ss:$16 sps:$4 sm:$0xff]   ;;  %v6627_v18 = vld [vmem:[#allocation12 + $0x4c] ss:$16 sps:$4 sm:$0xff]  }
 0x2b0   :  { %5532 = vpow2.f32 %v4898_v33  ;;  %v6629_v20 = vld [vmem:[#allocation12 + $0x40] ss:$16 sps:$4 sm:$0xff]   ;;  %v6631_v9 = vld [vmem:[#allocation12 + $0x48] ss:$16 sps:$4 sm:$0xff]   ;;  %v6637_v14 = vld [vmem:[#allocation12 + $0x64] ss:$16 sps:$4 sm:$0xff]  }
 0x2b1   :  { %5534 = vpow2.f32 %v4899_v34  ;;  %v6639_v33 = vld [vmem:[#allocation12 + $0x6c] ss:$16 sps:$4 sm:$0xff]   ;;  %v6641_v34 = vld [vmem:[#allocation12 + $0x60] ss:$16 sps:$4 sm:$0xff]  }
 0x2b2   :  { %5536 = vtanh.f32 %v1177_v11  ;;  %v6607_v11 = vld [vmem:[#allocation12 + $0x8] ss:$16 sps:$4 sm:$0xff]  }
 0x2b9   :  { %v5531_v21 = vpop.eup %5530 }
 0x2ba   :  { %v5533_v12 = vpop.eup %5532  ;;  %v1182_v25 = vadd.f32 1.0, %v5531_v21  ;;  %v6643_v21 = vld [vmem:[#allocation12 + $0x68] ss:$16 sps:$4 sm:$0xff]  }
 0x2bb   :  { %v1188_v27 = vadd.f32 1.0, %v5533_v12  ;;  %v5535_v29 = vpop.eup %5534  ;;  %v6649_v12 = vld [vmem:[#allocation12 + $0x80] ss:$16 sps:$4 sm:$0xff]  }
 0x2bc   :  { %5538 = vrcp.f32 %v1182_v25  ;;  %v5537_v22 = vpop.eup %5536  ;;  %v1195_v8 = vadd.f32 1.0, %v5535_v29  ;;  %v6651_v25 = vld [vmem:[#allocation12 + $0x84] ss:$16 sps:$4 sm:$0xff]   ;;  %v6655_v29 = vld [vmem:[#allocation12 + $0x8c] ss:$16 sps:$4 sm:$0xff]  }
 0x2bd   :  { %5540 = vrcp.f32 %v1188_v27  ;;  %v6653_v27 = vld [vmem:[#allocation12 + $0x88] ss:$16 sps:$4 sm:$0xff]  }
 0x2be   :  { %5542 = vrcp.f32 %v1195_v8  ;;  %v6670_v8 = vld [vmem:[#allocation12 + $0xc4] ss:$16 sps:$4 sm:$0xff]  }
 0x2c6   :  { %v5539_v30 = vpop.eup %5538 }
 0x2c7   :  { %v5541_v23 = vpop.eup %5540  ;;  %v1199_v44 = vmul.f32 %v5539_v30, %v5537_v22  ;;  %v6657_v22 = vld [vmem:[#allocation12 + $0xa4] ss:$16 sps:$4 sm:$0xff]   ;;  %v6660_v30 = vld [vmem:[#allocation12 + $0xac] ss:$16 sps:$4 sm:$0xff]  }
 0x2c8   :  { %v1198_v7 = vmul.f32 %v5541_v23, %v6514_v26  ;;  %v5543_v10 = vpop.eup %5542  ;;  %v6603_v26 = vld [vmem:[#allocation12 + $0xc] ss:$16 sps:$4 sm:$0xff]   ;;  %v6664_v23 = vld [vmem:[#allocation12 + $0xa0] ss:$16 sps:$4 sm:$0xff]  }
 0x2ca   :  { %v6556_v24 = vadd.f32 %v1199_v44, %v1198_v7  ;;  %v6668_v44 = vld [vmem:[#allocation12 + $0xa8] ss:$16 sps:$4 sm:$0xff]   ;;  %v6673_v7 = vld [vmem:[#allocation12 + $0xcc] ss:$16 sps:$4 sm:$0xff]  }
 0x2cc   :  { %5544 = vtanh.f32 %v6556_v24 }
 0x2d6   :  { %v5545_v32 = vpop.eup %5544 }
 0x2d7   :  { %v1202_v0 = vmul.f32 %v5545_v32, %v5543_v10  ;;  %v6680_v10 = vld [vmem:[#allocation12 + $0xc8] ss:$16 sps:$4 sm:$0xff]   ;;  %v6682_v32 = vld [vmem:[#allocation12 + $0xe4] ss:$16 sps:$4 sm:$0xff]  }
 0x2d9   :  { %v1203_v13 = vpack.c.bf16 %v1202_v0, %v1202_v0  ;;  %v6685_v0 = vld [vmem:[#allocation12 + $0xec] ss:$16 sps:$4 sm:$0xff]  }
 0x2db   :  { %1205 = vst [vmem:[#allocation4 + $0x4] sm:$0xf] %v1203_v13  ;;  %1436 = vmatmul.mubr.bf16.vlgmr.msra.gmra.mrb[24].mxu0 %v1203_v13  ;;  %1477 = vmatmul.mubr.bf16.vlgmr.msra.gmra.mrb[24].mxu1 %v1203_v13  ;;  %v6688_v13 = vld [vmem:[#allocation12 + $0xe0] ss:$16 sps:$4 sm:$0xff]  }
 0x2dc   :  { %1714 = vmatpush1.bf16.msra.mxu0 %v6273_v36  ;;  %1755 = vmatpush1.bf16.msra.mxu1 %v6275_v37 }
 0x2dd   :  { %1715 = vmatprep.subr.bf16.mxu0 %v6279_v38  ;;  %1756 = vmatprep.subr.bf16.mxu1 %v6281_v39 }
 0x2de   :  { %1745 = vmatprep.mubr.bf16.mxu0 %v7523_v31  ;;  %1786 = vmatprep.mubr.bf16.mxu1 %v7523_v31 }
 0x2e0   :  { %1716 = vmatpush1.bf16.msra.mxu0 %v6283_v40  ;;  %1757 = vmatpush1.bf16.msra.mxu1 %v6287_v41 }
 0x2e1   :  { %1717 = vmatprep.subr.bf16.mxu0 %v6291_v42  ;;  %1758 = vmatprep.subr.bf16.mxu1 %v6293_v43  ;;  %v7524_v43 = vld [vmem:[#allocation32_spill] sm:$0xff] }
 0x2e4   :  { %1718 = vmatpush1.bf16.msra.mxu0 %v6300_v45  ;;  %1759 = vmatpush1.bf16.msra.mxu1 %v6302_v46 }
 0x2e5   :  { %1719 = vmatprep.subr.bf16.mxu0 %v6306_v47  ;;  %1760 = vmatprep.subr.bf16.mxu1 %v6310_v48 }
 0x2e8   :  { %1720 = vmatpush1.bf16.msra.mxu0 %v6312_v49  ;;  %1761 = vmatpush1.bf16.msra.mxu1 %v6314_v50 }
 0x2e9   :  { %1721 = vmatprep.subr.bf16.mxu0 %v6318_v51  ;;  %1762 = vmatprep.subr.bf16.mxu1 %v6322_v52 }
 0x2ec   :  { %1722 = vmatpush1.bf16.msra.mxu0 %v6329_v54  ;;  %1763 = vmatpush1.bf16.msra.mxu1 %v6331_v55 }
 0x2ed   :  { %1723 = vmatprep.subr.bf16.mxu0 %v6333_v56  ;;  %1764 = vmatprep.subr.bf16.mxu1 %v6335_v57 }
 0x2f0   :  { %1724 = vmatpush1.bf16.msra.mxu0 %v6341_v58  ;;  %1765 = vmatpush1.bf16.msra.mxu1 %v6343_v59 }
 0x2f1   :  { %1725 = vmatprep.subr.bf16.mxu0 %v6345_v60  ;;  %1766 = vmatprep.subr.bf16.mxu1 %v6347_v61 }
 0x2f4   :  { %1726 = vmatpush1.bf16.msra.mxu0 %v6358_v63  ;;  %1767 = vmatpush1.bf16.msra.mxu1 %v6360_v1 }
 0x2f5   :  { %1727 = vmatprep.subr.bf16.mxu0 %v6362_v2  ;;  %1768 = vmatprep.subr.bf16.mxu1 %v6364_v3 }
 0x2f8   :  { %1728 = vmatpush1.bf16.msra.mxu0 %v6370_v4  ;;  %1769 = vmatpush1.bf16.msra.mxu1 %v6372_v5 }
 0x2f9   :  { %2064 = vmatprep.subr.bf16.mxu1 %v6603_v26 }
 0x3ae   :  { %v1437_v36 = vpop.f32.mrb[24].mxu0  ;;  %v1478_v37 = vpop.f32.mrb[24].mxu1 }
 0x3af   :  { %v1485_v38 = vadd.f32 %v1437_v36, %v6450_v35  ;;  %v1487_v39 = vadd.f32 %v1478_v37, %v6453_v53  ;;  %v1439_v40 = vpop.f32.mrb[25].mxu0  ;;  %v1480_v41 = vpop.f32.mrb[25].mxu1  ;;  %v6692_v36 = vld [vmem:[#allocation12 + $0xe8] ss:$16 sps:$4 sm:$0xff]  }
 0x3b0   :  { %v1486_v42 = vadd.f32 %v1439_v40, %v6455_v6  ;;  %v1488_v45 = vadd.f32 %v1480_v41, %v7524_v43  ;;  %v1441_v46 = vpop.f32.mrb[26].mxu0  ;;  %v1482_v47 = vpop.f32.mrb[26].mxu1  ;;  %v6601_v6 = vld [vmem:[#allocation12 + $0x4] ss:$16 sps:$4 sm:$0xff]   ;;  %v7526_v41 = vld [vmem:[#allocation34_spill] sm:$0xff] }
 0x3b1   :  { %v4932_v48 = vmul.f32 -1.442695, %v1485_v38  ;;  %v1442_v49 = vpop.f32.mrb[27].mxu0  ;;  %v1483_v50 = vpop.f32.mrb[27].mxu1  ;;  %2023 = vmatprep.subr.bf16.mxu0 %v6601_v6  ;;  %v7527_v46 = vld [vmem:[#allocation35_spill] sm:$0xff] }
 0x3b2   :  { %v4933_v51 = vmul.f32 -1.442695, %v1486_v42  ;;  %v4934_v52 = vmul.f32 -1.442695, %v1488_v45 }
 0x3b3   :  { %5546 = vpow2.f32 %v4932_v48  ;;  %v7528_v48 = vld [vmem:[#allocation36_spill] sm:$0xff] }
 0x3b4   :  { %5548 = vpow2.f32 %v4933_v51 }
 0x3b5   :  { %5550 = vpow2.f32 %v4934_v52 }
 0x3b6   :  { %5552 = vtanh.f32 %v1487_v39  ;;  %v7525_v39 = vld [vmem:[#allocation33_spill] sm:$0xff] }
 0x3bd   :  { %v5547_v54 = vpop.eup %5546 }
 0x3be   :  { %v5549_v55 = vpop.eup %5548  ;;  %v1492_v56 = vadd.f32 1.0, %v5547_v54 }
 0x3bf   :  { %v1498_v57 = vadd.f32 1.0, %v5549_v55  ;;  %v5551_v58 = vpop.eup %5550 }
 0x3c0   :  { %5554 = vrcp.f32 %v1492_v56  ;;  %v5553_v59 = vpop.eup %5552  ;;  %v1505_v1 = vadd.f32 1.0, %v5551_v58 }
 0x3c1   :  { %5556 = vrcp.f32 %v1498_v57 }
 0x3c2   :  { %5558 = vrcp.f32 %v1505_v1 }
 0x3ca   :  { %v5555_v60 = vpop.eup %5554 }
 0x3cb   :  { %v5557_v61 = vpop.eup %5556  ;;  %v1509_v63 = vmul.f32 %v5555_v60, %v5553_v59 }
 0x3cc   :  { %v1508_v2 = vmul.f32 %v5557_v61, %v6556_v24  ;;  %v5559_v4 = vpop.eup %5558  ;;  %v6676_v24 = vld [vmem:[#allocation12 + $0xc0] ss:$16 sps:$4 sm:$0xff]  }
 0x3ce   :  { %v6596_v3 = vadd.f32 %v1509_v63, %v1508_v2 }
 0x3d0   :  { %5560 = vtanh.f32 %v6596_v3 }
 0x3da   :  { %v5561_v5 = vpop.eup %5560 }
 0x3db   :  { %v1512_v35 = vmul.f32 %v5561_v5, %v5559_v4 }
 0x3dd   :  { %v1513_v53 = vpack.c.bf16 %v1512_v35, %v1512_v35 }
 0x3df   :  { %1515 = vst [vmem:[#allocation4 + $0x8] sm:$0xf] %v1513_v53  ;;  %1746 = vmatmul.mubr.bf16.vlgmr.msra.gmra.mrb[28].mxu0 %v1513_v53  ;;  %1787 = vmatmul.mubr.bf16.vlgmr.msra.gmra.mrb[28].mxu1 %v1513_v53 }
 0x3e0   :  { %2055 = vmatprep.mubr.bf16.mxu0 %v7523_v31  ;;  %2096 = vmatprep.mubr.bf16.mxu1 %v7523_v31 }
 0x3e1   :  { %2024 = vmatpush1.bf16.msra.mxu0 %v6605_v28  ;;  %2065 = vmatpush1.bf16.msra.mxu1 %v6607_v11 }
 0x3e2   :  { %2025 = vmatprep.subr.bf16.mxu0 %v6613_v62  ;;  %2066 = vmatprep.subr.bf16.mxu1 %v6615_v16 }
 0x3e5   :  { %2026 = vmatpush1.bf16.msra.mxu0 %v6617_v15  ;;  %2067 = vmatpush1.bf16.msra.mxu1 %v6619_v17 }
 0x3e6   :  { %2027 = vmatprep.subr.bf16.mxu0 %v6625_v19  ;;  %2068 = vmatprep.subr.bf16.mxu1 %v6627_v18 }
 0x3e9   :  { %2028 = vmatpush1.bf16.msra.mxu0 %v6629_v20  ;;  %2069 = vmatpush1.bf16.msra.mxu1 %v6631_v9 }
 0x3ea   :  { %2029 = vmatprep.subr.bf16.mxu0 %v6637_v14  ;;  %2070 = vmatprep.subr.bf16.mxu1 %v6639_v33 }
 0x3ed   :  { %2030 = vmatpush1.bf16.msra.mxu0 %v6641_v34  ;;  %2071 = vmatpush1.bf16.msra.mxu1 %v6643_v21 }
 0x3ee   :  { %2031 = vmatprep.subr.bf16.mxu0 %v6651_v25  ;;  %2072 = vmatprep.subr.bf16.mxu1 %v6655_v29 }
 0x3f1   :  { %2032 = vmatpush1.bf16.msra.mxu0 %v6649_v12  ;;  %2073 = vmatpush1.bf16.msra.mxu1 %v6653_v27 }
 0x3f2   :  { %2033 = vmatprep.subr.bf16.mxu0 %v6657_v22  ;;  %2074 = vmatprep.subr.bf16.mxu1 %v6660_v30 }
 0x3f5   :  { %2034 = vmatpush1.bf16.msra.mxu0 %v6664_v23  ;;  %2075 = vmatpush1.bf16.msra.mxu1 %v6668_v44 }
 0x3f6   :  { %2035 = vmatprep.subr.bf16.mxu0 %v6670_v8  ;;  %2076 = vmatprep.subr.bf16.mxu1 %v6673_v7 }
 0x3f9   :  { %2036 = vmatpush1.bf16.msra.mxu0 %v6676_v24  ;;  %2077 = vmatpush1.bf16.msra.mxu1 %v6680_v10 }
 0x3fa   :  { %2037 = vmatprep.subr.bf16.mxu0 %v6682_v32  ;;  %2078 = vmatprep.subr.bf16.mxu1 %v6685_v0 }
 0x3fd   :  { %2038 = vmatpush1.bf16.msra.mxu0 %v6688_v13  ;;  %2079 = vmatpush1.bf16.msra.mxu1 %v6692_v36 }
 0x3fe   :  { %2333 = vmatprep.subr.bf16.mxu0 %v6601_v6  ;;  %2374 = vmatprep.subr.bf16.mxu1 %v6603_v26 }
 0x4b2   :  { %v1747_v37 = vpop.f32.mrb[28].mxu0  ;;  %v1788_v38 = vpop.f32.mrb[28].mxu1 }
 0x4b3   :  { %v1795_v40 = vadd.f32 %v1747_v37, %v7525_v39  ;;  %v1797_v42 = vadd.f32 %v1788_v38, %v7526_v41  ;;  %v1749_v43 = vpop.f32.mrb[29].mxu0  ;;  %v1790_v45 = vpop.f32.mrb[29].mxu1 }
 0x4b4   :  { %v1796_v47 = vadd.f32 %v1749_v43, %v7527_v46  ;;  %v1798_v49 = vadd.f32 %v1790_v45, %v7528_v48  ;;  %v1751_v50 = vpop.f32.mrb[30].mxu0  ;;  %v1792_v51 = vpop.f32.mrb[30].mxu1  ;;  %v7529_v43 = vld [vmem:[#allocation37_spill] sm:$0xff]  ;;  %v7530_v46 = vld [vmem:[#allocation38_spill] sm:$0xff] }
 0x4b5   :  { %v4967_v52 = vmul.f32 -1.442695, %v1795_v40  ;;  %v1752_v54 = vpop.f32.mrb[31].mxu0  ;;  %v1793_v55 = vpop.f32.mrb[31].mxu1  ;;  %v7531_v50 = vld [vmem:[#allocation39_spill] sm:$0xff] }
 0x4b6   :  { %v4968_v56 = vmul.f32 -1.442695, %v1796_v47  ;;  %v4969_v57 = vmul.f32 -1.442695, %v1798_v49 }
 0x4b7   :  { %5562 = vpow2.f32 %v4967_v52  ;;  %v7532_v52 = vld [vmem:[#allocation40_spill] sm:$0xff] }
 0x4b8   :  { %5564 = vpow2.f32 %v4968_v56 }
 0x4b9   :  { %5566 = vpow2.f32 %v4969_v57 }
 0x4ba   :  { %5568 = vtanh.f32 %v1797_v42 }
 0x4c1   :  { %v5563_v58 = vpop.eup %5562 }
 0x4c2   :  { %v5565_v59 = vpop.eup %5564  ;;  %v1802_v60 = vadd.f32 1.0, %v5563_v58 }
 0x4c3   :  { %v1808_v61 = vadd.f32 1.0, %v5565_v59  ;;  %v5567_v63 = vpop.eup %5566 }
 0x4c4   :  { %5570 = vrcp.f32 %v1802_v60  ;;  %v5569_v1 = vpop.eup %5568  ;;  %v1815_v35 = vadd.f32 1.0, %v5567_v63 }
 0x4c5   :  { %5572 = vrcp.f32 %v1808_v61 }
 0x4c6   :  { %5574 = vrcp.f32 %v1815_v35 }
 0x4ce   :  { %v5571_v2 = vpop.eup %5570 }
 0x4cf   :  { %v5573_v4 = vpop.eup %5572  ;;  %v1819_v5 = vmul.f32 %v5571_v2, %v5569_v1 }
 0x4d0   :  { %v1818_v53 = vmul.f32 %v5573_v4, %v6596_v3  ;;  %v5575_v38 = vpop.eup %5574 }
 0x4d2   :  { %v6704_v37 = vadd.f32 %v1819_v5, %v1818_v53 }
 0x4d4   :  { %5576 = vtanh.f32 %v6704_v37 }
 0x4de   :  { %v5577_v39 = vpop.eup %5576 }
 0x4df   :  { %v1822_v40 = vmul.f32 %v5577_v39, %v5575_v38 }
 0x4e1   :  { %v1823_v41 = vpack.c.bf16 %v1822_v40, %v1822_v40 }
 0x4e3   :  { %1825 = vst [vmem:[#allocation4 + $0xc] sm:$0xf] %v1823_v41  ;;  %2056 = vmatmul.mubr.bf16.vlgmr.msra.gmra.mrb[32].mxu0 %v1823_v41  ;;  %2097 = vmatmul.mubr.bf16.vlgmr.msra.gmra.mrb[32].mxu1 %v1823_v41 }
 0x4e4   :  { %2334 = vmatpush1.bf16.msra.mxu0 %v6605_v28  ;;  %2375 = vmatpush1.bf16.msra.mxu1 %v6607_v11 }
 0x4e5   :  { %2335 = vmatprep.subr.bf16.mxu0 %v6613_v62  ;;  %2376 = vmatprep.subr.bf16.mxu1 %v6615_v16 }
 0x4e6   :  { %2365 = vmatprep.mubr.bf16.mxu0 %v7523_v31  ;;  %2406 = vmatprep.mubr.bf16.mxu1 %v7523_v31 }
 0x4e8   :  { %2336 = vmatpush1.bf16.msra.mxu0 %v6617_v15  ;;  %2377 = vmatpush1.bf16.msra.mxu1 %v6619_v17 }
 0x4e9   :  { %2337 = vmatprep.subr.bf16.mxu0 %v6625_v19  ;;  %2378 = vmatprep.subr.bf16.mxu1 %v6627_v18 }
 0x4ec   :  { %2338 = vmatpush1.bf16.msra.mxu0 %v6629_v20  ;;  %2379 = vmatpush1.bf16.msra.mxu1 %v6631_v9 }
 0x4ed   :  { %2339 = vmatprep.subr.bf16.mxu0 %v6637_v14  ;;  %2380 = vmatprep.subr.bf16.mxu1 %v6639_v33 }
 0x4f0   :  { %2340 = vmatpush1.bf16.msra.mxu0 %v6641_v34  ;;  %2381 = vmatpush1.bf16.msra.mxu1 %v6643_v21 }
 0x4f1   :  { %2341 = vmatprep.subr.bf16.mxu0 %v6651_v25  ;;  %2382 = vmatprep.subr.bf16.mxu1 %v6655_v29 }
 0x4f4   :  { %2342 = vmatpush1.bf16.msra.mxu0 %v6649_v12  ;;  %2383 = vmatpush1.bf16.msra.mxu1 %v6653_v27 }
 0x4f5   :  { %2343 = vmatprep.subr.bf16.mxu0 %v6657_v22  ;;  %2384 = vmatprep.subr.bf16.mxu1 %v6660_v30 }
 0x4f8   :  { %2344 = vmatpush1.bf16.msra.mxu0 %v6664_v23  ;;  %2385 = vmatpush1.bf16.msra.mxu1 %v6668_v44 }
 0x4f9   :  { %2345 = vmatprep.subr.bf16.mxu0 %v6670_v8  ;;  %2386 = vmatprep.subr.bf16.mxu1 %v6673_v7 }
 0x4fc   :  { %2346 = vmatpush1.bf16.msra.mxu0 %v6676_v24  ;;  %2387 = vmatpush1.bf16.msra.mxu1 %v6680_v10 }
 0x4fd   :  { %2347 = vmatprep.subr.bf16.mxu0 %v6682_v32  ;;  %2388 = vmatprep.subr.bf16.mxu1 %v6685_v0 }
 0x500   :  { %2348 = vmatpush1.bf16.msra.mxu0 %v6688_v13  ;;  %2389 = vmatpush1.bf16.msra.mxu1 %v6692_v36 }
 0x501   :  { %2643 = vmatprep.subr.bf16.mxu0 %v6601_v6  ;;  %2684 = vmatprep.subr.bf16.mxu1 %v6603_v26 }
 0x5b6   :  { %v2057_v3 = vpop.f32.mrb[32].mxu0  ;;  %v2098_v42 = vpop.f32.mrb[32].mxu1 }
 0x5b7   :  { %v2105_v45 = vadd.f32 %v2057_v3, %v7529_v43  ;;  %v2107_v47 = vadd.f32 %v2098_v42, %v7530_v46  ;;  %v2059_v48 = vpop.f32.mrb[33].mxu0  ;;  %v2100_v49 = vpop.f32.mrb[33].mxu1 }
 0x5b8   :  { %v2106_v51 = vadd.f32 %v2059_v48, %v7531_v50  ;;  %v2108_v54 = vadd.f32 %v2100_v49, %v7532_v52  ;;  %v2061_v55 = vpop.f32.mrb[34].mxu0  ;;  %v2102_v56 = vpop.f32.mrb[34].mxu1  ;;  %v7533_v48 = vld [vmem:[#allocation41_spill] sm:$0xff]  ;;  %v7534_v50 = vld [vmem:[#allocation42_spill] sm:$0xff] }
 0x5b9   :  { %v5002_v57 = vmul.f32 -1.442695, %v2105_v45  ;;  %v2062_v58 = vpop.f32.mrb[35].mxu0  ;;  %v2103_v59 = vpop.f32.mrb[35].mxu1  ;;  %v7535_v55 = vld [vmem:[#allocation43_spill] sm:$0xff] }
 0x5ba   :  { %v5003_v60 = vmul.f32 -1.442695, %v2106_v51  ;;  %v5004_v61 = vmul.f32 -1.442695, %v2108_v54 }
 0x5bb   :  { %5578 = vpow2.f32 %v5002_v57  ;;  %v7536_v57 = vld [vmem:[#allocation44_spill] sm:$0xff] }
 0x5bc   :  { %5580 = vpow2.f32 %v5003_v60 }
 0x5bd   :  { %5582 = vpow2.f32 %v5004_v61 }
 0x5be   :  { %5584 = vtanh.f32 %v2107_v47 }
 0x5c5   :  { %v5579_v63 = vpop.eup %5578 }
 0x5c6   :  { %v5581_v1 = vpop.eup %5580  ;;  %v2112_v2 = vadd.f32 1.0, %v5579_v63 }
 0x5c7   :  { %v2118_v4 = vadd.f32 1.0, %v5581_v1  ;;  %v5583_v5 = vpop.eup %5582 }
 0x5c8   :  { %5586 = vrcp.f32 %v2112_v2  ;;  %v5585_v35 = vpop.eup %5584  ;;  %v2125_v40 = vadd.f32 1.0, %v5583_v5 }
 0x5c9   :  { %5588 = vrcp.f32 %v2118_v4 }
 0x5ca   :  { %5590 = vrcp.f32 %v2125_v40 }
 0x5d2   :  { %v5587_v53 = vpop.eup %5586 }
 0x5d3   :  { %v5589_v38 = vpop.eup %5588  ;;  %v2129_v39 = vmul.f32 %v5587_v53, %v5585_v35 }
 0x5d4   :  { %v2128_v41 = vmul.f32 %v5589_v38, %v6704_v37  ;;  %v5591_v42 = vpop.eup %5590 }
 0x5d6   :  { %v6746_v3 = vadd.f32 %v2129_v39, %v2128_v41 }
 0x5d8   :  { %5592 = vtanh.f32 %v6746_v3 }
 0x5e2   :  { %v5593_v43 = vpop.eup %5592 }
 0x5e3   :  { %v2132_v45 = vmul.f32 %v5593_v43, %v5591_v42 }
 0x5e5   :  { %v2133_v46 = vpack.c.bf16 %v2132_v45, %v2132_v45 }
 0x5e7   :  { %2135 = vst [vmem:[#allocation4 + $0x10] sm:$0xf] %v2133_v46  ;;  %2366 = vmatmul.mubr.bf16.vlgmr.msra.gmra.mrb[36].mxu0 %v2133_v46  ;;  %2407 = vmatmul.mubr.bf16.vlgmr.msra.gmra.mrb[36].mxu1 %v2133_v46 }
 0x5e8   :  { %2644 = vmatpush1.bf16.msra.mxu0 %v6605_v28  ;;  %2685 = vmatpush1.bf16.msra.mxu1 %v6607_v11 }
 0x5e9   :  { %2645 = vmatprep.subr.bf16.mxu0 %v6613_v62  ;;  %2686 = vmatprep.subr.bf16.mxu1 %v6615_v16 }
 0x5ea   :  { %2675 = vmatprep.mubr.bf16.mxu0 %v7523_v31  ;;  %2716 = vmatprep.mubr.bf16.mxu1 %v7523_v31 }
 0x5ec   :  { %2646 = vmatpush1.bf16.msra.mxu0 %v6617_v15  ;;  %2687 = vmatpush1.bf16.msra.mxu1 %v6619_v17 }
 0x5ed   :  { %2647 = vmatprep.subr.bf16.mxu0 %v6625_v19  ;;  %2688 = vmatprep.subr.bf16.mxu1 %v6627_v18 }
 0x5f0   :  { %2648 = vmatpush1.bf16.msra.mxu0 %v6629_v20  ;;  %2689 = vmatpush1.bf16.msra.mxu1 %v6631_v9 }
 0x5f1   :  { %2649 = vmatprep.subr.bf16.mxu0 %v6637_v14  ;;  %2690 = vmatprep.subr.bf16.mxu1 %v6639_v33 }
 0x5f4   :  { %2650 = vmatpush1.bf16.msra.mxu0 %v6641_v34  ;;  %2691 = vmatpush1.bf16.msra.mxu1 %v6643_v21 }
 0x5f5   :  { %2651 = vmatprep.subr.bf16.mxu0 %v6651_v25  ;;  %2692 = vmatprep.subr.bf16.mxu1 %v6655_v29 }
 0x5f8   :  { %2652 = vmatpush1.bf16.msra.mxu0 %v6649_v12  ;;  %2693 = vmatpush1.bf16.msra.mxu1 %v6653_v27 }
 0x5f9   :  { %2653 = vmatprep.subr.bf16.mxu0 %v6657_v22  ;;  %2694 = vmatprep.subr.bf16.mxu1 %v6660_v30 }
 0x5fc   :  { %2654 = vmatpush1.bf16.msra.mxu0 %v6664_v23  ;;  %2695 = vmatpush1.bf16.msra.mxu1 %v6668_v44 }
 0x5fd   :  { %2655 = vmatprep.subr.bf16.mxu0 %v6670_v8  ;;  %2696 = vmatprep.subr.bf16.mxu1 %v6673_v7 }
 0x600   :  { %2656 = vmatpush1.bf16.msra.mxu0 %v6676_v24  ;;  %2697 = vmatpush1.bf16.msra.mxu1 %v6680_v10 }
 0x601   :  { %2657 = vmatprep.subr.bf16.mxu0 %v6682_v32  ;;  %2698 = vmatprep.subr.bf16.mxu1 %v6685_v0 }
 0x604   :  { %2658 = vmatpush1.bf16.msra.mxu0 %v6688_v13  ;;  %2699 = vmatpush1.bf16.msra.mxu1 %v6692_v36 }
 0x605   :  { %2953 = vmatprep.subr.bf16.mxu0 %v6601_v6  ;;  %2994 = vmatprep.subr.bf16.mxu1 %v6603_v26 }
 0x6ba   :  { %v2367_v37 = vpop.f32.mrb[36].mxu0  ;;  %v2408_v47 = vpop.f32.mrb[36].mxu1 }
 0x6bb   :  { %v2415_v49 = vadd.f32 %v2367_v37, %v7533_v48  ;;  %v2417_v51 = vadd.f32 %v2408_v47, %v7534_v50  ;;  %v2369_v52 = vpop.f32.mrb[37].mxu0  ;;  %v2410_v54 = vpop.f32.mrb[37].mxu1 }
 0x6bc   :  { %v2416_v56 = vadd.f32 %v2369_v52, %v7535_v55  ;;  %v2418_v58 = vadd.f32 %v2410_v54, %v7536_v57  ;;  %v2371_v59 = vpop.f32.mrb[38].mxu0  ;;  %v2412_v60 = vpop.f32.mrb[38].mxu1  ;;  %v5406_v55 = vld [vmem:[#allocation15] ss:$16 sps:$4 sm:$0xff]  }
 0x6bd   :  { %v5037_v61 = vmul.f32 -1.442695, %v2415_v49  ;;  %v2372_v63 = vpop.f32.mrb[39].mxu0  ;;  %v2413_v1 = vpop.f32.mrb[39].mxu1  ;;  %v5417_v59 = vld [vmem:[#allocation15 + $0x2c] ss:$16 sps:$4 sm:$0xff]  }
 0x6be   :  { %v5038_v6 = vmul.f32 -1.442695, %v2416_v56  ;;  %v5039_v26 = vmul.f32 -1.442695, %v2418_v58  ;;  %v5409_v56 = vld [vmem:[#allocation15 + $0x8] ss:$16 sps:$4 sm:$0xff]  }
 0x6bf   :  { %5594 = vpow2.f32 %v5037_v61  ;;  %v5414_v58 = vld [vmem:[#allocation15 + $0x24] ss:$16 sps:$4 sm:$0xff]   ;;  %v5412_v60 = vld [vmem:[#allocation15 + $0x20] ss:$16 sps:$4 sm:$0xff]   ;;  %v5415_v61 = vld [vmem:[#allocation15 + $0x28] ss:$16 sps:$4 sm:$0xff]  }
 0x6c0   :  { %5596 = vpow2.f32 %v5038_v6  ;;  %v5420_v63 = vld [vmem:[#allocation15 + $0x44] ss:$16 sps:$4 sm:$0xff]   ;;  %v5423_v1 = vld [vmem:[#allocation15 + $0x4c] ss:$16 sps:$4 sm:$0xff]   ;;  %v5418_v6 = vld [vmem:[#allocation15 + $0x40] ss:$16 sps:$4 sm:$0xff]  }
 0x6c1   :  { %5598 = vpow2.f32 %v5039_v26  ;;  %v5421_v26 = vld [vmem:[#allocation15 + $0x48] ss:$16 sps:$4 sm:$0xff]  }
 0x6c2   :  { %5600 = vtanh.f32 %v2417_v51 }
 0x6c9   :  { %v5595_v2 = vpop.eup %5594 }
 0x6ca   :  { %v5597_v4 = vpop.eup %5596  ;;  %v2422_v5 = vadd.f32 1.0, %v5595_v2  ;;  %v5426_v2 = vld [vmem:[#allocation15 + $0x64] ss:$16 sps:$4 sm:$0xff]  }
 0x6cb   :  { %v2428_v35 = vadd.f32 1.0, %v5597_v4  ;;  %v5599_v53 = vpop.eup %5598  ;;  %v5429_v4 = vld [vmem:[#allocation15 + $0x6c] ss:$16 sps:$4 sm:$0xff]  }
 0x6cc   :  { %5602 = vrcp.f32 %v2422_v5  ;;  %v5601_v38 = vpop.eup %5600  ;;  %v2435_v42 = vadd.f32 1.0, %v5599_v53  ;;  %v5424_v5 = vld [vmem:[#allocation15 + $0x60] ss:$16 sps:$4 sm:$0xff]   ;;  %v5432_v53 = vld [vmem:[#allocation15 + $0x84] ss:$16 sps:$4 sm:$0xff]  }
 0x6cd   :  { %5604 = vrcp.f32 %v2428_v35  ;;  %v5427_v35 = vld [vmem:[#allocation15 + $0x68] ss:$16 sps:$4 sm:$0xff]  }
 0x6ce   :  { %5606 = vrcp.f32 %v2435_v42  ;;  %v5441_v42 = vld [vmem:[#allocation15 + $0xac] ss:$16 sps:$4 sm:$0xff]  }
 0x6d6   :  { %v5603_v39 = vpop.eup %5602 }
 0x6d7   :  { %v5605_v40 = vpop.eup %5604  ;;  %v2439_v41 = vmul.f32 %v5603_v39, %v5601_v38  ;;  %v5435_v38 = vld [vmem:[#allocation15 + $0x8c] ss:$16 sps:$4 sm:$0xff]   ;;  %v5430_v39 = vld [vmem:[#allocation15 + $0x80] ss:$16 sps:$4 sm:$0xff]  }
 0x6d8   :  { %v2438_v43 = vmul.f32 %v5605_v40, %v6746_v3  ;;  %v5607_v46 = vpop.eup %5606  ;;  %v5433_v40 = vld [vmem:[#allocation15 + $0x88] ss:$16 sps:$4 sm:$0xff]  }
 0x6da   :  { %v6788_v45 = vadd.f32 %v2439_v41, %v2438_v43  ;;  %v5438_v41 = vld [vmem:[#allocation15 + $0xa4] ss:$16 sps:$4 sm:$0xff]   ;;  %v5436_v43 = vld [vmem:[#allocation15 + $0xa0] ss:$16 sps:$4 sm:$0xff]  }
 0x6dc   :  { %5608 = vtanh.f32 %v6788_v45 }
 0x6e6   :  { %v5609_v37 = vpop.eup %5608 }
 0x6e7   :  { %v2442_v47 = vmul.f32 %v5609_v37, %v5607_v46  ;;  %v5444_v46 = vld [vmem:[#allocation15 + $0xc4] ss:$16 sps:$4 sm:$0xff]   ;;  %v5447_v37 = vld [vmem:[#allocation15 + $0xcc] ss:$16 sps:$4 sm:$0xff]  }
 0x6e9   :  { %v2443_v48 = vpack.c.bf16 %v2442_v47, %v2442_v47  ;;  %v5442_v47 = vld [vmem:[#allocation15 + $0xc0] ss:$16 sps:$4 sm:$0xff]  }
 0x6eb   :  { %2445 = vst [vmem:[#allocation4 + $0x14] sm:$0xf] %v2443_v48  ;;  %2676 = vmatmul.mubr.bf16.vlgmr.msra.gmra.mrb[40].mxu0 %v2443_v48  ;;  %2717 = vmatmul.mubr.bf16.vlgmr.msra.gmra.mrb[40].mxu1 %v2443_v48  ;;  %v5445_v48 = vld [vmem:[#allocation15 + $0xc8] ss:$16 sps:$4 sm:$0xff]  }
 0x6ec   :  { %2954 = vmatpush1.bf16.msra.mxu0 %v6605_v28  ;;  %2995 = vmatpush1.bf16.msra.mxu1 %v6607_v11  ;;  %v5408_v28 = vld [vmem:[#allocation15 + $0x4] ss:$16 sps:$4 sm:$0xff]   ;;  %v5411_v11 = vld [vmem:[#allocation15 + $0xc] ss:$16 sps:$4 sm:$0xff]  }
 0x6ed   :  { %2955 = vmatprep.subr.bf16.mxu0 %v6613_v62  ;;  %2996 = vmatprep.subr.bf16.mxu1 %v6615_v16 }
 0x6ee   :  { %2985 = vmatprep.mubr.bf16.mxu0 %v7523_v31  ;;  %3026 = vmatprep.mubr.bf16.mxu1 %v7523_v31 }
 0x6f0   :  { %2956 = vmatpush1.bf16.msra.mxu0 %v6617_v15  ;;  %2997 = vmatpush1.bf16.msra.mxu1 %v6619_v17  ;;  %v7537_v15 = vld [vmem:[#allocation45_spill] sm:$0xff] }
 0x6f1   :  { %2957 = vmatprep.subr.bf16.mxu0 %v6625_v19  ;;  %2998 = vmatprep.subr.bf16.mxu1 %v6627_v18  ;;  %v7538_v19 = vld [vmem:[#allocation46_spill] sm:$0xff] }
 0x6f4   :  { %2958 = vmatpush1.bf16.msra.mxu0 %v6629_v20  ;;  %2999 = vmatpush1.bf16.msra.mxu1 %v6631_v9 }
 0x6f5   :  { %2959 = vmatprep.subr.bf16.mxu0 %v6637_v14  ;;  %3000 = vmatprep.subr.bf16.mxu1 %v6639_v33  ;;  %v7539_v14 = vld [vmem:[#allocation47_spill] sm:$0xff] }
 0x6f8   :  { %2960 = vmatpush1.bf16.msra.mxu0 %v6641_v34  ;;  %3001 = vmatpush1.bf16.msra.mxu1 %v6643_v21  ;;  %v7540_v34 = vld [vmem:[#allocation48_spill] sm:$0xff] }
 0x6f9   :  { %2961 = vmatprep.subr.bf16.mxu0 %v6651_v25  ;;  %3002 = vmatprep.subr.bf16.mxu1 %v6655_v29 }
 0x6fc   :  { %2962 = vmatpush1.bf16.msra.mxu0 %v6649_v12  ;;  %3003 = vmatpush1.bf16.msra.mxu1 %v6653_v27 }
 0x6fd   :  { %2963 = vmatprep.subr.bf16.mxu0 %v6657_v22  ;;  %3004 = vmatprep.subr.bf16.mxu1 %v6660_v30 }
 0x700   :  { %2964 = vmatpush1.bf16.msra.mxu0 %v6664_v23  ;;  %3005 = vmatpush1.bf16.msra.mxu1 %v6668_v44 }
 0x701   :  { %2965 = vmatprep.subr.bf16.mxu0 %v6670_v8  ;;  %3006 = vmatprep.subr.bf16.mxu1 %v6673_v7 }
 0x704   :  { %2966 = vmatpush1.bf16.msra.mxu0 %v6676_v24  ;;  %3007 = vmatpush1.bf16.msra.mxu1 %v6680_v10 }
 0x705   :  { %2967 = vmatprep.subr.bf16.mxu0 %v6682_v32  ;;  %3008 = vmatprep.subr.bf16.mxu1 %v6685_v0 }
 0x708   :  { %2968 = vmatpush1.bf16.msra.mxu0 %v6688_v13  ;;  %3009 = vmatpush1.bf16.msra.mxu1 %v6692_v36 }
 0x709   :  { %3314 = vmatprep.subr.bf16.mxu0 %v5408_v28  ;;  %3387 = vmatprep.subr.bf16.mxu1 %v5411_v11  ;;  %v5450_v28 = vld [vmem:[#allocation15 + $0xe4] ss:$16 sps:$4 sm:$0xff]   ;;  %v5453_v11 = vld [vmem:[#allocation15 + $0xec] ss:$16 sps:$4 sm:$0xff]  }
 0x7be   :  { %v2677_v62 = vpop.f32.mrb[40].mxu0  ;;  %v2718_v16 = vpop.f32.mrb[40].mxu1 }
 0x7bf   :  { %v2725_v17 = vadd.f32 %v2677_v62, %v7537_v15  ;;  %v2727_v18 = vadd.f32 %v2718_v16, %v7538_v19  ;;  %v2679_v20 = vpop.f32.mrb[41].mxu0  ;;  %v2720_v9 = vpop.f32.mrb[41].mxu1  ;;  %v5448_v62 = vld [vmem:[#allocation15 + $0xe0] ss:$16 sps:$4 sm:$0xff]   ;;  %v5451_v16 = vld [vmem:[#allocation15 + $0xe8] ss:$16 sps:$4 sm:$0xff]  }
 0x7c0   :  { %v2726_v33 = vadd.f32 %v2679_v20, %v7539_v14  ;;  %v2728_v21 = vadd.f32 %v2720_v9, %v7540_v34  ;;  %v2681_v12 = vpop.f32.mrb[42].mxu0  ;;  %v2722_v25 = vpop.f32.mrb[42].mxu1  ;;  %v5454_v15 = vld [vmem:[#allocation4] sm:$0xff]   ;;  %v5456_v19 = vld [vmem:[#allocation4 + $0x10] sm:$0xff]   ;;  %v6845_v14 = vld [vmem:[#allocation17 + $0x8] ss:$16 sps:$4 sm:$0xff]  }
 0x7c1   :  { %v5072_v27 = vmul.f32 -1.442695, %v2725_v17  ;;  %v2682_v29 = vpop.f32.mrb[43].mxu0  ;;  %v2723_v22 = vpop.f32.mrb[43].mxu1  ;;  %v5455_v17 = vld [vmem:[#allocation4 + $0x8] sm:$0xff]  }
 0x7c2   :  { %v5073_v30 = vmul.f32 -1.442695, %v2726_v33  ;;  %v5074_v23 = vmul.f32 -1.442695, %v2728_v21  ;;  %v6841_v20 = vld [vmem:[#allocation17 + $0xc] ss:$16 sps:$4 sm:$0xff]  }
 0x7c3   :  { %5610 = vpow2.f32 %v5072_v27  ;;  %v6843_v9 = vld [vmem:[#allocation17] ss:$16 sps:$4 sm:$0xff]   ;;  %v6851_v33 = vld [vmem:[#allocation17 + $0x24] ss:$16 sps:$4 sm:$0xff]   ;;  %v6853_v34 = vld [vmem:[#allocation17 + $0x2c] ss:$16 sps:$4 sm:$0xff]  }
 0x7c4   :  { %5612 = vpow2.f32 %v5073_v30  ;;  %v6855_v21 = vld [vmem:[#allocation17 + $0x20] ss:$16 sps:$4 sm:$0xff]   ;;  %v6857_v12 = vld [vmem:[#allocation17 + $0x28] ss:$16 sps:$4 sm:$0xff]   ;;  %v6863_v25 = vld [vmem:[#allocation17 + $0x44] ss:$16 sps:$4 sm:$0xff]  }
 0x7c5   :  { %5614 = vpow2.f32 %v5074_v23  ;;  %v6865_v27 = vld [vmem:[#allocation17 + $0x4c] ss:$16 sps:$4 sm:$0xff]   ;;  %v6867_v29 = vld [vmem:[#allocation17 + $0x40] ss:$16 sps:$4 sm:$0xff]   ;;  %v6869_v22 = vld [vmem:[#allocation17 + $0x48] ss:$16 sps:$4 sm:$0xff]  }
 0x7c6   :  { %5616 = vtanh.f32 %v2727_v18  ;;  %v6839_v18 = vld [vmem:[#allocation17 + $0x4] ss:$16 sps:$4 sm:$0xff]   ;;  %v6877_v23 = vld [vmem:[#allocation17 + $0x6c] ss:$16 sps:$4 sm:$0xff]  }
 0x7c7   :  { %v6875_v30 = vld [vmem:[#allocation17 + $0x64] ss:$16 sps:$4 sm:$0xff]  }
 0x7cd   :  { %v5611_v44 = vpop.eup %5610 }
 0x7ce   :  { %v5613_v8 = vpop.eup %5612  ;;  %v2732_v7 = vadd.f32 1.0, %v5611_v44  ;;  %v6879_v44 = vld [vmem:[#allocation17 + $0x60] ss:$16 sps:$4 sm:$0xff]  }
 0x7cf   :  { %v2738_v24 = vadd.f32 1.0, %v5613_v8  ;;  %v5615_v10 = vpop.eup %5614  ;;  %v6881_v8 = vld [vmem:[#allocation17 + $0x68] ss:$16 sps:$4 sm:$0xff]  }
 0x7d0   :  { %5618 = vrcp.f32 %v2732_v7  ;;  %v5617_v32 = vpop.eup %5616  ;;  %v2745_v3 = vadd.f32 1.0, %v5615_v10  ;;  %v6887_v7 = vld [vmem:[#allocation17 + $0x84] ss:$16 sps:$4 sm:$0xff]   ;;  %v6891_v10 = vld [vmem:[#allocation17 + $0x80] ss:$16 sps:$4 sm:$0xff]  }
 0x7d1   :  { %5620 = vrcp.f32 %v2738_v24  ;;  %v6889_v24 = vld [vmem:[#allocation17 + $0x8c] ss:$16 sps:$4 sm:$0xff]  }
 0x7d2   :  { %5622 = vrcp.f32 %v2745_v3  ;;  %v6905_v3 = vld [vmem:[#allocation17 + $0xa8] ss:$16 sps:$4 sm:$0xff]  }
 0x7da   :  { %v5619_v0 = vpop.eup %5618 }
 0x7db   :  { %v5621_v13 = vpop.eup %5620  ;;  %v2749_v36 = vmul.f32 %v5619_v0, %v5617_v32  ;;  %v6893_v32 = vld [vmem:[#allocation17 + $0x88] ss:$16 sps:$4 sm:$0xff]   ;;  %v6899_v0 = vld [vmem:[#allocation17 + $0xa4] ss:$16 sps:$4 sm:$0xff]  }
 0x7dc   :  { %v2748_v49 = vmul.f32 %v5621_v13, %v6788_v45  ;;  %v5623_v51 = vpop.eup %5622  ;;  %v5439_v45 = vld [vmem:[#allocation15 + $0xa8] ss:$16 sps:$4 sm:$0xff]   ;;  %v6901_v13 = vld [vmem:[#allocation17 + $0xac] ss:$16 sps:$4 sm:$0xff]  }
 0x7de   :  { %v6828_v50 = vadd.f32 %v2749_v36, %v2748_v49  ;;  %v6903_v36 = vld [vmem:[#allocation17 + $0xa0] ss:$16 sps:$4 sm:$0xff]   ;;  %v6911_v49 = vld [vmem:[#allocation17 + $0xc4] ss:$16 sps:$4 sm:$0xff]  }
 0x7e0   :  { %5624 = vtanh.f32 %v6828_v50 }
 0x7ea   :  { %v5625_v52 = vpop.eup %5624 }
 0x7eb   :  { %v2752_v54 = vmul.f32 %v5625_v52, %v5623_v51  ;;  %v6913_v51 = vld [vmem:[#allocation17 + $0xcc] ss:$16 sps:$4 sm:$0xff]   ;;  %v6915_v52 = vld [vmem:[#allocation17 + $0xc0] ss:$16 sps:$4 sm:$0xff]  }
 0x7ed   :  { %v2753_v57 = vpack.c.bf16 %v2752_v54, %v2752_v54  ;;  %v6917_v54 = vld [vmem:[#allocation17 + $0xc8] ss:$16 sps:$4 sm:$0xff]  }
 0x7ef   :  { %2755 = vst [vmem:[#allocation4 + $0x18] sm:$0xf] %v2753_v57  ;;  %2986 = vmatmul.mubr.bf16.vlgmr.msra.gmra.mrb[44].mxu0 %v2753_v57  ;;  %3027 = vmatmul.mubr.bf16.vlgmr.msra.gmra.mrb[44].mxu1 %v2753_v57  ;;  %v6927_v57 = vld [vmem:[#allocation17 + $0xe0] ss:$16 sps:$4 sm:$0xff]  }
 0x7f0   :  { %3315 = vmatpush1.bf16.msra.mxu0 %v5406_v55  ;;  %3388 = vmatpush1.bf16.msra.mxu1 %v5409_v56  ;;  %v6919_v55 = vld [vmem:[#allocation17 + $0xe4] ss:$16 sps:$4 sm:$0xff]   ;;  %v6923_v56 = vld [vmem:[#allocation17 + $0xec] ss:$16 sps:$4 sm:$0xff]  }
 0x7f1   :  { %3316 = vmatprep.subr.bf16.mxu0 %v5414_v58  ;;  %3389 = vmatprep.subr.bf16.mxu1 %v5417_v59  ;;  %v6929_v58 = vld [vmem:[#allocation17 + $0xe8] ss:$16 sps:$4 sm:$0xff]  }
 0x7f2   :  { %3346 = vmatprep.mubr.bf16.mxu0 %v7523_v31  ;;  %3419 = vmatprep.mubr.bf16.mxu1 %v7523_v31 }
 0x7f4   :  { %3317 = vmatpush1.bf16.msra.mxu0 %v5412_v60  ;;  %3390 = vmatpush1.bf16.msra.mxu1 %v5415_v61  ;;  %v7541_v61 = vld [vmem:[#allocation49_spill] sm:$0xff] }
 0x7f5   :  { %3318 = vmatprep.subr.bf16.mxu0 %v5420_v63  ;;  %3391 = vmatprep.subr.bf16.mxu1 %v5423_v1  ;;  %v7542_v1 = vld [vmem:[#allocation50_spill] sm:$0xff] }
 0x7f8   :  { %3319 = vmatpush1.bf16.msra.mxu0 %v5418_v6  ;;  %3392 = vmatpush1.bf16.msra.mxu1 %v5421_v26 }
 0x7f9   :  { %3320 = vmatprep.subr.bf16.mxu0 %v5426_v2  ;;  %3393 = vmatprep.subr.bf16.mxu1 %v5429_v4  ;;  %v7543_v4 = vld [vmem:[#allocation51_spill] sm:$0xff] }
 0x7fc   :  { %3321 = vmatpush1.bf16.msra.mxu0 %v5424_v5  ;;  %3394 = vmatpush1.bf16.msra.mxu1 %v5427_v35  ;;  %v7544_v35 = vld [vmem:[#allocation52_spill] sm:$0xff] }
 0x7fd   :  { %3322 = vmatprep.subr.bf16.mxu0 %v5432_v53  ;;  %3395 = vmatprep.subr.bf16.mxu1 %v5435_v38 }
 0x800   :  { %3323 = vmatpush1.bf16.msra.mxu0 %v5430_v39  ;;  %3396 = vmatpush1.bf16.msra.mxu1 %v5433_v40 }
 0x801   :  { %3324 = vmatprep.subr.bf16.mxu0 %v5438_v41  ;;  %3397 = vmatprep.subr.bf16.mxu1 %v5441_v42 }
 0x804   :  { %3325 = vmatpush1.bf16.msra.mxu0 %v5436_v43  ;;  %3398 = vmatpush1.bf16.msra.mxu1 %v5439_v45 }
 0x805   :  { %3326 = vmatprep.subr.bf16.mxu0 %v5444_v46  ;;  %3399 = vmatprep.subr.bf16.mxu1 %v5447_v37 }
 0x808   :  { %3327 = vmatpush1.bf16.msra.mxu0 %v5442_v47  ;;  %3400 = vmatpush1.bf16.msra.mxu1 %v5445_v48 }
 0x809   :  { %3328 = vmatprep.subr.bf16.mxu0 %v5450_v28  ;;  %3401 = vmatprep.subr.bf16.mxu1 %v5453_v11 }
 0x80c   :  { %3329 = vmatpush1.bf16.msra.mxu0 %v5448_v62  ;;  %3402 = vmatpush1.bf16.msra.mxu1 %v5451_v16 }
 0x80d   :  { %3693 = vmatprep.subr.bf16.mxu0 %v6839_v18  ;;  %3734 = vmatprep.subr.bf16.mxu1 %v6841_v20 }
 0x80f   :  { %3347 = vmatmul.mubr.bf16.vlgmr.msra.gmra.mrb[48].mxu0 %v5454_v15  ;;  %3420 = vmatmul.mubr.bf16.vlgmr.msra.gmra.mrb[48].mxu1 %v5454_v15 }
 0x810   :  { %3356 = vmatprep.mubr.bf16.mxu0 %v7523_v31  ;;  %3429 = vmatprep.mubr.bf16.mxu1 %v7523_v31 }
 0x811   :  { %3694 = vmatpush1.bf16.msra.mxu0 %v6843_v9  ;;  %3735 = vmatpush1.bf16.msra.mxu1 %v6845_v14 }
 0x812   :  { %3695 = vmatprep.subr.bf16.mxu0 %v6851_v33  ;;  %3736 = vmatprep.subr.bf16.mxu1 %v6853_v34 }
 0x815   :  { %3696 = vmatpush1.bf16.msra.mxu0 %v6855_v21  ;;  %3737 = vmatpush1.bf16.msra.mxu1 %v6857_v12 }
 0x816   :  { %3697 = vmatprep.subr.bf16.mxu0 %v6863_v25  ;;  %3738 = vmatprep.subr.bf16.mxu1 %v6865_v27 }
 0x817   :  { %3357 = vmatmul.mubr.bf16.gmra.mrb[52].mxu0 %v5455_v17  ;;  %3430 = vmatmul.mubr.bf16.gmra.mrb[52].mxu1 %v5455_v17 }
 0x818   :  { %3366 = vmatprep.mubr.bf16.mxu0 %v7523_v31  ;;  %3439 = vmatprep.mubr.bf16.mxu1 %v7523_v31 }
 0x819   :  { %3698 = vmatpush1.bf16.msra.mxu0 %v6867_v29  ;;  %3739 = vmatpush1.bf16.msra.mxu1 %v6869_v22 }
 0x81a   :  { %3699 = vmatprep.subr.bf16.mxu0 %v6875_v30  ;;  %3740 = vmatprep.subr.bf16.mxu1 %v6877_v23 }
 0x81d   :  { %3700 = vmatpush1.bf16.msra.mxu0 %v6879_v44  ;;  %3741 = vmatpush1.bf16.msra.mxu1 %v6881_v8 }
 0x81e   :  { %3701 = vmatprep.subr.bf16.mxu0 %v6887_v7  ;;  %3742 = vmatprep.subr.bf16.mxu1 %v6889_v24 }
 0x81f   :  { %3367 = vmatmul.mubr.bf16.gmra.mrb[56].mxu0 %v5456_v19  ;;  %3440 = vmatmul.mubr.bf16.gmra.mrb[56].mxu1 %v5456_v19 }
 0x820   :  { %3376 = vmatprep.mubr.bf16.mxu0 %v7523_v31  ;;  %3449 = vmatprep.mubr.bf16.mxu1 %v7523_v31 }
 0x821   :  { %3702 = vmatpush1.bf16.msra.mxu0 %v6891_v10  ;;  %3743 = vmatpush1.bf16.msra.mxu1 %v6893_v32 }
 0x822   :  { %3703 = vmatprep.subr.bf16.mxu0 %v6899_v0  ;;  %3744 = vmatprep.subr.bf16.mxu1 %v6901_v13 }
 0x825   :  { %3704 = vmatpush1.bf16.msra.mxu0 %v6903_v36  ;;  %3745 = vmatpush1.bf16.msra.mxu1 %v6905_v3 }
 0x826   :  { %3705 = vmatprep.subr.bf16.mxu0 %v6911_v49  ;;  %3746 = vmatprep.subr.bf16.mxu1 %v6913_v51 }
 0x829   :  { %3706 = vmatpush1.bf16.msra.mxu0 %v6915_v52  ;;  %3747 = vmatpush1.bf16.msra.mxu1 %v6917_v54 }
 0x82a   :  { %3707 = vmatprep.subr.bf16.mxu0 %v6919_v55  ;;  %3748 = vmatprep.subr.bf16.mxu1 %v6923_v56 }
 0x82d   :  { %3708 = vmatpush1.bf16.msra.mxu0 %v6927_v57  ;;  %3749 = vmatpush1.bf16.msra.mxu1 %v6929_v58 }
 0x82e   :  { %3808 = vmatprep.subr.bf16.mxu0 %v6839_v18  ;;  %3849 = vmatprep.subr.bf16.mxu1 %v6841_v20 }
 0x8c2   :  { %v2987_v59 = vpop.f32.mrb[44].mxu0  ;;  %v3028_v60 = vpop.f32.mrb[44].mxu1 }
 0x8c3   :  { %v3035_v63 = vadd.f32 %v2987_v59, %v7541_v61  ;;  %v3037_v6 = vadd.f32 %v3028_v60, %v7542_v1  ;;  %v2989_v26 = vpop.f32.mrb[45].mxu0  ;;  %v3030_v2 = vpop.f32.mrb[45].mxu1 }
 0x8c4   :  { %v3036_v5 = vadd.f32 %v2989_v26, %v7543_v4  ;;  %v3038_v53 = vadd.f32 %v3030_v2, %v7544_v35  ;;  %v2991_v38 = vpop.f32.mrb[46].mxu0  ;;  %v3032_v39 = vpop.f32.mrb[46].mxu1 }
 0x8c5   :  { %v5107_v40 = vmul.f32 -1.442695, %v3035_v63  ;;  %v2992_v41 = vpop.f32.mrb[47].mxu0  ;;  %v3033_v42 = vpop.f32.mrb[47].mxu1 }
 0x8c6   :  { %v5108_v43 = vmul.f32 -1.442695, %v3036_v5  ;;  %v5109_v45 = vmul.f32 -1.442695, %v3038_v53 }
 0x8c7   :  { %5626 = vpow2.f32 %v5107_v40 }
 0x8c8   :  { %5628 = vpow2.f32 %v5108_v43 }
 0x8c9   :  { %5630 = vpow2.f32 %v5109_v45 }
 0x8ca   :  { %5632 = vtanh.f32 %v3037_v6 }
 0x8d1   :  { %v5627_v46 = vpop.eup %5626 }
 0x8d2   :  { %v5629_v37 = vpop.eup %5628  ;;  %v3042_v47 = vadd.f32 1.0, %v5627_v46 }
 0x8d3   :  { %v3048_v48 = vadd.f32 1.0, %v5629_v37  ;;  %v5631_v28 = vpop.eup %5630 }
 0x8d4   :  { %5634 = vrcp.f32 %v3042_v47  ;;  %v5633_v11 = vpop.eup %5632  ;;  %v3055_v17 = vadd.f32 1.0, %v5631_v28 }
 0x8d5   :  { %5636 = vrcp.f32 %v3048_v48 }
 0x8d6   :  { %5638 = vrcp.f32 %v3055_v17 }
 0x8de   :  { %v5635_v62 = vpop.eup %5634 }
 0x8df   :  { %v5637_v16 = vpop.eup %5636  ;;  %v3059_v15 = vmul.f32 %v5635_v62, %v5633_v11 }
 0x8e0   :  { %v3058_v19 = vmul.f32 %v5637_v16, %v6828_v50  ;;  %v5639_v40 = vpop.eup %5638 }
 0x8e2   :  { %v3060_v59 = vadd.f32 %v3059_v15, %v3058_v19  ;;  %v6942_v60 = vpop.f32.mrb[48].mxu0  ;;  %v6944_v61 = vpop.f32.mrb[48].mxu1  ;;  %v154_v19 = vld [vmem:[#allocation6 + $0x8] sm:$0xff] }
 0x8e3   :  { %v6946_v63 = vpop.f32.mrb[49].mxu0  ;;  %v6948_v1 = vpop.f32.mrb[49].mxu1 }
 0x8e4   :  { %5640 = vtanh.f32 %v3060_v59  ;;  %4619 = vst [vmem:[#allocation23] sm:$0xff] %v3060_v59  ;;  %v6950_v6 = vpop.f32.mrb[50].mxu0  ;;  %v6952_v26 = vpop.f32.mrb[50].mxu1  ;;  %v3500_v59 = vpack.c.bf16 %v154_v19, %v154_v19 }
 0x8e5   :  { %v6954_v2 = vpop.f32.mrb[51].mxu0  ;;  %v6956_v4 = vpop.f32.mrb[51].mxu1 }
 0x8ea   :  { %v6958_v50 = vpop.f32.mrb[52].mxu0  ;;  %v6960_v5 = vpop.f32.mrb[52].mxu1 }
 0x8eb   :  { %7545 = vst [vmem:[#allocation32_spill] sm:$0xff] %v6960_v5  ;;  %v6962_v35 = vpop.f32.mrb[53].mxu0  ;;  %v6964_v53 = vpop.f32.mrb[53].mxu1 }
 0x8ec   :  { %7546 = vst [vmem:[#allocation33_spill] sm:$0xff] %v6962_v35  ;;  %7547 = vst [vmem:[#allocation34_spill] sm:$0xff] %v6964_v53  ;;  %v6966_v38 = vpop.f32.mrb[54].mxu0  ;;  %v6968_v39 = vpop.f32.mrb[54].mxu1 }
 0x8ed   :  { %7548 = vst [vmem:[#allocation35_spill] sm:$0xff] %v6966_v38  ;;  %7549 = vst [vmem:[#allocation36_spill] sm:$0xff] %v6968_v39  ;;  %v6970_v41 = vpop.f32.mrb[55].mxu0  ;;  %v6972_v42 = vpop.f32.mrb[55].mxu1 }
 0x8ee   :  { %7550 = vst [vmem:[#allocation37_spill] sm:$0xff] %v6970_v41  ;;  %7551 = vst [vmem:[#allocation38_spill] sm:$0xff] %v6972_v42  ;;  %v5641_v43 = vpop.eup %5640 }
 0x8ef   :  { %v3062_v45 = vmul.f32 %v5641_v43, %v5639_v40  ;;  %v3108_v40 = vld [vmem:[#allocation18] sm:$0xf] }
 0x8f1   :  { %v3063_v46 = vpack.c.bf16 %v3062_v45, %v3062_v45  ;;  %4615 = vst [vmem:[#allocation21] sm:$0xff] %v3062_v45 }
 0x8f2   :  { %v6974_v37 = vpop.f32.mrb[56].mxu0  ;;  %v6976_v47 = vpop.f32.mrb[56].mxu1 }
 0x8f3   :  { %7552 = vst [vmem:[#allocation39_spill] sm:$0xff] %v6974_v37  ;;  %7553 = vst [vmem:[#allocation40_spill] sm:$0xff] %v6976_v47  ;;  %v6978_v48 = vpop.f32.mrb[57].mxu0  ;;  %v6980_v28 = vpop.f32.mrb[57].mxu1 }
 0x8f4   :  { %3065 = vst [vmem:[#allocation4 + $0x1c] sm:$0xf] %v3063_v46  ;;  %7554 = vst [vmem:[#allocation41_spill] sm:$0xff] %v6978_v48  ;;  %v6982_v11 = vpop.f32.mrb[58].mxu0  ;;  %v6984_v62 = vpop.f32.mrb[58].mxu1 }
 0x8f5   :  { %7555 = vst [vmem:[#allocation42_spill] sm:$0xff] %v6980_v28  ;;  %7556 = vst [vmem:[#allocation43_spill] sm:$0xff] %v6982_v11  ;;  %v6986_v16 = vpop.f32.mrb[59].mxu0  ;;  %v6988_v15 = vpop.f32.mrb[59].mxu1 }
 0x8f6   :  { %7557 = vst [vmem:[#allocation44_spill] sm:$0xff] %v6984_v62  ;;  %7558 = vst [vmem:[#allocation45_spill] sm:$0xff] %v6986_v16 }
 0x8f7   :  { %7559 = vst [vmem:[#allocation46_spill] sm:$0xff] %v6988_v15  ;;  %v7566_v15 = vld [vmem:[#allocation31_spill] sm:$0xff] }
 0x8f8   :  { %v7567_v16 = vsub.s32 0, %v7566_v15  ;;  %v7568_v11 = vsub.s32 2, %v7566_v15 }
 0x8fa   :  { %v7040_v62 = vrot.slane %v3108_v40, %v7567_v16  ;;  %v7044_v28 = vrot.slane %v3108_v40, %v7568_v11 }
 0x8fb   :  { %v5493_v17 = vld [vmem:[#allocation4 + $0x18] sm:$0xff]  }
 0x8fc   :  { %3377 = vmatmul.mubr.bf16.gmra.mrb[60].mxu0 %v5493_v17  ;;  %3450 = vmatmul.mubr.bf16.gmra.mrb[60].mxu1 %v5493_v17  ;;  %v3349_v16 = vadd.f32 %v6942_v60, %v7040_v62 }
 0x8fd   :  { %3725 = vmatprep.mubr.bf16.mxu0 %v7523_v31  ;;  %3766 = vmatprep.mubr.bf16.mxu1 %v7523_v31 }
 0x904   :  { %3726 = vmatmul.mubr.bf16.vlgmr.msra.gmra.mrb[64].mxu0 %v3500_v59  ;;  %3767 = vmatmul.mubr.bf16.vlgmr.msra.gmra.mrb[64].mxu1 %v3500_v59 }
 0x905   :  { %3809 = vmatpush1.bf16.msra.mxu0 %v6843_v9  ;;  %3850 = vmatpush1.bf16.msra.mxu1 %v6845_v14 }
 0x906   :  { %3810 = vmatprep.subr.bf16.mxu0 %v6851_v33  ;;  %3851 = vmatprep.subr.bf16.mxu1 %v6853_v34 }
 0x907   :  { %3840 = vmatprep.mubr.bf16.mxu0 %v7523_v31  ;;  %3881 = vmatprep.mubr.bf16.mxu1 %v7523_v31 }
 0x909   :  { %3811 = vmatpush1.bf16.msra.mxu0 %v6855_v21  ;;  %3852 = vmatpush1.bf16.msra.mxu1 %v6857_v12 }
 0x90a   :  { %3812 = vmatprep.subr.bf16.mxu0 %v6863_v25  ;;  %3853 = vmatprep.subr.bf16.mxu1 %v6865_v27 }
 0x90d   :  { %3813 = vmatpush1.bf16.msra.mxu0 %v6867_v29  ;;  %3854 = vmatpush1.bf16.msra.mxu1 %v6869_v22 }
 0x90e   :  { %3814 = vmatprep.subr.bf16.mxu0 %v6875_v30  ;;  %3855 = vmatprep.subr.bf16.mxu1 %v6877_v23 }
 0x911   :  { %3815 = vmatpush1.bf16.msra.mxu0 %v6879_v44  ;;  %3856 = vmatpush1.bf16.msra.mxu1 %v6881_v8 }
 0x912   :  { %3816 = vmatprep.subr.bf16.mxu0 %v6887_v7  ;;  %3857 = vmatprep.subr.bf16.mxu1 %v6889_v24 }
 0x915   :  { %3817 = vmatpush1.bf16.msra.mxu0 %v6891_v10  ;;  %3858 = vmatpush1.bf16.msra.mxu1 %v6893_v32 }
 0x916   :  { %3818 = vmatprep.subr.bf16.mxu0 %v6899_v0  ;;  %3859 = vmatprep.subr.bf16.mxu1 %v6901_v13 }
 0x919   :  { %3819 = vmatpush1.bf16.msra.mxu0 %v6903_v36  ;;  %3860 = vmatpush1.bf16.msra.mxu1 %v6905_v3 }
 0x91a   :  { %3820 = vmatprep.subr.bf16.mxu0 %v6911_v49  ;;  %3861 = vmatprep.subr.bf16.mxu1 %v6913_v51 }
 0x91d   :  { %3821 = vmatpush1.bf16.msra.mxu0 %v6915_v52  ;;  %3862 = vmatpush1.bf16.msra.mxu1 %v6917_v54 }
 0x91e   :  { %3822 = vmatprep.subr.bf16.mxu0 %v6919_v55  ;;  %3863 = vmatprep.subr.bf16.mxu1 %v6923_v56 }
 0x921   :  { %3823 = vmatpush1.bf16.msra.mxu0 %v6927_v57  ;;  %3864 = vmatpush1.bf16.msra.mxu1 %v6929_v58 }
 0x922   :  { %3923 = vmatprep.subr.bf16.mxu0 %v6839_v18  ;;  %3964 = vmatprep.subr.bf16.mxu1 %v6841_v20 }
 0x9cf   :  { %v7026_v43 = vpop.f32.mrb[60].mxu0  ;;  %v7028_v45 = vpop.f32.mrb[60].mxu1 }
 0x9d0   :  { %7560 = vst [vmem:[#allocation47_spill] sm:$0xff] %v7026_v43  ;;  %7561 = vst [vmem:[#allocation48_spill] sm:$0xff] %v7028_v45  ;;  %v7030_v46 = vpop.f32.mrb[61].mxu0  ;;  %v7032_v17 = vpop.f32.mrb[61].mxu1 }
 0x9d1   :  { %7562 = vst [vmem:[#allocation49_spill] sm:$0xff] %v7030_v46  ;;  %7563 = vst [vmem:[#allocation50_spill] sm:$0xff] %v7032_v17  ;;  %v7034_v19 = vpop.f32.mrb[62].mxu0  ;;  %v7036_v59 = vpop.f32.mrb[62].mxu1  ;;  %v7571_v46 = vsub.s32 1, %v7566_v15 }
 0x9d2   :  { %7564 = vst [vmem:[#allocation51_spill] sm:$0xff] %v7034_v19  ;;  %7565 = vst [vmem:[#allocation52_spill] sm:$0xff] %v7036_v59  ;;  %v7046_v48 = vpop.f32.mrb[63].mxu0  ;;  %v7048_v43 = vpop.f32.mrb[63].mxu1  ;;  %v7572_v19 = vsub.s32 3, %v7566_v15  ;;  %v3422_v59 = vadd.f32 %v6944_v61, %v7044_v28 }
 0x9d3   :  { %7569 = vst [vmem:[#allocation31_spill] sm:$0xff] %v7046_v48  ;;  %7570 = vst [vmem:[#allocation53_spill] sm:$0xff] %v7048_v43  ;;  %v7052_v45 = vrot.slane %v3108_v40, %v7571_v46 }
 0x9d4   :  { %v7056_v17 = vrot.slane %v3108_v40, %v7572_v19 }
 0x9d5   :  { %v3351_v11 = vadd.f32 %v6946_v63, %v7052_v45 }
 0x9d6   :  { %v3424_v43 = vadd.f32 %v6948_v1, %v7056_v17 }
 0x9d7   :  { %v3727_v48 = vpop.f32.mrb[64].mxu0  ;;  %v3768_v47 = vpop.f32.mrb[64].mxu1 }
 0x9d8   :  { %v3775_v46 = vadd.f32 %v3727_v48, %v3349_v16  ;;  %v3777_v37 = vadd.f32 %v3768_v47, %v3422_v59  ;;  %v3729_v42 = vpop.f32.mrb[65].mxu0  ;;  %v3770_v15 = vpop.f32.mrb[65].mxu1 }
 0x9d9   :  { %v3776_v40 = vadd.f32 %v3729_v42, %v3351_v11  ;;  %v3778_v19 = vadd.f32 %v3770_v15, %v3424_v43  ;;  %v3731_v41 = vpop.f32.mrb[66].mxu0  ;;  %v3772_v39 = vpop.f32.mrb[66].mxu1  ;;  %v158_v43 = vld [vmem:[#allocation9 + $0x8] sm:$0xff]  ;;  %v3426_v15 = vadd.f32 %v6952_v26, %v7044_v28 }
 0x9da   :  { %v5178_v60 = vmul.f32 -1.442695, %v3775_v46  ;;  %v3732_v38 = vpop.f32.mrb[67].mxu0  ;;  %v3773_v53 = vpop.f32.mrb[67].mxu1 }
 0x9db   :  { %v5179_v61 = vmul.f32 -1.442695, %v3776_v40  ;;  %v5180_v63 = vmul.f32 -1.442695, %v3778_v19  ;;  %v3355_v40 = vadd.f32 %v6954_v2, %v7052_v45  ;;  %v3428_v19 = vadd.f32 %v6956_v4, %v7056_v17 }
 0x9dc   :  { %5642 = vpow2.f32 %v5178_v60 }
 0x9dd   :  { %5644 = vpow2.f32 %v5179_v61 }
 0x9de   :  { %5646 = vpow2.f32 %v5180_v63 }
 0x9df   :  { %5648 = vtanh.f32 %v3777_v37 }
 0x9e6   :  { %v5643_v35 = vpop.eup %5642 }
 0x9e7   :  { %v5645_v5 = vpop.eup %5644  ;;  %v3782_v1 = vadd.f32 1.0, %v5643_v35 }
 0x9e8   :  { %v3788_v48 = vadd.f32 1.0, %v5645_v5  ;;  %v5647_v47 = vpop.eup %5646  ;;  %v3353_v5 = vadd.f32 %v6950_v6, %v7040_v62 }
 0x9e9   :  { %5650 = vrcp.f32 %v3782_v1  ;;  %v5649_v42 = vpop.eup %5648  ;;  %v3795_v38 = vadd.f32 1.0, %v5647_v47 }
 0x9ea   :  { %5652 = vrcp.f32 %v3788_v48 }
 0x9eb   :  { %5654 = vrcp.f32 %v3795_v38 }
 0x9f3   :  { %v5651_v41 = vpop.eup %5650 }
 0x9f4   :  { %v5653_v39 = vpop.eup %5652  ;;  %v3799_v59 = vmul.f32 %v5651_v41, %v5649_v42 }
 0x9f5   :  { %v3798_v53 = vmul.f32 %v5653_v39, %v158_v43  ;;  %v5655_v11 = vpop.eup %5654 }
 0x9f7   :  { %v7066_v16 = vadd.f32 %v3799_v59, %v3798_v53 }
 0x9f9   :  { %5656 = vtanh.f32 %v7066_v16 }
 0xa03   :  { %v5657_v35 = vpop.eup %5656 }
 0xa04   :  { %v3802_v46 = vmul.f32 %v5657_v35, %v5655_v11 }
 0xa06   :  { %v3807_v37 = vpack.c.bf16 %v3802_v46, %v3802_v46 }
 0xa08   :  { %3841 = vmatmul.mubr.bf16.vlgmr.msra.gmra.mrb[68].mxu0 %v3807_v37  ;;  %3882 = vmatmul.mubr.bf16.vlgmr.msra.gmra.mrb[68].mxu1 %v3807_v37 }
 0xa09   :  { %3924 = vmatpush1.bf16.msra.mxu0 %v6843_v9  ;;  %3965 = vmatpush1.bf16.msra.mxu1 %v6845_v14 }
 0xa0a   :  { %3925 = vmatprep.subr.bf16.mxu0 %v6851_v33  ;;  %3966 = vmatprep.subr.bf16.mxu1 %v6853_v34 }
 0xa0b   :  { %3955 = vmatprep.mubr.bf16.mxu0 %v7523_v31  ;;  %3996 = vmatprep.mubr.bf16.mxu1 %v7523_v31 }
 0xa0d   :  { %3926 = vmatpush1.bf16.msra.mxu0 %v6855_v21  ;;  %3967 = vmatpush1.bf16.msra.mxu1 %v6857_v12 }
 0xa0e   :  { %3927 = vmatprep.subr.bf16.mxu0 %v6863_v25  ;;  %3968 = vmatprep.subr.bf16.mxu1 %v6865_v27 }
 0xa11   :  { %3928 = vmatpush1.bf16.msra.mxu0 %v6867_v29  ;;  %3969 = vmatpush1.bf16.msra.mxu1 %v6869_v22 }
 0xa12   :  { %3929 = vmatprep.subr.bf16.mxu0 %v6875_v30  ;;  %3970 = vmatprep.subr.bf16.mxu1 %v6877_v23 }
 0xa15   :  { %3930 = vmatpush1.bf16.msra.mxu0 %v6879_v44  ;;  %3971 = vmatpush1.bf16.msra.mxu1 %v6881_v8 }
 0xa16   :  { %3931 = vmatprep.subr.bf16.mxu0 %v6887_v7  ;;  %3972 = vmatprep.subr.bf16.mxu1 %v6889_v24 }
 0xa19   :  { %3932 = vmatpush1.bf16.msra.mxu0 %v6891_v10  ;;  %3973 = vmatpush1.bf16.msra.mxu1 %v6893_v32 }
 0xa1a   :  { %3933 = vmatprep.subr.bf16.mxu0 %v6899_v0  ;;  %3974 = vmatprep.subr.bf16.mxu1 %v6901_v13 }
 0xa1d   :  { %3934 = vmatpush1.bf16.msra.mxu0 %v6903_v36  ;;  %3975 = vmatpush1.bf16.msra.mxu1 %v6905_v3 }
 0xa1e   :  { %3935 = vmatprep.subr.bf16.mxu0 %v6911_v49  ;;  %3976 = vmatprep.subr.bf16.mxu1 %v6913_v51 }
 0xa21   :  { %3936 = vmatpush1.bf16.msra.mxu0 %v6915_v52  ;;  %3977 = vmatpush1.bf16.msra.mxu1 %v6917_v54 }
 0xa22   :  { %3937 = vmatprep.subr.bf16.mxu0 %v6919_v55  ;;  %3978 = vmatprep.subr.bf16.mxu1 %v6923_v56 }
 0xa25   :  { %3938 = vmatpush1.bf16.msra.mxu0 %v6927_v57  ;;  %3979 = vmatpush1.bf16.msra.mxu1 %v6929_v58 }
 0xa26   :  { %4038 = vmatprep.subr.bf16.mxu0 %v6839_v18  ;;  %4079 = vmatprep.subr.bf16.mxu1 %v6841_v20 }
 0xadb   :  { %v3842_v60 = vpop.f32.mrb[68].mxu0  ;;  %v3883_v61 = vpop.f32.mrb[68].mxu1 }
 0xadc   :  { %v3890_v63 = vadd.f32 %v3842_v60, %v3353_v5  ;;  %v3892_v1 = vadd.f32 %v3883_v61, %v3426_v15  ;;  %v3844_v48 = vpop.f32.mrb[69].mxu0  ;;  %v3885_v47 = vpop.f32.mrb[69].mxu1 }
 0xadd   :  { %v3891_v42 = vadd.f32 %v3844_v48, %v3355_v40  ;;  %v3893_v43 = vadd.f32 %v3885_v47, %v3428_v19  ;;  %v3846_v41 = vpop.f32.mrb[70].mxu0  ;;  %v3887_v39 = vpop.f32.mrb[70].mxu1 }
 0xade   :  { %v5181_v6 = vmul.f32 -1.442695, %v3890_v63  ;;  %v3847_v59 = vpop.f32.mrb[71].mxu0  ;;  %v3888_v38 = vpop.f32.mrb[71].mxu1  ;;  %v7574_v41 = vld [vmem:[#allocation33_spill] sm:$0xff] }
 0xadf   :  { %v5182_v26 = vmul.f32 -1.442695, %v3891_v42  ;;  %v5183_v2 = vmul.f32 -1.442695, %v3893_v43  ;;  %v7573_v42 = vld [vmem:[#allocation32_spill] sm:$0xff]  ;;  %v3361_v39 = vadd.f32 %v7574_v41, %v7052_v45 }
 0xae0   :  { %5658 = vpow2.f32 %v5181_v6  ;;  %v3432_v43 = vadd.f32 %v7573_v42, %v7044_v28  ;;  %v7575_v6 = vld [vmem:[#allocation34_spill] sm:$0xff] }
 0xae1   :  { %5660 = vpow2.f32 %v5182_v26  ;;  %v3434_v59 = vadd.f32 %v7575_v6, %v7056_v17 }
 0xae2   :  { %5662 = vpow2.f32 %v5183_v2 }
 0xae3   :  { %5664 = vtanh.f32 %v3892_v1 }
 0xaea   :  { %v5659_v53 = vpop.eup %5658 }
 0xaeb   :  { %v5661_v11 = vpop.eup %5660  ;;  %v3897_v4 = vadd.f32 1.0, %v5659_v53 }
 0xaec   :  { %v3903_v35 = vadd.f32 1.0, %v5661_v11  ;;  %v5663_v46 = vpop.eup %5662 }
 0xaed   :  { %5666 = vrcp.f32 %v3897_v4  ;;  %v5665_v37 = vpop.eup %5664  ;;  %v3910_v19 = vadd.f32 1.0, %v5663_v46 }
 0xaee   :  { %5668 = vrcp.f32 %v3903_v35 }
 0xaef   :  { %5670 = vrcp.f32 %v3910_v19 }
 0xaf7   :  { %v5667_v5 = vpop.eup %5666 }
 0xaf8   :  { %v5669_v15 = vpop.eup %5668  ;;  %v3914_v40 = vmul.f32 %v5667_v5, %v5665_v37 }
 0xaf9   :  { %v3913_v60 = vmul.f32 %v5669_v15, %v7066_v16  ;;  %v5671_v63 = vpop.eup %5670  ;;  %v3359_v16 = vadd.f32 %v6958_v50, %v7040_v62 }
 0xafb   :  { %v7112_v61 = vadd.f32 %v3914_v40, %v3913_v60 }
 0xafd   :  { %5672 = vtanh.f32 %v7112_v61 }
 0xb07   :  { %v5673_v48 = vpop.eup %5672 }
 0xb08   :  { %v3917_v47 = vmul.f32 %v5673_v48, %v5671_v63 }
 0xb0a   :  { %v3922_v1 = vpack.c.bf16 %v3917_v47, %v3917_v47 }
 0xb0c   :  { %3956 = vmatmul.mubr.bf16.vlgmr.msra.gmra.mrb[72].mxu0 %v3922_v1  ;;  %3997 = vmatmul.mubr.bf16.vlgmr.msra.gmra.mrb[72].mxu1 %v3922_v1 }
 0xb0d   :  { %4039 = vmatpush1.bf16.msra.mxu0 %v6843_v9  ;;  %4080 = vmatpush1.bf16.msra.mxu1 %v6845_v14 }
 0xb0e   :  { %4040 = vmatprep.subr.bf16.mxu0 %v6851_v33  ;;  %4081 = vmatprep.subr.bf16.mxu1 %v6853_v34 }
 0xb0f   :  { %4070 = vmatprep.mubr.bf16.mxu0 %v7523_v31  ;;  %4111 = vmatprep.mubr.bf16.mxu1 %v7523_v31 }
 0xb11   :  { %4041 = vmatpush1.bf16.msra.mxu0 %v6855_v21  ;;  %4082 = vmatpush1.bf16.msra.mxu1 %v6857_v12 }
 0xb12   :  { %4042 = vmatprep.subr.bf16.mxu0 %v6863_v25  ;;  %4083 = vmatprep.subr.bf16.mxu1 %v6865_v27 }
 0xb15   :  { %4043 = vmatpush1.bf16.msra.mxu0 %v6867_v29  ;;  %4084 = vmatpush1.bf16.msra.mxu1 %v6869_v22 }
 0xb16   :  { %4044 = vmatprep.subr.bf16.mxu0 %v6875_v30  ;;  %4085 = vmatprep.subr.bf16.mxu1 %v6877_v23 }
 0xb19   :  { %4045 = vmatpush1.bf16.msra.mxu0 %v6879_v44  ;;  %4086 = vmatpush1.bf16.msra.mxu1 %v6881_v8 }
 0xb1a   :  { %4046 = vmatprep.subr.bf16.mxu0 %v6887_v7  ;;  %4087 = vmatprep.subr.bf16.mxu1 %v6889_v24 }
 0xb1d   :  { %4047 = vmatpush1.bf16.msra.mxu0 %v6891_v10  ;;  %4088 = vmatpush1.bf16.msra.mxu1 %v6893_v32 }
 0xb1e   :  { %4048 = vmatprep.subr.bf16.mxu0 %v6899_v0  ;;  %4089 = vmatprep.subr.bf16.mxu1 %v6901_v13 }
 0xb21   :  { %4049 = vmatpush1.bf16.msra.mxu0 %v6903_v36  ;;  %4090 = vmatpush1.bf16.msra.mxu1 %v6905_v3 }
 0xb22   :  { %4050 = vmatprep.subr.bf16.mxu0 %v6911_v49  ;;  %4091 = vmatprep.subr.bf16.mxu1 %v6913_v51 }
 0xb25   :  { %4051 = vmatpush1.bf16.msra.mxu0 %v6915_v52  ;;  %4092 = vmatpush1.bf16.msra.mxu1 %v6917_v54 }
 0xb26   :  { %4052 = vmatprep.subr.bf16.mxu0 %v6919_v55  ;;  %4093 = vmatprep.subr.bf16.mxu1 %v6923_v56 }
 0xb29   :  { %4053 = vmatpush1.bf16.msra.mxu0 %v6927_v57  ;;  %4094 = vmatpush1.bf16.msra.mxu1 %v6929_v58 }
 0xb2a   :  { %4153 = vmatprep.subr.bf16.mxu0 %v6839_v18  ;;  %4194 = vmatprep.subr.bf16.mxu1 %v6841_v20 }
 0xbdf   :  { %v3957_v38 = vpop.f32.mrb[72].mxu0  ;;  %v3998_v26 = vpop.f32.mrb[72].mxu1 }
 0xbe0   :  { %v4005_v2 = vadd.f32 %v3957_v38, %v3359_v16  ;;  %v4007_v53 = vadd.f32 %v3998_v26, %v3432_v43  ;;  %v3959_v11 = vpop.f32.mrb[73].mxu0  ;;  %v4000_v4 = vpop.f32.mrb[73].mxu1 }
 0xbe1   :  { %v4006_v35 = vadd.f32 %v3959_v11, %v3361_v39  ;;  %v4008_v46 = vadd.f32 %v4000_v4, %v3434_v59  ;;  %v3961_v37 = vpop.f32.mrb[74].mxu0  ;;  %v4002_v5 = vpop.f32.mrb[74].mxu1 }
 0xbe2   :  { %v5184_v50 = vmul.f32 -1.442695, %v4005_v2  ;;  %v3962_v15 = vpop.f32.mrb[75].mxu0  ;;  %v4003_v40 = vpop.f32.mrb[75].mxu1  ;;  %v7578_v37 = vld [vmem:[#allocation37_spill] sm:$0xff] }
 0xbe3   :  { %v5185_v19 = vmul.f32 -1.442695, %v4006_v35  ;;  %v5186_v60 = vmul.f32 -1.442695, %v4008_v46  ;;  %v7577_v35 = vld [vmem:[#allocation36_spill] sm:$0xff]  ;;  %v3365_v5 = vadd.f32 %v7578_v37, %v7052_v45 }
 0xbe4   :  { %5674 = vpow2.f32 %v5184_v50  ;;  %v3436_v46 = vadd.f32 %v7577_v35, %v7044_v28  ;;  %v7579_v50 = vld [vmem:[#allocation38_spill] sm:$0xff] }
 0xbe5   :  { %5676 = vpow2.f32 %v5185_v19  ;;  %v3438_v15 = vadd.f32 %v7579_v50, %v7056_v17 }
 0xbe6   :  { %5678 = vpow2.f32 %v5186_v60 }
 0xbe7   :  { %5680 = vtanh.f32 %v4007_v53 }
 0xbee   :  { %v5675_v63 = vpop.eup %5674 }
 0xbef   :  { %v5677_v48 = vpop.eup %5676  ;;  %v4012_v47 = vadd.f32 1.0, %v5675_v63 }
 0xbf0   :  { %v4018_v1 = vadd.f32 1.0, %v5677_v48  ;;  %v5679_v16 = vpop.eup %5678 }
 0xbf1   :  { %5682 = vrcp.f32 %v4012_v47  ;;  %v5681_v42 = vpop.eup %5680  ;;  %v4025_v6 = vadd.f32 1.0, %v5679_v16 }
 0xbf2   :  { %5684 = vrcp.f32 %v4018_v1 }
 0xbf3   :  { %5686 = vrcp.f32 %v4025_v6 }
 0xbfb   :  { %v5683_v43 = vpop.eup %5682 }
 0xbfc   :  { %v5685_v41 = vpop.eup %5684  ;;  %v4029_v39 = vmul.f32 %v5683_v43, %v5681_v42 }
 0xbfd   :  { %v4028_v59 = vmul.f32 %v5685_v41, %v7112_v61  ;;  %v5687_v26 = vpop.eup %5686  ;;  %v7576_v61 = vld [vmem:[#allocation35_spill] sm:$0xff] }
 0xbfe   :  { %v3363_v4 = vadd.f32 %v7576_v61, %v7040_v62 }
 0xbff   :  { %v7158_v38 = vadd.f32 %v4029_v39, %v4028_v59 }
 0xc01   :  { %5688 = vtanh.f32 %v7158_v38 }
 0xc0b   :  { %v5689_v2 = vpop.eup %5688 }
 0xc0c   :  { %v4032_v11 = vmul.f32 %v5689_v2, %v5687_v26 }
 0xc0e   :  { %v4037_v53 = vpack.c.bf16 %v4032_v11, %v4032_v11 }
 0xc10   :  { %4071 = vmatmul.mubr.bf16.vlgmr.msra.gmra.mrb[76].mxu0 %v4037_v53  ;;  %4112 = vmatmul.mubr.bf16.vlgmr.msra.gmra.mrb[76].mxu1 %v4037_v53 }
 0xc11   :  { %4154 = vmatpush1.bf16.msra.mxu0 %v6843_v9  ;;  %4195 = vmatpush1.bf16.msra.mxu1 %v6845_v14 }
 0xc12   :  { %4155 = vmatprep.subr.bf16.mxu0 %v6851_v33  ;;  %4196 = vmatprep.subr.bf16.mxu1 %v6853_v34 }
 0xc13   :  { %4185 = vmatprep.mubr.bf16.mxu0 %v7523_v31  ;;  %4226 = vmatprep.mubr.bf16.mxu1 %v7523_v31 }
 0xc15   :  { %4156 = vmatpush1.bf16.msra.mxu0 %v6855_v21  ;;  %4197 = vmatpush1.bf16.msra.mxu1 %v6857_v12 }
 0xc16   :  { %4157 = vmatprep.subr.bf16.mxu0 %v6863_v25  ;;  %4198 = vmatprep.subr.bf16.mxu1 %v6865_v27 }
 0xc19   :  { %4158 = vmatpush1.bf16.msra.mxu0 %v6867_v29  ;;  %4199 = vmatpush1.bf16.msra.mxu1 %v6869_v22 }
 0xc1a   :  { %4159 = vmatprep.subr.bf16.mxu0 %v6875_v30  ;;  %4200 = vmatprep.subr.bf16.mxu1 %v6877_v23 }
 0xc1d   :  { %4160 = vmatpush1.bf16.msra.mxu0 %v6879_v44  ;;  %4201 = vmatpush1.bf16.msra.mxu1 %v6881_v8 }
 0xc1e   :  { %4161 = vmatprep.subr.bf16.mxu0 %v6887_v7  ;;  %4202 = vmatprep.subr.bf16.mxu1 %v6889_v24 }
 0xc21   :  { %4162 = vmatpush1.bf16.msra.mxu0 %v6891_v10  ;;  %4203 = vmatpush1.bf16.msra.mxu1 %v6893_v32 }
 0xc22   :  { %4163 = vmatprep.subr.bf16.mxu0 %v6899_v0  ;;  %4204 = vmatprep.subr.bf16.mxu1 %v6901_v13 }
 0xc25   :  { %4164 = vmatpush1.bf16.msra.mxu0 %v6903_v36  ;;  %4205 = vmatpush1.bf16.msra.mxu1 %v6905_v3 }
 0xc26   :  { %4165 = vmatprep.subr.bf16.mxu0 %v6911_v49  ;;  %4206 = vmatprep.subr.bf16.mxu1 %v6913_v51 }
 0xc29   :  { %4166 = vmatpush1.bf16.msra.mxu0 %v6915_v52  ;;  %4207 = vmatpush1.bf16.msra.mxu1 %v6917_v54 }
 0xc2a   :  { %4167 = vmatprep.subr.bf16.mxu0 %v6919_v55  ;;  %4208 = vmatprep.subr.bf16.mxu1 %v6923_v56 }
 0xc2d   :  { %4168 = vmatpush1.bf16.msra.mxu0 %v6927_v57  ;;  %4209 = vmatpush1.bf16.msra.mxu1 %v6929_v58 }
 0xc2e   :  { %4268 = vmatprep.subr.bf16.mxu0 %v6839_v18  ;;  %4309 = vmatprep.subr.bf16.mxu1 %v6841_v20 }
 0xce3   :  { %v4072_v40 = vpop.f32.mrb[76].mxu0  ;;  %v4113_v19 = vpop.f32.mrb[76].mxu1 }
 0xce4   :  { %v4120_v60 = vadd.f32 %v4072_v40, %v3363_v4  ;;  %v4122_v63 = vadd.f32 %v4113_v19, %v3436_v46  ;;  %v4074_v48 = vpop.f32.mrb[77].mxu0  ;;  %v4115_v47 = vpop.f32.mrb[77].mxu1 }
 0xce5   :  { %v4121_v1 = vadd.f32 %v4074_v48, %v3365_v5  ;;  %v4123_v16 = vadd.f32 %v4115_v47, %v3438_v15  ;;  %v4076_v42 = vpop.f32.mrb[78].mxu0  ;;  %v4117_v43 = vpop.f32.mrb[78].mxu1 }
 0xce6   :  { %v5187_v41 = vmul.f32 -1.442695, %v4120_v60  ;;  %v4077_v39 = vpop.f32.mrb[79].mxu0  ;;  %v4118_v6 = vpop.f32.mrb[79].mxu1 }
 0xce7   :  { %v5188_v59 = vmul.f32 -1.442695, %v4121_v1  ;;  %v5189_v26 = vmul.f32 -1.442695, %v4123_v16  ;;  %v7253_v39 = vld [vmem:[#allocation17] ss:$16 sps:$4 sm:$0xff]  }
 0xce8   :  { %5690 = vpow2.f32 %v5187_v41  ;;  %v7256_v6 = vld [vmem:[#allocation17 + $0x8] ss:$16 sps:$4 sm:$0xff]  }
 0xce9   :  { %5692 = vpow2.f32 %v5188_v59  ;;  %v7259_v59 = vld [vmem:[#allocation17 + $0x24] ss:$16 sps:$4 sm:$0xff]  }
 0xcea   :  { %5694 = vpow2.f32 %v5189_v26  ;;  %v7262_v26 = vld [vmem:[#allocation17 + $0x2c] ss:$16 sps:$4 sm:$0xff]  }
 0xceb   :  { %5696 = vtanh.f32 %v4122_v63 }
 0xcf2   :  { %v5691_v2 = vpop.eup %5690 }
 0xcf3   :  { %v5693_v11 = vpop.eup %5692  ;;  %v4127_v53 = vadd.f32 1.0, %v5691_v2  ;;  %v7267_v2 = vld [vmem:[#allocation17 + $0x20] ss:$16 sps:$4 sm:$0xff]  }
 0xcf4   :  { %v4133_v61 = vadd.f32 1.0, %v5693_v11  ;;  %v5695_v4 = vpop.eup %5694  ;;  %v7270_v11 = vld [vmem:[#allocation17 + $0x28] ss:$16 sps:$4 sm:$0xff]  }
 0xcf5   :  { %5698 = vrcp.f32 %v4127_v53  ;;  %v5697_v35 = vpop.eup %5696  ;;  %v4140_v50 = vadd.f32 1.0, %v5695_v4  ;;  %v7273_v53 = vld [vmem:[#allocation17 + $0x44] ss:$16 sps:$4 sm:$0xff]   ;;  %v7279_v4 = vld [vmem:[#allocation17 + $0x40] ss:$16 sps:$4 sm:$0xff]  }
 0xcf6   :  { %5700 = vrcp.f32 %v4133_v61  ;;  %v7276_v61 = vld [vmem:[#allocation17 + $0x4c] ss:$16 sps:$4 sm:$0xff]  }
 0xcf7   :  { %5702 = vrcp.f32 %v4140_v50  ;;  %v7294_v50 = vld [vmem:[#allocation17 + $0x68] ss:$16 sps:$4 sm:$0xff]  }
 0xcff   :  { %v5699_v46 = vpop.eup %5698 }
 0xd00   :  { %v5701_v37 = vpop.eup %5700  ;;  %v4144_v5 = vmul.f32 %v5699_v46, %v5697_v35  ;;  %v7282_v35 = vld [vmem:[#allocation17 + $0x48] ss:$16 sps:$4 sm:$0xff]   ;;  %v7285_v46 = vld [vmem:[#allocation17 + $0x64] ss:$16 sps:$4 sm:$0xff]  }
 0xd01   :  { %v4143_v15 = vmul.f32 %v5701_v37, %v7158_v38  ;;  %v5703_v19 = vpop.eup %5702  ;;  %v7288_v37 = vld [vmem:[#allocation17 + $0x6c] ss:$16 sps:$4 sm:$0xff]  }
 0xd03   :  { %v7204_v40 = vadd.f32 %v4144_v5, %v4143_v15  ;;  %v7291_v5 = vld [vmem:[#allocation17 + $0x60] ss:$16 sps:$4 sm:$0xff]   ;;  %v7297_v15 = vld [vmem:[#allocation17 + $0x84] ss:$16 sps:$4 sm:$0xff]  }
 0xd05   :  { %5704 = vtanh.f32 %v7204_v40 }
 0xd0f   :  { %v5705_v60 = vpop.eup %5704 }
 0xd10   :  { %v4147_v48 = vmul.f32 %v5705_v60, %v5703_v19  ;;  %v7303_v19 = vld [vmem:[#allocation17 + $0x80] ss:$16 sps:$4 sm:$0xff]   ;;  %v7306_v60 = vld [vmem:[#allocation17 + $0x88] ss:$16 sps:$4 sm:$0xff]  }
 0xd12   :  { %v4152_v63 = vpack.c.bf16 %v4147_v48, %v4147_v48  ;;  %v7309_v48 = vld [vmem:[#allocation17 + $0xa4] ss:$16 sps:$4 sm:$0xff]  }
 0xd14   :  { %4186 = vmatmul.mubr.bf16.vlgmr.msra.gmra.mrb[80].mxu0 %v4152_v63  ;;  %4227 = vmatmul.mubr.bf16.vlgmr.msra.gmra.mrb[80].mxu1 %v4152_v63  ;;  %v7312_v63 = vld [vmem:[#allocation17 + $0xac] ss:$16 sps:$4 sm:$0xff]  }
 0xd15   :  { %4269 = vmatpush1.bf16.msra.mxu0 %v6843_v9  ;;  %4310 = vmatpush1.bf16.msra.mxu1 %v6845_v14  ;;  %v7580_v9 = vld [vmem:[#allocation39_spill] sm:$0xff] }
 0xd16   :  { %4270 = vmatprep.subr.bf16.mxu0 %v6851_v33  ;;  %4311 = vmatprep.subr.bf16.mxu1 %v6853_v34  ;;  %v3369_v14 = vadd.f32 %v7580_v9, %v7040_v62  ;;  %v7581_v33 = vld [vmem:[#allocation40_spill] sm:$0xff]  ;;  %v7315_v9 = vld [vmem:[#allocation17 + $0xa0] ss:$16 sps:$4 sm:$0xff]  }
 0xd17   :  { %4300 = vmatprep.mubr.bf16.mxu0 %v7523_v31  ;;  %4341 = vmatprep.mubr.bf16.mxu1 %v7523_v31  ;;  %v3442_v34 = vadd.f32 %v7581_v33, %v7044_v28  ;;  %v7321_v33 = vld [vmem:[#allocation17 + $0xc4] ss:$16 sps:$4 sm:$0xff]  }
 0xd19   :  { %4271 = vmatpush1.bf16.msra.mxu0 %v6855_v21  ;;  %4312 = vmatpush1.bf16.msra.mxu1 %v6857_v12  ;;  %v7582_v21 = vld [vmem:[#allocation41_spill] sm:$0xff] }
 0xd1a   :  { %4272 = vmatprep.subr.bf16.mxu0 %v6863_v25  ;;  %4313 = vmatprep.subr.bf16.mxu1 %v6865_v27  ;;  %v3371_v12 = vadd.f32 %v7582_v21, %v7052_v45  ;;  %v7583_v25 = vld [vmem:[#allocation42_spill] sm:$0xff]  ;;  %v7327_v21 = vld [vmem:[#allocation17 + $0xc0] ss:$16 sps:$4 sm:$0xff]  }
 0xd1b   :  { %v3444_v27 = vadd.f32 %v7583_v25, %v7056_v17  ;;  %v7333_v25 = vld [vmem:[#allocation17 + $0xe4] ss:$16 sps:$4 sm:$0xff]  }
 0xd1d   :  { %4273 = vmatpush1.bf16.msra.mxu0 %v6867_v29  ;;  %4314 = vmatpush1.bf16.msra.mxu1 %v6869_v22 }
 0xd1e   :  { %4274 = vmatprep.subr.bf16.mxu0 %v6875_v30  ;;  %4315 = vmatprep.subr.bf16.mxu1 %v6877_v23 }
 0xd21   :  { %4275 = vmatpush1.bf16.msra.mxu0 %v6879_v44  ;;  %4316 = vmatpush1.bf16.msra.mxu1 %v6881_v8 }
 0xd22   :  { %4276 = vmatprep.subr.bf16.mxu0 %v6887_v7  ;;  %4317 = vmatprep.subr.bf16.mxu1 %v6889_v24 }
 0xd25   :  { %4277 = vmatpush1.bf16.msra.mxu0 %v6891_v10  ;;  %4318 = vmatpush1.bf16.msra.mxu1 %v6893_v32 }
 0xd26   :  { %4278 = vmatprep.subr.bf16.mxu0 %v6899_v0  ;;  %4319 = vmatprep.subr.bf16.mxu1 %v6901_v13 }
 0xd29   :  { %4279 = vmatpush1.bf16.msra.mxu0 %v6903_v36  ;;  %4320 = vmatpush1.bf16.msra.mxu1 %v6905_v3 }
 0xd2a   :  { %4280 = vmatprep.subr.bf16.mxu0 %v6911_v49  ;;  %4321 = vmatprep.subr.bf16.mxu1 %v6913_v51 }
 0xd2d   :  { %4281 = vmatpush1.bf16.msra.mxu0 %v6915_v52  ;;  %4322 = vmatpush1.bf16.msra.mxu1 %v6917_v54 }
 0xd2e   :  { %4282 = vmatprep.subr.bf16.mxu0 %v6919_v55  ;;  %4323 = vmatprep.subr.bf16.mxu1 %v6923_v56 }
 0xd31   :  { %4283 = vmatpush1.bf16.msra.mxu0 %v6927_v57  ;;  %4324 = vmatpush1.bf16.msra.mxu1 %v6929_v58 }
 0xd32   :  { %4383 = vmatprep.subr.bf16.mxu0 %v6839_v18  ;;  %4424 = vmatprep.subr.bf16.mxu1 %v6841_v20 }
 0xde7   :  { %v4187_v29 = vpop.f32.mrb[80].mxu0  ;;  %v4228_v22 = vpop.f32.mrb[80].mxu1 }
 0xde8   :  { %v4235_v30 = vadd.f32 %v4187_v29, %v3369_v14  ;;  %v4237_v23 = vadd.f32 %v4228_v22, %v3442_v34  ;;  %v4189_v44 = vpop.f32.mrb[81].mxu0  ;;  %v4230_v18 = vpop.f32.mrb[81].mxu1  ;;  %v7318_v14 = vld [vmem:[#allocation17 + $0xa8] ss:$16 sps:$4 sm:$0xff]   ;;  %v7324_v34 = vld [vmem:[#allocation17 + $0xcc] ss:$16 sps:$4 sm:$0xff]  }
 0xde9   :  { %v4236_v8 = vadd.f32 %v4189_v44, %v3371_v12  ;;  %v4238_v20 = vadd.f32 %v4230_v18, %v3444_v27  ;;  %v4191_v7 = vpop.f32.mrb[82].mxu0  ;;  %v4232_v24 = vpop.f32.mrb[82].mxu1  ;;  %v7330_v12 = vld [vmem:[#allocation17 + $0xc8] ss:$16 sps:$4 sm:$0xff]   ;;  %v7336_v27 = vld [vmem:[#allocation17 + $0xec] ss:$16 sps:$4 sm:$0xff]  }
 0xdea   :  { %v5190_v10 = vmul.f32 -1.442695, %v4235_v30  ;;  %v4192_v32 = vpop.f32.mrb[83].mxu0  ;;  %v4233_v0 = vpop.f32.mrb[83].mxu1  ;;  %v7339_v29 = vld [vmem:[#allocation17 + $0xe0] ss:$16 sps:$4 sm:$0xff]  }
 0xdeb   :  { %v5191_v13 = vmul.f32 -1.442695, %v4236_v8  ;;  %v5192_v36 = vmul.f32 -1.442695, %v4238_v20  ;;  %v7342_v22 = vld [vmem:[#allocation17 + $0xe8] ss:$16 sps:$4 sm:$0xff]  }
 0xdec   :  { %5706 = vpow2.f32 %v5190_v10  ;;  %v5804_v30 = vld [vmem:[#allocation17 + $0x4] ss:$16 sps:$4 sm:$0xff]   ;;  %v7584_v44 = vld [vmem:[#allocation43_spill] sm:$0xff]  ;;  %v7586_v7 = vld [vmem:[#allocation45_spill] sm:$0xff] }
 0xded   :  { %5708 = vpow2.f32 %v5191_v13  ;;  %v3373_v18 = vadd.f32 %v7584_v44, %v7040_v62  ;;  %v7585_v8 = vld [vmem:[#allocation44_spill] sm:$0xff]  ;;  %v3375_v24 = vadd.f32 %v7586_v7, %v7052_v45  ;;  %v7587_v10 = vld [vmem:[#allocation46_spill] sm:$0xff] }
 0xdee   :  { %5710 = vpow2.f32 %v5192_v36  ;;  %v3446_v20 = vadd.f32 %v7585_v8, %v7044_v28  ;;  %v3448_v32 = vadd.f32 %v7587_v10, %v7056_v17 }
 0xdef   :  { %5712 = vtanh.f32 %v4237_v23  ;;  %v5805_v23 = vld [vmem:[#allocation17 + $0xc] ss:$16 sps:$4 sm:$0xff]  }
 0xdf6   :  { %v5707_v3 = vpop.eup %5706 }
 0xdf7   :  { %v5709_v49 = vpop.eup %5708  ;;  %v4242_v51 = vadd.f32 1.0, %v5707_v3 }
 0xdf8   :  { %v4248_v52 = vadd.f32 1.0, %v5709_v49  ;;  %v5711_v54 = vpop.eup %5710 }
 0xdf9   :  { %5714 = vrcp.f32 %v4242_v51  ;;  %v5713_v55 = vpop.eup %5712  ;;  %v4255_v38 = vadd.f32 1.0, %v5711_v54 }
 0xdfa   :  { %5716 = vrcp.f32 %v4248_v52 }
 0xdfb   :  { %5718 = vrcp.f32 %v4255_v38 }
 0xe03   :  { %v5715_v56 = vpop.eup %5714 }
 0xe04   :  { %v5717_v57 = vpop.eup %5716  ;;  %v4259_v58 = vmul.f32 %v5715_v56, %v5713_v55 }
 0xe05   :  { %v4258_v47 = vmul.f32 %v5717_v57, %v7204_v40  ;;  %v5719_v16 = vpop.eup %5718  ;;  %v7300_v40 = vld [vmem:[#allocation17 + $0x8c] ss:$16 sps:$4 sm:$0xff]  }
 0xe07   :  { %v7250_v1 = vadd.f32 %v4259_v58, %v4258_v47 }
 0xe09   :  { %5720 = vtanh.f32 %v7250_v1 }
 0xe13   :  { %v5721_v42 = vpop.eup %5720 }
 0xe14   :  { %v4262_v43 = vmul.f32 %v5721_v42, %v5719_v16 }
 0xe16   :  { %v4267_v41 = vpack.c.bf16 %v4262_v43, %v4262_v43 }
 0xe18   :  { %4301 = vmatmul.mubr.bf16.vlgmr.msra.gmra.mrb[84].mxu0 %v4267_v41  ;;  %4342 = vmatmul.mubr.bf16.vlgmr.msra.gmra.mrb[84].mxu1 %v4267_v41 }
 0xe19   :  { %4384 = vmatpush1.bf16.msra.mxu0 %v7253_v39  ;;  %4425 = vmatpush1.bf16.msra.mxu1 %v7256_v6 }
 0xe1a   :  { %4385 = vmatprep.subr.bf16.mxu0 %v7259_v59  ;;  %4426 = vmatprep.subr.bf16.mxu1 %v7262_v26 }
 0xe1b   :  { %4415 = vmatprep.mubr.bf16.mxu0 %v7523_v31  ;;  %4456 = vmatprep.mubr.bf16.mxu1 %v7523_v31 }
 0xe1d   :  { %4386 = vmatpush1.bf16.msra.mxu0 %v7267_v2  ;;  %4427 = vmatpush1.bf16.msra.mxu1 %v7270_v11 }
 0xe1e   :  { %4387 = vmatprep.subr.bf16.mxu0 %v7273_v53  ;;  %4428 = vmatprep.subr.bf16.mxu1 %v7276_v61 }
 0xe21   :  { %4388 = vmatpush1.bf16.msra.mxu0 %v7279_v4  ;;  %4429 = vmatpush1.bf16.msra.mxu1 %v7282_v35 }
 0xe22   :  { %4389 = vmatprep.subr.bf16.mxu0 %v7285_v46  ;;  %4430 = vmatprep.subr.bf16.mxu1 %v7288_v37 }
 0xe25   :  { %4390 = vmatpush1.bf16.msra.mxu0 %v7291_v5  ;;  %4431 = vmatpush1.bf16.msra.mxu1 %v7294_v50 }
 0xe26   :  { %4391 = vmatprep.subr.bf16.mxu0 %v7297_v15  ;;  %4432 = vmatprep.subr.bf16.mxu1 %v7300_v40 }
 0xe29   :  { %4392 = vmatpush1.bf16.msra.mxu0 %v7303_v19  ;;  %4433 = vmatpush1.bf16.msra.mxu1 %v7306_v60 }
 0xe2a   :  { %4393 = vmatprep.subr.bf16.mxu0 %v7309_v48  ;;  %4434 = vmatprep.subr.bf16.mxu1 %v7312_v63 }
 0xe2d   :  { %4394 = vmatpush1.bf16.msra.mxu0 %v7315_v9  ;;  %4435 = vmatpush1.bf16.msra.mxu1 %v7318_v14 }
 0xe2e   :  { %4395 = vmatprep.subr.bf16.mxu0 %v7321_v33  ;;  %4436 = vmatprep.subr.bf16.mxu1 %v7324_v34 }
 0xe31   :  { %4396 = vmatpush1.bf16.msra.mxu0 %v7327_v21  ;;  %4437 = vmatpush1.bf16.msra.mxu1 %v7330_v12 }
 0xe32   :  { %4397 = vmatprep.subr.bf16.mxu0 %v7333_v25  ;;  %4438 = vmatprep.subr.bf16.mxu1 %v7336_v27 }
 0xe35   :  { %4398 = vmatpush1.bf16.msra.mxu0 %v7339_v29  ;;  %4439 = vmatpush1.bf16.msra.mxu1 %v7342_v22 }
 0xe36   :  { %4498 = vmatprep.subr.bf16.mxu0 %v5804_v30  ;;  %4539 = vmatprep.subr.bf16.mxu1 %v5805_v23 }
 0xeeb   :  { %v4302_v0 = vpop.f32.mrb[84].mxu0  ;;  %v4343_v13 = vpop.f32.mrb[84].mxu1 }
 0xeec   :  { %v4350_v36 = vadd.f32 %v4302_v0, %v3373_v18  ;;  %v4352_v3 = vadd.f32 %v4343_v13, %v3446_v20  ;;  %v4304_v49 = vpop.f32.mrb[85].mxu0  ;;  %v4345_v51 = vpop.f32.mrb[85].mxu1 }
 0xeed   :  { %v4351_v52 = vadd.f32 %v4304_v49, %v3375_v24  ;;  %v4353_v54 = vadd.f32 %v4345_v51, %v3448_v32  ;;  %v4306_v55 = vpop.f32.mrb[86].mxu0  ;;  %v4347_v56 = vpop.f32.mrb[86].mxu1 }
 0xeee   :  { %v5193_v57 = vmul.f32 -1.442695, %v4350_v36  ;;  %v4307_v58 = vpop.f32.mrb[87].mxu0  ;;  %v4348_v38 = vpop.f32.mrb[87].mxu1 }
 0xeef   :  { %v5194_v47 = vmul.f32 -1.442695, %v4351_v52  ;;  %v5195_v16 = vmul.f32 -1.442695, %v4353_v54  ;;  %v6075_v58 = vmov 0.0   ;;  %v5507_v38 = vld [vmem:[%s7488_s9 + $0x8] sm:$0xff]  }
 0xef0   :  { %5722 = vpow2.f32 %v5193_v57  ;;  %v5506_v57 = vld [vmem:[%s7488_s9] sm:$0xff]  }
 0xef1   :  { %5724 = vpow2.f32 %v5194_v47  ;;  %v5508_v47 = vld [vmem:[%s7488_s9 + $0x10] sm:$0xff]  }
 0xef2   :  { %5726 = vpow2.f32 %v5195_v16  ;;  %v5509_v16 = vld [vmem:[%s7488_s9 + $0x18] sm:$0xff]  }
 0xef3   :  { %5728 = vtanh.f32 %v4352_v3 }
 0xefa   :  { %v5723_v42 = vpop.eup %5722 }
 0xefb   :  { %v5725_v43 = vpop.eup %5724  ;;  %v4357_v41 = vadd.f32 1.0, %v5723_v42  ;;  %v5510_v42 = vld [vmem:[%s7488_s9 + $0x20] sm:$0xff]  }
 0xefc   :  { %v4363_v30 = vadd.f32 1.0, %v5725_v43  ;;  %v5727_v23 = vpop.eup %5726  ;;  %v5511_v43 = vld [vmem:[%s7488_s9 + $0x28] sm:$0xff]  }
 0xefd   :  { %5730 = vrcp.f32 %v4357_v41  ;;  %v5729_v44 = vpop.eup %5728  ;;  %v4370_v7 = vadd.f32 1.0, %v5727_v23  ;;  %v5512_v41 = vld [vmem:[%s7488_s9 + $0x30] sm:$0xff]  }
 0xefe   :  { %5732 = vrcp.f32 %v4363_v30  ;;  %v5513_v30 = vld [vmem:[%s7488_s9 + $0x38] sm:$0xff]   ;;  %v7592_v23 = vld [vmem:[#allocation51_spill] sm:$0xff] }
 0xeff   :  { %5734 = vrcp.f32 %v4370_v7 }
 0xf07   :  { %v5731_v18 = vpop.eup %5730 }
 0xf08   :  { %v5733_v8 = vpop.eup %5732  ;;  %v4374_v20 = vmul.f32 %v5731_v18, %v5729_v44  ;;  %v3383_v44 = vadd.f32 %v7592_v23, %v7040_v62  ;;  %v7593_v18 = vld [vmem:[#allocation52_spill] sm:$0xff] }
 0xf09   :  { %v4373_v24 = vmul.f32 %v5733_v8, %v7250_v1  ;;  %v5735_v32 = vpop.eup %5734  ;;  %v3456_v8 = vadd.f32 %v7593_v18, %v7044_v28 }
 0xf0b   :  { %v7354_v10 = vadd.f32 %v4374_v20, %v4373_v24  ;;  %v7594_v20 = vld [vmem:[#allocation31_spill] sm:$0xff]  ;;  %v7595_v24 = vld [vmem:[#allocation53_spill] sm:$0xff] }
 0xf0c   :  { %v3385_v7 = vadd.f32 %v7594_v20, %v7052_v45 }
 0xf0d   :  { %5736 = vtanh.f32 %v7354_v10 }
 0xf17   :  { %v5737_v0 = vpop.eup %5736 }
 0xf18   :  { %v4377_v13 = vmul.f32 %v5737_v0, %v5735_v32 }
 0xf1a   :  { %v4382_v36 = vpack.c.bf16 %v4377_v13, %v4377_v13 }
 0xf1c   :  { %4416 = vmatmul.mubr.bf16.vlgmr.msra.gmra.mrb[88].mxu0 %v4382_v36  ;;  %4457 = vmatmul.mubr.bf16.vlgmr.msra.gmra.mrb[88].mxu1 %v4382_v36 }
 0xf1d   :  { %4499 = vmatpush1.bf16.msra.mxu0 %v7253_v39  ;;  %4540 = vmatpush1.bf16.msra.mxu1 %v7256_v6  ;;  %v7589_v39 = vld [vmem:[#allocation48_spill] sm:$0xff] }
 0xf1e   :  { %4500 = vmatprep.subr.bf16.mxu0 %v7259_v59  ;;  %4541 = vmatprep.subr.bf16.mxu1 %v7262_v26  ;;  %v3452_v6 = vadd.f32 %v7589_v39, %v7044_v28  ;;  %v7590_v59 = vld [vmem:[#allocation49_spill] sm:$0xff] }
 0xf1f   :  { %4530 = vmatprep.mubr.bf16.mxu0 %v7523_v31  ;;  %4571 = vmatprep.mubr.bf16.mxu1 %v7523_v31  ;;  %v7588_v31 = vld [vmem:[#allocation47_spill] sm:$0xff]  ;;  %v3381_v26 = vadd.f32 %v7590_v59, %v7052_v45 }
 0xf20   :  { %v3379_v1 = vadd.f32 %v7588_v31, %v7040_v62 }
 0xf21   :  { %4501 = vmatpush1.bf16.msra.mxu0 %v7267_v2  ;;  %4542 = vmatpush1.bf16.msra.mxu1 %v7270_v11  ;;  %v7591_v2 = vld [vmem:[#allocation50_spill] sm:$0xff] }
 0xf22   :  { %4502 = vmatprep.subr.bf16.mxu0 %v7273_v53  ;;  %4543 = vmatprep.subr.bf16.mxu1 %v7276_v61  ;;  %v3454_v11 = vadd.f32 %v7591_v2, %v7056_v17 }
 0xf25   :  { %4503 = vmatpush1.bf16.msra.mxu0 %v7279_v4  ;;  %4544 = vmatpush1.bf16.msra.mxu1 %v7282_v35 }
 0xf26   :  { %4504 = vmatprep.subr.bf16.mxu0 %v7285_v46  ;;  %4545 = vmatprep.subr.bf16.mxu1 %v7288_v37 }
 0xf29   :  { %4505 = vmatpush1.bf16.msra.mxu0 %v7291_v5  ;;  %4546 = vmatpush1.bf16.msra.mxu1 %v7294_v50 }
 0xf2a   :  { %4506 = vmatprep.subr.bf16.mxu0 %v7297_v15  ;;  %4547 = vmatprep.subr.bf16.mxu1 %v7300_v40 }
 0xf2d   :  { %4507 = vmatpush1.bf16.msra.mxu0 %v7303_v19  ;;  %4548 = vmatpush1.bf16.msra.mxu1 %v7306_v60 }
 0xf2e   :  { %4508 = vmatprep.subr.bf16.mxu0 %v7309_v48  ;;  %4549 = vmatprep.subr.bf16.mxu1 %v7312_v63 }
 0xf31   :  { %4509 = vmatpush1.bf16.msra.mxu0 %v7315_v9  ;;  %4550 = vmatpush1.bf16.msra.mxu1 %v7318_v14 }
 0xf32   :  { %4510 = vmatprep.subr.bf16.mxu0 %v7321_v33  ;;  %4551 = vmatprep.subr.bf16.mxu1 %v7324_v34 }
 0xf35   :  { %4511 = vmatpush1.bf16.msra.mxu0 %v7327_v21  ;;  %4552 = vmatpush1.bf16.msra.mxu1 %v7330_v12 }
 0xf36   :  { %4512 = vmatprep.subr.bf16.mxu0 %v7333_v25  ;;  %4553 = vmatprep.subr.bf16.mxu1 %v7336_v27 }
 0xf39   :  { %4513 = vmatpush1.bf16.msra.mxu0 %v7339_v29  ;;  %4554 = vmatpush1.bf16.msra.mxu1 %v7342_v22 }
 0xf3a   :  { %5220 = vmatprep.subr.bf16.mxu0 %v6075_v58 }
 0xfef   :  { %v4417_v53 = vpop.f32.mrb[88].mxu0  ;;  %v4458_v61 = vpop.f32.mrb[88].mxu1 }
 0xff0   :  { %v4465_v4 = vadd.f32 %v4417_v53, %v3379_v1  ;;  %v4467_v35 = vadd.f32 %v4458_v61, %v3452_v6  ;;  %v4419_v46 = vpop.f32.mrb[89].mxu0  ;;  %v4460_v37 = vpop.f32.mrb[89].mxu1 }
 0xff1   :  { %v4466_v5 = vadd.f32 %v4419_v46, %v3381_v26  ;;  %v4468_v50 = vadd.f32 %v4460_v37, %v3454_v11  ;;  %v4421_v15 = vpop.f32.mrb[90].mxu0  ;;  %v4462_v40 = vpop.f32.mrb[90].mxu1 }
 0xff2   :  { %v5196_v19 = vmul.f32 -1.442695, %v4465_v4  ;;  %v4422_v60 = vpop.f32.mrb[91].mxu0  ;;  %v4463_v48 = vpop.f32.mrb[91].mxu1 }
 0xff3   :  { %v5197_v63 = vmul.f32 -1.442695, %v4466_v5  ;;  %v5198_v9 = vmul.f32 -1.442695, %v4468_v50 }
 0xff4   :  { %5738 = vpow2.f32 %v5196_v19 }
 0xff5   :  { %5740 = vpow2.f32 %v5197_v63 }
 0xff6   :  { %5742 = vpow2.f32 %v5198_v9 }
 0xff7   :  { %5744 = vtanh.f32 %v4467_v35 }
 0xffe   :  { %v5739_v14 = vpop.eup %5738 }
 0xfff   :  { %v5741_v33 = vpop.eup %5740  ;;  %v4472_v34 = vadd.f32 1.0, %v5739_v14  ;;  %v5202_v14 = vld [vmem:[%s7489_s10] ss:$0 sm:$0xff] }
0x1000   :  { %v4478_v21 = vadd.f32 1.0, %v5741_v33  ;;  %v5743_v12 = vpop.eup %5742 }
0x1001   :  { %5746 = vrcp.f32 %v4472_v34  ;;  %v5745_v25 = vpop.eup %5744  ;;  %v4485_v3 = vadd.f32 1.0, %v5743_v12 }
0x1002   :  { %5748 = vrcp.f32 %v4478_v21 }
0x1003   :  { %5750 = vrcp.f32 %v4485_v3 }
0x100b   :  { %v5747_v27 = vpop.eup %5746 }
0x100c   :  { %v5749_v29 = vpop.eup %5748  ;;  %v4489_v22 = vmul.f32 %v5747_v27, %v5745_v25 }
0x100d   :  { %v4488_v49 = vmul.f32 %v5749_v29, %v7354_v10  ;;  %v5751_v52 = vpop.eup %5750  ;;  %v3458_v10 = vadd.f32 %v7595_v24, %v7056_v17 }
0x100f   :  { %v7398_v51 = vadd.f32 %v4489_v22, %v4488_v49 }
0x1011   :  { %5752 = vtanh.f32 %v7398_v51 }
0x101b   :  { %v5753_v54 = vpop.eup %5752 }
0x101c   :  { %v4492_v55 = vmul.f32 %v5753_v54, %v5751_v52 }
0x101e   :  { %v4497_v56 = vpack.c.bf16 %v4492_v55, %v4492_v55 }
0x1020   :  { %4531 = vmatmul.mubr.bf16.vlgmr.msra.gmra.mrb[92].mxu0 %v4497_v56  ;;  %4572 = vmatmul.mubr.bf16.vlgmr.msra.gmra.mrb[92].mxu1 %v4497_v56 }
0x1021   :  { %5221 = vmatpush3.bf16.msra.mxu0 %v5506_v57  ;;  %5236 = vmatprep.mubr.msk.bf16.mxu0 %vm6076_vm0, %v6075_v58 }
0x1022   :  { %5222 = vmatprep.subr.bf16.mxu0 %v6075_v58 }
0x1025   :  { %5223 = vmatpush3.bf16.msra.mxu0 %v5507_v38 }
0x1026   :  { %5224 = vmatprep.subr.bf16.mxu0 %v6075_v58 }
0x1029   :  { %5225 = vmatpush3.bf16.msra.mxu0 %v5508_v47 }
0x102a   :  { %5226 = vmatprep.subr.bf16.mxu0 %v6075_v58 }
0x102d   :  { %5227 = vmatpush3.bf16.msra.mxu0 %v5509_v16 }
0x102e   :  { %5228 = vmatprep.subr.bf16.mxu0 %v6075_v58 }
0x1031   :  { %5229 = vmatpush3.bf16.msra.mxu0 %v5510_v42 }
0x1032   :  { %5230 = vmatprep.subr.bf16.mxu0 %v6075_v58 }
0x1035   :  { %5231 = vmatpush3.bf16.msra.mxu0 %v5511_v43 }
0x1036   :  { %5232 = vmatprep.subr.bf16.mxu0 %v6075_v58 }
0x1039   :  { %5233 = vmatpush3.bf16.msra.mxu0 %v5512_v41 }
0x103a   :  { %5234 = vmatprep.subr.bf16.mxu0 %v6075_v58 }
0x103d   :  { %5235 = vmatpush3.bf16.msra.mxu0 %v5513_v30 }
0x10f3   :  { %v4532_v32 = vpop.f32.mrb[92].mxu0  ;;  %v4573_v0 = vpop.f32.mrb[92].mxu1 }
0x10f4   :  { %v4580_v13 = vadd.f32 %v4532_v32, %v3383_v44  ;;  %v4582_v36 = vadd.f32 %v4573_v0, %v3456_v8  ;;  %v4534_v31 = vpop.f32.mrb[93].mxu0  ;;  %v4575_v1 = vpop.f32.mrb[93].mxu1 }
0x10f5   :  { %v4581_v39 = vadd.f32 %v4534_v31, %v3385_v7  ;;  %v4583_v6 = vadd.f32 %v4575_v1, %v3458_v10  ;;  %v4536_v59 = vpop.f32.mrb[94].mxu0  ;;  %v4577_v26 = vpop.f32.mrb[94].mxu1 }
0x10f6   :  { %v5199_v62 = vmul.f32 -1.442695, %v4580_v13  ;;  %v4537_v2 = vpop.f32.mrb[95].mxu0  ;;  %v4578_v11 = vpop.f32.mrb[95].mxu1 }
0x10f7   :  { %v5200_v28 = vmul.f32 -1.442695, %v4581_v39  ;;  %v5201_v45 = vmul.f32 -1.442695, %v4583_v6 }
0x10f8   :  { %5754 = vpow2.f32 %v5199_v62 }
0x10f9   :  { %5756 = vpow2.f32 %v5200_v28 }
0x10fa   :  { %5758 = vpow2.f32 %v5201_v45 }
0x10fb   :  { %5760 = vtanh.f32 %v4582_v36 }
0x1102   :  { %v5755_v53 = vpop.eup %5754 }
0x1103   :  { %v5757_v61 = vpop.eup %5756  ;;  %v4587_v17 = vadd.f32 1.0, %v5755_v53 }
0x1104   :  { %v4593_v4 = vadd.f32 1.0, %v5757_v61  ;;  %v5759_v35 = vpop.eup %5758 }
0x1105   :  { %5762 = vrcp.f32 %v4587_v17  ;;  %v5761_v46 = vpop.eup %5760  ;;  %v4600_v15 = vadd.f32 1.0, %v5759_v35 }
0x1106   :  { %5764 = vrcp.f32 %v4593_v4 }
0x1107   :  { %5766 = vrcp.f32 %v4600_v15 }
0x110f   :  { %v5763_v37 = vpop.eup %5762 }
0x1110   :  { %v5765_v5 = vpop.eup %5764  ;;  %v4604_v50 = vmul.f32 %v5763_v37, %v5761_v46 }
0x1111   :  { %v4603_v40 = vmul.f32 %v5765_v5, %v7398_v51  ;;  %v5767_v60 = vpop.eup %5766 }
0x1113   :  { %v4605_v19 = vadd.f32 %v4604_v50, %v4603_v40 }
0x1115   :  { %5768 = vtanh.f32 %v4605_v19  ;;  %4620 = vst [vmem:[#allocation23 + $0x8] sm:$0xff] %v4605_v19 }
0x111f   :  { %v5769_v48 = vpop.eup %5768 }
0x1120   :  { %v4607_v63 = vmul.f32 %v5769_v48, %v5767_v60 }
0x1122   :  { %v4622_v9 = vpack.c.bf16 %v4607_v63, %v4607_v63  ;;  %4616 = vst [vmem:[#allocation21 + $0x8] sm:$0xff] %v4607_v63 }
0x1124   :  { %5237 = vmatmul.mubr.bf16.vlgmr.msra.gmra.mrb[96].mxu0 %v4622_v9 }
0x11f7   :  { %v4728_v33 = vpop.f32.mrb[96].mxu0 }
0x11f8   :  { %v4729_v34 = vadd.f32 %v5202_v14, %v4728_v33  ;;  %v5238_v21 = vpop.f32.mrb[97].mxu0 }
0x11f9   :  { %v4731_v12 = vpop.f32.mrb[98].mxu0 }
0x11fa   :  { %4734 = vmax.xlane.f32.xlu0 %v4729_v34  ;;  %v5239_v25 = vpop.f32.mrb[99].mxu0 }
0x1287   :  { %v4735_v27 = vpop.xlane.xlu0 %4734 }
0x1288   :  { %v4736_v29 = vsub.f32 %v4729_v34, %v4735_v27 }
0x128a   :  { %v4737_v22 = vmul.f32 1.442695, %v4736_v29 }
0x128c   :  { %5770 = vpow2.f32 %v4737_v22 }
0x1296   :  { %v5771_v3 = vpop.eup %5770 }
0x1297   :  { %4739 = vadd.xlane.f32.xlu0 %v5771_v3 }
0x1298   :  { %5993 = shalt.err (!%p5990_p12)
}
0x1299   :  { %s5994_s29 = scalar_lea.hbm %s7491_s12, 256 }
0x129a   :  { %p5995_p13 = scmp.ne.s32.totalorder %s7491_s12, %s5994_s29  ;;  %p5998_p0 = scmp.lt.u32.totalorder %s5994_s29, %s7491_s12 }
0x129c   :  { %p6000_p1 = pnand %p5998_p0, %p5995_p13 }
0x129e   :  { %6003 = shalt.err (!%p6000_p1)
}
0x129f   :  { %4765 = dma.vmem_to_hbm [thread:$0]  %s4760_s6, 256, %s7491_s12, [#allocation22], %s6063_s18, %s6063_s18, %s6064_s19  }
0x12a0   :  { %s6078_s4 = smov [#allocation23]  }
0x12a1   :  { %s4771_s23 = sshll.u32 %s6078_s4, 4  ;;  %s4772_s23 = int_to_ptr.vmem [resolvable:$true] %s4771_s23 }
0x12a2   :  { %s6004_s16 = scalar_lea.vmem %s4772_s23, 256  ;;  %p6009_p3 = scmp.lt.s32.totalorder %s4772_s23, %s4772_s23 }
0x12a3   :  { %p6005_p2 = scmp.ne.s32.totalorder %s4772_s23, %s6004_s16  ;;  %p6010_p4 = scmp.lt.s32.totalorder %s6004_s16, %s6004_s16 }
0x12a5   :  { %p6011_p5 = por %p6010_p4, %p6009_p3 }
0x12a7   :  { %p6012_p6 = pnand %p6011_p5, %p6005_p2 }
0x12a9   :  { %6015 = shalt.err (!%p6012_p6)
}
0x12aa   :  { %s6016_s3 = scalar_lea.hbm %s7492_s13, 256 }
0x12ab   :  { %p6017_p7 = scmp.ne.s32.totalorder %s7492_s13, %s6016_s3  ;;  %p6020_p8 = scmp.lt.u32.totalorder %s6016_s3, %s7492_s13 }
0x12ad   :  { %p6022_p9 = pnand %p6020_p8, %p6017_p7 }
0x12af   :  { %6025 = shalt.err (!%p6022_p9)
}
0x12b0   :  { %4777 = dma.vmem_to_hbm [thread:$0]  %s4772_s23, 256, %s7492_s13, [#allocation22], %s6063_s18, %s6063_s18, %s6064_s19  }
0x12b1   :  { %s6079_s26 = smov [#allocation20]  }
0x12b2   :  { %s4750_s9 = sshll.u32 %s6079_s26, 4  ;;  %s4751_s9 = int_to_ptr.vmem [resolvable:$true] %s4750_s9 }
0x12b3   :  { %s6026_s8 = scalar_lea.vmem %s4751_s9, 128  ;;  %p6031_p11 = scmp.lt.s32.totalorder %s4751_s9, %s4751_s9 }
0x12b4   :  { %p6027_p10 = scmp.ne.s32.totalorder %s4751_s9, %s6026_s8  ;;  %p6032_p12 = scmp.lt.s32.totalorder %s6026_s8, %s6026_s8 }
0x12b6   :  { %p6033_p13 = por %p6032_p12, %p6031_p11 }
0x12b8   :  { %p6034_p0 = pnand %p6033_p13, %p6027_p10 }
0x1324   :  { %v4740_v49 = vpop.xlane.xlu0 %4739 }
0x1325   :  { %5772 = vrcp.f32 %v4740_v49 }
0x132f   :  { %v5773_v51 = vpop.eup %5772 }
0x1330   :  { %v4742_v52 = vmul.f32 %v5773_v51, %v5771_v3 }
0x1332   :  { %4743 = vst [vmem:[#allocation20] sm:$0xff] %v4742_v52 }
0x1333   :  { %6037 = shalt.err (!%p6034_p0)
}
0x1334   :  { %s6038_s1 = scalar_lea.hbm %s7490_s11, 128 }
0x1335   :  { %p6039_p1 = scmp.ne.s32.totalorder %s7490_s11, %s6038_s1  ;;  %p6042_p2 = scmp.lt.u32.totalorder %s6038_s1, %s7490_s11 }
0x1337   :  { %p6044_p3 = pnand %p6042_p2, %p6039_p1 }
0x1339   :  { %6047 = shalt.err (!%p6044_p3)
}
0x133a   :  { %4753 = dma.vmem_to_hbm [thread:$0]  %s4751_s9, 128, %s7490_s11, [#allocation8]  }
0x133b   :  { %6058 = dma.done.wait [#allocation8], 128  }
0x133c   :  { %6059 = vsyncadd [#allocation8], 4294967168 }
0x133d   :  { %6060 = dma.done.wait [#allocation22], 512  }
0x133e   :  { %6061 = vsyncadd [#allocation22], 4294966784 }
0x133f   :  { %4787 = vsyncpa [#allocation7], 1 }
0x1340   :  { %4788 = vsyncpa [#allocation10], 1 }
0x1341   :  { %4789 = vsyncpa [#allocation13], 1 }
0x1342   :  { %4790 = vsyncpa [#allocation16], 1 }
0x1343   :  { %4791 = vsyncpa [#allocation19], 1 }
0x1344   :  { %4792 = vsyncpa [#allocation8], 1 }
0x1345   :  { %4793 = vsyncpa [#allocation22], 1 }

</bundles_post_ra>
